<compile_context>
chip_gen: v7x
topology: tpu7x:2x2x1
jax: 0.10.0
libtpu: 0.0.40
codegen_flags: <defaults>
</compile_context>

<pallas_src>
import math

import jax
import jax.numpy as jnp
from jax.experimental import pallas as pl
from jax.experimental.pallas import tpu as pltpu

NEG_SLOPE = 0.01  # nn.LeakyReLU default negative_slope


# ----------------------------- fused kernel --------------------------------

def _leaky(y):
    return jnp.where(y >= 0, y, NEG_SLOPE * y)


def _make_vae_kernel(T, B, H_enc, H_dec, n_enc, n_dec):
    """Builds the single fused forward kernel.

    Ref order (all whole-array VMEM refs):
      inputs : x, eps,
               [wih_f, wih_b, whh, b] * n_enc,
               w_lr, b_lr, w_lr2, b_lr2, w_ave, b_ave, w_dev, b_dev,
               w_lr3, b_lr3, w_lr4, b_lr4, w_lr5, b_lr5,
               [wih_f, wih_b, whh, b] * n_dec,
               w_out, b_out
      outputs: recon, z, u, log_sigma2
      scratch: seq_a, seq_b   (ping-pong (T*B, 2*max(H)) sequence slabs)
    """

    def bilstm_layer(x, wihf_ref, wihb_ref, whh_ref, b_ref, out_ref, H):
        """One bidirectional LSTM layer, both directions fused per step.

        x       : (T*B, D_in) time-major value
        wihf/b  : (D_in, 8H)  input->gate weights, fused interleaved columns,
                              zero-padded in the other direction's slots
        whh     : (2H, 8H)    block-diagonal recurrent weights
        b       : (1, 8H)     b_ih + b_hh for both directions
        out_ref : (T*B, >=2H) VMEM slab; columns [0:H]=fwd, [H:2H]=bwd
        """
        G = 2 * H  # width of one gate slice covering both directions

        # Hoisted input projection (off the critical path): one MXU pass per
        # direction over the whole sequence; bias rides along in gx_f.
        gx_f = (jnp.dot(x, wihf_ref[...], preferred_element_type=jnp.float32)
                + b_ref[...])
        gx_b = jnp.dot(x, wihb_ref[...], preferred_element_type=jnp.float32)
        whh = whh_ref[...]

        h = jnp.zeros((B, 2 * H), jnp.float32)   # [h_f | h_b]
        c = jnp.zeros((B, 2 * H), jnp.float32)   # [c_f | c_b]

        # T is small and static: fully unroll so every slice offset is static
        # and the scheduler interleaves fwd/bwd work.
        # TODO(synk): lax.fori_loop(..., unroll=k) + pl.ds and a T-chunk grid
        # before scaling T*B (v7x has half the VMEM of v5e/v6e).
        for t in range(T):
            tb = T - 1 - t                       # backward direction walks reversed
            rf = slice(t * B, (t + 1) * B)
            rb = slice(tb * B, (tb + 1) * B)
            # Single fused recurrent matmul for both directions.
            gates = (jnp.dot(h, whh, preferred_element_type=jnp.float32)
                     + gx_f[rf, :] + gx_b[rb, :])
            sig = jax.nn.sigmoid(gates)          # i/f/o slices used below
            i = sig[:, 0 * G:1 * G]
            f = sig[:, 1 * G:2 * G]
            g = jnp.tanh(gates[:, 2 * G:3 * G])
            o = sig[:, 3 * G:4 * G]
            c = f * c + i * g
            h = o * jnp.tanh(c)
            out_ref[rf, 0:H] = h[:, 0:H]         # forward hidden at time t
            out_ref[rb, H:2 * H] = h[:, H:2 * H]  # backward hidden at time tb

    def linear(x, w_ref, b_ref, leaky):
        y = (jnp.dot(x, w_ref[...], preferred_element_type=jnp.float32)
             + b_ref[...])
        return _leaky(y) if leaky else y

    def kernel(*refs):
        it = iter(refs)
        x_ref, eps_ref = next(it), next(it)
        enc = [tuple(next(it) for _ in range(4)) for _ in range(n_enc)]
        (w1, b1, w2, b2, wa, ba, wd, bd,
         w3, b3, w4, b4, w5, b5) = (next(it) for _ in range(14))
        dec = [tuple(next(it) for _ in range(4)) for _ in range(n_dec)]
        wo, bo = next(it), next(it)
        recon_ref, z_ref, u_ref, ls_ref = (next(it) for _ in range(4))
        slabs = (next(it), next(it))

        # ---------------- encoder (bidirectional LSTM stack) ----------------
        h = x_ref[...]
        for li, lp in enumerate(enc):
            slab = slabs[li % 2]
            bilstm_layer(h, *lp, slab, H_enc)
            h = slab[:, 0:2 * H_enc]

        # ---------------- MLP head + reparameterization ---------------------
        h = linear(h, w1, b1, True)          # lr   + LeakyReLU
        h = linear(h, w2, b2, True)          # lr2  + LeakyReLU
        u = linear(h, wa, ba, False)         # lr_ave
        ls = linear(h, wd, bd, False)        # lr_dev
        z = u + jnp.exp(0.5 * ls) * eps_ref[...]
        d = linear(z, w3, b3, True)          # lr3  + LeakyReLU
        d = linear(d, w4, b4, True)          # lr4  + LeakyReLU
        d = linear(d, w5, b5, True)          # lr5  + LeakyReLU
        u_ref[...] = u
        ls_ref[...] = ls
        z_ref[...] = z

        # ---------------- decoder (bidirectional LSTM stack) ----------------
        for li, lp in enumerate(dec):
            slab = slabs[(n_enc + li) % 2]
            bilstm_layer(d, *lp, slab, H_dec)
            d = slab[:, 0:2 * H_dec]

        # ---------------- output_player (fused final Linear) ----------------
        recon_ref[...] = (jnp.dot(d, wo[...],
                                  preferred_element_type=jnp.float32)
                          + bo[...])

    return kernel


# ----------------------------- parameter init ------------------------------

def _uniform(key, shape, k):
    return jax.random.uniform(key, shape, jnp.float32, -k, k)


def _interleave_gates(wf, wb, H):
    """Interleave per-gate column blocks of two (rows, 4H) matrices into the
    fused layout [i_f,i_b | f_f,f_b | g_f,g_b | o_f,o_b] -> (rows, 8H)."""
    rows = wf.shape[0]
    return jnp.stack([wf.reshape(rows, 4, H), wb.reshape(rows, 4, H)],
                     axis=2).reshape(rows, 8 * H)


def init_bilstm_params(key, input_size, hidden_size, num_layers):
    """Bidirectional LSTM params, PyTorch-style init, stored in the fused
    interleaved-gate layout used by the kernel:
      wih_f : (D_in, 8H) fwd input weights in fwd column slots, zeros elsewhere
      wih_b : (D_in, 8H) bwd input weights in bwd column slots, zeros elsewhere
      whh   : (2H, 8H)   block-diagonal recurrent weights (rows = [h_f | h_b])
      b     : (1, 8H)    b_ih + b_hh for both directions
    """
    H = hidden_size
    k = 1.0 / math.sqrt(H)
    layers = []
    for layer in range(num_layers):
        in_size = input_size if layer == 0 else 2 * H
        raw = {}
        for tag in ('f', 'b'):
            key, k1, k2, k3, k4 = jax.random.split(key, 5)
            raw['wih_' + tag] = jnp.transpose(
                _uniform(k1, (4 * H, in_size), k))                  # (in, 4H)
            raw['whh_' + tag] = jnp.transpose(
                _uniform(k2, (4 * H, H), k))                        # (H, 4H)
            raw['b_' + tag] = (_uniform(k3, (4 * H,), k)
                               + _uniform(k4, (4 * H,), k)).reshape(1, 4 * H)
        z_in = jnp.zeros((in_size, 4 * H), jnp.float32)
        z_hh = jnp.zeros((H, 4 * H), jnp.float32)
        layers.append({
            'wih_f': _interleave_gates(raw['wih_f'], z_in, H),
            'wih_b': _interleave_gates(z_in, raw['wih_b'], H),
            'whh': jnp.concatenate(
                [_interleave_gates(raw['whh_f'], z_hh, H),
                 _interleave_gates(z_hh, raw['whh_b'], H)], axis=0),
            'b': _interleave_gates(raw['b_f'], raw['b_b'], H),
        })
    return layers, key


def init_linear_params(key, in_features, out_features):
    k = 1.0 / math.sqrt(in_features)
    key, kw, kb = jax.random.split(key, 3)
    w = _uniform(kw, (out_features, in_features), k)
    b = _uniform(kb, (out_features,), k)
    return (jnp.transpose(w), b.reshape(1, -1)), key   # (in, out), (1, out)


def init_lstm_vae_params(key, input_dim, hidden_dim, num_layers=3):
    params = {}
    params['encoder'], key = init_bilstm_params(key, input_dim, hidden_dim,
                                                num_layers)
    mlp = {}
    mlp['lr'], key = init_linear_params(key, hidden_dim * 2, 128)
    mlp['lr2'], key = init_linear_params(key, 128, 64)
    mlp['lr_ave'], key = init_linear_params(key, 64, 32)
    mlp['lr_dev'], key = init_linear_params(key, 64, 32)
    mlp['lr3'], key = init_linear_params(key, 32, 64)
    mlp['lr4'], key = init_linear_params(key, 64, 128)
    mlp['lr5'], key = init_linear_params(key, 128, hidden_dim)
    params['mlp'] = mlp
    params['decoder'], key = init_bilstm_params(key, hidden_dim, input_dim,
                                                num_layers)
    params['output_player'], key = init_linear_params(key, input_dim * 2,
                                                      input_dim)
    return params


# ----------------------------- forward pass --------------------------------

def lstm_vae_forward(params, x, eps_key):
    """Mirrors LSTM_VAE.forward; returns (recon, z, u, log_sigma2), batch-first."""
    B, T, D = x.shape
    # Static dims derived from weight shapes (safe under jit).
    H_enc = params['encoder'][0]['whh'].shape[0] // 2
    H_dec = params['decoder'][0]['whh'].shape[0] // 2
    n_enc = len(params['encoder'])
    n_dec = len(params['decoder'])
    latent = params['mlp']['lr_ave'][0].shape[1]

    # Pad batch to sublane-full multiple of 8 (free in time, 4x utilization).
    Bp = max(8, ((B + 7) // 8) * 8)
    if Bp != B:
        x = jnp.pad(x, ((0, Bp - B), (0, 0), (0, 0)))

    # Single boundary layout op: (Bp, T, D) -> time-major flattened (T*Bp, D).
    x2 = jnp.transpose(x, (1, 0, 2)).reshape(T * Bp, D).astype(jnp.float32)
    eps = jax.random.normal(eps_key, (T * Bp, latent), jnp.float32)

    args = [x2, eps]
    for lp in params['encoder']:
        args += [lp['wih_f'], lp['wih_b'], lp['whh'], lp['b']]
    for name in ('lr', 'lr2', 'lr_ave', 'lr_dev', 'lr3', 'lr4', 'lr5'):
        w, b = params['mlp'][name]
        args += [w, b]
    for lp in params['decoder']:
        args += [lp['wih_f'], lp['wih_b'], lp['whh'], lp['b']]
    args += list(params['output_player'])

    out_shape = (
        jax.ShapeDtypeStruct((T * Bp, D), jnp.float32),       # recon
        jax.ShapeDtypeStruct((T * Bp, latent), jnp.float32),  # z
        jax.ShapeDtypeStruct((T * Bp, latent), jnp.float32),  # u
        jax.ShapeDtypeStruct((T * Bp, latent), jnp.float32),  # log_sigma2
    )
    slab_w = 2 * max(H_enc, H_dec)
    kernel = _make_vae_kernel(T, Bp, H_enc, H_dec, n_enc, n_dec)

    recon2, z2, u2, ls2 = pl.pallas_call(
        kernel,
        out_shape=out_shape,
        in_specs=[pl.BlockSpec(memory_space=pltpu.MemorySpace.VMEM)
                  for _ in args],
        out_specs=tuple(pl.BlockSpec(memory_space=pltpu.MemorySpace.VMEM)
                        for _ in range(4)),
        scratch_shapes=[pltpu.VMEM((T * Bp, slab_w), jnp.float32)
                        for _ in range(2)],
    )(*args)

    def unflat(a):  # (T*Bp, F) -> (B, T, F), dropping the batch padding
        return jnp.transpose(a.reshape(T, Bp, a.shape[-1]), (1, 0, 2))[:B]

    return unflat(recon2), unflat(z2), unflat(u2), unflat(ls2)


# ----------------------------- main ----------------------------------------

if __name__ == "__main__":
    INPUT_DIM = 16
    HIDDEN_DIM = 32
    NUM_LAYERS = 3
    B, T = 2, 8

    key = jax.random.PRNGKey(0)
    key, pkey, xkey, ekey = jax.random.split(key, 4)

    params = init_lstm_vae_params(pkey, INPUT_DIM, HIDDEN_DIM, NUM_LAYERS)
    x = jax.random.normal(xkey, (B, T, INPUT_DIM), jnp.float32)

    fwd = jax.jit(lambda p, xx: lstm_vae_forward(p, xx, ekey))
    recon, z, u, log_sigma2 = fwd(params, x)
    jax.block_until_ready((recon, z, u, log_sigma2))

    assert recon.shape == (B, T, INPUT_DIM)
    assert z.shape == (B, T, 32)
    assert u.shape == (B, T, 32)
    assert log_sigma2.shape == (B, T, 32)
    assert jnp.all(jnp.isfinite(recon))
    assert jnp.all(jnp.isfinite(z))
    assert jnp.all(jnp.isfinite(u))
    assert jnp.all(jnp.isfinite(log_sigma2))
    print("KERNEL_OK")
</pallas_src>

<mosaic_0001>
module attributes {stable_mosaic.version = 11 : i64} {
  func.func @kernel(%arg0: memref<64x16xf32, #tpu.memory_space<vmem>>, %arg1: memref<64x32xf32, #tpu.memory_space<vmem>>, %arg2: memref<16x256xf32, #tpu.memory_space<vmem>>, %arg3: memref<16x256xf32, #tpu.memory_space<vmem>>, %arg4: memref<64x256xf32, #tpu.memory_space<vmem>>, %arg5: memref<1x256xf32, #tpu.memory_space<vmem>>, %arg6: memref<64x256xf32, #tpu.memory_space<vmem>>, %arg7: memref<64x256xf32, #tpu.memory_space<vmem>>, %arg8: memref<64x256xf32, #tpu.memory_space<vmem>>, %arg9: memref<1x256xf32, #tpu.memory_space<vmem>>, %arg10: memref<64x256xf32, #tpu.memory_space<vmem>>, %arg11: memref<64x256xf32, #tpu.memory_space<vmem>>, %arg12: memref<64x256xf32, #tpu.memory_space<vmem>>, %arg13: memref<1x256xf32, #tpu.memory_space<vmem>>, %arg14: memref<64x128xf32, #tpu.memory_space<vmem>>, %arg15: memref<1x128xf32, #tpu.memory_space<vmem>>, %arg16: memref<128x64xf32, #tpu.memory_space<vmem>>, %arg17: memref<1x64xf32, #tpu.memory_space<vmem>>, %arg18: memref<64x32xf32, #tpu.memory_space<vmem>>, %arg19: memref<1x32xf32, #tpu.memory_space<vmem>>, %arg20: memref<64x32xf32, #tpu.memory_space<vmem>>, %arg21: memref<1x32xf32, #tpu.memory_space<vmem>>, %arg22: memref<32x64xf32, #tpu.memory_space<vmem>>, %arg23: memref<1x64xf32, #tpu.memory_space<vmem>>, %arg24: memref<64x128xf32, #tpu.memory_space<vmem>>, %arg25: memref<1x128xf32, #tpu.memory_space<vmem>>, %arg26: memref<128x32xf32, #tpu.memory_space<vmem>>, %arg27: memref<1x32xf32, #tpu.memory_space<vmem>>, %arg28: memref<32x128xf32, #tpu.memory_space<vmem>>, %arg29: memref<32x128xf32, #tpu.memory_space<vmem>>, %arg30: memref<32x128xf32, #tpu.memory_space<vmem>>, %arg31: memref<1x128xf32, #tpu.memory_space<vmem>>, %arg32: memref<32x128xf32, #tpu.memory_space<vmem>>, %arg33: memref<32x128xf32, #tpu.memory_space<vmem>>, %arg34: memref<32x128xf32, #tpu.memory_space<vmem>>, %arg35: memref<1x128xf32, #tpu.memory_space<vmem>>, %arg36: memref<32x128xf32, #tpu.memory_space<vmem>>, %arg37: memref<32x128xf32, #tpu.memory_space<vmem>>, %arg38: memref<32x128xf32, #tpu.memory_space<vmem>>, %arg39: memref<1x128xf32, #tpu.memory_space<vmem>>, %arg40: memref<32x16xf32, #tpu.memory_space<vmem>>, %arg41: memref<1x16xf32, #tpu.memory_space<vmem>>, %arg42: memref<64x16xf32, #tpu.memory_space<vmem>>, %arg43: memref<64x32xf32, #tpu.memory_space<vmem>>, %arg44: memref<64x32xf32, #tpu.memory_space<vmem>>, %arg45: memref<64x32xf32, #tpu.memory_space<vmem>>, %arg46: memref<64x64xf32, #tpu.memory_space<vmem>>, %arg47: memref<64x64xf32, #tpu.memory_space<vmem>>) attributes {dimension_semantics = [], scalar_prefetch = 0 : i64, scratch_operands = 2 : i64, tpu.core_type = #tpu.core_type<tc>} {
    %c0 = arith.constant 0 : index
    %c0_0 = arith.constant 0 : index
    %0 = vector.load %arg0[%c0, %c0_0] : memref<64x16xf32, #tpu.memory_space<vmem>>, vector<64x16xf32>
    %c0_1 = arith.constant 0 : index
    %c0_2 = arith.constant 0 : index
    %1 = vector.load %arg2[%c0_1, %c0_2] : memref<16x256xf32, #tpu.memory_space<vmem>>, vector<16x256xf32>
    %cst = arith.constant dense<0.000000e+00> : vector<64x256xf32>
    %2 = tpu.matmul %0, %1, %cst {dimension_numbers = #tpu.dot_dimension_numbers<[1], [0], [0], [1], [0, 0, 1, 1], [], []>} : vector<64x16xf32>, vector<16x256xf32>, vector<64x256xf32> -> vector<64x256xf32>
    %c0_3 = arith.constant 0 : index
    %c0_4 = arith.constant 0 : index
    %3 = vector.load %arg5[%c0_3, %c0_4] : memref<1x256xf32, #tpu.memory_space<vmem>>, vector<1x256xf32>
    %4 = vector.broadcast %3 : vector<1x256xf32> to vector<64x256xf32>
    %5 = arith.addf %2, %4 : vector<64x256xf32>
    %c0_5 = arith.constant 0 : index
    %c0_6 = arith.constant 0 : index
    %6 = vector.load %arg3[%c0_5, %c0_6] : memref<16x256xf32, #tpu.memory_space<vmem>>, vector<16x256xf32>
    %cst_7 = arith.constant dense<0.000000e+00> : vector<64x256xf32>
    %7 = tpu.matmul %0, %6, %cst_7 {dimension_numbers = #tpu.dot_dimension_numbers<[1], [0], [0], [1], [0, 0, 1, 1], [], []>} : vector<64x16xf32>, vector<16x256xf32>, vector<64x256xf32> -> vector<64x256xf32>
    %c0_8 = arith.constant 0 : index
    %c0_9 = arith.constant 0 : index
    %8 = vector.load %arg4[%c0_8, %c0_9] : memref<64x256xf32, #tpu.memory_space<vmem>>, vector<64x256xf32>
    %cst_10 = arith.constant 0.000000e+00 : f32
    %9 = vector.broadcast %cst_10 : f32 to vector<8x64xf32>
    %cst_11 = arith.constant 0.000000e+00 : f32
    %10 = vector.broadcast %cst_11 : f32 to vector<8x64xf32>
    %cst_12 = arith.constant dense<0.000000e+00> : vector<8x256xf32>
    %11 = tpu.matmul %9, %8, %cst_12 {dimension_numbers = #tpu.dot_dimension_numbers<[1], [0], [0], [1], [0, 0, 1, 1], [], []>} : vector<8x64xf32>, vector<64x256xf32>, vector<8x256xf32> -> vector<8x256xf32>
    %12 = vector.extract_strided_slice %5 {offsets = [0, 0], sizes = [8, 256], strides = [1, 1]} : vector<64x256xf32> to vector<8x256xf32>
    %13 = arith.addf %11, %12 : vector<8x256xf32>
    %14 = vector.extract_strided_slice %7 {offsets = [56, 0], sizes = [8, 256], strides = [1, 1]} : vector<64x256xf32> to vector<8x256xf32>
    %15 = arith.addf %13, %14 : vector<8x256xf32>
    %16 = arith.negf %15 : vector<8x256xf32>
    %17 = math.exp %16 : vector<8x256xf32>
    %cst_13 = arith.constant 1.000000e+00 : f32
    %18 = vector.broadcast %cst_13 : f32 to vector<8x256xf32>
    %19 = arith.addf %18, %17 : vector<8x256xf32>
    %20 = arith.divf %18, %19 : vector<8x256xf32>
    %21 = vector.extract_strided_slice %20 {offsets = [0, 0], sizes = [8, 64], strides = [1, 1]} : vector<8x256xf32> to vector<8x64xf32>
    %22 = vector.extract_strided_slice %20 {offsets = [0, 64], sizes = [8, 64], strides = [1, 1]} : vector<8x256xf32> to vector<8x64xf32>
    %23 = vector.extract_strided_slice %15 {offsets = [0, 128], sizes = [8, 64], strides = [1, 1]} : vector<8x256xf32> to vector<8x64xf32>
    %24 = math.tanh %23 : vector<8x64xf32>
    %25 = vector.extract_strided_slice %20 {offsets = [0, 192], sizes = [8, 64], strides = [1, 1]} : vector<8x256xf32> to vector<8x64xf32>
    %26 = arith.mulf %22, %10 : vector<8x64xf32>
    %27 = arith.mulf %21, %24 : vector<8x64xf32>
    %28 = arith.addf %26, %27 : vector<8x64xf32>
    %29 = math.tanh %28 : vector<8x64xf32>
    %30 = arith.mulf %25, %29 : vector<8x64xf32>
    %31 = vector.extract_strided_slice %30 {offsets = [0, 0], sizes = [8, 32], strides = [1, 1]} : vector<8x64xf32> to vector<8x32xf32>
    %c0_14 = arith.constant 0 : index
    %c0_15 = arith.constant 0 : index
    %32 = vector.load %arg46[%c0_14, %c0_15] : memref<64x64xf32, #tpu.memory_space<vmem>>, vector<8x32xf32>
    tpu.vector_store %arg46[%c0_14, %c0_15], %31 {strides = array<i32>} : memref<64x64xf32, #tpu.memory_space<vmem>>, vector<8x32xf32>,
    %33 = vector.extract_strided_slice %30 {offsets = [0, 32], sizes = [8, 32], strides = [1, 1]} : vector<8x64xf32> to vector<8x32xf32>
    %c56 = arith.constant 56 : index
    %c32 = arith.constant 32 : index
    %34 = vector.load %arg46[%c56, %c32] : memref<64x64xf32, #tpu.memory_space<vmem>>, vector<8x32xf32>
    tpu.vector_store %arg46[%c56, %c32], %33 {strides = array<i32>} : memref<64x64xf32, #tpu.memory_space<vmem>>, vector<8x32xf32>,
    %cst_16 = arith.constant dense<0.000000e+00> : vector<8x256xf32>
    %35 = tpu.matmul %30, %8, %cst_16 {dimension_numbers = #tpu.dot_dimension_numbers<[1], [0], [0], [1], [0, 0, 1, 1], [], []>} : vector<8x64xf32>, vector<64x256xf32>, vector<8x256xf32> -> vector<8x256xf32>
    %36 = vector.extract_strided_slice %5 {offsets = [8, 0], sizes = [8, 256], strides = [1, 1]} : vector<64x256xf32> to vector<8x256xf32>
    %37 = arith.addf %35, %36 : vector<8x256xf32>
    %38 = vector.extract_strided_slice %7 {offsets = [48, 0], sizes = [8, 256], strides = [1, 1]} : vector<64x256xf32> to vector<8x256xf32>
    %39 = arith.addf %37, %38 : vector<8x256xf32>
    %40 = arith.negf %39 : vector<8x256xf32>
    %41 = math.exp %40 : vector<8x256xf32>
    %cst_17 = arith.constant 1.000000e+00 : f32
    %42 = vector.broadcast %cst_17 : f32 to vector<8x256xf32>
    %43 = arith.addf %42, %41 : vector<8x256xf32>
    %44 = arith.divf %42, %43 : vector<8x256xf32>
    %45 = vector.extract_strided_slice %44 {offsets = [0, 0], sizes = [8, 64], strides = [1, 1]} : vector<8x256xf32> to vector<8x64xf32>
    %46 = vector.extract_strided_slice %44 {offsets = [0, 64], sizes = [8, 64], strides = [1, 1]} : vector<8x256xf32> to vector<8x64xf32>
    %47 = vector.extract_strided_slice %39 {offsets = [0, 128], sizes = [8, 64], strides = [1, 1]} : vector<8x256xf32> to vector<8x64xf32>
    %48 = math.tanh %47 : vector<8x64xf32>
    %49 = vector.extract_strided_slice %44 {offsets = [0, 192], sizes = [8, 64], strides = [1, 1]} : vector<8x256xf32> to vector<8x64xf32>
    %50 = arith.mulf %46, %28 : vector<8x64xf32>
    %51 = arith.mulf %45, %48 : vector<8x64xf32>
    %52 = arith.addf %50, %51 : vector<8x64xf32>
    %53 = math.tanh %52 : vector<8x64xf32>
    %54 = arith.mulf %49, %53 : vector<8x64xf32>
    %55 = vector.extract_strided_slice %54 {offsets = [0, 0], sizes = [8, 32], strides = [1, 1]} : vector<8x64xf32> to vector<8x32xf32>
    %c8 = arith.constant 8 : index
    %c0_18 = arith.constant 0 : index
    %56 = vector.load %arg46[%c8, %c0_18] : memref<64x64xf32, #tpu.memory_space<vmem>>, vector<8x32xf32>
    tpu.vector_store %arg46[%c8, %c0_18], %55 {strides = array<i32>} : memref<64x64xf32, #tpu.memory_space<vmem>>, vector<8x32xf32>,
    %57 = vector.extract_strided_slice %54 {offsets = [0, 32], sizes = [8, 32], strides = [1, 1]} : vector<8x64xf32> to vector<8x32xf32>
    %c48 = arith.constant 48 : index
    %c32_19 = arith.constant 32 : index
    %58 = vector.load %arg46[%c48, %c32_19] : memref<64x64xf32, #tpu.memory_space<vmem>>, vector<8x32xf32>
    tpu.vector_store %arg46[%c48, %c32_19], %57 {strides = array<i32>} : memref<64x64xf32, #tpu.memory_space<vmem>>, vector<8x32xf32>,
    %cst_20 = arith.constant dense<0.000000e+00> : vector<8x256xf32>
    %59 = tpu.matmul %54, %8, %cst_20 {dimension_numbers = #tpu.dot_dimension_numbers<[1], [0], [0], [1], [0, 0, 1, 1], [], []>} : vector<8x64xf32>, vector<64x256xf32>, vector<8x256xf32> -> vector<8x256xf32>
    %60 = vector.extract_strided_slice %5 {offsets = [16, 0], sizes = [8, 256], strides = [1, 1]} : vector<64x256xf32> to vector<8x256xf32>
    %61 = arith.addf %59, %60 : vector<8x256xf32>
    %62 = vector.extract_strided_slice %7 {offsets = [40, 0], sizes = [8, 256], strides = [1, 1]} : vector<64x256xf32> to vector<8x256xf32>
    %63 = arith.addf %61, %62 : vector<8x256xf32>
    %64 = arith.negf %63 : vector<8x256xf32>
    %65 = math.exp %64 : vector<8x256xf32>
    %cst_21 = arith.constant 1.000000e+00 : f32
    %66 = vector.broadcast %cst_21 : f32 to vector<8x256xf32>
    %67 = arith.addf %66, %65 : vector<8x256xf32>
    %68 = arith.divf %66, %67 : vector<8x256xf32>
    %69 = vector.extract_strided_slice %68 {offsets = [0, 0], sizes = [8, 64], strides = [1, 1]} : vector<8x256xf32> to vector<8x64xf32>
    %70 = vector.extract_strided_slice %68 {offsets = [0, 64], sizes = [8, 64], strides = [1, 1]} : vector<8x256xf32> to vector<8x64xf32>
    %71 = vector.extract_strided_slice %63 {offsets = [0, 128], sizes = [8, 64], strides = [1, 1]} : vector<8x256xf32> to vector<8x64xf32>
    %72 = math.tanh %71 : vector<8x64xf32>
    %73 = vector.extract_strided_slice %68 {offsets = [0, 192], sizes = [8, 64], strides = [1, 1]} : vector<8x256xf32> to vector<8x64xf32>
    %74 = arith.mulf %70, %52 : vector<8x64xf32>
    %75 = arith.mulf %69, %72 : vector<8x64xf32>
    %76 = arith.addf %74, %75 : vector<8x64xf32>
    %77 = math.tanh %76 : vector<8x64xf32>
    %78 = arith.mulf %73, %77 : vector<8x64xf32>
    %79 = vector.extract_strided_slice %78 {offsets = [0, 0], sizes = [8, 32], strides = [1, 1]} : vector<8x64xf32> to vector<8x32xf32>
    %c16 = arith.constant 16 : index
    %c0_22 = arith.constant 0 : index
    %80 = vector.load %arg46[%c16, %c0_22] : memref<64x64xf32, #tpu.memory_space<vmem>>, vector<8x32xf32>
    tpu.vector_store %arg46[%c16, %c0_22], %79 {strides = array<i32>} : memref<64x64xf32, #tpu.memory_space<vmem>>, vector<8x32xf32>,
    %81 = vector.extract_strided_slice %78 {offsets = [0, 32], sizes = [8, 32], strides = [1, 1]} : vector<8x64xf32> to vector<8x32xf32>
    %c40 = arith.constant 40 : index
    %c32_23 = arith.constant 32 : index
    %82 = vector.load %arg46[%c40, %c32_23] : memref<64x64xf32, #tpu.memory_space<vmem>>, vector<8x32xf32>
    tpu.vector_store %arg46[%c40, %c32_23], %81 {strides = array<i32>} : memref<64x64xf32, #tpu.memory_space<vmem>>, vector<8x32xf32>,
    %cst_24 = arith.constant dense<0.000000e+00> : vector<8x256xf32>
    %83 = tpu.matmul %78, %8, %cst_24 {dimension_numbers = #tpu.dot_dimension_numbers<[1], [0], [0], [1], [0, 0, 1, 1], [], []>} : vector<8x64xf32>, vector<64x256xf32>, vector<8x256xf32> -> vector<8x256xf32>
    %84 = vector.extract_strided_slice %5 {offsets = [24, 0], sizes = [8, 256], strides = [1, 1]} : vector<64x256xf32> to vector<8x256xf32>
    %85 = arith.addf %83, %84 : vector<8x256xf32>
    %86 = vector.extract_strided_slice %7 {offsets = [32, 0], sizes = [8, 256], strides = [1, 1]} : vector<64x256xf32> to vector<8x256xf32>
    %87 = arith.addf %85, %86 : vector<8x256xf32>
    %88 = arith.negf %87 : vector<8x256xf32>
    %89 = math.exp %88 : vector<8x256xf32>
    %cst_25 = arith.constant 1.000000e+00 : f32
    %90 = vector.broadcast %cst_25 : f32 to vector<8x256xf32>
    %91 = arith.addf %90, %89 : vector<8x256xf32>
    %92 = arith.divf %90, %91 : vector<8x256xf32>
    %93 = vector.extract_strided_slice %92 {offsets = [0, 0], sizes = [8, 64], strides = [1, 1]} : vector<8x256xf32> to vector<8x64xf32>
    %94 = vector.extract_strided_slice %92 {offsets = [0, 64], sizes = [8, 64], strides = [1, 1]} : vector<8x256xf32> to vector<8x64xf32>
    %95 = vector.extract_strided_slice %87 {offsets = [0, 128], sizes = [8, 64], strides = [1, 1]} : vector<8x256xf32> to vector<8x64xf32>
    %96 = math.tanh %95 : vector<8x64xf32>
    %97 = vector.extract_strided_slice %92 {offsets = [0, 192], sizes = [8, 64], strides = [1, 1]} : vector<8x256xf32> to vector<8x64xf32>
    %98 = arith.mulf %94, %76 : vector<8x64xf32>
    %99 = arith.mulf %93, %96 : vector<8x64xf32>
    %100 = arith.addf %98, %99 : vector<8x64xf32>
    %101 = math.tanh %100 : vector<8x64xf32>
    %102 = arith.mulf %97, %101 : vector<8x64xf32>
    %103 = vector.extract_strided_slice %102 {offsets = [0, 0], sizes = [8, 32], strides = [1, 1]} : vector<8x64xf32> to vector<8x32xf32>
    %c24 = arith.constant 24 : index
    %c0_26 = arith.constant 0 : index
    %104 = vector.load %arg46[%c24, %c0_26] : memref<64x64xf32, #tpu.memory_space<vmem>>, vector<8x32xf32>
    tpu.vector_store %arg46[%c24, %c0_26], %103 {strides = array<i32>} : memref<64x64xf32, #tpu.memory_space<vmem>>, vector<8x32xf32>,
    %105 = vector.extract_strided_slice %102 {offsets = [0, 32], sizes = [8, 32], strides = [1, 1]} : vector<8x64xf32> to vector<8x32xf32>
    %c32_27 = arith.constant 32 : index
    %c32_28 = arith.constant 32 : index
    %106 = vector.load %arg46[%c32_27, %c32_28] : memref<64x64xf32, #tpu.memory_space<vmem>>, vector<8x32xf32>
    tpu.vector_store %arg46[%c32_27, %c32_28], %105 {strides = array<i32>} : memref<64x64xf32, #tpu.memory_space<vmem>>, vector<8x32xf32>,
    %cst_29 = arith.constant dense<0.000000e+00> : vector<8x256xf32>
    %107 = tpu.matmul %102, %8, %cst_29 {dimension_numbers = #tpu.dot_dimension_numbers<[1], [0], [0], [1], [0, 0, 1, 1], [], []>} : vector<8x64xf32>, vector<64x256xf32>, vector<8x256xf32> -> vector<8x256xf32>
    %108 = vector.extract_strided_slice %5 {offsets = [32, 0], sizes = [8, 256], strides = [1, 1]} : vector<64x256xf32> to vector<8x256xf32>
    %109 = arith.addf %107, %108 : vector<8x256xf32>
    %110 = vector.extract_strided_slice %7 {offsets = [24, 0], sizes = [8, 256], strides = [1, 1]} : vector<64x256xf32> to vector<8x256xf32>
    %111 = arith.addf %109, %110 : vector<8x256xf32>
    %112 = arith.negf %111 : vector<8x256xf32>
    %113 = math.exp %112 : vector<8x256xf32>
    %cst_30 = arith.constant 1.000000e+00 : f32
    %114 = vector.broadcast %cst_30 : f32 to vector<8x256xf32>
    %115 = arith.addf %114, %113 : vector<8x256xf32>
    %116 = arith.divf %114, %115 : vector<8x256xf32>
    %117 = vector.extract_strided_slice %116 {offsets = [0, 0], sizes = [8, 64], strides = [1, 1]} : vector<8x256xf32> to vector<8x64xf32>
    %118 = vector.extract_strided_slice %116 {offsets = [0, 64], sizes = [8, 64], strides = [1, 1]} : vector<8x256xf32> to vector<8x64xf32>
    %119 = vector.extract_strided_slice %111 {offsets = [0, 128], sizes = [8, 64], strides = [1, 1]} : vector<8x256xf32> to vector<8x64xf32>
    %120 = math.tanh %119 : vector<8x64xf32>
    %121 = vector.extract_strided_slice %116 {offsets = [0, 192], sizes = [8, 64], strides = [1, 1]} : vector<8x256xf32> to vector<8x64xf32>
    %122 = arith.mulf %118, %100 : vector<8x64xf32>
    %123 = arith.mulf %117, %120 : vector<8x64xf32>
    %124 = arith.addf %122, %123 : vector<8x64xf32>
    %125 = math.tanh %124 : vector<8x64xf32>
    %126 = arith.mulf %121, %125 : vector<8x64xf32>
    %127 = vector.extract_strided_slice %126 {offsets = [0, 0], sizes = [8, 32], strides = [1, 1]} : vector<8x64xf32> to vector<8x32xf32>
    %c32_31 = arith.constant 32 : index
    %c0_32 = arith.constant 0 : index
    %128 = vector.load %arg46[%c32_31, %c0_32] : memref<64x64xf32, #tpu.memory_space<vmem>>, vector<8x32xf32>
    tpu.vector_store %arg46[%c32_31, %c0_32], %127 {strides = array<i32>} : memref<64x64xf32, #tpu.memory_space<vmem>>, vector<8x32xf32>,
    %129 = vector.extract_strided_slice %126 {offsets = [0, 32], sizes = [8, 32], strides = [1, 1]} : vector<8x64xf32> to vector<8x32xf32>
    %c24_33 = arith.constant 24 : index
    %c32_34 = arith.constant 32 : index
    %130 = vector.load %arg46[%c24_33, %c32_34] : memref<64x64xf32, #tpu.memory_space<vmem>>, vector<8x32xf32>
    tpu.vector_store %arg46[%c24_33, %c32_34], %129 {strides = array<i32>} : memref<64x64xf32, #tpu.memory_space<vmem>>, vector<8x32xf32>,
    %cst_35 = arith.constant dense<0.000000e+00> : vector<8x256xf32>
    %131 = tpu.matmul %126, %8, %cst_35 {dimension_numbers = #tpu.dot_dimension_numbers<[1], [0], [0], [1], [0, 0, 1, 1], [], []>} : vector<8x64xf32>, vector<64x256xf32>, vector<8x256xf32> -> vector<8x256xf32>
    %132 = vector.extract_strided_slice %5 {offsets = [40, 0], sizes = [8, 256], strides = [1, 1]} : vector<64x256xf32> to vector<8x256xf32>
    %133 = arith.addf %131, %132 : vector<8x256xf32>
    %134 = vector.extract_strided_slice %7 {offsets = [16, 0], sizes = [8, 256], strides = [1, 1]} : vector<64x256xf32> to vector<8x256xf32>
    %135 = arith.addf %133, %134 : vector<8x256xf32>
    %136 = arith.negf %135 : vector<8x256xf32>
    %137 = math.exp %136 : vector<8x256xf32>
    %cst_36 = arith.constant 1.000000e+00 : f32
    %138 = vector.broadcast %cst_36 : f32 to vector<8x256xf32>
    %139 = arith.addf %138, %137 : vector<8x256xf32>
    %140 = arith.divf %138, %139 : vector<8x256xf32>
    %141 = vector.extract_strided_slice %140 {offsets = [0, 0], sizes = [8, 64], strides = [1, 1]} : vector<8x256xf32> to vector<8x64xf32>
    %142 = vector.extract_strided_slice %140 {offsets = [0, 64], sizes = [8, 64], strides = [1, 1]} : vector<8x256xf32> to vector<8x64xf32>
    %143 = vector.extract_strided_slice %135 {offsets = [0, 128], sizes = [8, 64], strides = [1, 1]} : vector<8x256xf32> to vector<8x64xf32>
    %144 = math.tanh %143 : vector<8x64xf32>
    %145 = vector.extract_strided_slice %140 {offsets = [0, 192], sizes = [8, 64], strides = [1, 1]} : vector<8x256xf32> to vector<8x64xf32>
    %146 = arith.mulf %142, %124 : vector<8x64xf32>
    %147 = arith.mulf %141, %144 : vector<8x64xf32>
    %148 = arith.addf %146, %147 : vector<8x64xf32>
    %149 = math.tanh %148 : vector<8x64xf32>
    %150 = arith.mulf %145, %149 : vector<8x64xf32>
    %151 = vector.extract_strided_slice %150 {offsets = [0, 0], sizes = [8, 32], strides = [1, 1]} : vector<8x64xf32> to vector<8x32xf32>
    %c40_37 = arith.constant 40 : index
    %c0_38 = arith.constant 0 : index
    %152 = vector.load %arg46[%c40_37, %c0_38] : memref<64x64xf32, #tpu.memory_space<vmem>>, vector<8x32xf32>
    tpu.vector_store %arg46[%c40_37, %c0_38], %151 {strides = array<i32>} : memref<64x64xf32, #tpu.memory_space<vmem>>, vector<8x32xf32>,
    %153 = vector.extract_strided_slice %150 {offsets = [0, 32], sizes = [8, 32], strides = [1, 1]} : vector<8x64xf32> to vector<8x32xf32>
    %c16_39 = arith.constant 16 : index
    %c32_40 = arith.constant 32 : index
    %154 = vector.load %arg46[%c16_39, %c32_40] : memref<64x64xf32, #tpu.memory_space<vmem>>, vector<8x32xf32>
    tpu.vector_store %arg46[%c16_39, %c32_40], %153 {strides = array<i32>} : memref<64x64xf32, #tpu.memory_space<vmem>>, vector<8x32xf32>,
    %cst_41 = arith.constant dense<0.000000e+00> : vector<8x256xf32>
    %155 = tpu.matmul %150, %8, %cst_41 {dimension_numbers = #tpu.dot_dimension_numbers<[1], [0], [0], [1], [0, 0, 1, 1], [], []>} : vector<8x64xf32>, vector<64x256xf32>, vector<8x256xf32> -> vector<8x256xf32>
    %156 = vector.extract_strided_slice %5 {offsets = [48, 0], sizes = [8, 256], strides = [1, 1]} : vector<64x256xf32> to vector<8x256xf32>
    %157 = arith.addf %155, %156 : vector<8x256xf32>
    %158 = vector.extract_strided_slice %7 {offsets = [8, 0], sizes = [8, 256], strides = [1, 1]} : vector<64x256xf32> to vector<8x256xf32>
    %159 = arith.addf %157, %158 : vector<8x256xf32>
    %160 = arith.negf %159 : vector<8x256xf32>
    %161 = math.exp %160 : vector<8x256xf32>
    %cst_42 = arith.constant 1.000000e+00 : f32
    %162 = vector.broadcast %cst_42 : f32 to vector<8x256xf32>
    %163 = arith.addf %162, %161 : vector<8x256xf32>
    %164 = arith.divf %162, %163 : vector<8x256xf32>
    %165 = vector.extract_strided_slice %164 {offsets = [0, 0], sizes = [8, 64], strides = [1, 1]} : vector<8x256xf32> to vector<8x64xf32>
    %166 = vector.extract_strided_slice %164 {offsets = [0, 64], sizes = [8, 64], strides = [1, 1]} : vector<8x256xf32> to vector<8x64xf32>
    %167 = vector.extract_strided_slice %159 {offsets = [0, 128], sizes = [8, 64], strides = [1, 1]} : vector<8x256xf32> to vector<8x64xf32>
    %168 = math.tanh %167 : vector<8x64xf32>
    %169 = vector.extract_strided_slice %164 {offsets = [0, 192], sizes = [8, 64], strides = [1, 1]} : vector<8x256xf32> to vector<8x64xf32>
    %170 = arith.mulf %166, %148 : vector<8x64xf32>
    %171 = arith.mulf %165, %168 : vector<8x64xf32>
    %172 = arith.addf %170, %171 : vector<8x64xf32>
    %173 = math.tanh %172 : vector<8x64xf32>
    %174 = arith.mulf %169, %173 : vector<8x64xf32>
    %175 = vector.extract_strided_slice %174 {offsets = [0, 0], sizes = [8, 32], strides = [1, 1]} : vector<8x64xf32> to vector<8x32xf32>
    %c48_43 = arith.constant 48 : index
    %c0_44 = arith.constant 0 : index
    %176 = vector.load %arg46[%c48_43, %c0_44] : memref<64x64xf32, #tpu.memory_space<vmem>>, vector<8x32xf32>
    tpu.vector_store %arg46[%c48_43, %c0_44], %175 {strides = array<i32>} : memref<64x64xf32, #tpu.memory_space<vmem>>, vector<8x32xf32>,
    %177 = vector.extract_strided_slice %174 {offsets = [0, 32], sizes = [8, 32], strides = [1, 1]} : vector<8x64xf32> to vector<8x32xf32>
    %c8_45 = arith.constant 8 : index
    %c32_46 = arith.constant 32 : index
    %178 = vector.load %arg46[%c8_45, %c32_46] : memref<64x64xf32, #tpu.memory_space<vmem>>, vector<8x32xf32>
    tpu.vector_store %arg46[%c8_45, %c32_46], %177 {strides = array<i32>} : memref<64x64xf32, #tpu.memory_space<vmem>>, vector<8x32xf32>,
    %cst_47 = arith.constant dense<0.000000e+00> : vector<8x256xf32>
    %179 = tpu.matmul %174, %8, %cst_47 {dimension_numbers = #tpu.dot_dimension_numbers<[1], [0], [0], [1], [0, 0, 1, 1], [], []>} : vector<8x64xf32>, vector<64x256xf32>, vector<8x256xf32> -> vector<8x256xf32>
    %180 = vector.extract_strided_slice %5 {offsets = [56, 0], sizes = [8, 256], strides = [1, 1]} : vector<64x256xf32> to vector<8x256xf32>
    %181 = arith.addf %179, %180 : vector<8x256xf32>
    %182 = vector.extract_strided_slice %7 {offsets = [0, 0], sizes = [8, 256], strides = [1, 1]} : vector<64x256xf32> to vector<8x256xf32>
    %183 = arith.addf %181, %182 : vector<8x256xf32>
    %184 = arith.negf %183 : vector<8x256xf32>
    %185 = math.exp %184 : vector<8x256xf32>
    %cst_48 = arith.constant 1.000000e+00 : f32
    %186 = vector.broadcast %cst_48 : f32 to vector<8x256xf32>
    %187 = arith.addf %186, %185 : vector<8x256xf32>
    %188 = arith.divf %186, %187 : vector<8x256xf32>
    %189 = vector.extract_strided_slice %188 {offsets = [0, 0], sizes = [8, 64], strides = [1, 1]} : vector<8x256xf32> to vector<8x64xf32>
    %190 = vector.extract_strided_slice %188 {offsets = [0, 64], sizes = [8, 64], strides = [1, 1]} : vector<8x256xf32> to vector<8x64xf32>
    %191 = vector.extract_strided_slice %183 {offsets = [0, 128], sizes = [8, 64], strides = [1, 1]} : vector<8x256xf32> to vector<8x64xf32>
    %192 = math.tanh %191 : vector<8x64xf32>
    %193 = vector.extract_strided_slice %188 {offsets = [0, 192], sizes = [8, 64], strides = [1, 1]} : vector<8x256xf32> to vector<8x64xf32>
    %194 = arith.mulf %190, %172 : vector<8x64xf32>
    %195 = arith.mulf %189, %192 : vector<8x64xf32>
    %196 = arith.addf %194, %195 : vector<8x64xf32>
    %197 = math.tanh %196 : vector<8x64xf32>
    %198 = arith.mulf %193, %197 : vector<8x64xf32>
    %199 = vector.extract_strided_slice %198 {offsets = [0, 0], sizes = [8, 32], strides = [1, 1]} : vector<8x64xf32> to vector<8x32xf32>
    %c56_49 = arith.constant 56 : index
    %c0_50 = arith.constant 0 : index
    %200 = vector.load %arg46[%c56_49, %c0_50] : memref<64x64xf32, #tpu.memory_space<vmem>>, vector<8x32xf32>
    tpu.vector_store %arg46[%c56_49, %c0_50], %199 {strides = array<i32>} : memref<64x64xf32, #tpu.memory_space<vmem>>, vector<8x32xf32>,
    %201 = vector.extract_strided_slice %198 {offsets = [0, 32], sizes = [8, 32], strides = [1, 1]} : vector<8x64xf32> to vector<8x32xf32>
    %c0_51 = arith.constant 0 : index
    %c32_52 = arith.constant 32 : index
    %202 = vector.load %arg46[%c0_51, %c32_52] : memref<64x64xf32, #tpu.memory_space<vmem>>, vector<8x32xf32>
    tpu.vector_store %arg46[%c0_51, %c32_52], %201 {strides = array<i32>} : memref<64x64xf32, #tpu.memory_space<vmem>>, vector<8x32xf32>,
    %c0_53 = arith.constant 0 : index
    %c0_54 = arith.constant 0 : index
    %203 = vector.load %arg46[%c0_53, %c0_54] : memref<64x64xf32, #tpu.memory_space<vmem>>, vector<64x64xf32>
    %c0_55 = arith.constant 0 : index
    %c0_56 = arith.constant 0 : index
    %204 = vector.load %arg6[%c0_55, %c0_56] : memref<64x256xf32, #tpu.memory_space<vmem>>, vector<64x256xf32>
    %cst_57 = arith.constant dense<0.000000e+00> : vector<64x256xf32>
    %205 = tpu.matmul %203, %204, %cst_57 {dimension_numbers = #tpu.dot_dimension_numbers<[1], [0], [0], [1], [0, 0, 1, 1], [], []>} : vector<64x64xf32>, vector<64x256xf32>, vector<64x256xf32> -> vector<64x256xf32>
    %c0_58 = arith.constant 0 : index
    %c0_59 = arith.constant 0 : index
    %206 = vector.load %arg9[%c0_58, %c0_59] : memref<1x256xf32, #tpu.memory_space<vmem>>, vector<1x256xf32>
    %207 = vector.broadcast %206 : vector<1x256xf32> to vector<64x256xf32>
    %208 = arith.addf %205, %207 : vector<64x256xf32>
    %c0_60 = arith.constant 0 : index
    %c0_61 = arith.constant 0 : index
    %209 = vector.load %arg7[%c0_60, %c0_61] : memref<64x256xf32, #tpu.memory_space<vmem>>, vector<64x256xf32>
    %cst_62 = arith.constant dense<0.000000e+00> : vector<64x256xf32>
    %210 = tpu.matmul %203, %209, %cst_62 {dimension_numbers = #tpu.dot_dimension_numbers<[1], [0], [0], [1], [0, 0, 1, 1], [], []>} : vector<64x64xf32>, vector<64x256xf32>, vector<64x256xf32> -> vector<64x256xf32>
    %c0_63 = arith.constant 0 : index
    %c0_64 = arith.constant 0 : index
    %211 = vector.load %arg8[%c0_63, %c0_64] : memref<64x256xf32, #tpu.memory_space<vmem>>, vector<64x256xf32>
    %cst_65 = arith.constant 0.000000e+00 : f32
    %212 = vector.broadcast %cst_65 : f32 to vector<8x64xf32>
    %cst_66 = arith.constant 0.000000e+00 : f32
    %213 = vector.broadcast %cst_66 : f32 to vector<8x64xf32>
    %cst_67 = arith.constant dense<0.000000e+00> : vector<8x256xf32>
    %214 = tpu.matmul %212, %211, %cst_67 {dimension_numbers = #tpu.dot_dimension_numbers<[1], [0], [0], [1], [0, 0, 1, 1], [], []>} : vector<8x64xf32>, vector<64x256xf32>, vector<8x256xf32> -> vector<8x256xf32>
    %215 = vector.extract_strided_slice %208 {offsets = [0, 0], sizes = [8, 256], strides = [1, 1]} : vector<64x256xf32> to vector<8x256xf32>
    %216 = arith.addf %214, %215 : vector<8x256xf32>
    %217 = vector.extract_strided_slice %210 {offsets = [56, 0], sizes = [8, 256], strides = [1, 1]} : vector<64x256xf32> to vector<8x256xf32>
    %218 = arith.addf %216, %217 : vector<8x256xf32>
    %219 = arith.negf %218 : vector<8x256xf32>
    %220 = math.exp %219 : vector<8x256xf32>
    %cst_68 = arith.constant 1.000000e+00 : f32
    %221 = vector.broadcast %cst_68 : f32 to vector<8x256xf32>
    %222 = arith.addf %221, %220 : vector<8x256xf32>
    %223 = arith.divf %221, %222 : vector<8x256xf32>
    %224 = vector.extract_strided_slice %223 {offsets = [0, 0], sizes = [8, 64], strides = [1, 1]} : vector<8x256xf32> to vector<8x64xf32>
    %225 = vector.extract_strided_slice %223 {offsets = [0, 64], sizes = [8, 64], strides = [1, 1]} : vector<8x256xf32> to vector<8x64xf32>
    %226 = vector.extract_strided_slice %218 {offsets = [0, 128], sizes = [8, 64], strides = [1, 1]} : vector<8x256xf32> to vector<8x64xf32>
    %227 = math.tanh %226 : vector<8x64xf32>
    %228 = vector.extract_strided_slice %223 {offsets = [0, 192], sizes = [8, 64], strides = [1, 1]} : vector<8x256xf32> to vector<8x64xf32>
    %229 = arith.mulf %225, %213 : vector<8x64xf32>
    %230 = arith.mulf %224, %227 : vector<8x64xf32>
    %231 = arith.addf %229, %230 : vector<8x64xf32>
    %232 = math.tanh %231 : vector<8x64xf32>
    %233 = arith.mulf %228, %232 : vector<8x64xf32>
    %234 = vector.extract_strided_slice %233 {offsets = [0, 0], sizes = [8, 32], strides = [1, 1]} : vector<8x64xf32> to vector<8x32xf32>
    %c0_69 = arith.constant 0 : index
    %c0_70 = arith.constant 0 : index
    %235 = vector.load %arg47[%c0_69, %c0_70] : memref<64x64xf32, #tpu.memory_space<vmem>>, vector<8x32xf32>
    tpu.vector_store %arg47[%c0_69, %c0_70], %234 {strides = array<i32>} : memref<64x64xf32, #tpu.memory_space<vmem>>, vector<8x32xf32>,
    %236 = vector.extract_strided_slice %233 {offsets = [0, 32], sizes = [8, 32], strides = [1, 1]} : vector<8x64xf32> to vector<8x32xf32>
    %c56_71 = arith.constant 56 : index
    %c32_72 = arith.constant 32 : index
    %237 = vector.load %arg47[%c56_71, %c32_72] : memref<64x64xf32, #tpu.memory_space<vmem>>, vector<8x32xf32>
    tpu.vector_store %arg47[%c56_71, %c32_72], %236 {strides = array<i32>} : memref<64x64xf32, #tpu.memory_space<vmem>>, vector<8x32xf32>,
    %cst_73 = arith.constant dense<0.000000e+00> : vector<8x256xf32>
    %238 = tpu.matmul %233, %211, %cst_73 {dimension_numbers = #tpu.dot_dimension_numbers<[1], [0], [0], [1], [0, 0, 1, 1], [], []>} : vector<8x64xf32>, vector<64x256xf32>, vector<8x256xf32> -> vector<8x256xf32>
    %239 = vector.extract_strided_slice %208 {offsets = [8, 0], sizes = [8, 256], strides = [1, 1]} : vector<64x256xf32> to vector<8x256xf32>
    %240 = arith.addf %238, %239 : vector<8x256xf32>
    %241 = vector.extract_strided_slice %210 {offsets = [48, 0], sizes = [8, 256], strides = [1, 1]} : vector<64x256xf32> to vector<8x256xf32>
    %242 = arith.addf %240, %241 : vector<8x256xf32>
    %243 = arith.negf %242 : vector<8x256xf32>
    %244 = math.exp %243 : vector<8x256xf32>
    %cst_74 = arith.constant 1.000000e+00 : f32
    %245 = vector.broadcast %cst_74 : f32 to vector<8x256xf32>
    %246 = arith.addf %245, %244 : vector<8x256xf32>
    %247 = arith.divf %245, %246 : vector<8x256xf32>
    %248 = vector.extract_strided_slice %247 {offsets = [0, 0], sizes = [8, 64], strides = [1, 1]} : vector<8x256xf32> to vector<8x64xf32>
    %249 = vector.extract_strided_slice %247 {offsets = [0, 64], sizes = [8, 64], strides = [1, 1]} : vector<8x256xf32> to vector<8x64xf32>
    %250 = vector.extract_strided_slice %242 {offsets = [0, 128], sizes = [8, 64], strides = [1, 1]} : vector<8x256xf32> to vector<8x64xf32>
    %251 = math.tanh %250 : vector<8x64xf32>
    %252 = vector.extract_strided_slice %247 {offsets = [0, 192], sizes = [8, 64], strides = [1, 1]} : vector<8x256xf32> to vector<8x64xf32>
    %253 = arith.mulf %249, %231 : vector<8x64xf32>
    %254 = arith.mulf %248, %251 : vector<8x64xf32>
    %255 = arith.addf %253, %254 : vector<8x64xf32>
    %256 = math.tanh %255 : vector<8x64xf32>
    %257 = arith.mulf %252, %256 : vector<8x64xf32>
    %258 = vector.extract_strided_slice %257 {offsets = [0, 0], sizes = [8, 32], strides = [1, 1]} : vector<8x64xf32> to vector<8x32xf32>
    %c8_75 = arith.constant 8 : index
    %c0_76 = arith.constant 0 : index
    %259 = vector.load %arg47[%c8_75, %c0_76] : memref<64x64xf32, #tpu.memory_space<vmem>>, vector<8x32xf32>
    tpu.vector_store %arg47[%c8_75, %c0_76], %258 {strides = array<i32>} : memref<64x64xf32, #tpu.memory_space<vmem>>, vector<8x32xf32>,
    %260 = vector.extract_strided_slice %257 {offsets = [0, 32], sizes = [8, 32], strides = [1, 1]} : vector<8x64xf32> to vector<8x32xf32>
    %c48_77 = arith.constant 48 : index
    %c32_78 = arith.constant 32 : index
    %261 = vector.load %arg47[%c48_77, %c32_78] : memref<64x64xf32, #tpu.memory_space<vmem>>, vector<8x32xf32>
    tpu.vector_store %arg47[%c48_77, %c32_78], %260 {strides = array<i32>} : memref<64x64xf32, #tpu.memory_space<vmem>>, vector<8x32xf32>,
    %cst_79 = arith.constant dense<0.000000e+00> : vector<8x256xf32>
    %262 = tpu.matmul %257, %211, %cst_79 {dimension_numbers = #tpu.dot_dimension_numbers<[1], [0], [0], [1], [0, 0, 1, 1], [], []>} : vector<8x64xf32>, vector<64x256xf32>, vector<8x256xf32> -> vector<8x256xf32>
    %263 = vector.extract_strided_slice %208 {offsets = [16, 0], sizes = [8, 256], strides = [1, 1]} : vector<64x256xf32> to vector<8x256xf32>
    %264 = arith.addf %262, %263 : vector<8x256xf32>
    %265 = vector.extract_strided_slice %210 {offsets = [40, 0], sizes = [8, 256], strides = [1, 1]} : vector<64x256xf32> to vector<8x256xf32>
    %266 = arith.addf %264, %265 : vector<8x256xf32>
    %267 = arith.negf %266 : vector<8x256xf32>
    %268 = math.exp %267 : vector<8x256xf32>
    %cst_80 = arith.constant 1.000000e+00 : f32
    %269 = vector.broadcast %cst_80 : f32 to vector<8x256xf32>
    %270 = arith.addf %269, %268 : vector<8x256xf32>
    %271 = arith.divf %269, %270 : vector<8x256xf32>
    %272 = vector.extract_strided_slice %271 {offsets = [0, 0], sizes = [8, 64], strides = [1, 1]} : vector<8x256xf32> to vector<8x64xf32>
    %273 = vector.extract_strided_slice %271 {offsets = [0, 64], sizes = [8, 64], strides = [1, 1]} : vector<8x256xf32> to vector<8x64xf32>
    %274 = vector.extract_strided_slice %266 {offsets = [0, 128], sizes = [8, 64], strides = [1, 1]} : vector<8x256xf32> to vector<8x64xf32>
    %275 = math.tanh %274 : vector<8x64xf32>
    %276 = vector.extract_strided_slice %271 {offsets = [0, 192], sizes = [8, 64], strides = [1, 1]} : vector<8x256xf32> to vector<8x64xf32>
    %277 = arith.mulf %273, %255 : vector<8x64xf32>
    %278 = arith.mulf %272, %275 : vector<8x64xf32>
    %279 = arith.addf %277, %278 : vector<8x64xf32>
    %280 = math.tanh %279 : vector<8x64xf32>
    %281 = arith.mulf %276, %280 : vector<8x64xf32>
    %282 = vector.extract_strided_slice %281 {offsets = [0, 0], sizes = [8, 32], strides = [1, 1]} : vector<8x64xf32> to vector<8x32xf32>
    %c16_81 = arith.constant 16 : index
    %c0_82 = arith.constant 0 : index
    %283 = vector.load %arg47[%c16_81, %c0_82] : memref<64x64xf32, #tpu.memory_space<vmem>>, vector<8x32xf32>
    tpu.vector_store %arg47[%c16_81, %c0_82], %282 {strides = array<i32>} : memref<64x64xf32, #tpu.memory_space<vmem>>, vector<8x32xf32>,
    %284 = vector.extract_strided_slice %281 {offsets = [0, 32], sizes = [8, 32], strides = [1, 1]} : vector<8x64xf32> to vector<8x32xf32>
    %c40_83 = arith.constant 40 : index
    %c32_84 = arith.constant 32 : index
    %285 = vector.load %arg47[%c40_83, %c32_84] : memref<64x64xf32, #tpu.memory_space<vmem>>, vector<8x32xf32>
    tpu.vector_store %arg47[%c40_83, %c32_84], %284 {strides = array<i32>} : memref<64x64xf32, #tpu.memory_space<vmem>>, vector<8x32xf32>,
    %cst_85 = arith.constant dense<0.000000e+00> : vector<8x256xf32>
    %286 = tpu.matmul %281, %211, %cst_85 {dimension_numbers = #tpu.dot_dimension_numbers<[1], [0], [0], [1], [0, 0, 1, 1], [], []>} : vector<8x64xf32>, vector<64x256xf32>, vector<8x256xf32> -> vector<8x256xf32>
    %287 = vector.extract_strided_slice %208 {offsets = [24, 0], sizes = [8, 256], strides = [1, 1]} : vector<64x256xf32> to vector<8x256xf32>
    %288 = arith.addf %286, %287 : vector<8x256xf32>
    %289 = vector.extract_strided_slice %210 {offsets = [32, 0], sizes = [8, 256], strides = [1, 1]} : vector<64x256xf32> to vector<8x256xf32>
    %290 = arith.addf %288, %289 : vector<8x256xf32>
    %291 = arith.negf %290 : vector<8x256xf32>
    %292 = math.exp %291 : vector<8x256xf32>
    %cst_86 = arith.constant 1.000000e+00 : f32
    %293 = vector.broadcast %cst_86 : f32 to vector<8x256xf32>
    %294 = arith.addf %293, %292 : vector<8x256xf32>
    %295 = arith.divf %293, %294 : vector<8x256xf32>
    %296 = vector.extract_strided_slice %295 {offsets = [0, 0], sizes = [8, 64], strides = [1, 1]} : vector<8x256xf32> to vector<8x64xf32>
    %297 = vector.extract_strided_slice %295 {offsets = [0, 64], sizes = [8, 64], strides = [1, 1]} : vector<8x256xf32> to vector<8x64xf32>
    %298 = vector.extract_strided_slice %290 {offsets = [0, 128], sizes = [8, 64], strides = [1, 1]} : vector<8x256xf32> to vector<8x64xf32>
    %299 = math.tanh %298 : vector<8x64xf32>
    %300 = vector.extract_strided_slice %295 {offsets = [0, 192], sizes = [8, 64], strides = [1, 1]} : vector<8x256xf32> to vector<8x64xf32>
    %301 = arith.mulf %297, %279 : vector<8x64xf32>
    %302 = arith.mulf %296, %299 : vector<8x64xf32>
    %303 = arith.addf %301, %302 : vector<8x64xf32>
    %304 = math.tanh %303 : vector<8x64xf32>
    %305 = arith.mulf %300, %304 : vector<8x64xf32>
    %306 = vector.extract_strided_slice %305 {offsets = [0, 0], sizes = [8, 32], strides = [1, 1]} : vector<8x64xf32> to vector<8x32xf32>
    %c24_87 = arith.constant 24 : index
    %c0_88 = arith.constant 0 : index
    %307 = vector.load %arg47[%c24_87, %c0_88] : memref<64x64xf32, #tpu.memory_space<vmem>>, vector<8x32xf32>
    tpu.vector_store %arg47[%c24_87, %c0_88], %306 {strides = array<i32>} : memref<64x64xf32, #tpu.memory_space<vmem>>, vector<8x32xf32>,
    %308 = vector.extract_strided_slice %305 {offsets = [0, 32], sizes = [8, 32], strides = [1, 1]} : vector<8x64xf32> to vector<8x32xf32>
    %c32_89 = arith.constant 32 : index
    %c32_90 = arith.constant 32 : index
    %309 = vector.load %arg47[%c32_89, %c32_90] : memref<64x64xf32, #tpu.memory_space<vmem>>, vector<8x32xf32>
    tpu.vector_store %arg47[%c32_89, %c32_90], %308 {strides = array<i32>} : memref<64x64xf32, #tpu.memory_space<vmem>>, vector<8x32xf32>,
    %cst_91 = arith.constant dense<0.000000e+00> : vector<8x256xf32>
    %310 = tpu.matmul %305, %211, %cst_91 {dimension_numbers = #tpu.dot_dimension_numbers<[1], [0], [0], [1], [0, 0, 1, 1], [], []>} : vector<8x64xf32>, vector<64x256xf32>, vector<8x256xf32> -> vector<8x256xf32>
    %311 = vector.extract_strided_slice %208 {offsets = [32, 0], sizes = [8, 256], strides = [1, 1]} : vector<64x256xf32> to vector<8x256xf32>
    %312 = arith.addf %310, %311 : vector<8x256xf32>
    %313 = vector.extract_strided_slice %210 {offsets = [24, 0], sizes = [8, 256], strides = [1, 1]} : vector<64x256xf32> to vector<8x256xf32>
    %314 = arith.addf %312, %313 : vector<8x256xf32>
    %315 = arith.negf %314 : vector<8x256xf32>
    %316 = math.exp %315 : vector<8x256xf32>
    %cst_92 = arith.constant 1.000000e+00 : f32
    %317 = vector.broadcast %cst_92 : f32 to vector<8x256xf32>
    %318 = arith.addf %317, %316 : vector<8x256xf32>
    %319 = arith.divf %317, %318 : vector<8x256xf32>
    %320 = vector.extract_strided_slice %319 {offsets = [0, 0], sizes = [8, 64], strides = [1, 1]} : vector<8x256xf32> to vector<8x64xf32>
    %321 = vector.extract_strided_slice %319 {offsets = [0, 64], sizes = [8, 64], strides = [1, 1]} : vector<8x256xf32> to vector<8x64xf32>
    %322 = vector.extract_strided_slice %314 {offsets = [0, 128], sizes = [8, 64], strides = [1, 1]} : vector<8x256xf32> to vector<8x64xf32>
    %323 = math.tanh %322 : vector<8x64xf32>
    %324 = vector.extract_strided_slice %319 {offsets = [0, 192], sizes = [8, 64], strides = [1, 1]} : vector<8x256xf32> to vector<8x64xf32>
    %325 = arith.mulf %321, %303 : vector<8x64xf32>
    %326 = arith.mulf %320, %323 : vector<8x64xf32>
    %327 = arith.addf %325, %326 : vector<8x64xf32>
    %328 = math.tanh %327 : vector<8x64xf32>
    %329 = arith.mulf %324, %328 : vector<8x64xf32>
    %330 = vector.extract_strided_slice %329 {offsets = [0, 0], sizes = [8, 32], strides = [1, 1]} : vector<8x64xf32> to vector<8x32xf32>
    %c32_93 = arith.constant 32 : index
    %c0_94 = arith.constant 0 : index
    %331 = vector.load %arg47[%c32_93, %c0_94] : memref<64x64xf32, #tpu.memory_space<vmem>>, vector<8x32xf32>
    tpu.vector_store %arg47[%c32_93, %c0_94], %330 {strides = array<i32>} : memref<64x64xf32, #tpu.memory_space<vmem>>, vector<8x32xf32>,
    %332 = vector.extract_strided_slice %329 {offsets = [0, 32], sizes = [8, 32], strides = [1, 1]} : vector<8x64xf32> to vector<8x32xf32>
    %c24_95 = arith.constant 24 : index
    %c32_96 = arith.constant 32 : index
    %333 = vector.load %arg47[%c24_95, %c32_96] : memref<64x64xf32, #tpu.memory_space<vmem>>, vector<8x32xf32>
    tpu.vector_store %arg47[%c24_95, %c32_96], %332 {strides = array<i32>} : memref<64x64xf32, #tpu.memory_space<vmem>>, vector<8x32xf32>,
    %cst_97 = arith.constant dense<0.000000e+00> : vector<8x256xf32>
    %334 = tpu.matmul %329, %211, %cst_97 {dimension_numbers = #tpu.dot_dimension_numbers<[1], [0], [0], [1], [0, 0, 1, 1], [], []>} : vector<8x64xf32>, vector<64x256xf32>, vector<8x256xf32> -> vector<8x256xf32>
    %335 = vector.extract_strided_slice %208 {offsets = [40, 0], sizes = [8, 256], strides = [1, 1]} : vector<64x256xf32> to vector<8x256xf32>
    %336 = arith.addf %334, %335 : vector<8x256xf32>
    %337 = vector.extract_strided_slice %210 {offsets = [16, 0], sizes = [8, 256], strides = [1, 1]} : vector<64x256xf32> to vector<8x256xf32>
    %338 = arith.addf %336, %337 : vector<8x256xf32>
    %339 = arith.negf %338 : vector<8x256xf32>
    %340 = math.exp %339 : vector<8x256xf32>
    %cst_98 = arith.constant 1.000000e+00 : f32
    %341 = vector.broadcast %cst_98 : f32 to vector<8x256xf32>
    %342 = arith.addf %341, %340 : vector<8x256xf32>
    %343 = arith.divf %341, %342 : vector<8x256xf32>
    %344 = vector.extract_strided_slice %343 {offsets = [0, 0], sizes = [8, 64], strides = [1, 1]} : vector<8x256xf32> to vector<8x64xf32>
    %345 = vector.extract_strided_slice %343 {offsets = [0, 64], sizes = [8, 64], strides = [1, 1]} : vector<8x256xf32> to vector<8x64xf32>
    %346 = vector.extract_strided_slice %338 {offsets = [0, 128], sizes = [8, 64], strides = [1, 1]} : vector<8x256xf32> to vector<8x64xf32>
    %347 = math.tanh %346 : vector<8x64xf32>
    %348 = vector.extract_strided_slice %343 {offsets = [0, 192], sizes = [8, 64], strides = [1, 1]} : vector<8x256xf32> to vector<8x64xf32>
    %349 = arith.mulf %345, %327 : vector<8x64xf32>
    %350 = arith.mulf %344, %347 : vector<8x64xf32>
    %351 = arith.addf %349, %350 : vector<8x64xf32>
    %352 = math.tanh %351 : vector<8x64xf32>
    %353 = arith.mulf %348, %352 : vector<8x64xf32>
    %354 = vector.extract_strided_slice %353 {offsets = [0, 0], sizes = [8, 32], strides = [1, 1]} : vector<8x64xf32> to vector<8x32xf32>
    %c40_99 = arith.constant 40 : index
    %c0_100 = arith.constant 0 : index
    %355 = vector.load %arg47[%c40_99, %c0_100] : memref<64x64xf32, #tpu.memory_space<vmem>>, vector<8x32xf32>
    tpu.vector_store %arg47[%c40_99, %c0_100], %354 {strides = array<i32>} : memref<64x64xf32, #tpu.memory_space<vmem>>, vector<8x32xf32>,
    %356 = vector.extract_strided_slice %353 {offsets = [0, 32], sizes = [8, 32], strides = [1, 1]} : vector<8x64xf32> to vector<8x32xf32>
    %c16_101 = arith.constant 16 : index
    %c32_102 = arith.constant 32 : index
    %357 = vector.load %arg47[%c16_101, %c32_102] : memref<64x64xf32, #tpu.memory_space<vmem>>, vector<8x32xf32>
    tpu.vector_store %arg47[%c16_101, %c32_102], %356 {strides = array<i32>} : memref<64x64xf32, #tpu.memory_space<vmem>>, vector<8x32xf32>,
    %cst_103 = arith.constant dense<0.000000e+00> : vector<8x256xf32>
    %358 = tpu.matmul %353, %211, %cst_103 {dimension_numbers = #tpu.dot_dimension_numbers<[1], [0], [0], [1], [0, 0, 1, 1], [], []>} : vector<8x64xf32>, vector<64x256xf32>, vector<8x256xf32> -> vector<8x256xf32>
    %359 = vector.extract_strided_slice %208 {offsets = [48, 0], sizes = [8, 256], strides = [1, 1]} : vector<64x256xf32> to vector<8x256xf32>
    %360 = arith.addf %358, %359 : vector<8x256xf32>
    %361 = vector.extract_strided_slice %210 {offsets = [8, 0], sizes = [8, 256], strides = [1, 1]} : vector<64x256xf32> to vector<8x256xf32>
    %362 = arith.addf %360, %361 : vector<8x256xf32>
    %363 = arith.negf %362 : vector<8x256xf32>
    %364 = math.exp %363 : vector<8x256xf32>
    %cst_104 = arith.constant 1.000000e+00 : f32
    %365 = vector.broadcast %cst_104 : f32 to vector<8x256xf32>
    %366 = arith.addf %365, %364 : vector<8x256xf32>
    %367 = arith.divf %365, %366 : vector<8x256xf32>
    %368 = vector.extract_strided_slice %367 {offsets = [0, 0], sizes = [8, 64], strides = [1, 1]} : vector<8x256xf32> to vector<8x64xf32>
    %369 = vector.extract_strided_slice %367 {offsets = [0, 64], sizes = [8, 64], strides = [1, 1]} : vector<8x256xf32> to vector<8x64xf32>
    %370 = vector.extract_strided_slice %362 {offsets = [0, 128], sizes = [8, 64], strides = [1, 1]} : vector<8x256xf32> to vector<8x64xf32>
    %371 = math.tanh %370 : vector<8x64xf32>
    %372 = vector.extract_strided_slice %367 {offsets = [0, 192], sizes = [8, 64], strides = [1, 1]} : vector<8x256xf32> to vector<8x64xf32>
    %373 = arith.mulf %369, %351 : vector<8x64xf32>
    %374 = arith.mulf %368, %371 : vector<8x64xf32>
    %375 = arith.addf %373, %374 : vector<8x64xf32>
    %376 = math.tanh %375 : vector<8x64xf32>
    %377 = arith.mulf %372, %376 : vector<8x64xf32>
    %378 = vector.extract_strided_slice %377 {offsets = [0, 0], sizes = [8, 32], strides = [1, 1]} : vector<8x64xf32> to vector<8x32xf32>
    %c48_105 = arith.constant 48 : index
    %c0_106 = arith.constant 0 : index
    %379 = vector.load %arg47[%c48_105, %c0_106] : memref<64x64xf32, #tpu.memory_space<vmem>>, vector<8x32xf32>
    tpu.vector_store %arg47[%c48_105, %c0_106], %378 {strides = array<i32>} : memref<64x64xf32, #tpu.memory_space<vmem>>, vector<8x32xf32>,
    %380 = vector.extract_strided_slice %377 {offsets = [0, 32], sizes = [8, 32], strides = [1, 1]} : vector<8x64xf32> to vector<8x32xf32>
    %c8_107 = arith.constant 8 : index
    %c32_108 = arith.constant 32 : index
    %381 = vector.load %arg47[%c8_107, %c32_108] : memref<64x64xf32, #tpu.memory_space<vmem>>, vector<8x32xf32>
    tpu.vector_store %arg47[%c8_107, %c32_108], %380 {strides = array<i32>} : memref<64x64xf32, #tpu.memory_space<vmem>>, vector<8x32xf32>,
    %cst_109 = arith.constant dense<0.000000e+00> : vector<8x256xf32>
    %382 = tpu.matmul %377, %211, %cst_109 {dimension_numbers = #tpu.dot_dimension_numbers<[1], [0], [0], [1], [0, 0, 1, 1], [], []>} : vector<8x64xf32>, vector<64x256xf32>, vector<8x256xf32> -> vector<8x256xf32>
    %383 = vector.extract_strided_slice %208 {offsets = [56, 0], sizes = [8, 256], strides = [1, 1]} : vector<64x256xf32> to vector<8x256xf32>
    %384 = arith.addf %382, %383 : vector<8x256xf32>
    %385 = vector.extract_strided_slice %210 {offsets = [0, 0], sizes = [8, 256], strides = [1, 1]} : vector<64x256xf32> to vector<8x256xf32>
    %386 = arith.addf %384, %385 : vector<8x256xf32>
    %387 = arith.negf %386 : vector<8x256xf32>
    %388 = math.exp %387 : vector<8x256xf32>
    %cst_110 = arith.constant 1.000000e+00 : f32
    %389 = vector.broadcast %cst_110 : f32 to vector<8x256xf32>
    %390 = arith.addf %389, %388 : vector<8x256xf32>
    %391 = arith.divf %389, %390 : vector<8x256xf32>
    %392 = vector.extract_strided_slice %391 {offsets = [0, 0], sizes = [8, 64], strides = [1, 1]} : vector<8x256xf32> to vector<8x64xf32>
    %393 = vector.extract_strided_slice %391 {offsets = [0, 64], sizes = [8, 64], strides = [1, 1]} : vector<8x256xf32> to vector<8x64xf32>
    %394 = vector.extract_strided_slice %386 {offsets = [0, 128], sizes = [8, 64], strides = [1, 1]} : vector<8x256xf32> to vector<8x64xf32>
    %395 = math.tanh %394 : vector<8x64xf32>
    %396 = vector.extract_strided_slice %391 {offsets = [0, 192], sizes = [8, 64], strides = [1, 1]} : vector<8x256xf32> to vector<8x64xf32>
    %397 = arith.mulf %393, %375 : vector<8x64xf32>
    %398 = arith.mulf %392, %395 : vector<8x64xf32>
    %399 = arith.addf %397, %398 : vector<8x64xf32>
    %400 = math.tanh %399 : vector<8x64xf32>
    %401 = arith.mulf %396, %400 : vector<8x64xf32>
    %402 = vector.extract_strided_slice %401 {offsets = [0, 0], sizes = [8, 32], strides = [1, 1]} : vector<8x64xf32> to vector<8x32xf32>
    %c56_111 = arith.constant 56 : index
    %c0_112 = arith.constant 0 : index
    %403 = vector.load %arg47[%c56_111, %c0_112] : memref<64x64xf32, #tpu.memory_space<vmem>>, vector<8x32xf32>
    tpu.vector_store %arg47[%c56_111, %c0_112], %402 {strides = array<i32>} : memref<64x64xf32, #tpu.memory_space<vmem>>, vector<8x32xf32>,
    %404 = vector.extract_strided_slice %401 {offsets = [0, 32], sizes = [8, 32], strides = [1, 1]} : vector<8x64xf32> to vector<8x32xf32>
    %c0_113 = arith.constant 0 : index
    %c32_114 = arith.constant 32 : index
    %405 = vector.load %arg47[%c0_113, %c32_114] : memref<64x64xf32, #tpu.memory_space<vmem>>, vector<8x32xf32>
    tpu.vector_store %arg47[%c0_113, %c32_114], %404 {strides = array<i32>} : memref<64x64xf32, #tpu.memory_space<vmem>>, vector<8x32xf32>,
    %c0_115 = arith.constant 0 : index
    %c0_116 = arith.constant 0 : index
    %406 = vector.load %arg47[%c0_115, %c0_116] : memref<64x64xf32, #tpu.memory_space<vmem>>, vector<64x64xf32>
    %c0_117 = arith.constant 0 : index
    %c0_118 = arith.constant 0 : index
    %407 = vector.load %arg10[%c0_117, %c0_118] : memref<64x256xf32, #tpu.memory_space<vmem>>, vector<64x256xf32>
    %cst_119 = arith.constant dense<0.000000e+00> : vector<64x256xf32>
    %408 = tpu.matmul %406, %407, %cst_119 {dimension_numbers = #tpu.dot_dimension_numbers<[1], [0], [0], [1], [0, 0, 1, 1], [], []>} : vector<64x64xf32>, vector<64x256xf32>, vector<64x256xf32> -> vector<64x256xf32>
    %c0_120 = arith.constant 0 : index
    %c0_121 = arith.constant 0 : index
    %409 = vector.load %arg13[%c0_120, %c0_121] : memref<1x256xf32, #tpu.memory_space<vmem>>, vector<1x256xf32>
    %410 = vector.broadcast %409 : vector<1x256xf32> to vector<64x256xf32>
    %411 = arith.addf %408, %410 : vector<64x256xf32>
    %c0_122 = arith.constant 0 : index
    %c0_123 = arith.constant 0 : index
    %412 = vector.load %arg11[%c0_122, %c0_123] : memref<64x256xf32, #tpu.memory_space<vmem>>, vector<64x256xf32>
    %cst_124 = arith.constant dense<0.000000e+00> : vector<64x256xf32>
    %413 = tpu.matmul %406, %412, %cst_124 {dimension_numbers = #tpu.dot_dimension_numbers<[1], [0], [0], [1], [0, 0, 1, 1], [], []>} : vector<64x64xf32>, vector<64x256xf32>, vector<64x256xf32> -> vector<64x256xf32>
    %c0_125 = arith.constant 0 : index
    %c0_126 = arith.constant 0 : index
    %414 = vector.load %arg12[%c0_125, %c0_126] : memref<64x256xf32, #tpu.memory_space<vmem>>, vector<64x256xf32>
    %cst_127 = arith.constant 0.000000e+00 : f32
    %415 = vector.broadcast %cst_127 : f32 to vector<8x64xf32>
    %cst_128 = arith.constant 0.000000e+00 : f32
    %416 = vector.broadcast %cst_128 : f32 to vector<8x64xf32>
    %cst_129 = arith.constant dense<0.000000e+00> : vector<8x256xf32>
    %417 = tpu.matmul %415, %414, %cst_129 {dimension_numbers = #tpu.dot_dimension_numbers<[1], [0], [0], [1], [0, 0, 1, 1], [], []>} : vector<8x64xf32>, vector<64x256xf32>, vector<8x256xf32> -> vector<8x256xf32>
    %418 = vector.extract_strided_slice %411 {offsets = [0, 0], sizes = [8, 256], strides = [1, 1]} : vector<64x256xf32> to vector<8x256xf32>
    %419 = arith.addf %417, %418 : vector<8x256xf32>
    %420 = vector.extract_strided_slice %413 {offsets = [56, 0], sizes = [8, 256], strides = [1, 1]} : vector<64x256xf32> to vector<8x256xf32>
    %421 = arith.addf %419, %420 : vector<8x256xf32>
    %422 = arith.negf %421 : vector<8x256xf32>
    %423 = math.exp %422 : vector<8x256xf32>
    %cst_130 = arith.constant 1.000000e+00 : f32
    %424 = vector.broadcast %cst_130 : f32 to vector<8x256xf32>
    %425 = arith.addf %424, %423 : vector<8x256xf32>
    %426 = arith.divf %424, %425 : vector<8x256xf32>
    %427 = vector.extract_strided_slice %426 {offsets = [0, 0], sizes = [8, 64], strides = [1, 1]} : vector<8x256xf32> to vector<8x64xf32>
    %428 = vector.extract_strided_slice %426 {offsets = [0, 64], sizes = [8, 64], strides = [1, 1]} : vector<8x256xf32> to vector<8x64xf32>
    %429 = vector.extract_strided_slice %421 {offsets = [0, 128], sizes = [8, 64], strides = [1, 1]} : vector<8x256xf32> to vector<8x64xf32>
    %430 = math.tanh %429 : vector<8x64xf32>
    %431 = vector.extract_strided_slice %426 {offsets = [0, 192], sizes = [8, 64], strides = [1, 1]} : vector<8x256xf32> to vector<8x64xf32>
    %432 = arith.mulf %428, %416 : vector<8x64xf32>
    %433 = arith.mulf %427, %430 : vector<8x64xf32>
    %434 = arith.addf %432, %433 : vector<8x64xf32>
    %435 = math.tanh %434 : vector<8x64xf32>
    %436 = arith.mulf %431, %435 : vector<8x64xf32>
    %437 = vector.extract_strided_slice %436 {offsets = [0, 0], sizes = [8, 32], strides = [1, 1]} : vector<8x64xf32> to vector<8x32xf32>
    %c0_131 = arith.constant 0 : index
    %c0_132 = arith.constant 0 : index
    %438 = vector.load %arg46[%c0_131, %c0_132] : memref<64x64xf32, #tpu.memory_space<vmem>>, vector<8x32xf32>
    tpu.vector_store %arg46[%c0_131, %c0_132], %437 {strides = array<i32>} : memref<64x64xf32, #tpu.memory_space<vmem>>, vector<8x32xf32>,
    %439 = vector.extract_strided_slice %436 {offsets = [0, 32], sizes = [8, 32], strides = [1, 1]} : vector<8x64xf32> to vector<8x32xf32>
    %c56_133 = arith.constant 56 : index
    %c32_134 = arith.constant 32 : index
    %440 = vector.load %arg46[%c56_133, %c32_134] : memref<64x64xf32, #tpu.memory_space<vmem>>, vector<8x32xf32>
    tpu.vector_store %arg46[%c56_133, %c32_134], %439 {strides = array<i32>} : memref<64x64xf32, #tpu.memory_space<vmem>>, vector<8x32xf32>,
    %cst_135 = arith.constant dense<0.000000e+00> : vector<8x256xf32>
    %441 = tpu.matmul %436, %414, %cst_135 {dimension_numbers = #tpu.dot_dimension_numbers<[1], [0], [0], [1], [0, 0, 1, 1], [], []>} : vector<8x64xf32>, vector<64x256xf32>, vector<8x256xf32> -> vector<8x256xf32>
    %442 = vector.extract_strided_slice %411 {offsets = [8, 0], sizes = [8, 256], strides = [1, 1]} : vector<64x256xf32> to vector<8x256xf32>
    %443 = arith.addf %441, %442 : vector<8x256xf32>
    %444 = vector.extract_strided_slice %413 {offsets = [48, 0], sizes = [8, 256], strides = [1, 1]} : vector<64x256xf32> to vector<8x256xf32>
    %445 = arith.addf %443, %444 : vector<8x256xf32>
    %446 = arith.negf %445 : vector<8x256xf32>
    %447 = math.exp %446 : vector<8x256xf32>
    %cst_136 = arith.constant 1.000000e+00 : f32
    %448 = vector.broadcast %cst_136 : f32 to vector<8x256xf32>
    %449 = arith.addf %448, %447 : vector<8x256xf32>
    %450 = arith.divf %448, %449 : vector<8x256xf32>
    %451 = vector.extract_strided_slice %450 {offsets = [0, 0], sizes = [8, 64], strides = [1, 1]} : vector<8x256xf32> to vector<8x64xf32>
    %452 = vector.extract_strided_slice %450 {offsets = [0, 64], sizes = [8, 64], strides = [1, 1]} : vector<8x256xf32> to vector<8x64xf32>
    %453 = vector.extract_strided_slice %445 {offsets = [0, 128], sizes = [8, 64], strides = [1, 1]} : vector<8x256xf32> to vector<8x64xf32>
    %454 = math.tanh %453 : vector<8x64xf32>
    %455 = vector.extract_strided_slice %450 {offsets = [0, 192], sizes = [8, 64], strides = [1, 1]} : vector<8x256xf32> to vector<8x64xf32>
    %456 = arith.mulf %452, %434 : vector<8x64xf32>
    %457 = arith.mulf %451, %454 : vector<8x64xf32>
    %458 = arith.addf %456, %457 : vector<8x64xf32>
    %459 = math.tanh %458 : vector<8x64xf32>
    %460 = arith.mulf %455, %459 : vector<8x64xf32>
    %461 = vector.extract_strided_slice %460 {offsets = [0, 0], sizes = [8, 32], strides = [1, 1]} : vector<8x64xf32> to vector<8x32xf32>
    %c8_137 = arith.constant 8 : index
    %c0_138 = arith.constant 0 : index
    %462 = vector.load %arg46[%c8_137, %c0_138] : memref<64x64xf32, #tpu.memory_space<vmem>>, vector<8x32xf32>
    tpu.vector_store %arg46[%c8_137, %c0_138], %461 {strides = array<i32>} : memref<64x64xf32, #tpu.memory_space<vmem>>, vector<8x32xf32>,
    %463 = vector.extract_strided_slice %460 {offsets = [0, 32], sizes = [8, 32], strides = [1, 1]} : vector<8x64xf32> to vector<8x32xf32>
    %c48_139 = arith.constant 48 : index
    %c32_140 = arith.constant 32 : index
    %464 = vector.load %arg46[%c48_139, %c32_140] : memref<64x64xf32, #tpu.memory_space<vmem>>, vector<8x32xf32>
    tpu.vector_store %arg46[%c48_139, %c32_140], %463 {strides = array<i32>} : memref<64x64xf32, #tpu.memory_space<vmem>>, vector<8x32xf32>,
    %cst_141 = arith.constant dense<0.000000e+00> : vector<8x256xf32>
    %465 = tpu.matmul %460, %414, %cst_141 {dimension_numbers = #tpu.dot_dimension_numbers<[1], [0], [0], [1], [0, 0, 1, 1], [], []>} : vector<8x64xf32>, vector<64x256xf32>, vector<8x256xf32> -> vector<8x256xf32>
    %466 = vector.extract_strided_slice %411 {offsets = [16, 0], sizes = [8, 256], strides = [1, 1]} : vector<64x256xf32> to vector<8x256xf32>
    %467 = arith.addf %465, %466 : vector<8x256xf32>
    %468 = vector.extract_strided_slice %413 {offsets = [40, 0], sizes = [8, 256], strides = [1, 1]} : vector<64x256xf32> to vector<8x256xf32>
    %469 = arith.addf %467, %468 : vector<8x256xf32>
    %470 = arith.negf %469 : vector<8x256xf32>
    %471 = math.exp %470 : vector<8x256xf32>
    %cst_142 = arith.constant 1.000000e+00 : f32
    %472 = vector.broadcast %cst_142 : f32 to vector<8x256xf32>
    %473 = arith.addf %472, %471 : vector<8x256xf32>
    %474 = arith.divf %472, %473 : vector<8x256xf32>
    %475 = vector.extract_strided_slice %474 {offsets = [0, 0], sizes = [8, 64], strides = [1, 1]} : vector<8x256xf32> to vector<8x64xf32>
    %476 = vector.extract_strided_slice %474 {offsets = [0, 64], sizes = [8, 64], strides = [1, 1]} : vector<8x256xf32> to vector<8x64xf32>
    %477 = vector.extract_strided_slice %469 {offsets = [0, 128], sizes = [8, 64], strides = [1, 1]} : vector<8x256xf32> to vector<8x64xf32>
    %478 = math.tanh %477 : vector<8x64xf32>
    %479 = vector.extract_strided_slice %474 {offsets = [0, 192], sizes = [8, 64], strides = [1, 1]} : vector<8x256xf32> to vector<8x64xf32>
    %480 = arith.mulf %476, %458 : vector<8x64xf32>
    %481 = arith.mulf %475, %478 : vector<8x64xf32>
    %482 = arith.addf %480, %481 : vector<8x64xf32>
    %483 = math.tanh %482 : vector<8x64xf32>
    %484 = arith.mulf %479, %483 : vector<8x64xf32>
    %485 = vector.extract_strided_slice %484 {offsets = [0, 0], sizes = [8, 32], strides = [1, 1]} : vector<8x64xf32> to vector<8x32xf32>
    %c16_143 = arith.constant 16 : index
    %c0_144 = arith.constant 0 : index
    %486 = vector.load %arg46[%c16_143, %c0_144] : memref<64x64xf32, #tpu.memory_space<vmem>>, vector<8x32xf32>
    tpu.vector_store %arg46[%c16_143, %c0_144], %485 {strides = array<i32>} : memref<64x64xf32, #tpu.memory_space<vmem>>, vector<8x32xf32>,
    %487 = vector.extract_strided_slice %484 {offsets = [0, 32], sizes = [8, 32], strides = [1, 1]} : vector<8x64xf32> to vector<8x32xf32>
    %c40_145 = arith.constant 40 : index
    %c32_146 = arith.constant 32 : index
    %488 = vector.load %arg46[%c40_145, %c32_146] : memref<64x64xf32, #tpu.memory_space<vmem>>, vector<8x32xf32>
    tpu.vector_store %arg46[%c40_145, %c32_146], %487 {strides = array<i32>} : memref<64x64xf32, #tpu.memory_space<vmem>>, vector<8x32xf32>,
    %cst_147 = arith.constant dense<0.000000e+00> : vector<8x256xf32>
    %489 = tpu.matmul %484, %414, %cst_147 {dimension_numbers = #tpu.dot_dimension_numbers<[1], [0], [0], [1], [0, 0, 1, 1], [], []>} : vector<8x64xf32>, vector<64x256xf32>, vector<8x256xf32> -> vector<8x256xf32>
    %490 = vector.extract_strided_slice %411 {offsets = [24, 0], sizes = [8, 256], strides = [1, 1]} : vector<64x256xf32> to vector<8x256xf32>
    %491 = arith.addf %489, %490 : vector<8x256xf32>
    %492 = vector.extract_strided_slice %413 {offsets = [32, 0], sizes = [8, 256], strides = [1, 1]} : vector<64x256xf32> to vector<8x256xf32>
    %493 = arith.addf %491, %492 : vector<8x256xf32>
    %494 = arith.negf %493 : vector<8x256xf32>
    %495 = math.exp %494 : vector<8x256xf32>
    %cst_148 = arith.constant 1.000000e+00 : f32
    %496 = vector.broadcast %cst_148 : f32 to vector<8x256xf32>
    %497 = arith.addf %496, %495 : vector<8x256xf32>
    %498 = arith.divf %496, %497 : vector<8x256xf32>
    %499 = vector.extract_strided_slice %498 {offsets = [0, 0], sizes = [8, 64], strides = [1, 1]} : vector<8x256xf32> to vector<8x64xf32>
    %500 = vector.extract_strided_slice %498 {offsets = [0, 64], sizes = [8, 64], strides = [1, 1]} : vector<8x256xf32> to vector<8x64xf32>
    %501 = vector.extract_strided_slice %493 {offsets = [0, 128], sizes = [8, 64], strides = [1, 1]} : vector<8x256xf32> to vector<8x64xf32>
    %502 = math.tanh %501 : vector<8x64xf32>
    %503 = vector.extract_strided_slice %498 {offsets = [0, 192], sizes = [8, 64], strides = [1, 1]} : vector<8x256xf32> to vector<8x64xf32>
    %504 = arith.mulf %500, %482 : vector<8x64xf32>
    %505 = arith.mulf %499, %502 : vector<8x64xf32>
    %506 = arith.addf %504, %505 : vector<8x64xf32>
    %507 = math.tanh %506 : vector<8x64xf32>
    %508 = arith.mulf %503, %507 : vector<8x64xf32>
    %509 = vector.extract_strided_slice %508 {offsets = [0, 0], sizes = [8, 32], strides = [1, 1]} : vector<8x64xf32> to vector<8x32xf32>
    %c24_149 = arith.constant 24 : index
    %c0_150 = arith.constant 0 : index
    %510 = vector.load %arg46[%c24_149, %c0_150] : memref<64x64xf32, #tpu.memory_space<vmem>>, vector<8x32xf32>
    tpu.vector_store %arg46[%c24_149, %c0_150], %509 {strides = array<i32>} : memref<64x64xf32, #tpu.memory_space<vmem>>, vector<8x32xf32>,
    %511 = vector.extract_strided_slice %508 {offsets = [0, 32], sizes = [8, 32], strides = [1, 1]} : vector<8x64xf32> to vector<8x32xf32>
    %c32_151 = arith.constant 32 : index
    %c32_152 = arith.constant 32 : index
    %512 = vector.load %arg46[%c32_151, %c32_152] : memref<64x64xf32, #tpu.memory_space<vmem>>, vector<8x32xf32>
    tpu.vector_store %arg46[%c32_151, %c32_152], %511 {strides = array<i32>} : memref<64x64xf32, #tpu.memory_space<vmem>>, vector<8x32xf32>,
    %cst_153 = arith.constant dense<0.000000e+00> : vector<8x256xf32>
    %513 = tpu.matmul %508, %414, %cst_153 {dimension_numbers = #tpu.dot_dimension_numbers<[1], [0], [0], [1], [0, 0, 1, 1], [], []>} : vector<8x64xf32>, vector<64x256xf32>, vector<8x256xf32> -> vector<8x256xf32>
    %514 = vector.extract_strided_slice %411 {offsets = [32, 0], sizes = [8, 256], strides = [1, 1]} : vector<64x256xf32> to vector<8x256xf32>
    %515 = arith.addf %513, %514 : vector<8x256xf32>
    %516 = vector.extract_strided_slice %413 {offsets = [24, 0], sizes = [8, 256], strides = [1, 1]} : vector<64x256xf32> to vector<8x256xf32>
    %517 = arith.addf %515, %516 : vector<8x256xf32>
    %518 = arith.negf %517 : vector<8x256xf32>
    %519 = math.exp %518 : vector<8x256xf32>
    %cst_154 = arith.constant 1.000000e+00 : f32
    %520 = vector.broadcast %cst_154 : f32 to vector<8x256xf32>
    %521 = arith.addf %520, %519 : vector<8x256xf32>
    %522 = arith.divf %520, %521 : vector<8x256xf32>
    %523 = vector.extract_strided_slice %522 {offsets = [0, 0], sizes = [8, 64], strides = [1, 1]} : vector<8x256xf32> to vector<8x64xf32>
    %524 = vector.extract_strided_slice %522 {offsets = [0, 64], sizes = [8, 64], strides = [1, 1]} : vector<8x256xf32> to vector<8x64xf32>
    %525 = vector.extract_strided_slice %517 {offsets = [0, 128], sizes = [8, 64], strides = [1, 1]} : vector<8x256xf32> to vector<8x64xf32>
    %526 = math.tanh %525 : vector<8x64xf32>
    %527 = vector.extract_strided_slice %522 {offsets = [0, 192], sizes = [8, 64], strides = [1, 1]} : vector<8x256xf32> to vector<8x64xf32>
    %528 = arith.mulf %524, %506 : vector<8x64xf32>
    %529 = arith.mulf %523, %526 : vector<8x64xf32>
    %530 = arith.addf %528, %529 : vector<8x64xf32>
    %531 = math.tanh %530 : vector<8x64xf32>
    %532 = arith.mulf %527, %531 : vector<8x64xf32>
    %533 = vector.extract_strided_slice %532 {offsets = [0, 0], sizes = [8, 32], strides = [1, 1]} : vector<8x64xf32> to vector<8x32xf32>
    %c32_155 = arith.constant 32 : index
    %c0_156 = arith.constant 0 : index
    %534 = vector.load %arg46[%c32_155, %c0_156] : memref<64x64xf32, #tpu.memory_space<vmem>>, vector<8x32xf32>
    tpu.vector_store %arg46[%c32_155, %c0_156], %533 {strides = array<i32>} : memref<64x64xf32, #tpu.memory_space<vmem>>, vector<8x32xf32>,
    %535 = vector.extract_strided_slice %532 {offsets = [0, 32], sizes = [8, 32], strides = [1, 1]} : vector<8x64xf32> to vector<8x32xf32>
    %c24_157 = arith.constant 24 : index
    %c32_158 = arith.constant 32 : index
    %536 = vector.load %arg46[%c24_157, %c32_158] : memref<64x64xf32, #tpu.memory_space<vmem>>, vector<8x32xf32>
    tpu.vector_store %arg46[%c24_157, %c32_158], %535 {strides = array<i32>} : memref<64x64xf32, #tpu.memory_space<vmem>>, vector<8x32xf32>,
    %cst_159 = arith.constant dense<0.000000e+00> : vector<8x256xf32>
    %537 = tpu.matmul %532, %414, %cst_159 {dimension_numbers = #tpu.dot_dimension_numbers<[1], [0], [0], [1], [0, 0, 1, 1], [], []>} : vector<8x64xf32>, vector<64x256xf32>, vector<8x256xf32> -> vector<8x256xf32>
    %538 = vector.extract_strided_slice %411 {offsets = [40, 0], sizes = [8, 256], strides = [1, 1]} : vector<64x256xf32> to vector<8x256xf32>
    %539 = arith.addf %537, %538 : vector<8x256xf32>
    %540 = vector.extract_strided_slice %413 {offsets = [16, 0], sizes = [8, 256], strides = [1, 1]} : vector<64x256xf32> to vector<8x256xf32>
    %541 = arith.addf %539, %540 : vector<8x256xf32>
    %542 = arith.negf %541 : vector<8x256xf32>
    %543 = math.exp %542 : vector<8x256xf32>
    %cst_160 = arith.constant 1.000000e+00 : f32
    %544 = vector.broadcast %cst_160 : f32 to vector<8x256xf32>
    %545 = arith.addf %544, %543 : vector<8x256xf32>
    %546 = arith.divf %544, %545 : vector<8x256xf32>
    %547 = vector.extract_strided_slice %546 {offsets = [0, 0], sizes = [8, 64], strides = [1, 1]} : vector<8x256xf32> to vector<8x64xf32>
    %548 = vector.extract_strided_slice %546 {offsets = [0, 64], sizes = [8, 64], strides = [1, 1]} : vector<8x256xf32> to vector<8x64xf32>
    %549 = vector.extract_strided_slice %541 {offsets = [0, 128], sizes = [8, 64], strides = [1, 1]} : vector<8x256xf32> to vector<8x64xf32>
    %550 = math.tanh %549 : vector<8x64xf32>
    %551 = vector.extract_strided_slice %546 {offsets = [0, 192], sizes = [8, 64], strides = [1, 1]} : vector<8x256xf32> to vector<8x64xf32>
    %552 = arith.mulf %548, %530 : vector<8x64xf32>
    %553 = arith.mulf %547, %550 : vector<8x64xf32>
    %554 = arith.addf %552, %553 : vector<8x64xf32>
    %555 = math.tanh %554 : vector<8x64xf32>
    %556 = arith.mulf %551, %555 : vector<8x64xf32>
    %557 = vector.extract_strided_slice %556 {offsets = [0, 0], sizes = [8, 32], strides = [1, 1]} : vector<8x64xf32> to vector<8x32xf32>
    %c40_161 = arith.constant 40 : index
    %c0_162 = arith.constant 0 : index
    %558 = vector.load %arg46[%c40_161, %c0_162] : memref<64x64xf32, #tpu.memory_space<vmem>>, vector<8x32xf32>
    tpu.vector_store %arg46[%c40_161, %c0_162], %557 {strides = array<i32>} : memref<64x64xf32, #tpu.memory_space<vmem>>, vector<8x32xf32>,
    %559 = vector.extract_strided_slice %556 {offsets = [0, 32], sizes = [8, 32], strides = [1, 1]} : vector<8x64xf32> to vector<8x32xf32>
    %c16_163 = arith.constant 16 : index
    %c32_164 = arith.constant 32 : index
    %560 = vector.load %arg46[%c16_163, %c32_164] : memref<64x64xf32, #tpu.memory_space<vmem>>, vector<8x32xf32>
    tpu.vector_store %arg46[%c16_163, %c32_164], %559 {strides = array<i32>} : memref<64x64xf32, #tpu.memory_space<vmem>>, vector<8x32xf32>,
    %cst_165 = arith.constant dense<0.000000e+00> : vector<8x256xf32>
    %561 = tpu.matmul %556, %414, %cst_165 {dimension_numbers = #tpu.dot_dimension_numbers<[1], [0], [0], [1], [0, 0, 1, 1], [], []>} : vector<8x64xf32>, vector<64x256xf32>, vector<8x256xf32> -> vector<8x256xf32>
    %562 = vector.extract_strided_slice %411 {offsets = [48, 0], sizes = [8, 256], strides = [1, 1]} : vector<64x256xf32> to vector<8x256xf32>
    %563 = arith.addf %561, %562 : vector<8x256xf32>
    %564 = vector.extract_strided_slice %413 {offsets = [8, 0], sizes = [8, 256], strides = [1, 1]} : vector<64x256xf32> to vector<8x256xf32>
    %565 = arith.addf %563, %564 : vector<8x256xf32>
    %566 = arith.negf %565 : vector<8x256xf32>
    %567 = math.exp %566 : vector<8x256xf32>
    %cst_166 = arith.constant 1.000000e+00 : f32
    %568 = vector.broadcast %cst_166 : f32 to vector<8x256xf32>
    %569 = arith.addf %568, %567 : vector<8x256xf32>
    %570 = arith.divf %568, %569 : vector<8x256xf32>
    %571 = vector.extract_strided_slice %570 {offsets = [0, 0], sizes = [8, 64], strides = [1, 1]} : vector<8x256xf32> to vector<8x64xf32>
    %572 = vector.extract_strided_slice %570 {offsets = [0, 64], sizes = [8, 64], strides = [1, 1]} : vector<8x256xf32> to vector<8x64xf32>
    %573 = vector.extract_strided_slice %565 {offsets = [0, 128], sizes = [8, 64], strides = [1, 1]} : vector<8x256xf32> to vector<8x64xf32>
    %574 = math.tanh %573 : vector<8x64xf32>
    %575 = vector.extract_strided_slice %570 {offsets = [0, 192], sizes = [8, 64], strides = [1, 1]} : vector<8x256xf32> to vector<8x64xf32>
    %576 = arith.mulf %572, %554 : vector<8x64xf32>
    %577 = arith.mulf %571, %574 : vector<8x64xf32>
    %578 = arith.addf %576, %577 : vector<8x64xf32>
    %579 = math.tanh %578 : vector<8x64xf32>
    %580 = arith.mulf %575, %579 : vector<8x64xf32>
    %581 = vector.extract_strided_slice %580 {offsets = [0, 0], sizes = [8, 32], strides = [1, 1]} : vector<8x64xf32> to vector<8x32xf32>
    %c48_167 = arith.constant 48 : index
    %c0_168 = arith.constant 0 : index
    %582 = vector.load %arg46[%c48_167, %c0_168] : memref<64x64xf32, #tpu.memory_space<vmem>>, vector<8x32xf32>
    tpu.vector_store %arg46[%c48_167, %c0_168], %581 {strides = array<i32>} : memref<64x64xf32, #tpu.memory_space<vmem>>, vector<8x32xf32>,
    %583 = vector.extract_strided_slice %580 {offsets = [0, 32], sizes = [8, 32], strides = [1, 1]} : vector<8x64xf32> to vector<8x32xf32>
    %c8_169 = arith.constant 8 : index
    %c32_170 = arith.constant 32 : index
    %584 = vector.load %arg46[%c8_169, %c32_170] : memref<64x64xf32, #tpu.memory_space<vmem>>, vector<8x32xf32>
    tpu.vector_store %arg46[%c8_169, %c32_170], %583 {strides = array<i32>} : memref<64x64xf32, #tpu.memory_space<vmem>>, vector<8x32xf32>,
    %cst_171 = arith.constant dense<0.000000e+00> : vector<8x256xf32>
    %585 = tpu.matmul %580, %414, %cst_171 {dimension_numbers = #tpu.dot_dimension_numbers<[1], [0], [0], [1], [0, 0, 1, 1], [], []>} : vector<8x64xf32>, vector<64x256xf32>, vector<8x256xf32> -> vector<8x256xf32>
    %586 = vector.extract_strided_slice %411 {offsets = [56, 0], sizes = [8, 256], strides = [1, 1]} : vector<64x256xf32> to vector<8x256xf32>
    %587 = arith.addf %585, %586 : vector<8x256xf32>
    %588 = vector.extract_strided_slice %413 {offsets = [0, 0], sizes = [8, 256], strides = [1, 1]} : vector<64x256xf32> to vector<8x256xf32>
    %589 = arith.addf %587, %588 : vector<8x256xf32>
    %590 = arith.negf %589 : vector<8x256xf32>
    %591 = math.exp %590 : vector<8x256xf32>
    %cst_172 = arith.constant 1.000000e+00 : f32
    %592 = vector.broadcast %cst_172 : f32 to vector<8x256xf32>
    %593 = arith.addf %592, %591 : vector<8x256xf32>
    %594 = arith.divf %592, %593 : vector<8x256xf32>
    %595 = vector.extract_strided_slice %594 {offsets = [0, 0], sizes = [8, 64], strides = [1, 1]} : vector<8x256xf32> to vector<8x64xf32>
    %596 = vector.extract_strided_slice %594 {offsets = [0, 64], sizes = [8, 64], strides = [1, 1]} : vector<8x256xf32> to vector<8x64xf32>
    %597 = vector.extract_strided_slice %589 {offsets = [0, 128], sizes = [8, 64], strides = [1, 1]} : vector<8x256xf32> to vector<8x64xf32>
    %598 = math.tanh %597 : vector<8x64xf32>
    %599 = vector.extract_strided_slice %594 {offsets = [0, 192], sizes = [8, 64], strides = [1, 1]} : vector<8x256xf32> to vector<8x64xf32>
    %600 = arith.mulf %596, %578 : vector<8x64xf32>
    %601 = arith.mulf %595, %598 : vector<8x64xf32>
    %602 = arith.addf %600, %601 : vector<8x64xf32>
    %603 = math.tanh %602 : vector<8x64xf32>
    %604 = arith.mulf %599, %603 : vector<8x64xf32>
    %605 = vector.extract_strided_slice %604 {offsets = [0, 0], sizes = [8, 32], strides = [1, 1]} : vector<8x64xf32> to vector<8x32xf32>
    %c56_173 = arith.constant 56 : index
    %c0_174 = arith.constant 0 : index
    %606 = vector.load %arg46[%c56_173, %c0_174] : memref<64x64xf32, #tpu.memory_space<vmem>>, vector<8x32xf32>
    tpu.vector_store %arg46[%c56_173, %c0_174], %605 {strides = array<i32>} : memref<64x64xf32, #tpu.memory_space<vmem>>, vector<8x32xf32>,
    %607 = vector.extract_strided_slice %604 {offsets = [0, 32], sizes = [8, 32], strides = [1, 1]} : vector<8x64xf32> to vector<8x32xf32>
    %c0_175 = arith.constant 0 : index
    %c32_176 = arith.constant 32 : index
    %608 = vector.load %arg46[%c0_175, %c32_176] : memref<64x64xf32, #tpu.memory_space<vmem>>, vector<8x32xf32>
    tpu.vector_store %arg46[%c0_175, %c32_176], %607 {strides = array<i32>} : memref<64x64xf32, #tpu.memory_space<vmem>>, vector<8x32xf32>,
    %c0_177 = arith.constant 0 : index
    %c0_178 = arith.constant 0 : index
    %609 = vector.load %arg46[%c0_177, %c0_178] : memref<64x64xf32, #tpu.memory_space<vmem>>, vector<64x64xf32>
    %c0_179 = arith.constant 0 : index
    %c0_180 = arith.constant 0 : index
    %610 = vector.load %arg14[%c0_179, %c0_180] : memref<64x128xf32, #tpu.memory_space<vmem>>, vector<64x128xf32>
    %cst_181 = arith.constant dense<0.000000e+00> : vector<64x128xf32>
    %611 = tpu.matmul %609, %610, %cst_181 {dimension_numbers = #tpu.dot_dimension_numbers<[1], [0], [0], [1], [0, 0, 1, 1], [], []>} : vector<64x64xf32>, vector<64x128xf32>, vector<64x128xf32> -> vector<64x128xf32>
    %c0_182 = arith.constant 0 : index
    %c0_183 = arith.constant 0 : index
    %612 = vector.load %arg15[%c0_182, %c0_183] : memref<1x128xf32, #tpu.memory_space<vmem>>, vector<1x128xf32>
    %613 = vector.broadcast %612 : vector<1x128xf32> to vector<64x128xf32>
    %614 = arith.addf %611, %613 : vector<64x128xf32>
    %cst_184 = arith.constant 0.000000e+00 : f32
    %615 = vector.broadcast %cst_184 : f32 to vector<64x128xf32>
    %616 = arith.cmpf oge, %614, %615 : vector<64x128xf32>
    %cst_185 = arith.constant 0.00999999977 : f32
    %617 = vector.broadcast %cst_185 : f32 to vector<64x128xf32>
    %618 = arith.mulf %617, %614 : vector<64x128xf32>
    %619 = arith.select %616, %614, %618 : vector<64x128xi1>, vector<64x128xf32>
    %c0_186 = arith.constant 0 : index
    %c0_187 = arith.constant 0 : index
    %620 = vector.load %arg16[%c0_186, %c0_187] : memref<128x64xf32, #tpu.memory_space<vmem>>, vector<128x64xf32>
    %cst_188 = arith.constant dense<0.000000e+00> : vector<64x64xf32>
    %621 = tpu.matmul %619, %620, %cst_188 {dimension_numbers = #tpu.dot_dimension_numbers<[1], [0], [0], [1], [0, 0, 1, 1], [], []>} : vector<64x128xf32>, vector<128x64xf32>, vector<64x64xf32> -> vector<64x64xf32>
    %c0_189 = arith.constant 0 : index
    %c0_190 = arith.constant 0 : index
    %622 = vector.load %arg17[%c0_189, %c0_190] : memref<1x64xf32, #tpu.memory_space<vmem>>, vector<1x64xf32>
    %623 = vector.broadcast %622 : vector<1x64xf32> to vector<64x64xf32>
    %624 = arith.addf %621, %623 : vector<64x64xf32>
    %cst_191 = arith.constant 0.000000e+00 : f32
    %625 = vector.broadcast %cst_191 : f32 to vector<64x64xf32>
    %626 = arith.cmpf oge, %624, %625 : vector<64x64xf32>
    %cst_192 = arith.constant 0.00999999977 : f32
    %627 = vector.broadcast %cst_192 : f32 to vector<64x64xf32>
    %628 = arith.mulf %627, %624 : vector<64x64xf32>
    %629 = arith.select %626, %624, %628 : vector<64x64xi1>, vector<64x64xf32>
    %c0_193 = arith.constant 0 : index
    %c0_194 = arith.constant 0 : index
    %630 = vector.load %arg18[%c0_193, %c0_194] : memref<64x32xf32, #tpu.memory_space<vmem>>, vector<64x32xf32>
    %cst_195 = arith.constant dense<0.000000e+00> : vector<64x32xf32>
    %631 = tpu.matmul %629, %630, %cst_195 {dimension_numbers = #tpu.dot_dimension_numbers<[1], [0], [0], [1], [0, 0, 1, 1], [], []>} : vector<64x64xf32>, vector<64x32xf32>, vector<64x32xf32> -> vector<64x32xf32>
    %c0_196 = arith.constant 0 : index
    %c0_197 = arith.constant 0 : index
    %632 = vector.load %arg19[%c0_196, %c0_197] : memref<1x32xf32, #tpu.memory_space<vmem>>, vector<1x32xf32>
    %633 = vector.broadcast %632 : vector<1x32xf32> to vector<64x32xf32>
    %634 = arith.addf %631, %633 : vector<64x32xf32>
    %c0_198 = arith.constant 0 : index
    %c0_199 = arith.constant 0 : index
    %635 = vector.load %arg20[%c0_198, %c0_199] : memref<64x32xf32, #tpu.memory_space<vmem>>, vector<64x32xf32>
    %cst_200 = arith.constant dense<0.000000e+00> : vector<64x32xf32>
    %636 = tpu.matmul %629, %635, %cst_200 {dimension_numbers = #tpu.dot_dimension_numbers<[1], [0], [0], [1], [0, 0, 1, 1], [], []>} : vector<64x64xf32>, vector<64x32xf32>, vector<64x32xf32> -> vector<64x32xf32>
    %c0_201 = arith.constant 0 : index
    %c0_202 = arith.constant 0 : index
    %637 = vector.load %arg21[%c0_201, %c0_202] : memref<1x32xf32, #tpu.memory_space<vmem>>, vector<1x32xf32>
    %638 = vector.broadcast %637 : vector<1x32xf32> to vector<64x32xf32>
    %639 = arith.addf %636, %638 : vector<64x32xf32>
    %cst_203 = arith.constant 5.000000e-01 : f32
    %640 = vector.broadcast %cst_203 : f32 to vector<64x32xf32>
    %641 = arith.mulf %640, %639 : vector<64x32xf32>
    %642 = math.exp %641 : vector<64x32xf32>
    %c0_204 = arith.constant 0 : index
    %c0_205 = arith.constant 0 : index
    %643 = vector.load %arg1[%c0_204, %c0_205] : memref<64x32xf32, #tpu.memory_space<vmem>>, vector<64x32xf32>
    %644 = arith.mulf %642, %643 : vector<64x32xf32>
    %645 = arith.addf %634, %644 : vector<64x32xf32>
    %c0_206 = arith.constant 0 : index
    %c0_207 = arith.constant 0 : index
    %646 = vector.load %arg22[%c0_206, %c0_207] : memref<32x64xf32, #tpu.memory_space<vmem>>, vector<32x64xf32>
    %cst_208 = arith.constant dense<0.000000e+00> : vector<64x64xf32>
    %647 = tpu.matmul %645, %646, %cst_208 {dimension_numbers = #tpu.dot_dimension_numbers<[1], [0], [0], [1], [0, 0, 1, 1], [], []>} : vector<64x32xf32>, vector<32x64xf32>, vector<64x64xf32> -> vector<64x64xf32>
    %c0_209 = arith.constant 0 : index
    %c0_210 = arith.constant 0 : index
    %648 = vector.load %arg23[%c0_209, %c0_210] : memref<1x64xf32, #tpu.memory_space<vmem>>, vector<1x64xf32>
    %649 = vector.broadcast %648 : vector<1x64xf32> to vector<64x64xf32>
    %650 = arith.addf %647, %649 : vector<64x64xf32>
    %cst_211 = arith.constant 0.000000e+00 : f32
    %651 = vector.broadcast %cst_211 : f32 to vector<64x64xf32>
    %652 = arith.cmpf oge, %650, %651 : vector<64x64xf32>
    %cst_212 = arith.constant 0.00999999977 : f32
    %653 = vector.broadcast %cst_212 : f32 to vector<64x64xf32>
    %654 = arith.mulf %653, %650 : vector<64x64xf32>
    %655 = arith.select %652, %650, %654 : vector<64x64xi1>, vector<64x64xf32>
    %c0_213 = arith.constant 0 : index
    %c0_214 = arith.constant 0 : index
    %656 = vector.load %arg24[%c0_213, %c0_214] : memref<64x128xf32, #tpu.memory_space<vmem>>, vector<64x128xf32>
    %cst_215 = arith.constant dense<0.000000e+00> : vector<64x128xf32>
    %657 = tpu.matmul %655, %656, %cst_215 {dimension_numbers = #tpu.dot_dimension_numbers<[1], [0], [0], [1], [0, 0, 1, 1], [], []>} : vector<64x64xf32>, vector<64x128xf32>, vector<64x128xf32> -> vector<64x128xf32>
    %c0_216 = arith.constant 0 : index
    %c0_217 = arith.constant 0 : index
    %658 = vector.load %arg25[%c0_216, %c0_217] : memref<1x128xf32, #tpu.memory_space<vmem>>, vector<1x128xf32>
    %659 = vector.broadcast %658 : vector<1x128xf32> to vector<64x128xf32>
    %660 = arith.addf %657, %659 : vector<64x128xf32>
    %cst_218 = arith.constant 0.000000e+00 : f32
    %661 = vector.broadcast %cst_218 : f32 to vector<64x128xf32>
    %662 = arith.cmpf oge, %660, %661 : vector<64x128xf32>
    %cst_219 = arith.constant 0.00999999977 : f32
    %663 = vector.broadcast %cst_219 : f32 to vector<64x128xf32>
    %664 = arith.mulf %663, %660 : vector<64x128xf32>
    %665 = arith.select %662, %660, %664 : vector<64x128xi1>, vector<64x128xf32>
    %c0_220 = arith.constant 0 : index
    %c0_221 = arith.constant 0 : index
    %666 = vector.load %arg26[%c0_220, %c0_221] : memref<128x32xf32, #tpu.memory_space<vmem>>, vector<128x32xf32>
    %cst_222 = arith.constant dense<0.000000e+00> : vector<64x32xf32>
    %667 = tpu.matmul %665, %666, %cst_222 {dimension_numbers = #tpu.dot_dimension_numbers<[1], [0], [0], [1], [0, 0, 1, 1], [], []>} : vector<64x128xf32>, vector<128x32xf32>, vector<64x32xf32> -> vector<64x32xf32>
    %c0_223 = arith.constant 0 : index
    %c0_224 = arith.constant 0 : index
    %668 = vector.load %arg27[%c0_223, %c0_224] : memref<1x32xf32, #tpu.memory_space<vmem>>, vector<1x32xf32>
    %669 = vector.broadcast %668 : vector<1x32xf32> to vector<64x32xf32>
    %670 = arith.addf %667, %669 : vector<64x32xf32>
    %cst_225 = arith.constant 0.000000e+00 : f32
    %671 = vector.broadcast %cst_225 : f32 to vector<64x32xf32>
    %672 = arith.cmpf oge, %670, %671 : vector<64x32xf32>
    %cst_226 = arith.constant 0.00999999977 : f32
    %673 = vector.broadcast %cst_226 : f32 to vector<64x32xf32>
    %674 = arith.mulf %673, %670 : vector<64x32xf32>
    %675 = arith.select %672, %670, %674 : vector<64x32xi1>, vector<64x32xf32>
    %c0_227 = arith.constant 0 : index
    %c0_228 = arith.constant 0 : index
    %676 = vector.load %arg44[%c0_227, %c0_228] : memref<64x32xf32, #tpu.memory_space<vmem>>, vector<64x32xf32>
    tpu.vector_store %arg44[%c0_227, %c0_228], %634 {strides = array<i32>} : memref<64x32xf32, #tpu.memory_space<vmem>>, vector<64x32xf32>,
    %c0_229 = arith.constant 0 : index
    %c0_230 = arith.constant 0 : index
    %677 = vector.load %arg45[%c0_229, %c0_230] : memref<64x32xf32, #tpu.memory_space<vmem>>, vector<64x32xf32>
    tpu.vector_store %arg45[%c0_229, %c0_230], %639 {strides = array<i32>} : memref<64x32xf32, #tpu.memory_space<vmem>>, vector<64x32xf32>,
    %c0_231 = arith.constant 0 : index
    %c0_232 = arith.constant 0 : index
    %678 = vector.load %arg43[%c0_231, %c0_232] : memref<64x32xf32, #tpu.memory_space<vmem>>, vector<64x32xf32>
    tpu.vector_store %arg43[%c0_231, %c0_232], %645 {strides = array<i32>} : memref<64x32xf32, #tpu.memory_space<vmem>>, vector<64x32xf32>,
    %c0_233 = arith.constant 0 : index
    %c0_234 = arith.constant 0 : index
    %679 = vector.load %arg28[%c0_233, %c0_234] : memref<32x128xf32, #tpu.memory_space<vmem>>, vector<32x128xf32>
    %cst_235 = arith.constant dense<0.000000e+00> : vector<64x128xf32>
    %680 = tpu.matmul %675, %679, %cst_235 {dimension_numbers = #tpu.dot_dimension_numbers<[1], [0], [0], [1], [0, 0, 1, 1], [], []>} : vector<64x32xf32>, vector<32x128xf32>, vector<64x128xf32> -> vector<64x128xf32>
    %c0_236 = arith.constant 0 : index
    %c0_237 = arith.constant 0 : index
    %681 = vector.load %arg31[%c0_236, %c0_237] : memref<1x128xf32, #tpu.memory_space<vmem>>, vector<1x128xf32>
    %682 = vector.broadcast %681 : vector<1x128xf32> to vector<64x128xf32>
    %683 = arith.addf %680, %682 : vector<64x128xf32>
    %c0_238 = arith.constant 0 : index
    %c0_239 = arith.constant 0 : index
    %684 = vector.load %arg29[%c0_238, %c0_239] : memref<32x128xf32, #tpu.memory_space<vmem>>, vector<32x128xf32>
    %cst_240 = arith.constant dense<0.000000e+00> : vector<64x128xf32>
    %685 = tpu.matmul %675, %684, %cst_240 {dimension_numbers = #tpu.dot_dimension_numbers<[1], [0], [0], [1], [0, 0, 1, 1], [], []>} : vector<64x32xf32>, vector<32x128xf32>, vector<64x128xf32> -> vector<64x128xf32>
    %c0_241 = arith.constant 0 : index
    %c0_242 = arith.constant 0 : index
    %686 = vector.load %arg30[%c0_241, %c0_242] : memref<32x128xf32, #tpu.memory_space<vmem>>, vector<32x128xf32>
    %cst_243 = arith.constant 0.000000e+00 : f32
    %687 = vector.broadcast %cst_243 : f32 to vector<8x32xf32>
    %cst_244 = arith.constant 0.000000e+00 : f32
    %688 = vector.broadcast %cst_244 : f32 to vector<8x32xf32>
    %cst_245 = arith.constant dense<0.000000e+00> : vector<8x128xf32>
    %689 = tpu.matmul %687, %686, %cst_245 {dimension_numbers = #tpu.dot_dimension_numbers<[1], [0], [0], [1], [0, 0, 1, 1], [], []>} : vector<8x32xf32>, vector<32x128xf32>, vector<8x128xf32> -> vector<8x128xf32>
    %690 = vector.extract_strided_slice %683 {offsets = [0, 0], sizes = [8, 128], strides = [1, 1]} : vector<64x128xf32> to vector<8x128xf32>
    %691 = arith.addf %689, %690 : vector<8x128xf32>
    %692 = vector.extract_strided_slice %685 {offsets = [56, 0], sizes = [8, 128], strides = [1, 1]} : vector<64x128xf32> to vector<8x128xf32>
    %693 = arith.addf %691, %692 : vector<8x128xf32>
    %694 = arith.negf %693 : vector<8x128xf32>
    %695 = math.exp %694 : vector<8x128xf32>
    %cst_246 = arith.constant 1.000000e+00 : f32
    %696 = vector.broadcast %cst_246 : f32 to vector<8x128xf32>
    %697 = arith.addf %696, %695 : vector<8x128xf32>
    %698 = arith.divf %696, %697 : vector<8x128xf32>
    %699 = vector.extract_strided_slice %698 {offsets = [0, 0], sizes = [8, 32], strides = [1, 1]} : vector<8x128xf32> to vector<8x32xf32>
    %700 = vector.extract_strided_slice %698 {offsets = [0, 32], sizes = [8, 32], strides = [1, 1]} : vector<8x128xf32> to vector<8x32xf32>
    %701 = vector.extract_strided_slice %693 {offsets = [0, 64], sizes = [8, 32], strides = [1, 1]} : vector<8x128xf32> to vector<8x32xf32>
    %702 = math.tanh %701 : vector<8x32xf32>
    %703 = vector.extract_strided_slice %698 {offsets = [0, 96], sizes = [8, 32], strides = [1, 1]} : vector<8x128xf32> to vector<8x32xf32>
    %704 = arith.mulf %700, %688 : vector<8x32xf32>
    %705 = arith.mulf %699, %702 : vector<8x32xf32>
    %706 = arith.addf %704, %705 : vector<8x32xf32>
    %707 = math.tanh %706 : vector<8x32xf32>
    %708 = arith.mulf %703, %707 : vector<8x32xf32>
    %709 = vector.extract_strided_slice %708 {offsets = [0, 0], sizes = [8, 16], strides = [1, 1]} : vector<8x32xf32> to vector<8x16xf32>
    %c0_247 = arith.constant 0 : index
    %c0_248 = arith.constant 0 : index
    %710 = vector.load %arg47[%c0_247, %c0_248] : memref<64x64xf32, #tpu.memory_space<vmem>>, vector<8x16xf32>
    tpu.vector_store %arg47[%c0_247, %c0_248], %709 {strides = array<i32>} : memref<64x64xf32, #tpu.memory_space<vmem>>, vector<8x16xf32>,
    %711 = vector.extract_strided_slice %708 {offsets = [0, 16], sizes = [8, 16], strides = [1, 1]} : vector<8x32xf32> to vector<8x16xf32>
    %c56_249 = arith.constant 56 : index
    %c16_250 = arith.constant 16 : index
    %712 = vector.load %arg47[%c56_249, %c16_250] : memref<64x64xf32, #tpu.memory_space<vmem>>, vector<8x16xf32>
    tpu.vector_store %arg47[%c56_249, %c16_250], %711 {strides = array<i32>} : memref<64x64xf32, #tpu.memory_space<vmem>>, vector<8x16xf32>,
    %cst_251 = arith.constant dense<0.000000e+00> : vector<8x128xf32>
    %713 = tpu.matmul %708, %686, %cst_251 {dimension_numbers = #tpu.dot_dimension_numbers<[1], [0], [0], [1], [0, 0, 1, 1], [], []>} : vector<8x32xf32>, vector<32x128xf32>, vector<8x128xf32> -> vector<8x128xf32>
    %714 = vector.extract_strided_slice %683 {offsets = [8, 0], sizes = [8, 128], strides = [1, 1]} : vector<64x128xf32> to vector<8x128xf32>
    %715 = arith.addf %713, %714 : vector<8x128xf32>
    %716 = vector.extract_strided_slice %685 {offsets = [48, 0], sizes = [8, 128], strides = [1, 1]} : vector<64x128xf32> to vector<8x128xf32>
    %717 = arith.addf %715, %716 : vector<8x128xf32>
    %718 = arith.negf %717 : vector<8x128xf32>
    %719 = math.exp %718 : vector<8x128xf32>
    %cst_252 = arith.constant 1.000000e+00 : f32
    %720 = vector.broadcast %cst_252 : f32 to vector<8x128xf32>
    %721 = arith.addf %720, %719 : vector<8x128xf32>
    %722 = arith.divf %720, %721 : vector<8x128xf32>
    %723 = vector.extract_strided_slice %722 {offsets = [0, 0], sizes = [8, 32], strides = [1, 1]} : vector<8x128xf32> to vector<8x32xf32>
    %724 = vector.extract_strided_slice %722 {offsets = [0, 32], sizes = [8, 32], strides = [1, 1]} : vector<8x128xf32> to vector<8x32xf32>
    %725 = vector.extract_strided_slice %717 {offsets = [0, 64], sizes = [8, 32], strides = [1, 1]} : vector<8x128xf32> to vector<8x32xf32>
    %726 = math.tanh %725 : vector<8x32xf32>
    %727 = vector.extract_strided_slice %722 {offsets = [0, 96], sizes = [8, 32], strides = [1, 1]} : vector<8x128xf32> to vector<8x32xf32>
    %728 = arith.mulf %724, %706 : vector<8x32xf32>
    %729 = arith.mulf %723, %726 : vector<8x32xf32>
    %730 = arith.addf %728, %729 : vector<8x32xf32>
    %731 = math.tanh %730 : vector<8x32xf32>
    %732 = arith.mulf %727, %731 : vector<8x32xf32>
    %733 = vector.extract_strided_slice %732 {offsets = [0, 0], sizes = [8, 16], strides = [1, 1]} : vector<8x32xf32> to vector<8x16xf32>
    %c8_253 = arith.constant 8 : index
    %c0_254 = arith.constant 0 : index
    %734 = vector.load %arg47[%c8_253, %c0_254] : memref<64x64xf32, #tpu.memory_space<vmem>>, vector<8x16xf32>
    tpu.vector_store %arg47[%c8_253, %c0_254], %733 {strides = array<i32>} : memref<64x64xf32, #tpu.memory_space<vmem>>, vector<8x16xf32>,
    %735 = vector.extract_strided_slice %732 {offsets = [0, 16], sizes = [8, 16], strides = [1, 1]} : vector<8x32xf32> to vector<8x16xf32>
    %c48_255 = arith.constant 48 : index
    %c16_256 = arith.constant 16 : index
    %736 = vector.load %arg47[%c48_255, %c16_256] : memref<64x64xf32, #tpu.memory_space<vmem>>, vector<8x16xf32>
    tpu.vector_store %arg47[%c48_255, %c16_256], %735 {strides = array<i32>} : memref<64x64xf32, #tpu.memory_space<vmem>>, vector<8x16xf32>,
    %cst_257 = arith.constant dense<0.000000e+00> : vector<8x128xf32>
    %737 = tpu.matmul %732, %686, %cst_257 {dimension_numbers = #tpu.dot_dimension_numbers<[1], [0], [0], [1], [0, 0, 1, 1], [], []>} : vector<8x32xf32>, vector<32x128xf32>, vector<8x128xf32> -> vector<8x128xf32>
    %738 = vector.extract_strided_slice %683 {offsets = [16, 0], sizes = [8, 128], strides = [1, 1]} : vector<64x128xf32> to vector<8x128xf32>
    %739 = arith.addf %737, %738 : vector<8x128xf32>
    %740 = vector.extract_strided_slice %685 {offsets = [40, 0], sizes = [8, 128], strides = [1, 1]} : vector<64x128xf32> to vector<8x128xf32>
    %741 = arith.addf %739, %740 : vector<8x128xf32>
    %742 = arith.negf %741 : vector<8x128xf32>
    %743 = math.exp %742 : vector<8x128xf32>
    %cst_258 = arith.constant 1.000000e+00 : f32
    %744 = vector.broadcast %cst_258 : f32 to vector<8x128xf32>
    %745 = arith.addf %744, %743 : vector<8x128xf32>
    %746 = arith.divf %744, %745 : vector<8x128xf32>
    %747 = vector.extract_strided_slice %746 {offsets = [0, 0], sizes = [8, 32], strides = [1, 1]} : vector<8x128xf32> to vector<8x32xf32>
    %748 = vector.extract_strided_slice %746 {offsets = [0, 32], sizes = [8, 32], strides = [1, 1]} : vector<8x128xf32> to vector<8x32xf32>
    %749 = vector.extract_strided_slice %741 {offsets = [0, 64], sizes = [8, 32], strides = [1, 1]} : vector<8x128xf32> to vector<8x32xf32>
    %750 = math.tanh %749 : vector<8x32xf32>
    %751 = vector.extract_strided_slice %746 {offsets = [0, 96], sizes = [8, 32], strides = [1, 1]} : vector<8x128xf32> to vector<8x32xf32>
    %752 = arith.mulf %748, %730 : vector<8x32xf32>
    %753 = arith.mulf %747, %750 : vector<8x32xf32>
    %754 = arith.addf %752, %753 : vector<8x32xf32>
    %755 = math.tanh %754 : vector<8x32xf32>
    %756 = arith.mulf %751, %755 : vector<8x32xf32>
    %757 = vector.extract_strided_slice %756 {offsets = [0, 0], sizes = [8, 16], strides = [1, 1]} : vector<8x32xf32> to vector<8x16xf32>
    %c16_259 = arith.constant 16 : index
    %c0_260 = arith.constant 0 : index
    %758 = vector.load %arg47[%c16_259, %c0_260] : memref<64x64xf32, #tpu.memory_space<vmem>>, vector<8x16xf32>
    tpu.vector_store %arg47[%c16_259, %c0_260], %757 {strides = array<i32>} : memref<64x64xf32, #tpu.memory_space<vmem>>, vector<8x16xf32>,
    %759 = vector.extract_strided_slice %756 {offsets = [0, 16], sizes = [8, 16], strides = [1, 1]} : vector<8x32xf32> to vector<8x16xf32>
    %c40_261 = arith.constant 40 : index
    %c16_262 = arith.constant 16 : index
    %760 = vector.load %arg47[%c40_261, %c16_262] : memref<64x64xf32, #tpu.memory_space<vmem>>, vector<8x16xf32>
    tpu.vector_store %arg47[%c40_261, %c16_262], %759 {strides = array<i32>} : memref<64x64xf32, #tpu.memory_space<vmem>>, vector<8x16xf32>,
    %cst_263 = arith.constant dense<0.000000e+00> : vector<8x128xf32>
    %761 = tpu.matmul %756, %686, %cst_263 {dimension_numbers = #tpu.dot_dimension_numbers<[1], [0], [0], [1], [0, 0, 1, 1], [], []>} : vector<8x32xf32>, vector<32x128xf32>, vector<8x128xf32> -> vector<8x128xf32>
    %762 = vector.extract_strided_slice %683 {offsets = [24, 0], sizes = [8, 128], strides = [1, 1]} : vector<64x128xf32> to vector<8x128xf32>
    %763 = arith.addf %761, %762 : vector<8x128xf32>
    %764 = vector.extract_strided_slice %685 {offsets = [32, 0], sizes = [8, 128], strides = [1, 1]} : vector<64x128xf32> to vector<8x128xf32>
    %765 = arith.addf %763, %764 : vector<8x128xf32>
    %766 = arith.negf %765 : vector<8x128xf32>
    %767 = math.exp %766 : vector<8x128xf32>
    %cst_264 = arith.constant 1.000000e+00 : f32
    %768 = vector.broadcast %cst_264 : f32 to vector<8x128xf32>
    %769 = arith.addf %768, %767 : vector<8x128xf32>
    %770 = arith.divf %768, %769 : vector<8x128xf32>
    %771 = vector.extract_strided_slice %770 {offsets = [0, 0], sizes = [8, 32], strides = [1, 1]} : vector<8x128xf32> to vector<8x32xf32>
    %772 = vector.extract_strided_slice %770 {offsets = [0, 32], sizes = [8, 32], strides = [1, 1]} : vector<8x128xf32> to vector<8x32xf32>
    %773 = vector.extract_strided_slice %765 {offsets = [0, 64], sizes = [8, 32], strides = [1, 1]} : vector<8x128xf32> to vector<8x32xf32>
    %774 = math.tanh %773 : vector<8x32xf32>
    %775 = vector.extract_strided_slice %770 {offsets = [0, 96], sizes = [8, 32], strides = [1, 1]} : vector<8x128xf32> to vector<8x32xf32>
    %776 = arith.mulf %772, %754 : vector<8x32xf32>
    %777 = arith.mulf %771, %774 : vector<8x32xf32>
    %778 = arith.addf %776, %777 : vector<8x32xf32>
    %779 = math.tanh %778 : vector<8x32xf32>
    %780 = arith.mulf %775, %779 : vector<8x32xf32>
    %781 = vector.extract_strided_slice %780 {offsets = [0, 0], sizes = [8, 16], strides = [1, 1]} : vector<8x32xf32> to vector<8x16xf32>
    %c24_265 = arith.constant 24 : index
    %c0_266 = arith.constant 0 : index
    %782 = vector.load %arg47[%c24_265, %c0_266] : memref<64x64xf32, #tpu.memory_space<vmem>>, vector<8x16xf32>
    tpu.vector_store %arg47[%c24_265, %c0_266], %781 {strides = array<i32>} : memref<64x64xf32, #tpu.memory_space<vmem>>, vector<8x16xf32>,
    %783 = vector.extract_strided_slice %780 {offsets = [0, 16], sizes = [8, 16], strides = [1, 1]} : vector<8x32xf32> to vector<8x16xf32>
    %c32_267 = arith.constant 32 : index
    %c16_268 = arith.constant 16 : index
    %784 = vector.load %arg47[%c32_267, %c16_268] : memref<64x64xf32, #tpu.memory_space<vmem>>, vector<8x16xf32>
    tpu.vector_store %arg47[%c32_267, %c16_268], %783 {strides = array<i32>} : memref<64x64xf32, #tpu.memory_space<vmem>>, vector<8x16xf32>,
    %cst_269 = arith.constant dense<0.000000e+00> : vector<8x128xf32>
    %785 = tpu.matmul %780, %686, %cst_269 {dimension_numbers = #tpu.dot_dimension_numbers<[1], [0], [0], [1], [0, 0, 1, 1], [], []>} : vector<8x32xf32>, vector<32x128xf32>, vector<8x128xf32> -> vector<8x128xf32>
    %786 = vector.extract_strided_slice %683 {offsets = [32, 0], sizes = [8, 128], strides = [1, 1]} : vector<64x128xf32> to vector<8x128xf32>
    %787 = arith.addf %785, %786 : vector<8x128xf32>
    %788 = vector.extract_strided_slice %685 {offsets = [24, 0], sizes = [8, 128], strides = [1, 1]} : vector<64x128xf32> to vector<8x128xf32>
    %789 = arith.addf %787, %788 : vector<8x128xf32>
    %790 = arith.negf %789 : vector<8x128xf32>
    %791 = math.exp %790 : vector<8x128xf32>
    %cst_270 = arith.constant 1.000000e+00 : f32
    %792 = vector.broadcast %cst_270 : f32 to vector<8x128xf32>
    %793 = arith.addf %792, %791 : vector<8x128xf32>
    %794 = arith.divf %792, %793 : vector<8x128xf32>
    %795 = vector.extract_strided_slice %794 {offsets = [0, 0], sizes = [8, 32], strides = [1, 1]} : vector<8x128xf32> to vector<8x32xf32>
    %796 = vector.extract_strided_slice %794 {offsets = [0, 32], sizes = [8, 32], strides = [1, 1]} : vector<8x128xf32> to vector<8x32xf32>
    %797 = vector.extract_strided_slice %789 {offsets = [0, 64], sizes = [8, 32], strides = [1, 1]} : vector<8x128xf32> to vector<8x32xf32>
    %798 = math.tanh %797 : vector<8x32xf32>
    %799 = vector.extract_strided_slice %794 {offsets = [0, 96], sizes = [8, 32], strides = [1, 1]} : vector<8x128xf32> to vector<8x32xf32>
    %800 = arith.mulf %796, %778 : vector<8x32xf32>
    %801 = arith.mulf %795, %798 : vector<8x32xf32>
    %802 = arith.addf %800, %801 : vector<8x32xf32>
    %803 = math.tanh %802 : vector<8x32xf32>
    %804 = arith.mulf %799, %803 : vector<8x32xf32>
    %805 = vector.extract_strided_slice %804 {offsets = [0, 0], sizes = [8, 16], strides = [1, 1]} : vector<8x32xf32> to vector<8x16xf32>
    %c32_271 = arith.constant 32 : index
    %c0_272 = arith.constant 0 : index
    %806 = vector.load %arg47[%c32_271, %c0_272] : memref<64x64xf32, #tpu.memory_space<vmem>>, vector<8x16xf32>
    tpu.vector_store %arg47[%c32_271, %c0_272], %805 {strides = array<i32>} : memref<64x64xf32, #tpu.memory_space<vmem>>, vector<8x16xf32>,
    %807 = vector.extract_strided_slice %804 {offsets = [0, 16], sizes = [8, 16], strides = [1, 1]} : vector<8x32xf32> to vector<8x16xf32>
    %c24_273 = arith.constant 24 : index
    %c16_274 = arith.constant 16 : index
    %808 = vector.load %arg47[%c24_273, %c16_274] : memref<64x64xf32, #tpu.memory_space<vmem>>, vector<8x16xf32>
    tpu.vector_store %arg47[%c24_273, %c16_274], %807 {strides = array<i32>} : memref<64x64xf32, #tpu.memory_space<vmem>>, vector<8x16xf32>,
    %cst_275 = arith.constant dense<0.000000e+00> : vector<8x128xf32>
    %809 = tpu.matmul %804, %686, %cst_275 {dimension_numbers = #tpu.dot_dimension_numbers<[1], [0], [0], [1], [0, 0, 1, 1], [], []>} : vector<8x32xf32>, vector<32x128xf32>, vector<8x128xf32> -> vector<8x128xf32>
    %810 = vector.extract_strided_slice %683 {offsets = [40, 0], sizes = [8, 128], strides = [1, 1]} : vector<64x128xf32> to vector<8x128xf32>
    %811 = arith.addf %809, %810 : vector<8x128xf32>
    %812 = vector.extract_strided_slice %685 {offsets = [16, 0], sizes = [8, 128], strides = [1, 1]} : vector<64x128xf32> to vector<8x128xf32>
    %813 = arith.addf %811, %812 : vector<8x128xf32>
    %814 = arith.negf %813 : vector<8x128xf32>
    %815 = math.exp %814 : vector<8x128xf32>
    %cst_276 = arith.constant 1.000000e+00 : f32
    %816 = vector.broadcast %cst_276 : f32 to vector<8x128xf32>
    %817 = arith.addf %816, %815 : vector<8x128xf32>
    %818 = arith.divf %816, %817 : vector<8x128xf32>
    %819 = vector.extract_strided_slice %818 {offsets = [0, 0], sizes = [8, 32], strides = [1, 1]} : vector<8x128xf32> to vector<8x32xf32>
    %820 = vector.extract_strided_slice %818 {offsets = [0, 32], sizes = [8, 32], strides = [1, 1]} : vector<8x128xf32> to vector<8x32xf32>
    %821 = vector.extract_strided_slice %813 {offsets = [0, 64], sizes = [8, 32], strides = [1, 1]} : vector<8x128xf32> to vector<8x32xf32>
    %822 = math.tanh %821 : vector<8x32xf32>
    %823 = vector.extract_strided_slice %818 {offsets = [0, 96], sizes = [8, 32], strides = [1, 1]} : vector<8x128xf32> to vector<8x32xf32>
    %824 = arith.mulf %820, %802 : vector<8x32xf32>
    %825 = arith.mulf %819, %822 : vector<8x32xf32>
    %826 = arith.addf %824, %825 : vector<8x32xf32>
    %827 = math.tanh %826 : vector<8x32xf32>
    %828 = arith.mulf %823, %827 : vector<8x32xf32>
    %829 = vector.extract_strided_slice %828 {offsets = [0, 0], sizes = [8, 16], strides = [1, 1]} : vector<8x32xf32> to vector<8x16xf32>
    %c40_277 = arith.constant 40 : index
    %c0_278 = arith.constant 0 : index
    %830 = vector.load %arg47[%c40_277, %c0_278] : memref<64x64xf32, #tpu.memory_space<vmem>>, vector<8x16xf32>
    tpu.vector_store %arg47[%c40_277, %c0_278], %829 {strides = array<i32>} : memref<64x64xf32, #tpu.memory_space<vmem>>, vector<8x16xf32>,
    %831 = vector.extract_strided_slice %828 {offsets = [0, 16], sizes = [8, 16], strides = [1, 1]} : vector<8x32xf32> to vector<8x16xf32>
    %c16_279 = arith.constant 16 : index
    %c16_280 = arith.constant 16 : index
    %832 = vector.load %arg47[%c16_279, %c16_280] : memref<64x64xf32, #tpu.memory_space<vmem>>, vector<8x16xf32>
    tpu.vector_store %arg47[%c16_279, %c16_280], %831 {strides = array<i32>} : memref<64x64xf32, #tpu.memory_space<vmem>>, vector<8x16xf32>,
    %cst_281 = arith.constant dense<0.000000e+00> : vector<8x128xf32>
    %833 = tpu.matmul %828, %686, %cst_281 {dimension_numbers = #tpu.dot_dimension_numbers<[1], [0], [0], [1], [0, 0, 1, 1], [], []>} : vector<8x32xf32>, vector<32x128xf32>, vector<8x128xf32> -> vector<8x128xf32>
    %834 = vector.extract_strided_slice %683 {offsets = [48, 0], sizes = [8, 128], strides = [1, 1]} : vector<64x128xf32> to vector<8x128xf32>
    %835 = arith.addf %833, %834 : vector<8x128xf32>
    %836 = vector.extract_strided_slice %685 {offsets = [8, 0], sizes = [8, 128], strides = [1, 1]} : vector<64x128xf32> to vector<8x128xf32>
    %837 = arith.addf %835, %836 : vector<8x128xf32>
    %838 = arith.negf %837 : vector<8x128xf32>
    %839 = math.exp %838 : vector<8x128xf32>
    %cst_282 = arith.constant 1.000000e+00 : f32
    %840 = vector.broadcast %cst_282 : f32 to vector<8x128xf32>
    %841 = arith.addf %840, %839 : vector<8x128xf32>
    %842 = arith.divf %840, %841 : vector<8x128xf32>
    %843 = vector.extract_strided_slice %842 {offsets = [0, 0], sizes = [8, 32], strides = [1, 1]} : vector<8x128xf32> to vector<8x32xf32>
    %844 = vector.extract_strided_slice %842 {offsets = [0, 32], sizes = [8, 32], strides = [1, 1]} : vector<8x128xf32> to vector<8x32xf32>
    %845 = vector.extract_strided_slice %837 {offsets = [0, 64], sizes = [8, 32], strides = [1, 1]} : vector<8x128xf32> to vector<8x32xf32>
    %846 = math.tanh %845 : vector<8x32xf32>
    %847 = vector.extract_strided_slice %842 {offsets = [0, 96], sizes = [8, 32], strides = [1, 1]} : vector<8x128xf32> to vector<8x32xf32>
    %848 = arith.mulf %844, %826 : vector<8x32xf32>
    %849 = arith.mulf %843, %846 : vector<8x32xf32>
    %850 = arith.addf %848, %849 : vector<8x32xf32>
    %851 = math.tanh %850 : vector<8x32xf32>
    %852 = arith.mulf %847, %851 : vector<8x32xf32>
    %853 = vector.extract_strided_slice %852 {offsets = [0, 0], sizes = [8, 16], strides = [1, 1]} : vector<8x32xf32> to vector<8x16xf32>
    %c48_283 = arith.constant 48 : index
    %c0_284 = arith.constant 0 : index
    %854 = vector.load %arg47[%c48_283, %c0_284] : memref<64x64xf32, #tpu.memory_space<vmem>>, vector<8x16xf32>
    tpu.vector_store %arg47[%c48_283, %c0_284], %853 {strides = array<i32>} : memref<64x64xf32, #tpu.memory_space<vmem>>, vector<8x16xf32>,
    %855 = vector.extract_strided_slice %852 {offsets = [0, 16], sizes = [8, 16], strides = [1, 1]} : vector<8x32xf32> to vector<8x16xf32>
    %c8_285 = arith.constant 8 : index
    %c16_286 = arith.constant 16 : index
    %856 = vector.load %arg47[%c8_285, %c16_286] : memref<64x64xf32, #tpu.memory_space<vmem>>, vector<8x16xf32>
    tpu.vector_store %arg47[%c8_285, %c16_286], %855 {strides = array<i32>} : memref<64x64xf32, #tpu.memory_space<vmem>>, vector<8x16xf32>,
    %cst_287 = arith.constant dense<0.000000e+00> : vector<8x128xf32>
    %857 = tpu.matmul %852, %686, %cst_287 {dimension_numbers = #tpu.dot_dimension_numbers<[1], [0], [0], [1], [0, 0, 1, 1], [], []>} : vector<8x32xf32>, vector<32x128xf32>, vector<8x128xf32> -> vector<8x128xf32>
    %858 = vector.extract_strided_slice %683 {offsets = [56, 0], sizes = [8, 128], strides = [1, 1]} : vector<64x128xf32> to vector<8x128xf32>
    %859 = arith.addf %857, %858 : vector<8x128xf32>
    %860 = vector.extract_strided_slice %685 {offsets = [0, 0], sizes = [8, 128], strides = [1, 1]} : vector<64x128xf32> to vector<8x128xf32>
    %861 = arith.addf %859, %860 : vector<8x128xf32>
    %862 = arith.negf %861 : vector<8x128xf32>
    %863 = math.exp %862 : vector<8x128xf32>
    %cst_288 = arith.constant 1.000000e+00 : f32
    %864 = vector.broadcast %cst_288 : f32 to vector<8x128xf32>
    %865 = arith.addf %864, %863 : vector<8x128xf32>
    %866 = arith.divf %864, %865 : vector<8x128xf32>
    %867 = vector.extract_strided_slice %866 {offsets = [0, 0], sizes = [8, 32], strides = [1, 1]} : vector<8x128xf32> to vector<8x32xf32>
    %868 = vector.extract_strided_slice %866 {offsets = [0, 32], sizes = [8, 32], strides = [1, 1]} : vector<8x128xf32> to vector<8x32xf32>
    %869 = vector.extract_strided_slice %861 {offsets = [0, 64], sizes = [8, 32], strides = [1, 1]} : vector<8x128xf32> to vector<8x32xf32>
    %870 = math.tanh %869 : vector<8x32xf32>
    %871 = vector.extract_strided_slice %866 {offsets = [0, 96], sizes = [8, 32], strides = [1, 1]} : vector<8x128xf32> to vector<8x32xf32>
    %872 = arith.mulf %868, %850 : vector<8x32xf32>
    %873 = arith.mulf %867, %870 : vector<8x32xf32>
    %874 = arith.addf %872, %873 : vector<8x32xf32>
    %875 = math.tanh %874 : vector<8x32xf32>
    %876 = arith.mulf %871, %875 : vector<8x32xf32>
    %877 = vector.extract_strided_slice %876 {offsets = [0, 0], sizes = [8, 16], strides = [1, 1]} : vector<8x32xf32> to vector<8x16xf32>
    %c56_289 = arith.constant 56 : index
    %c0_290 = arith.constant 0 : index
    %878 = vector.load %arg47[%c56_289, %c0_290] : memref<64x64xf32, #tpu.memory_space<vmem>>, vector<8x16xf32>
    tpu.vector_store %arg47[%c56_289, %c0_290], %877 {strides = array<i32>} : memref<64x64xf32, #tpu.memory_space<vmem>>, vector<8x16xf32>,
    %879 = vector.extract_strided_slice %876 {offsets = [0, 16], sizes = [8, 16], strides = [1, 1]} : vector<8x32xf32> to vector<8x16xf32>
    %c0_291 = arith.constant 0 : index
    %c16_292 = arith.constant 16 : index
    %880 = vector.load %arg47[%c0_291, %c16_292] : memref<64x64xf32, #tpu.memory_space<vmem>>, vector<8x16xf32>
    tpu.vector_store %arg47[%c0_291, %c16_292], %879 {strides = array<i32>} : memref<64x64xf32, #tpu.memory_space<vmem>>, vector<8x16xf32>,
    %c0_293 = arith.constant 0 : index
    %c0_294 = arith.constant 0 : index
    %881 = vector.load %arg47[%c0_293, %c0_294] : memref<64x64xf32, #tpu.memory_space<vmem>>, vector<64x32xf32>
    %c0_295 = arith.constant 0 : index
    %c0_296 = arith.constant 0 : index
    %882 = vector.load %arg32[%c0_295, %c0_296] : memref<32x128xf32, #tpu.memory_space<vmem>>, vector<32x128xf32>
    %cst_297 = arith.constant dense<0.000000e+00> : vector<64x128xf32>
    %883 = tpu.matmul %881, %882, %cst_297 {dimension_numbers = #tpu.dot_dimension_numbers<[1], [0], [0], [1], [0, 0, 1, 1], [], []>} : vector<64x32xf32>, vector<32x128xf32>, vector<64x128xf32> -> vector<64x128xf32>
    %c0_298 = arith.constant 0 : index
    %c0_299 = arith.constant 0 : index
    %884 = vector.load %arg35[%c0_298, %c0_299] : memref<1x128xf32, #tpu.memory_space<vmem>>, vector<1x128xf32>
    %885 = vector.broadcast %884 : vector<1x128xf32> to vector<64x128xf32>
    %886 = arith.addf %883, %885 : vector<64x128xf32>
    %c0_300 = arith.constant 0 : index
    %c0_301 = arith.constant 0 : index
    %887 = vector.load %arg33[%c0_300, %c0_301] : memref<32x128xf32, #tpu.memory_space<vmem>>, vector<32x128xf32>
    %cst_302 = arith.constant dense<0.000000e+00> : vector<64x128xf32>
    %888 = tpu.matmul %881, %887, %cst_302 {dimension_numbers = #tpu.dot_dimension_numbers<[1], [0], [0], [1], [0, 0, 1, 1], [], []>} : vector<64x32xf32>, vector<32x128xf32>, vector<64x128xf32> -> vector<64x128xf32>
    %c0_303 = arith.constant 0 : index
    %c0_304 = arith.constant 0 : index
    %889 = vector.load %arg34[%c0_303, %c0_304] : memref<32x128xf32, #tpu.memory_space<vmem>>, vector<32x128xf32>
    %cst_305 = arith.constant 0.000000e+00 : f32
    %890 = vector.broadcast %cst_305 : f32 to vector<8x32xf32>
    %cst_306 = arith.constant 0.000000e+00 : f32
    %891 = vector.broadcast %cst_306 : f32 to vector<8x32xf32>
    %cst_307 = arith.constant dense<0.000000e+00> : vector<8x128xf32>
    %892 = tpu.matmul %890, %889, %cst_307 {dimension_numbers = #tpu.dot_dimension_numbers<[1], [0], [0], [1], [0, 0, 1, 1], [], []>} : vector<8x32xf32>, vector<32x128xf32>, vector<8x128xf32> -> vector<8x128xf32>
    %893 = vector.extract_strided_slice %886 {offsets = [0, 0], sizes = [8, 128], strides = [1, 1]} : vector<64x128xf32> to vector<8x128xf32>
    %894 = arith.addf %892, %893 : vector<8x128xf32>
    %895 = vector.extract_strided_slice %888 {offsets = [56, 0], sizes = [8, 128], strides = [1, 1]} : vector<64x128xf32> to vector<8x128xf32>
    %896 = arith.addf %894, %895 : vector<8x128xf32>
    %897 = arith.negf %896 : vector<8x128xf32>
    %898 = math.exp %897 : vector<8x128xf32>
    %cst_308 = arith.constant 1.000000e+00 : f32
    %899 = vector.broadcast %cst_308 : f32 to vector<8x128xf32>
    %900 = arith.addf %899, %898 : vector<8x128xf32>
    %901 = arith.divf %899, %900 : vector<8x128xf32>
    %902 = vector.extract_strided_slice %901 {offsets = [0, 0], sizes = [8, 32], strides = [1, 1]} : vector<8x128xf32> to vector<8x32xf32>
    %903 = vector.extract_strided_slice %901 {offsets = [0, 32], sizes = [8, 32], strides = [1, 1]} : vector<8x128xf32> to vector<8x32xf32>
    %904 = vector.extract_strided_slice %896 {offsets = [0, 64], sizes = [8, 32], strides = [1, 1]} : vector<8x128xf32> to vector<8x32xf32>
    %905 = math.tanh %904 : vector<8x32xf32>
    %906 = vector.extract_strided_slice %901 {offsets = [0, 96], sizes = [8, 32], strides = [1, 1]} : vector<8x128xf32> to vector<8x32xf32>
    %907 = arith.mulf %903, %891 : vector<8x32xf32>
    %908 = arith.mulf %902, %905 : vector<8x32xf32>
    %909 = arith.addf %907, %908 : vector<8x32xf32>
    %910 = math.tanh %909 : vector<8x32xf32>
    %911 = arith.mulf %906, %910 : vector<8x32xf32>
    %912 = vector.extract_strided_slice %911 {offsets = [0, 0], sizes = [8, 16], strides = [1, 1]} : vector<8x32xf32> to vector<8x16xf32>
    %c0_309 = arith.constant 0 : index
    %c0_310 = arith.constant 0 : index
    %913 = vector.load %arg46[%c0_309, %c0_310] : memref<64x64xf32, #tpu.memory_space<vmem>>, vector<8x16xf32>
    tpu.vector_store %arg46[%c0_309, %c0_310], %912 {strides = array<i32>} : memref<64x64xf32, #tpu.memory_space<vmem>>, vector<8x16xf32>,
    %914 = vector.extract_strided_slice %911 {offsets = [0, 16], sizes = [8, 16], strides = [1, 1]} : vector<8x32xf32> to vector<8x16xf32>
    %c56_311 = arith.constant 56 : index
    %c16_312 = arith.constant 16 : index
    %915 = vector.load %arg46[%c56_311, %c16_312] : memref<64x64xf32, #tpu.memory_space<vmem>>, vector<8x16xf32>
    tpu.vector_store %arg46[%c56_311, %c16_312], %914 {strides = array<i32>} : memref<64x64xf32, #tpu.memory_space<vmem>>, vector<8x16xf32>,
    %cst_313 = arith.constant dense<0.000000e+00> : vector<8x128xf32>
    %916 = tpu.matmul %911, %889, %cst_313 {dimension_numbers = #tpu.dot_dimension_numbers<[1], [0], [0], [1], [0, 0, 1, 1], [], []>} : vector<8x32xf32>, vector<32x128xf32>, vector<8x128xf32> -> vector<8x128xf32>
    %917 = vector.extract_strided_slice %886 {offsets = [8, 0], sizes = [8, 128], strides = [1, 1]} : vector<64x128xf32> to vector<8x128xf32>
    %918 = arith.addf %916, %917 : vector<8x128xf32>
    %919 = vector.extract_strided_slice %888 {offsets = [48, 0], sizes = [8, 128], strides = [1, 1]} : vector<64x128xf32> to vector<8x128xf32>
    %920 = arith.addf %918, %919 : vector<8x128xf32>
    %921 = arith.negf %920 : vector<8x128xf32>
    %922 = math.exp %921 : vector<8x128xf32>
    %cst_314 = arith.constant 1.000000e+00 : f32
    %923 = vector.broadcast %cst_314 : f32 to vector<8x128xf32>
    %924 = arith.addf %923, %922 : vector<8x128xf32>
    %925 = arith.divf %923, %924 : vector<8x128xf32>
    %926 = vector.extract_strided_slice %925 {offsets = [0, 0], sizes = [8, 32], strides = [1, 1]} : vector<8x128xf32> to vector<8x32xf32>
    %927 = vector.extract_strided_slice %925 {offsets = [0, 32], sizes = [8, 32], strides = [1, 1]} : vector<8x128xf32> to vector<8x32xf32>
    %928 = vector.extract_strided_slice %920 {offsets = [0, 64], sizes = [8, 32], strides = [1, 1]} : vector<8x128xf32> to vector<8x32xf32>
    %929 = math.tanh %928 : vector<8x32xf32>
    %930 = vector.extract_strided_slice %925 {offsets = [0, 96], sizes = [8, 32], strides = [1, 1]} : vector<8x128xf32> to vector<8x32xf32>
    %931 = arith.mulf %927, %909 : vector<8x32xf32>
    %932 = arith.mulf %926, %929 : vector<8x32xf32>
    %933 = arith.addf %931, %932 : vector<8x32xf32>
    %934 = math.tanh %933 : vector<8x32xf32>
    %935 = arith.mulf %930, %934 : vector<8x32xf32>
    %936 = vector.extract_strided_slice %935 {offsets = [0, 0], sizes = [8, 16], strides = [1, 1]} : vector<8x32xf32> to vector<8x16xf32>
    %c8_315 = arith.constant 8 : index
    %c0_316 = arith.constant 0 : index
    %937 = vector.load %arg46[%c8_315, %c0_316] : memref<64x64xf32, #tpu.memory_space<vmem>>, vector<8x16xf32>
    tpu.vector_store %arg46[%c8_315, %c0_316], %936 {strides = array<i32>} : memref<64x64xf32, #tpu.memory_space<vmem>>, vector<8x16xf32>,
    %938 = vector.extract_strided_slice %935 {offsets = [0, 16], sizes = [8, 16], strides = [1, 1]} : vector<8x32xf32> to vector<8x16xf32>
    %c48_317 = arith.constant 48 : index
    %c16_318 = arith.constant 16 : index
    %939 = vector.load %arg46[%c48_317, %c16_318] : memref<64x64xf32, #tpu.memory_space<vmem>>, vector<8x16xf32>
    tpu.vector_store %arg46[%c48_317, %c16_318], %938 {strides = array<i32>} : memref<64x64xf32, #tpu.memory_space<vmem>>, vector<8x16xf32>,
    %cst_319 = arith.constant dense<0.000000e+00> : vector<8x128xf32>
    %940 = tpu.matmul %935, %889, %cst_319 {dimension_numbers = #tpu.dot_dimension_numbers<[1], [0], [0], [1], [0, 0, 1, 1], [], []>} : vector<8x32xf32>, vector<32x128xf32>, vector<8x128xf32> -> vector<8x128xf32>
    %941 = vector.extract_strided_slice %886 {offsets = [16, 0], sizes = [8, 128], strides = [1, 1]} : vector<64x128xf32> to vector<8x128xf32>
    %942 = arith.addf %940, %941 : vector<8x128xf32>
    %943 = vector.extract_strided_slice %888 {offsets = [40, 0], sizes = [8, 128], strides = [1, 1]} : vector<64x128xf32> to vector<8x128xf32>
    %944 = arith.addf %942, %943 : vector<8x128xf32>
    %945 = arith.negf %944 : vector<8x128xf32>
    %946 = math.exp %945 : vector<8x128xf32>
    %cst_320 = arith.constant 1.000000e+00 : f32
    %947 = vector.broadcast %cst_320 : f32 to vector<8x128xf32>
    %948 = arith.addf %947, %946 : vector<8x128xf32>
    %949 = arith.divf %947, %948 : vector<8x128xf32>
    %950 = vector.extract_strided_slice %949 {offsets = [0, 0], sizes = [8, 32], strides = [1, 1]} : vector<8x128xf32> to vector<8x32xf32>
    %951 = vector.extract_strided_slice %949 {offsets = [0, 32], sizes = [8, 32], strides = [1, 1]} : vector<8x128xf32> to vector<8x32xf32>
    %952 = vector.extract_strided_slice %944 {offsets = [0, 64], sizes = [8, 32], strides = [1, 1]} : vector<8x128xf32> to vector<8x32xf32>
    %953 = math.tanh %952 : vector<8x32xf32>
    %954 = vector.extract_strided_slice %949 {offsets = [0, 96], sizes = [8, 32], strides = [1, 1]} : vector<8x128xf32> to vector<8x32xf32>
    %955 = arith.mulf %951, %933 : vector<8x32xf32>
    %956 = arith.mulf %950, %953 : vector<8x32xf32>
    %957 = arith.addf %955, %956 : vector<8x32xf32>
    %958 = math.tanh %957 : vector<8x32xf32>
    %959 = arith.mulf %954, %958 : vector<8x32xf32>
    %960 = vector.extract_strided_slice %959 {offsets = [0, 0], sizes = [8, 16], strides = [1, 1]} : vector<8x32xf32> to vector<8x16xf32>
    %c16_321 = arith.constant 16 : index
    %c0_322 = arith.constant 0 : index
    %961 = vector.load %arg46[%c16_321, %c0_322] : memref<64x64xf32, #tpu.memory_space<vmem>>, vector<8x16xf32>
    tpu.vector_store %arg46[%c16_321, %c0_322], %960 {strides = array<i32>} : memref<64x64xf32, #tpu.memory_space<vmem>>, vector<8x16xf32>,
    %962 = vector.extract_strided_slice %959 {offsets = [0, 16], sizes = [8, 16], strides = [1, 1]} : vector<8x32xf32> to vector<8x16xf32>
    %c40_323 = arith.constant 40 : index
    %c16_324 = arith.constant 16 : index
    %963 = vector.load %arg46[%c40_323, %c16_324] : memref<64x64xf32, #tpu.memory_space<vmem>>, vector<8x16xf32>
    tpu.vector_store %arg46[%c40_323, %c16_324], %962 {strides = array<i32>} : memref<64x64xf32, #tpu.memory_space<vmem>>, vector<8x16xf32>,
    %cst_325 = arith.constant dense<0.000000e+00> : vector<8x128xf32>
    %964 = tpu.matmul %959, %889, %cst_325 {dimension_numbers = #tpu.dot_dimension_numbers<[1], [0], [0], [1], [0, 0, 1, 1], [], []>} : vector<8x32xf32>, vector<32x128xf32>, vector<8x128xf32> -> vector<8x128xf32>
    %965 = vector.extract_strided_slice %886 {offsets = [24, 0], sizes = [8, 128], strides = [1, 1]} : vector<64x128xf32> to vector<8x128xf32>
    %966 = arith.addf %964, %965 : vector<8x128xf32>
    %967 = vector.extract_strided_slice %888 {offsets = [32, 0], sizes = [8, 128], strides = [1, 1]} : vector<64x128xf32> to vector<8x128xf32>
    %968 = arith.addf %966, %967 : vector<8x128xf32>
    %969 = arith.negf %968 : vector<8x128xf32>
    %970 = math.exp %969 : vector<8x128xf32>
    %cst_326 = arith.constant 1.000000e+00 : f32
    %971 = vector.broadcast %cst_326 : f32 to vector<8x128xf32>
    %972 = arith.addf %971, %970 : vector<8x128xf32>
    %973 = arith.divf %971, %972 : vector<8x128xf32>
    %974 = vector.extract_strided_slice %973 {offsets = [0, 0], sizes = [8, 32], strides = [1, 1]} : vector<8x128xf32> to vector<8x32xf32>
    %975 = vector.extract_strided_slice %973 {offsets = [0, 32], sizes = [8, 32], strides = [1, 1]} : vector<8x128xf32> to vector<8x32xf32>
    %976 = vector.extract_strided_slice %968 {offsets = [0, 64], sizes = [8, 32], strides = [1, 1]} : vector<8x128xf32> to vector<8x32xf32>
    %977 = math.tanh %976 : vector<8x32xf32>
    %978 = vector.extract_strided_slice %973 {offsets = [0, 96], sizes = [8, 32], strides = [1, 1]} : vector<8x128xf32> to vector<8x32xf32>
    %979 = arith.mulf %975, %957 : vector<8x32xf32>
    %980 = arith.mulf %974, %977 : vector<8x32xf32>
    %981 = arith.addf %979, %980 : vector<8x32xf32>
    %982 = math.tanh %981 : vector<8x32xf32>
    %983 = arith.mulf %978, %982 : vector<8x32xf32>
    %984 = vector.extract_strided_slice %983 {offsets = [0, 0], sizes = [8, 16], strides = [1, 1]} : vector<8x32xf32> to vector<8x16xf32>
    %c24_327 = arith.constant 24 : index
    %c0_328 = arith.constant 0 : index
    %985 = vector.load %arg46[%c24_327, %c0_328] : memref<64x64xf32, #tpu.memory_space<vmem>>, vector<8x16xf32>
    tpu.vector_store %arg46[%c24_327, %c0_328], %984 {strides = array<i32>} : memref<64x64xf32, #tpu.memory_space<vmem>>, vector<8x16xf32>,
    %986 = vector.extract_strided_slice %983 {offsets = [0, 16], sizes = [8, 16], strides = [1, 1]} : vector<8x32xf32> to vector<8x16xf32>
    %c32_329 = arith.constant 32 : index
    %c16_330 = arith.constant 16 : index
    %987 = vector.load %arg46[%c32_329, %c16_330] : memref<64x64xf32, #tpu.memory_space<vmem>>, vector<8x16xf32>
    tpu.vector_store %arg46[%c32_329, %c16_330], %986 {strides = array<i32>} : memref<64x64xf32, #tpu.memory_space<vmem>>, vector<8x16xf32>,
    %cst_331 = arith.constant dense<0.000000e+00> : vector<8x128xf32>
    %988 = tpu.matmul %983, %889, %cst_331 {dimension_numbers = #tpu.dot_dimension_numbers<[1], [0], [0], [1], [0, 0, 1, 1], [], []>} : vector<8x32xf32>, vector<32x128xf32>, vector<8x128xf32> -> vector<8x128xf32>
    %989 = vector.extract_strided_slice %886 {offsets = [32, 0], sizes = [8, 128], strides = [1, 1]} : vector<64x128xf32> to vector<8x128xf32>
    %990 = arith.addf %988, %989 : vector<8x128xf32>
    %991 = vector.extract_strided_slice %888 {offsets = [24, 0], sizes = [8, 128], strides = [1, 1]} : vector<64x128xf32> to vector<8x128xf32>
    %992 = arith.addf %990, %991 : vector<8x128xf32>
    %993 = arith.negf %992 : vector<8x128xf32>
    %994 = math.exp %993 : vector<8x128xf32>
    %cst_332 = arith.constant 1.000000e+00 : f32
    %995 = vector.broadcast %cst_332 : f32 to vector<8x128xf32>
    %996 = arith.addf %995, %994 : vector<8x128xf32>
    %997 = arith.divf %995, %996 : vector<8x128xf32>
    %998 = vector.extract_strided_slice %997 {offsets = [0, 0], sizes = [8, 32], strides = [1, 1]} : vector<8x128xf32> to vector<8x32xf32>
    %999 = vector.extract_strided_slice %997 {offsets = [0, 32], sizes = [8, 32], strides = [1, 1]} : vector<8x128xf32> to vector<8x32xf32>
    %1000 = vector.extract_strided_slice %992 {offsets = [0, 64], sizes = [8, 32], strides = [1, 1]} : vector<8x128xf32> to vector<8x32xf32>
    %1001 = math.tanh %1000 : vector<8x32xf32>
    %1002 = vector.extract_strided_slice %997 {offsets = [0, 96], sizes = [8, 32], strides = [1, 1]} : vector<8x128xf32> to vector<8x32xf32>
    %1003 = arith.mulf %999, %981 : vector<8x32xf32>
    %1004 = arith.mulf %998, %1001 : vector<8x32xf32>
    %1005 = arith.addf %1003, %1004 : vector<8x32xf32>
    %1006 = math.tanh %1005 : vector<8x32xf32>
    %1007 = arith.mulf %1002, %1006 : vector<8x32xf32>
    %1008 = vector.extract_strided_slice %1007 {offsets = [0, 0], sizes = [8, 16], strides = [1, 1]} : vector<8x32xf32> to vector<8x16xf32>
    %c32_333 = arith.constant 32 : index
    %c0_334 = arith.constant 0 : index
    %1009 = vector.load %arg46[%c32_333, %c0_334] : memref<64x64xf32, #tpu.memory_space<vmem>>, vector<8x16xf32>
    tpu.vector_store %arg46[%c32_333, %c0_334], %1008 {strides = array<i32>} : memref<64x64xf32, #tpu.memory_space<vmem>>, vector<8x16xf32>,
    %1010 = vector.extract_strided_slice %1007 {offsets = [0, 16], sizes = [8, 16], strides = [1, 1]} : vector<8x32xf32> to vector<8x16xf32>
    %c24_335 = arith.constant 24 : index
    %c16_336 = arith.constant 16 : index
    %1011 = vector.load %arg46[%c24_335, %c16_336] : memref<64x64xf32, #tpu.memory_space<vmem>>, vector<8x16xf32>
    tpu.vector_store %arg46[%c24_335, %c16_336], %1010 {strides = array<i32>} : memref<64x64xf32, #tpu.memory_space<vmem>>, vector<8x16xf32>,
    %cst_337 = arith.constant dense<0.000000e+00> : vector<8x128xf32>
    %1012 = tpu.matmul %1007, %889, %cst_337 {dimension_numbers = #tpu.dot_dimension_numbers<[1], [0], [0], [1], [0, 0, 1, 1], [], []>} : vector<8x32xf32>, vector<32x128xf32>, vector<8x128xf32> -> vector<8x128xf32>
    %1013 = vector.extract_strided_slice %886 {offsets = [40, 0], sizes = [8, 128], strides = [1, 1]} : vector<64x128xf32> to vector<8x128xf32>
    %1014 = arith.addf %1012, %1013 : vector<8x128xf32>
    %1015 = vector.extract_strided_slice %888 {offsets = [16, 0], sizes = [8, 128], strides = [1, 1]} : vector<64x128xf32> to vector<8x128xf32>
    %1016 = arith.addf %1014, %1015 : vector<8x128xf32>
    %1017 = arith.negf %1016 : vector<8x128xf32>
    %1018 = math.exp %1017 : vector<8x128xf32>
    %cst_338 = arith.constant 1.000000e+00 : f32
    %1019 = vector.broadcast %cst_338 : f32 to vector<8x128xf32>
    %1020 = arith.addf %1019, %1018 : vector<8x128xf32>
    %1021 = arith.divf %1019, %1020 : vector<8x128xf32>
    %1022 = vector.extract_strided_slice %1021 {offsets = [0, 0], sizes = [8, 32], strides = [1, 1]} : vector<8x128xf32> to vector<8x32xf32>
    %1023 = vector.extract_strided_slice %1021 {offsets = [0, 32], sizes = [8, 32], strides = [1, 1]} : vector<8x128xf32> to vector<8x32xf32>
    %1024 = vector.extract_strided_slice %1016 {offsets = [0, 64], sizes = [8, 32], strides = [1, 1]} : vector<8x128xf32> to vector<8x32xf32>
    %1025 = math.tanh %1024 : vector<8x32xf32>
    %1026 = vector.extract_strided_slice %1021 {offsets = [0, 96], sizes = [8, 32], strides = [1, 1]} : vector<8x128xf32> to vector<8x32xf32>
    %1027 = arith.mulf %1023, %1005 : vector<8x32xf32>
    %1028 = arith.mulf %1022, %1025 : vector<8x32xf32>
    %1029 = arith.addf %1027, %1028 : vector<8x32xf32>
    %1030 = math.tanh %1029 : vector<8x32xf32>
    %1031 = arith.mulf %1026, %1030 : vector<8x32xf32>
    %1032 = vector.extract_strided_slice %1031 {offsets = [0, 0], sizes = [8, 16], strides = [1, 1]} : vector<8x32xf32> to vector<8x16xf32>
    %c40_339 = arith.constant 40 : index
    %c0_340 = arith.constant 0 : index
    %1033 = vector.load %arg46[%c40_339, %c0_340] : memref<64x64xf32, #tpu.memory_space<vmem>>, vector<8x16xf32>
    tpu.vector_store %arg46[%c40_339, %c0_340], %1032 {strides = array<i32>} : memref<64x64xf32, #tpu.memory_space<vmem>>, vector<8x16xf32>,
    %1034 = vector.extract_strided_slice %1031 {offsets = [0, 16], sizes = [8, 16], strides = [1, 1]} : vector<8x32xf32> to vector<8x16xf32>
    %c16_341 = arith.constant 16 : index
    %c16_342 = arith.constant 16 : index
    %1035 = vector.load %arg46[%c16_341, %c16_342] : memref<64x64xf32, #tpu.memory_space<vmem>>, vector<8x16xf32>
    tpu.vector_store %arg46[%c16_341, %c16_342], %1034 {strides = array<i32>} : memref<64x64xf32, #tpu.memory_space<vmem>>, vector<8x16xf32>,
    %cst_343 = arith.constant dense<0.000000e+00> : vector<8x128xf32>
    %1036 = tpu.matmul %1031, %889, %cst_343 {dimension_numbers = #tpu.dot_dimension_numbers<[1], [0], [0], [1], [0, 0, 1, 1], [], []>} : vector<8x32xf32>, vector<32x128xf32>, vector<8x128xf32> -> vector<8x128xf32>
    %1037 = vector.extract_strided_slice %886 {offsets = [48, 0], sizes = [8, 128], strides = [1, 1]} : vector<64x128xf32> to vector<8x128xf32>
    %1038 = arith.addf %1036, %1037 : vector<8x128xf32>
    %1039 = vector.extract_strided_slice %888 {offsets = [8, 0], sizes = [8, 128], strides = [1, 1]} : vector<64x128xf32> to vector<8x128xf32>
    %1040 = arith.addf %1038, %1039 : vector<8x128xf32>
    %1041 = arith.negf %1040 : vector<8x128xf32>
    %1042 = math.exp %1041 : vector<8x128xf32>
    %cst_344 = arith.constant 1.000000e+00 : f32
    %1043 = vector.broadcast %cst_344 : f32 to vector<8x128xf32>
    %1044 = arith.addf %1043, %1042 : vector<8x128xf32>
    %1045 = arith.divf %1043, %1044 : vector<8x128xf32>
    %1046 = vector.extract_strided_slice %1045 {offsets = [0, 0], sizes = [8, 32], strides = [1, 1]} : vector<8x128xf32> to vector<8x32xf32>
    %1047 = vector.extract_strided_slice %1045 {offsets = [0, 32], sizes = [8, 32], strides = [1, 1]} : vector<8x128xf32> to vector<8x32xf32>
    %1048 = vector.extract_strided_slice %1040 {offsets = [0, 64], sizes = [8, 32], strides = [1, 1]} : vector<8x128xf32> to vector<8x32xf32>
    %1049 = math.tanh %1048 : vector<8x32xf32>
    %1050 = vector.extract_strided_slice %1045 {offsets = [0, 96], sizes = [8, 32], strides = [1, 1]} : vector<8x128xf32> to vector<8x32xf32>
    %1051 = arith.mulf %1047, %1029 : vector<8x32xf32>
    %1052 = arith.mulf %1046, %1049 : vector<8x32xf32>
    %1053 = arith.addf %1051, %1052 : vector<8x32xf32>
    %1054 = math.tanh %1053 : vector<8x32xf32>
    %1055 = arith.mulf %1050, %1054 : vector<8x32xf32>
    %1056 = vector.extract_strided_slice %1055 {offsets = [0, 0], sizes = [8, 16], strides = [1, 1]} : vector<8x32xf32> to vector<8x16xf32>
    %c48_345 = arith.constant 48 : index
    %c0_346 = arith.constant 0 : index
    %1057 = vector.load %arg46[%c48_345, %c0_346] : memref<64x64xf32, #tpu.memory_space<vmem>>, vector<8x16xf32>
    tpu.vector_store %arg46[%c48_345, %c0_346], %1056 {strides = array<i32>} : memref<64x64xf32, #tpu.memory_space<vmem>>, vector<8x16xf32>,
    %1058 = vector.extract_strided_slice %1055 {offsets = [0, 16], sizes = [8, 16], strides = [1, 1]} : vector<8x32xf32> to vector<8x16xf32>
    %c8_347 = arith.constant 8 : index
    %c16_348 = arith.constant 16 : index
    %1059 = vector.load %arg46[%c8_347, %c16_348] : memref<64x64xf32, #tpu.memory_space<vmem>>, vector<8x16xf32>
    tpu.vector_store %arg46[%c8_347, %c16_348], %1058 {strides = array<i32>} : memref<64x64xf32, #tpu.memory_space<vmem>>, vector<8x16xf32>,
    %cst_349 = arith.constant dense<0.000000e+00> : vector<8x128xf32>
    %1060 = tpu.matmul %1055, %889, %cst_349 {dimension_numbers = #tpu.dot_dimension_numbers<[1], [0], [0], [1], [0, 0, 1, 1], [], []>} : vector<8x32xf32>, vector<32x128xf32>, vector<8x128xf32> -> vector<8x128xf32>
    %1061 = vector.extract_strided_slice %886 {offsets = [56, 0], sizes = [8, 128], strides = [1, 1]} : vector<64x128xf32> to vector<8x128xf32>
    %1062 = arith.addf %1060, %1061 : vector<8x128xf32>
    %1063 = vector.extract_strided_slice %888 {offsets = [0, 0], sizes = [8, 128], strides = [1, 1]} : vector<64x128xf32> to vector<8x128xf32>
    %1064 = arith.addf %1062, %1063 : vector<8x128xf32>
    %1065 = arith.negf %1064 : vector<8x128xf32>
    %1066 = math.exp %1065 : vector<8x128xf32>
    %cst_350 = arith.constant 1.000000e+00 : f32
    %1067 = vector.broadcast %cst_350 : f32 to vector<8x128xf32>
    %1068 = arith.addf %1067, %1066 : vector<8x128xf32>
    %1069 = arith.divf %1067, %1068 : vector<8x128xf32>
    %1070 = vector.extract_strided_slice %1069 {offsets = [0, 0], sizes = [8, 32], strides = [1, 1]} : vector<8x128xf32> to vector<8x32xf32>
    %1071 = vector.extract_strided_slice %1069 {offsets = [0, 32], sizes = [8, 32], strides = [1, 1]} : vector<8x128xf32> to vector<8x32xf32>
    %1072 = vector.extract_strided_slice %1064 {offsets = [0, 64], sizes = [8, 32], strides = [1, 1]} : vector<8x128xf32> to vector<8x32xf32>
    %1073 = math.tanh %1072 : vector<8x32xf32>
    %1074 = vector.extract_strided_slice %1069 {offsets = [0, 96], sizes = [8, 32], strides = [1, 1]} : vector<8x128xf32> to vector<8x32xf32>
    %1075 = arith.mulf %1071, %1053 : vector<8x32xf32>
    %1076 = arith.mulf %1070, %1073 : vector<8x32xf32>
    %1077 = arith.addf %1075, %1076 : vector<8x32xf32>
    %1078 = math.tanh %1077 : vector<8x32xf32>
    %1079 = arith.mulf %1074, %1078 : vector<8x32xf32>
    %1080 = vector.extract_strided_slice %1079 {offsets = [0, 0], sizes = [8, 16], strides = [1, 1]} : vector<8x32xf32> to vector<8x16xf32>
    %c56_351 = arith.constant 56 : index
    %c0_352 = arith.constant 0 : index
    %1081 = vector.load %arg46[%c56_351, %c0_352] : memref<64x64xf32, #tpu.memory_space<vmem>>, vector<8x16xf32>
    tpu.vector_store %arg46[%c56_351, %c0_352], %1080 {strides = array<i32>} : memref<64x64xf32, #tpu.memory_space<vmem>>, vector<8x16xf32>,
    %1082 = vector.extract_strided_slice %1079 {offsets = [0, 16], sizes = [8, 16], strides = [1, 1]} : vector<8x32xf32> to vector<8x16xf32>
    %c0_353 = arith.constant 0 : index
    %c16_354 = arith.constant 16 : index
    %1083 = vector.load %arg46[%c0_353, %c16_354] : memref<64x64xf32, #tpu.memory_space<vmem>>, vector<8x16xf32>
    tpu.vector_store %arg46[%c0_353, %c16_354], %1082 {strides = array<i32>} : memref<64x64xf32, #tpu.memory_space<vmem>>, vector<8x16xf32>,
    %c0_355 = arith.constant 0 : index
    %c0_356 = arith.constant 0 : index
    %1084 = vector.load %arg46[%c0_355, %c0_356] : memref<64x64xf32, #tpu.memory_space<vmem>>, vector<64x32xf32>
    %c0_357 = arith.constant 0 : index
    %c0_358 = arith.constant 0 : index
    %1085 = vector.load %arg36[%c0_357, %c0_358] : memref<32x128xf32, #tpu.memory_space<vmem>>, vector<32x128xf32>
    %cst_359 = arith.constant dense<0.000000e+00> : vector<64x128xf32>
    %1086 = tpu.matmul %1084, %1085, %cst_359 {dimension_numbers = #tpu.dot_dimension_numbers<[1], [0], [0], [1], [0, 0, 1, 1], [], []>} : vector<64x32xf32>, vector<32x128xf32>, vector<64x128xf32> -> vector<64x128xf32>
    %c0_360 = arith.constant 0 : index
    %c0_361 = arith.constant 0 : index
    %1087 = vector.load %arg39[%c0_360, %c0_361] : memref<1x128xf32, #tpu.memory_space<vmem>>, vector<1x128xf32>
    %1088 = vector.broadcast %1087 : vector<1x128xf32> to vector<64x128xf32>
    %1089 = arith.addf %1086, %1088 : vector<64x128xf32>
    %c0_362 = arith.constant 0 : index
    %c0_363 = arith.constant 0 : index
    %1090 = vector.load %arg37[%c0_362, %c0_363] : memref<32x128xf32, #tpu.memory_space<vmem>>, vector<32x128xf32>
    %cst_364 = arith.constant dense<0.000000e+00> : vector<64x128xf32>
    %1091 = tpu.matmul %1084, %1090, %cst_364 {dimension_numbers = #tpu.dot_dimension_numbers<[1], [0], [0], [1], [0, 0, 1, 1], [], []>} : vector<64x32xf32>, vector<32x128xf32>, vector<64x128xf32> -> vector<64x128xf32>
    %c0_365 = arith.constant 0 : index
    %c0_366 = arith.constant 0 : index
    %1092 = vector.load %arg38[%c0_365, %c0_366] : memref<32x128xf32, #tpu.memory_space<vmem>>, vector<32x128xf32>
    %cst_367 = arith.constant 0.000000e+00 : f32
    %1093 = vector.broadcast %cst_367 : f32 to vector<8x32xf32>
    %cst_368 = arith.constant 0.000000e+00 : f32
    %1094 = vector.broadcast %cst_368 : f32 to vector<8x32xf32>
    %cst_369 = arith.constant dense<0.000000e+00> : vector<8x128xf32>
    %1095 = tpu.matmul %1093, %1092, %cst_369 {dimension_numbers = #tpu.dot_dimension_numbers<[1], [0], [0], [1], [0, 0, 1, 1], [], []>} : vector<8x32xf32>, vector<32x128xf32>, vector<8x128xf32> -> vector<8x128xf32>
    %1096 = vector.extract_strided_slice %1089 {offsets = [0, 0], sizes = [8, 128], strides = [1, 1]} : vector<64x128xf32> to vector<8x128xf32>
    %1097 = arith.addf %1095, %1096 : vector<8x128xf32>
    %1098 = vector.extract_strided_slice %1091 {offsets = [56, 0], sizes = [8, 128], strides = [1, 1]} : vector<64x128xf32> to vector<8x128xf32>
    %1099 = arith.addf %1097, %1098 : vector<8x128xf32>
    %1100 = arith.negf %1099 : vector<8x128xf32>
    %1101 = math.exp %1100 : vector<8x128xf32>
    %cst_370 = arith.constant 1.000000e+00 : f32
    %1102 = vector.broadcast %cst_370 : f32 to vector<8x128xf32>
    %1103 = arith.addf %1102, %1101 : vector<8x128xf32>
    %1104 = arith.divf %1102, %1103 : vector<8x128xf32>
    %1105 = vector.extract_strided_slice %1104 {offsets = [0, 0], sizes = [8, 32], strides = [1, 1]} : vector<8x128xf32> to vector<8x32xf32>
    %1106 = vector.extract_strided_slice %1104 {offsets = [0, 32], sizes = [8, 32], strides = [1, 1]} : vector<8x128xf32> to vector<8x32xf32>
    %1107 = vector.extract_strided_slice %1099 {offsets = [0, 64], sizes = [8, 32], strides = [1, 1]} : vector<8x128xf32> to vector<8x32xf32>
    %1108 = math.tanh %1107 : vector<8x32xf32>
    %1109 = vector.extract_strided_slice %1104 {offsets = [0, 96], sizes = [8, 32], strides = [1, 1]} : vector<8x128xf32> to vector<8x32xf32>
    %1110 = arith.mulf %1106, %1094 : vector<8x32xf32>
    %1111 = arith.mulf %1105, %1108 : vector<8x32xf32>
    %1112 = arith.addf %1110, %1111 : vector<8x32xf32>
    %1113 = math.tanh %1112 : vector<8x32xf32>
    %1114 = arith.mulf %1109, %1113 : vector<8x32xf32>
    %1115 = vector.extract_strided_slice %1114 {offsets = [0, 0], sizes = [8, 16], strides = [1, 1]} : vector<8x32xf32> to vector<8x16xf32>
    %c0_371 = arith.constant 0 : index
    %c0_372 = arith.constant 0 : index
    %1116 = vector.load %arg47[%c0_371, %c0_372] : memref<64x64xf32, #tpu.memory_space<vmem>>, vector<8x16xf32>
    tpu.vector_store %arg47[%c0_371, %c0_372], %1115 {strides = array<i32>} : memref<64x64xf32, #tpu.memory_space<vmem>>, vector<8x16xf32>,
    %1117 = vector.extract_strided_slice %1114 {offsets = [0, 16], sizes = [8, 16], strides = [1, 1]} : vector<8x32xf32> to vector<8x16xf32>
    %c56_373 = arith.constant 56 : index
    %c16_374 = arith.constant 16 : index
    %1118 = vector.load %arg47[%c56_373, %c16_374] : memref<64x64xf32, #tpu.memory_space<vmem>>, vector<8x16xf32>
    tpu.vector_store %arg47[%c56_373, %c16_374], %1117 {strides = array<i32>} : memref<64x64xf32, #tpu.memory_space<vmem>>, vector<8x16xf32>,
    %cst_375 = arith.constant dense<0.000000e+00> : vector<8x128xf32>
    %1119 = tpu.matmul %1114, %1092, %cst_375 {dimension_numbers = #tpu.dot_dimension_numbers<[1], [0], [0], [1], [0, 0, 1, 1], [], []>} : vector<8x32xf32>, vector<32x128xf32>, vector<8x128xf32> -> vector<8x128xf32>
    %1120 = vector.extract_strided_slice %1089 {offsets = [8, 0], sizes = [8, 128], strides = [1, 1]} : vector<64x128xf32> to vector<8x128xf32>
    %1121 = arith.addf %1119, %1120 : vector<8x128xf32>
    %1122 = vector.extract_strided_slice %1091 {offsets = [48, 0], sizes = [8, 128], strides = [1, 1]} : vector<64x128xf32> to vector<8x128xf32>
    %1123 = arith.addf %1121, %1122 : vector<8x128xf32>
    %1124 = arith.negf %1123 : vector<8x128xf32>
    %1125 = math.exp %1124 : vector<8x128xf32>
    %cst_376 = arith.constant 1.000000e+00 : f32
    %1126 = vector.broadcast %cst_376 : f32 to vector<8x128xf32>
    %1127 = arith.addf %1126, %1125 : vector<8x128xf32>
    %1128 = arith.divf %1126, %1127 : vector<8x128xf32>
    %1129 = vector.extract_strided_slice %1128 {offsets = [0, 0], sizes = [8, 32], strides = [1, 1]} : vector<8x128xf32> to vector<8x32xf32>
    %1130 = vector.extract_strided_slice %1128 {offsets = [0, 32], sizes = [8, 32], strides = [1, 1]} : vector<8x128xf32> to vector<8x32xf32>
    %1131 = vector.extract_strided_slice %1123 {offsets = [0, 64], sizes = [8, 32], strides = [1, 1]} : vector<8x128xf32> to vector<8x32xf32>
    %1132 = math.tanh %1131 : vector<8x32xf32>
    %1133 = vector.extract_strided_slice %1128 {offsets = [0, 96], sizes = [8, 32], strides = [1, 1]} : vector<8x128xf32> to vector<8x32xf32>
    %1134 = arith.mulf %1130, %1112 : vector<8x32xf32>
    %1135 = arith.mulf %1129, %1132 : vector<8x32xf32>
    %1136 = arith.addf %1134, %1135 : vector<8x32xf32>
    %1137 = math.tanh %1136 : vector<8x32xf32>
    %1138 = arith.mulf %1133, %1137 : vector<8x32xf32>
    %1139 = vector.extract_strided_slice %1138 {offsets = [0, 0], sizes = [8, 16], strides = [1, 1]} : vector<8x32xf32> to vector<8x16xf32>
    %c8_377 = arith.constant 8 : index
    %c0_378 = arith.constant 0 : index
    %1140 = vector.load %arg47[%c8_377, %c0_378] : memref<64x64xf32, #tpu.memory_space<vmem>>, vector<8x16xf32>
    tpu.vector_store %arg47[%c8_377, %c0_378], %1139 {strides = array<i32>} : memref<64x64xf32, #tpu.memory_space<vmem>>, vector<8x16xf32>,
    %1141 = vector.extract_strided_slice %1138 {offsets = [0, 16], sizes = [8, 16], strides = [1, 1]} : vector<8x32xf32> to vector<8x16xf32>
    %c48_379 = arith.constant 48 : index
    %c16_380 = arith.constant 16 : index
    %1142 = vector.load %arg47[%c48_379, %c16_380] : memref<64x64xf32, #tpu.memory_space<vmem>>, vector<8x16xf32>
    tpu.vector_store %arg47[%c48_379, %c16_380], %1141 {strides = array<i32>} : memref<64x64xf32, #tpu.memory_space<vmem>>, vector<8x16xf32>,
    %cst_381 = arith.constant dense<0.000000e+00> : vector<8x128xf32>
    %1143 = tpu.matmul %1138, %1092, %cst_381 {dimension_numbers = #tpu.dot_dimension_numbers<[1], [0], [0], [1], [0, 0, 1, 1], [], []>} : vector<8x32xf32>, vector<32x128xf32>, vector<8x128xf32> -> vector<8x128xf32>
    %1144 = vector.extract_strided_slice %1089 {offsets = [16, 0], sizes = [8, 128], strides = [1, 1]} : vector<64x128xf32> to vector<8x128xf32>
    %1145 = arith.addf %1143, %1144 : vector<8x128xf32>
    %1146 = vector.extract_strided_slice %1091 {offsets = [40, 0], sizes = [8, 128], strides = [1, 1]} : vector<64x128xf32> to vector<8x128xf32>
    %1147 = arith.addf %1145, %1146 : vector<8x128xf32>
    %1148 = arith.negf %1147 : vector<8x128xf32>
    %1149 = math.exp %1148 : vector<8x128xf32>
    %cst_382 = arith.constant 1.000000e+00 : f32
    %1150 = vector.broadcast %cst_382 : f32 to vector<8x128xf32>
    %1151 = arith.addf %1150, %1149 : vector<8x128xf32>
    %1152 = arith.divf %1150, %1151 : vector<8x128xf32>
    %1153 = vector.extract_strided_slice %1152 {offsets = [0, 0], sizes = [8, 32], strides = [1, 1]} : vector<8x128xf32> to vector<8x32xf32>
    %1154 = vector.extract_strided_slice %1152 {offsets = [0, 32], sizes = [8, 32], strides = [1, 1]} : vector<8x128xf32> to vector<8x32xf32>
    %1155 = vector.extract_strided_slice %1147 {offsets = [0, 64], sizes = [8, 32], strides = [1, 1]} : vector<8x128xf32> to vector<8x32xf32>
    %1156 = math.tanh %1155 : vector<8x32xf32>
    %1157 = vector.extract_strided_slice %1152 {offsets = [0, 96], sizes = [8, 32], strides = [1, 1]} : vector<8x128xf32> to vector<8x32xf32>
    %1158 = arith.mulf %1154, %1136 : vector<8x32xf32>
    %1159 = arith.mulf %1153, %1156 : vector<8x32xf32>
    %1160 = arith.addf %1158, %1159 : vector<8x32xf32>
    %1161 = math.tanh %1160 : vector<8x32xf32>
    %1162 = arith.mulf %1157, %1161 : vector<8x32xf32>
    %1163 = vector.extract_strided_slice %1162 {offsets = [0, 0], sizes = [8, 16], strides = [1, 1]} : vector<8x32xf32> to vector<8x16xf32>
    %c16_383 = arith.constant 16 : index
    %c0_384 = arith.constant 0 : index
    %1164 = vector.load %arg47[%c16_383, %c0_384] : memref<64x64xf32, #tpu.memory_space<vmem>>, vector<8x16xf32>
    tpu.vector_store %arg47[%c16_383, %c0_384], %1163 {strides = array<i32>} : memref<64x64xf32, #tpu.memory_space<vmem>>, vector<8x16xf32>,
    %1165 = vector.extract_strided_slice %1162 {offsets = [0, 16], sizes = [8, 16], strides = [1, 1]} : vector<8x32xf32> to vector<8x16xf32>
    %c40_385 = arith.constant 40 : index
    %c16_386 = arith.constant 16 : index
    %1166 = vector.load %arg47[%c40_385, %c16_386] : memref<64x64xf32, #tpu.memory_space<vmem>>, vector<8x16xf32>
    tpu.vector_store %arg47[%c40_385, %c16_386], %1165 {strides = array<i32>} : memref<64x64xf32, #tpu.memory_space<vmem>>, vector<8x16xf32>,
    %cst_387 = arith.constant dense<0.000000e+00> : vector<8x128xf32>
    %1167 = tpu.matmul %1162, %1092, %cst_387 {dimension_numbers = #tpu.dot_dimension_numbers<[1], [0], [0], [1], [0, 0, 1, 1], [], []>} : vector<8x32xf32>, vector<32x128xf32>, vector<8x128xf32> -> vector<8x128xf32>
    %1168 = vector.extract_strided_slice %1089 {offsets = [24, 0], sizes = [8, 128], strides = [1, 1]} : vector<64x128xf32> to vector<8x128xf32>
    %1169 = arith.addf %1167, %1168 : vector<8x128xf32>
    %1170 = vector.extract_strided_slice %1091 {offsets = [32, 0], sizes = [8, 128], strides = [1, 1]} : vector<64x128xf32> to vector<8x128xf32>
    %1171 = arith.addf %1169, %1170 : vector<8x128xf32>
    %1172 = arith.negf %1171 : vector<8x128xf32>
    %1173 = math.exp %1172 : vector<8x128xf32>
    %cst_388 = arith.constant 1.000000e+00 : f32
    %1174 = vector.broadcast %cst_388 : f32 to vector<8x128xf32>
    %1175 = arith.addf %1174, %1173 : vector<8x128xf32>
    %1176 = arith.divf %1174, %1175 : vector<8x128xf32>
    %1177 = vector.extract_strided_slice %1176 {offsets = [0, 0], sizes = [8, 32], strides = [1, 1]} : vector<8x128xf32> to vector<8x32xf32>
    %1178 = vector.extract_strided_slice %1176 {offsets = [0, 32], sizes = [8, 32], strides = [1, 1]} : vector<8x128xf32> to vector<8x32xf32>
    %1179 = vector.extract_strided_slice %1171 {offsets = [0, 64], sizes = [8, 32], strides = [1, 1]} : vector<8x128xf32> to vector<8x32xf32>
    %1180 = math.tanh %1179 : vector<8x32xf32>
    %1181 = vector.extract_strided_slice %1176 {offsets = [0, 96], sizes = [8, 32], strides = [1, 1]} : vector<8x128xf32> to vector<8x32xf32>
    %1182 = arith.mulf %1178, %1160 : vector<8x32xf32>
    %1183 = arith.mulf %1177, %1180 : vector<8x32xf32>
    %1184 = arith.addf %1182, %1183 : vector<8x32xf32>
    %1185 = math.tanh %1184 : vector<8x32xf32>
    %1186 = arith.mulf %1181, %1185 : vector<8x32xf32>
    %1187 = vector.extract_strided_slice %1186 {offsets = [0, 0], sizes = [8, 16], strides = [1, 1]} : vector<8x32xf32> to vector<8x16xf32>
    %c24_389 = arith.constant 24 : index
    %c0_390 = arith.constant 0 : index
    %1188 = vector.load %arg47[%c24_389, %c0_390] : memref<64x64xf32, #tpu.memory_space<vmem>>, vector<8x16xf32>
    tpu.vector_store %arg47[%c24_389, %c0_390], %1187 {strides = array<i32>} : memref<64x64xf32, #tpu.memory_space<vmem>>, vector<8x16xf32>,
    %1189 = vector.extract_strided_slice %1186 {offsets = [0, 16], sizes = [8, 16], strides = [1, 1]} : vector<8x32xf32> to vector<8x16xf32>
    %c32_391 = arith.constant 32 : index
    %c16_392 = arith.constant 16 : index
    %1190 = vector.load %arg47[%c32_391, %c16_392] : memref<64x64xf32, #tpu.memory_space<vmem>>, vector<8x16xf32>
    tpu.vector_store %arg47[%c32_391, %c16_392], %1189 {strides = array<i32>} : memref<64x64xf32, #tpu.memory_space<vmem>>, vector<8x16xf32>,
    %cst_393 = arith.constant dense<0.000000e+00> : vector<8x128xf32>
    %1191 = tpu.matmul %1186, %1092, %cst_393 {dimension_numbers = #tpu.dot_dimension_numbers<[1], [0], [0], [1], [0, 0, 1, 1], [], []>} : vector<8x32xf32>, vector<32x128xf32>, vector<8x128xf32> -> vector<8x128xf32>
    %1192 = vector.extract_strided_slice %1089 {offsets = [32, 0], sizes = [8, 128], strides = [1, 1]} : vector<64x128xf32> to vector<8x128xf32>
    %1193 = arith.addf %1191, %1192 : vector<8x128xf32>
    %1194 = vector.extract_strided_slice %1091 {offsets = [24, 0], sizes = [8, 128], strides = [1, 1]} : vector<64x128xf32> to vector<8x128xf32>
    %1195 = arith.addf %1193, %1194 : vector<8x128xf32>
    %1196 = arith.negf %1195 : vector<8x128xf32>
    %1197 = math.exp %1196 : vector<8x128xf32>
    %cst_394 = arith.constant 1.000000e+00 : f32
    %1198 = vector.broadcast %cst_394 : f32 to vector<8x128xf32>
    %1199 = arith.addf %1198, %1197 : vector<8x128xf32>
    %1200 = arith.divf %1198, %1199 : vector<8x128xf32>
    %1201 = vector.extract_strided_slice %1200 {offsets = [0, 0], sizes = [8, 32], strides = [1, 1]} : vector<8x128xf32> to vector<8x32xf32>
    %1202 = vector.extract_strided_slice %1200 {offsets = [0, 32], sizes = [8, 32], strides = [1, 1]} : vector<8x128xf32> to vector<8x32xf32>
    %1203 = vector.extract_strided_slice %1195 {offsets = [0, 64], sizes = [8, 32], strides = [1, 1]} : vector<8x128xf32> to vector<8x32xf32>
    %1204 = math.tanh %1203 : vector<8x32xf32>
    %1205 = vector.extract_strided_slice %1200 {offsets = [0, 96], sizes = [8, 32], strides = [1, 1]} : vector<8x128xf32> to vector<8x32xf32>
    %1206 = arith.mulf %1202, %1184 : vector<8x32xf32>
    %1207 = arith.mulf %1201, %1204 : vector<8x32xf32>
    %1208 = arith.addf %1206, %1207 : vector<8x32xf32>
    %1209 = math.tanh %1208 : vector<8x32xf32>
    %1210 = arith.mulf %1205, %1209 : vector<8x32xf32>
    %1211 = vector.extract_strided_slice %1210 {offsets = [0, 0], sizes = [8, 16], strides = [1, 1]} : vector<8x32xf32> to vector<8x16xf32>
    %c32_395 = arith.constant 32 : index
    %c0_396 = arith.constant 0 : index
    %1212 = vector.load %arg47[%c32_395, %c0_396] : memref<64x64xf32, #tpu.memory_space<vmem>>, vector<8x16xf32>
    tpu.vector_store %arg47[%c32_395, %c0_396], %1211 {strides = array<i32>} : memref<64x64xf32, #tpu.memory_space<vmem>>, vector<8x16xf32>,
    %1213 = vector.extract_strided_slice %1210 {offsets = [0, 16], sizes = [8, 16], strides = [1, 1]} : vector<8x32xf32> to vector<8x16xf32>
    %c24_397 = arith.constant 24 : index
    %c16_398 = arith.constant 16 : index
    %1214 = vector.load %arg47[%c24_397, %c16_398] : memref<64x64xf32, #tpu.memory_space<vmem>>, vector<8x16xf32>
    tpu.vector_store %arg47[%c24_397, %c16_398], %1213 {strides = array<i32>} : memref<64x64xf32, #tpu.memory_space<vmem>>, vector<8x16xf32>,
    %cst_399 = arith.constant dense<0.000000e+00> : vector<8x128xf32>
    %1215 = tpu.matmul %1210, %1092, %cst_399 {dimension_numbers = #tpu.dot_dimension_numbers<[1], [0], [0], [1], [0, 0, 1, 1], [], []>} : vector<8x32xf32>, vector<32x128xf32>, vector<8x128xf32> -> vector<8x128xf32>
    %1216 = vector.extract_strided_slice %1089 {offsets = [40, 0], sizes = [8, 128], strides = [1, 1]} : vector<64x128xf32> to vector<8x128xf32>
    %1217 = arith.addf %1215, %1216 : vector<8x128xf32>
    %1218 = vector.extract_strided_slice %1091 {offsets = [16, 0], sizes = [8, 128], strides = [1, 1]} : vector<64x128xf32> to vector<8x128xf32>
    %1219 = arith.addf %1217, %1218 : vector<8x128xf32>
    %1220 = arith.negf %1219 : vector<8x128xf32>
    %1221 = math.exp %1220 : vector<8x128xf32>
    %cst_400 = arith.constant 1.000000e+00 : f32
    %1222 = vector.broadcast %cst_400 : f32 to vector<8x128xf32>
    %1223 = arith.addf %1222, %1221 : vector<8x128xf32>
    %1224 = arith.divf %1222, %1223 : vector<8x128xf32>
    %1225 = vector.extract_strided_slice %1224 {offsets = [0, 0], sizes = [8, 32], strides = [1, 1]} : vector<8x128xf32> to vector<8x32xf32>
    %1226 = vector.extract_strided_slice %1224 {offsets = [0, 32], sizes = [8, 32], strides = [1, 1]} : vector<8x128xf32> to vector<8x32xf32>
    %1227 = vector.extract_strided_slice %1219 {offsets = [0, 64], sizes = [8, 32], strides = [1, 1]} : vector<8x128xf32> to vector<8x32xf32>
    %1228 = math.tanh %1227 : vector<8x32xf32>
    %1229 = vector.extract_strided_slice %1224 {offsets = [0, 96], sizes = [8, 32], strides = [1, 1]} : vector<8x128xf32> to vector<8x32xf32>
    %1230 = arith.mulf %1226, %1208 : vector<8x32xf32>
    %1231 = arith.mulf %1225, %1228 : vector<8x32xf32>
    %1232 = arith.addf %1230, %1231 : vector<8x32xf32>
    %1233 = math.tanh %1232 : vector<8x32xf32>
    %1234 = arith.mulf %1229, %1233 : vector<8x32xf32>
    %1235 = vector.extract_strided_slice %1234 {offsets = [0, 0], sizes = [8, 16], strides = [1, 1]} : vector<8x32xf32> to vector<8x16xf32>
    %c40_401 = arith.constant 40 : index
    %c0_402 = arith.constant 0 : index
    %1236 = vector.load %arg47[%c40_401, %c0_402] : memref<64x64xf32, #tpu.memory_space<vmem>>, vector<8x16xf32>
    tpu.vector_store %arg47[%c40_401, %c0_402], %1235 {strides = array<i32>} : memref<64x64xf32, #tpu.memory_space<vmem>>, vector<8x16xf32>,
    %1237 = vector.extract_strided_slice %1234 {offsets = [0, 16], sizes = [8, 16], strides = [1, 1]} : vector<8x32xf32> to vector<8x16xf32>
    %c16_403 = arith.constant 16 : index
    %c16_404 = arith.constant 16 : index
    %1238 = vector.load %arg47[%c16_403, %c16_404] : memref<64x64xf32, #tpu.memory_space<vmem>>, vector<8x16xf32>
    tpu.vector_store %arg47[%c16_403, %c16_404], %1237 {strides = array<i32>} : memref<64x64xf32, #tpu.memory_space<vmem>>, vector<8x16xf32>,
    %cst_405 = arith.constant dense<0.000000e+00> : vector<8x128xf32>
    %1239 = tpu.matmul %1234, %1092, %cst_405 {dimension_numbers = #tpu.dot_dimension_numbers<[1], [0], [0], [1], [0, 0, 1, 1], [], []>} : vector<8x32xf32>, vector<32x128xf32>, vector<8x128xf32> -> vector<8x128xf32>
    %1240 = vector.extract_strided_slice %1089 {offsets = [48, 0], sizes = [8, 128], strides = [1, 1]} : vector<64x128xf32> to vector<8x128xf32>
    %1241 = arith.addf %1239, %1240 : vector<8x128xf32>
    %1242 = vector.extract_strided_slice %1091 {offsets = [8, 0], sizes = [8, 128], strides = [1, 1]} : vector<64x128xf32> to vector<8x128xf32>
    %1243 = arith.addf %1241, %1242 : vector<8x128xf32>
    %1244 = arith.negf %1243 : vector<8x128xf32>
    %1245 = math.exp %1244 : vector<8x128xf32>
    %cst_406 = arith.constant 1.000000e+00 : f32
    %1246 = vector.broadcast %cst_406 : f32 to vector<8x128xf32>
    %1247 = arith.addf %1246, %1245 : vector<8x128xf32>
    %1248 = arith.divf %1246, %1247 : vector<8x128xf32>
    %1249 = vector.extract_strided_slice %1248 {offsets = [0, 0], sizes = [8, 32], strides = [1, 1]} : vector<8x128xf32> to vector<8x32xf32>
    %1250 = vector.extract_strided_slice %1248 {offsets = [0, 32], sizes = [8, 32], strides = [1, 1]} : vector<8x128xf32> to vector<8x32xf32>
    %1251 = vector.extract_strided_slice %1243 {offsets = [0, 64], sizes = [8, 32], strides = [1, 1]} : vector<8x128xf32> to vector<8x32xf32>
    %1252 = math.tanh %1251 : vector<8x32xf32>
    %1253 = vector.extract_strided_slice %1248 {offsets = [0, 96], sizes = [8, 32], strides = [1, 1]} : vector<8x128xf32> to vector<8x32xf32>
    %1254 = arith.mulf %1250, %1232 : vector<8x32xf32>
    %1255 = arith.mulf %1249, %1252 : vector<8x32xf32>
    %1256 = arith.addf %1254, %1255 : vector<8x32xf32>
    %1257 = math.tanh %1256 : vector<8x32xf32>
    %1258 = arith.mulf %1253, %1257 : vector<8x32xf32>
    %1259 = vector.extract_strided_slice %1258 {offsets = [0, 0], sizes = [8, 16], strides = [1, 1]} : vector<8x32xf32> to vector<8x16xf32>
    %c48_407 = arith.constant 48 : index
    %c0_408 = arith.constant 0 : index
    %1260 = vector.load %arg47[%c48_407, %c0_408] : memref<64x64xf32, #tpu.memory_space<vmem>>, vector<8x16xf32>
    tpu.vector_store %arg47[%c48_407, %c0_408], %1259 {strides = array<i32>} : memref<64x64xf32, #tpu.memory_space<vmem>>, vector<8x16xf32>,
    %1261 = vector.extract_strided_slice %1258 {offsets = [0, 16], sizes = [8, 16], strides = [1, 1]} : vector<8x32xf32> to vector<8x16xf32>
    %c8_409 = arith.constant 8 : index
    %c16_410 = arith.constant 16 : index
    %1262 = vector.load %arg47[%c8_409, %c16_410] : memref<64x64xf32, #tpu.memory_space<vmem>>, vector<8x16xf32>
    tpu.vector_store %arg47[%c8_409, %c16_410], %1261 {strides = array<i32>} : memref<64x64xf32, #tpu.memory_space<vmem>>, vector<8x16xf32>,
    %cst_411 = arith.constant dense<0.000000e+00> : vector<8x128xf32>
    %1263 = tpu.matmul %1258, %1092, %cst_411 {dimension_numbers = #tpu.dot_dimension_numbers<[1], [0], [0], [1], [0, 0, 1, 1], [], []>} : vector<8x32xf32>, vector<32x128xf32>, vector<8x128xf32> -> vector<8x128xf32>
    %1264 = vector.extract_strided_slice %1089 {offsets = [56, 0], sizes = [8, 128], strides = [1, 1]} : vector<64x128xf32> to vector<8x128xf32>
    %1265 = arith.addf %1263, %1264 : vector<8x128xf32>
    %1266 = vector.extract_strided_slice %1091 {offsets = [0, 0], sizes = [8, 128], strides = [1, 1]} : vector<64x128xf32> to vector<8x128xf32>
    %1267 = arith.addf %1265, %1266 : vector<8x128xf32>
    %1268 = arith.negf %1267 : vector<8x128xf32>
    %1269 = math.exp %1268 : vector<8x128xf32>
    %cst_412 = arith.constant 1.000000e+00 : f32
    %1270 = vector.broadcast %cst_412 : f32 to vector<8x128xf32>
    %1271 = arith.addf %1270, %1269 : vector<8x128xf32>
    %1272 = arith.divf %1270, %1271 : vector<8x128xf32>
    %1273 = vector.extract_strided_slice %1272 {offsets = [0, 0], sizes = [8, 32], strides = [1, 1]} : vector<8x128xf32> to vector<8x32xf32>
    %1274 = vector.extract_strided_slice %1272 {offsets = [0, 32], sizes = [8, 32], strides = [1, 1]} : vector<8x128xf32> to vector<8x32xf32>
    %1275 = vector.extract_strided_slice %1267 {offsets = [0, 64], sizes = [8, 32], strides = [1, 1]} : vector<8x128xf32> to vector<8x32xf32>
    %1276 = math.tanh %1275 : vector<8x32xf32>
    %1277 = vector.extract_strided_slice %1272 {offsets = [0, 96], sizes = [8, 32], strides = [1, 1]} : vector<8x128xf32> to vector<8x32xf32>
    %1278 = arith.mulf %1274, %1256 : vector<8x32xf32>
    %1279 = arith.mulf %1273, %1276 : vector<8x32xf32>
    %1280 = arith.addf %1278, %1279 : vector<8x32xf32>
    %1281 = math.tanh %1280 : vector<8x32xf32>
    %1282 = arith.mulf %1277, %1281 : vector<8x32xf32>
    %1283 = vector.extract_strided_slice %1282 {offsets = [0, 0], sizes = [8, 16], strides = [1, 1]} : vector<8x32xf32> to vector<8x16xf32>
    %c56_413 = arith.constant 56 : index
    %c0_414 = arith.constant 0 : index
    %1284 = vector.load %arg47[%c56_413, %c0_414] : memref<64x64xf32, #tpu.memory_space<vmem>>, vector<8x16xf32>
    tpu.vector_store %arg47[%c56_413, %c0_414], %1283 {strides = array<i32>} : memref<64x64xf32, #tpu.memory_space<vmem>>, vector<8x16xf32>,
    %1285 = vector.extract_strided_slice %1282 {offsets = [0, 16], sizes = [8, 16], strides = [1, 1]} : vector<8x32xf32> to vector<8x16xf32>
    %c0_415 = arith.constant 0 : index
    %c16_416 = arith.constant 16 : index
    %1286 = vector.load %arg47[%c0_415, %c16_416] : memref<64x64xf32, #tpu.memory_space<vmem>>, vector<8x16xf32>
    tpu.vector_store %arg47[%c0_415, %c16_416], %1285 {strides = array<i32>} : memref<64x64xf32, #tpu.memory_space<vmem>>, vector<8x16xf32>,
    %c0_417 = arith.constant 0 : index
    %c0_418 = arith.constant 0 : index
    %1287 = vector.load %arg47[%c0_417, %c0_418] : memref<64x64xf32, #tpu.memory_space<vmem>>, vector<64x32xf32>
    %c0_419 = arith.constant 0 : index
    %c0_420 = arith.constant 0 : index
    %1288 = vector.load %arg40[%c0_419, %c0_420] : memref<32x16xf32, #tpu.memory_space<vmem>>, vector<32x16xf32>
    %cst_421 = arith.constant dense<0.000000e+00> : vector<64x16xf32>
    %1289 = tpu.matmul %1287, %1288, %cst_421 {dimension_numbers = #tpu.dot_dimension_numbers<[1], [0], [0], [1], [0, 0, 1, 1], [], []>} : vector<64x32xf32>, vector<32x16xf32>, vector<64x16xf32> -> vector<64x16xf32>
    %c0_422 = arith.constant 0 : index
    %c0_423 = arith.constant 0 : index
    %1290 = vector.load %arg41[%c0_422, %c0_423] : memref<1x16xf32, #tpu.memory_space<vmem>>, vector<1x16xf32>
    %1291 = vector.broadcast %1290 : vector<1x16xf32> to vector<64x16xf32>
    %1292 = arith.addf %1289, %1291 : vector<64x16xf32>
    %c0_424 = arith.constant 0 : index
    %c0_425 = arith.constant 0 : index
    %1293 = vector.load %arg42[%c0_424, %c0_425] : memref<64x16xf32, #tpu.memory_space<vmem>>, vector<64x16xf32>
    tpu.vector_store %arg42[%c0_424, %c0_425], %1292 {strides = array<i32>} : memref<64x16xf32, #tpu.memory_space<vmem>>, vector<64x16xf32>,
    return
  }
}

</mosaic_0001>

<bundles_post_ra>
// kernel: _lambda_.1
= control target key start
LH: loop header
LB: loop body
LE: loop exit
PB: predicated region body
PF: predicated region fallthrough
CT: control target
= control target key end

     0   :  { %s11756_s6 = smov 1   ;;  %s11757_s10 = smov 2   ;;  %s13620_s0 = inlined_call_operand.smem [shape: u32[46], index: -1, kind: input, shape index: {}] }
   0x1   :  { %s11841_s5 = sld [smem:[%s13620_s0]]   ;;  %s11758_s14 = smov 3  }
   0x2   :  { %s11846_s9 = sld [smem:[%s13620_s0 + %s11756_s6]]   ;;  %s11759_s18 = smov 4  }
   0x3   :  { %s11851_s13 = sld [smem:[%s13620_s0 + %s11757_s10]]   ;;  %s11760_s22 = smov 5  }
   0x4   :  { %s11856_s17 = sld [smem:[%s13620_s0 + %s11758_s14]]   ;;  %s11761_s26 = smov 6  }
   0x5   :  { %s11861_s21 = sld [smem:[%s13620_s0 + %s11759_s18]]   ;;  %s11762_s30 = smov 7  }
   0x6   :  { %s11866_s25 = sld [smem:[%s13620_s0 + %s11760_s22]]   ;;  %s11763_s4 = smov 8  }
   0x7   :  { %13646 = sst [smem:[#allocation51_spill]] %s11841_s5  ;;  %s11764_s10 = smov 9  }
   0x8   :  { %13647 = sst [smem:[#allocation52_spill]] %s11846_s9  ;;  %s11765_s15 = smov 10  }
   0x9   :  { %s11871_s29 = sld [smem:[%s13620_s0 + %s11761_s26]]   ;;  %s11766_s20 = smov 11  }
   0xa   :  { %s11876_s3 = sld [smem:[%s13620_s0 + %s11762_s30]]   ;;  %s11767_s26 = smov 12  }
   0xb   :  { %13648 = sst [smem:[#allocation53_spill]] %s11861_s21  ;;  %s11768_s1 = smov 13  }
   0xc   :  { %13649 = sst [smem:[#allocation54_spill]] %s11866_s25  ;;  %s11769_s7 = smov 14  }
   0xd   :  { %s11881_s8 = sld [smem:[%s13620_s0 + %s11763_s4]]   ;;  %s11771_s22 = smov 16  }
   0xe   :  { %s11886_s14 = sld [smem:[%s13620_s0 + %s11764_s10]]   ;;  %s11772_s28 = smov 17  }
   0xf   :  { %13650 = sst [smem:[#allocation55_spill]] %s11871_s29 }
  0x10   :  { %13651 = sst [smem:[#allocation56_spill]] %s11876_s3 }
  0x11   :  { %s11891_s19 = sld [smem:[%s13620_s0 + %s11765_s15]]   ;;  %s11770_s15 = smov 15  }
  0x12   :  { %s11896_s24 = sld [smem:[%s13620_s0 + %s11766_s20]]  }
  0x13   :  { %13652 = sst [smem:[#allocation57_spill]] %s11881_s8 }
  0x14   :  { %s11901_s30 = sld [smem:[%s13620_s0 + %s11767_s26]]  }
  0x15   :  { %s11906_s6 = sld [smem:[%s13620_s0 + %s11768_s1]]  }
  0x16   :  { %s11911_s12 = sld [smem:[%s13620_s0 + %s11769_s7]]   ;;  %s11773_s7 = smov 18  }
  0x17   :  { %13653 = sst [smem:[#allocation58_spill]] %s11891_s19 }
  0x18   :  { %13654 = sst [smem:[#allocation59_spill]] %s11896_s24 }
  0x19   :  { %s11916_s20 = sld [smem:[%s13620_s0 + %s11770_s15]]   ;;  %s11774_s15 = smov 19  }
  0x1a   :  { %13655 = sst [smem:[#allocation60_spill]] %s11901_s30 }
  0x1b   :  { %s11921_s27 = sld [smem:[%s13620_s0 + %s11771_s22]]   ;;  %s11775_s22 = smov 20  }
  0x1c   :  { %s11926_s4 = sld [smem:[%s13620_s0 + %s11772_s28]]   ;;  %s11776_s28 = smov 21  }
  0x1d   :  { %s11931_s9 = sld [smem:[%s13620_s0 + %s11773_s7]]   ;;  %s11777_s7 = smov 22  }
  0x1e   :  { %s11936_s30 = sld [smem:[%s13620_s0 + %s11774_s15]]   ;;  %s11778_s15 = smov 23  }
  0x1f   :  { %s11946_s24 = sld [smem:[%s13620_s0 + %s11776_s28]]   ;;  %s11780_s28 = smov 25  }
  0x20   :  { %s11956_s19 = sld [smem:[%s13620_s0 + %s11778_s15]]   ;;  %s11782_s15 = smov 27  }
  0x21   :  { %13656 = sst [smem:[#allocation61_spill]] %s11921_s27 }
  0x22   :  { %13657 = sst [smem:[#allocation62_spill]] %s11926_s4 }
  0x23   :  { %13658 = sst [smem:[#allocation63_spill]] %s11931_s9 }
  0x24   :  { %s11941_s27 = sld [smem:[%s13620_s0 + %s11775_s22]]   ;;  %s11779_s22 = smov 24  }
  0x25   :  { %13660 = sst [smem:[#allocation65_spill]] %s11946_s24 }
  0x26   :  { %s11951_s9 = sld [smem:[%s13620_s0 + %s11777_s7]]   ;;  %s11781_s7 = smov 26  }
  0x27   :  { %13661 = sst [smem:[#allocation66_spill]] %s11956_s19 }
  0x28   :  { %s11966_s8 = sld [smem:[%s13620_s0 + %s11780_s28]]   ;;  %s11784_s28 = smov 29  }
  0x29   :  { %s11971_s3 = sld [smem:[%s13620_s0 + %s11781_s7]]   ;;  %s11785_s7 = smov 30  }
  0x2a   :  { %13659 = sst [smem:[#allocation64_spill]] %s11941_s27 }
  0x2b   :  { %s11961_s27 = sld [smem:[%s13620_s0 + %s11779_s22]]   ;;  %s11783_s22 = smov 28  }
  0x2c   :  { %s11976_s29 = sld [smem:[%s13620_s0 + %s11782_s15]]   ;;  %s11786_s15 = smov 31  }
  0x2d   :  { %s11986_s25 = sld [smem:[%s13620_s0 + %s11784_s28]]   ;;  %s11788_s28 = smov 33  }
  0x2e   :  { %s11996_s21 = sld [smem:[%s13620_s0 + %s11786_s15]]   ;;  %s11790_s15 = smov 35  }
  0x2f   :  { %13663 = sst [smem:[#allocation68_spill]] %s11971_s3 }
  0x30   :  { %s11991_s3 = sld [smem:[%s13620_s0 + %s11785_s7]]   ;;  %s11789_s7 = smov 34  }
  0x31   :  { %13662 = sst [smem:[#allocation67_spill]] %s11961_s27 }
  0x32   :  { %13664 = sst [smem:[#allocation69_spill]] %s11976_s29 }
  0x33   :  { %s11981_s27 = sld [smem:[%s13620_s0 + %s11783_s22]]   ;;  %s11787_s22 = smov 32  }
  0x34   :  { %13665 = sst [smem:[#allocation70_spill]] %s11986_s25 }
  0x35   :  { %13666 = sst [smem:[#allocation71_spill]] %s11996_s21 }
  0x36   :  { %s12001_s5 = sld [smem:[%s13620_s0 + %s11787_s22]]   ;;  %s11791_s22 = smov 36  }
  0x37   :  { %s12006_s25 = sld [smem:[%s13620_s0 + %s11788_s28]]   ;;  %s11792_s28 = smov 37  }
  0x38   :  { %s12011_s29 = sld [smem:[%s13620_s0 + %s11789_s7]]   ;;  %s11793_s7 = smov 38  }
  0x39   :  { %s12016_s21 = sld [smem:[%s13620_s0 + %s11790_s15]]   ;;  %s11794_s15 = smov 39  }
  0x3a   :  { %s12021_s19 = sld [smem:[%s13620_s0 + %s11791_s22]]   ;;  %s11795_s22 = smov 40  }
  0x3b   :  { %s12036_s24 = sld [smem:[%s13620_s0 + %s11794_s15]]   ;;  %s11798_s15 = smov 43  }
  0x3d   :  { %13667 = sst [smem:[#allocation72_spill]] %s12006_s25 }
  0x3e   :  { %13668 = sst [smem:[#allocation73_spill]] %s12011_s29 }
  0x3f   :  { %s12026_s25 = sld [smem:[%s13620_s0 + %s11792_s28]]   ;;  %s11796_s28 = smov 41  }
  0x40   :  { %13669 = sst [smem:[#allocation74_spill]] %s12021_s19 }
  0x41   :  { %s12031_s29 = sld [smem:[%s13620_s0 + %s11793_s7]]   ;;  %s11797_s7 = smov 42  }
  0x42   :  { %13671 = sst [smem:[#allocation76_spill]] %s12036_s24 }
  0x43   :  { %s12041_s19 = sld [smem:[%s13620_s0 + %s11795_s22]]   ;;  %s11799_s22 = smov 44  }
  0x44   :  { %s12046_s4 = sld [smem:[%s13620_s0 + %s11796_s28]]   ;;  %s11800_s28 = smov 45  }
  0x45   :  { %s12056_s24 = sld [smem:[%s13620_s0 + %s11798_s15]]  }
  0x47   :  { %13670 = sst [smem:[#allocation75_spill]] %s12031_s29 }
  0x48   :  { %s12051_s29 = sld [smem:[%s13620_s0 + %s11797_s7]]  }
  0x49   :  { %13672 = sst [smem:[#allocation77_spill]] %s12041_s19 }
  0x4a   :  { %13673 = sst [smem:[#allocation78_spill]] %s12046_s4 }
  0x4b   :  { %s12061_s19 = sld [smem:[%s13620_s0 + %s11799_s22]]  }
  0x4c   :  { %s12066_s4 = sld [smem:[%s13620_s0 + %s11800_s28]]  }
  0x4d   :  { %97 = vsyncpa [#allocation5], 0 }
  0x4e   :  { %98 = vsyncpa [#allocation7], 0 }
  0x4f   :  { %99 = vsyncpa [#allocation10], 0 }
  0x50   :  { %100 = vsyncpa [#allocation13], 0 }
  0x51   :  { %101 = vsyncpa [#allocation16], 0 }
  0x52   :  { %102 = vsyncpa [#allocation19], 0 }
  0x53   :  { %103 = vsyncpa [#allocation22], 0 }
  0x54   :  { %104 = vsyncpa [#allocation25], 0 }
  0x55   :  { %105 = vsyncpa [#allocation28], 0 }
  0x56   :  { %106 = vsyncpa [#allocation31], 0 }
  0x57   :  { %107 = vsyncpa [#allocation34], 0 }
  0x58   :  { %108 = vsyncpa [#allocation37], 0  ;;  %s11801_s7 = smov [#allocation6]   ;;  %s11802_s11 = smov [#allocation9]  }
  0x59   :  { %s130_s10 = sshll.u32 %s11801_s7, 4  ;;  %s169_s0 = sshll.u32 %s11802_s11, 4  ;;  %s131_s10 = int_to_ptr.vmem [resolvable:$true] %s130_s10  ;;  %s170_s0 = int_to_ptr.vmem [resolvable:$true] %s169_s0 }
  0x5a   :  { %s11226_s15 = scalar_lea.hbm %s11856_s17, 512 }
  0x5b   :  { %p11227_p0 = scmp.ne.s32.totalorder %s11856_s17, %s11226_s15  ;;  %p11230_p1 = scmp.lt.u32.totalorder %s11226_s15, %s11856_s17 }
  0x5d   :  { %p11232_p2 = pnand %p11230_p1, %p11227_p0 }
  0x5f   :  { %11235 = shalt.err (!%p11232_p2)
}
  0x60   :  { %s11236_s16 = scalar_lea.vmem %s131_s10, 512  ;;  %p11241_p4 = scmp.lt.s32.totalorder %s131_s10, %s131_s10 }
  0x61   :  { %p11237_p3 = scmp.ne.s32.totalorder %s131_s10, %s11236_s16  ;;  %p11242_p5 = scmp.lt.s32.totalorder %s11236_s16, %s11236_s16 }
  0x63   :  { %p11243_p6 = por %p11242_p5, %p11241_p4 }
  0x65   :  { %p11244_p7 = pnand %p11243_p6, %p11237_p3 }
  0x67   :  { %11247 = shalt.err (!%p11244_p7)
}
  0x68   :  { %s11803_s18 = smov 256   ;;  %s11804_s22 = smov 16  }
  0x69   :  { %136 = dma.hbm_to_vmem [thread:$0]  %s11856_s17, 512, %s131_s10, [#allocation7], %s11803_s18, %s11803_s18, %s11804_s22  }
  0x6a   :  { %s11248_s23 = scalar_lea.hbm %s11906_s6, 32 }
  0x6b   :  { %p11249_p8 = scmp.ne.s32.totalorder %s11906_s6, %s11248_s23  ;;  %p11252_p9 = scmp.lt.u32.totalorder %s11248_s23, %s11906_s6 }
  0x6d   :  { %p11254_p10 = pnand %p11252_p9, %p11249_p8 }
  0x6f   :  { %11257 = shalt.err (!%p11254_p10)
}
  0x70   :  { %s11258_s26 = scalar_lea.vmem %s170_s0, 32  ;;  %p11263_p12 = scmp.lt.s32.totalorder %s170_s0, %s170_s0 }
  0x71   :  { %p11259_p11 = scmp.ne.s32.totalorder %s170_s0, %s11258_s26  ;;  %p11264_p13 = scmp.lt.s32.totalorder %s11258_s26, %s11258_s26 }
  0x73   :  { %p11265_p0 = por %p11264_p13, %p11263_p12 }
  0x75   :  { %p11266_p1 = pnand %p11265_p0, %p11259_p11 }
  0x77   :  { %11269 = shalt.err (!%p11266_p1)
}
  0x78   :  { %172 = dma.hbm_to_vmem [thread:$0]  %s11906_s6, 32, %s170_s0, [#allocation10]  }
  0x79   :  { %s11805_s28 = smov [#allocation12]   ;;  %s11806_s17 = smov [#allocation15]  }
  0x7a   :  { %s191_s1 = sshll.u32 %s11805_s28, 4  ;;  %s215_s2 = sshll.u32 %s11806_s17, 4  ;;  %s192_s1 = int_to_ptr.vmem [resolvable:$true] %s191_s1  ;;  %s216_s2 = int_to_ptr.vmem [resolvable:$true] %s215_s2 }
  0x7b   :  { %s11270_s7 = scalar_lea.hbm %s11916_s20, 16 }
  0x7c   :  { %p11271_p2 = scmp.ne.s32.totalorder %s11916_s20, %s11270_s7  ;;  %p11274_p3 = scmp.lt.u32.totalorder %s11270_s7, %s11916_s20 }
  0x7e   :  { %p11276_p4 = pnand %p11274_p3, %p11271_p2 }
  0x80   :  { %11279 = shalt.err (!%p11276_p4)
}
  0x81   :  { %s11280_s10 = scalar_lea.vmem %s192_s1, 16  ;;  %s11284_s11 = scalar_lea.vmem %s192_s1, 32 }
  0x82   :  { %p11281_p5 = scmp.ne.s32.totalorder %s192_s1, %s11280_s10  ;;  %p11285_p6 = scmp.lt.s32.totalorder %s192_s1, %s192_s1 }
  0x83   :  { %p11286_p7 = scmp.lt.s32.totalorder %s11284_s11, %s11280_s10 }
  0x85   :  { %p11287_p8 = por %p11286_p7, %p11285_p6 }
  0x87   :  { %p11288_p9 = pnand %p11287_p8, %p11281_p5 }
  0x89   :  { %11291 = shalt.err (!%p11288_p9)
}
  0x8a   :  { %194 = dma.hbm_to_vmem [thread:$0]  %s11916_s20, 16, %s192_s1, [#allocation13]  }
  0x8b   :  { %s11292_s6 = scalar_lea.hbm %s11936_s30, 16 }
  0x8c   :  { %p11293_p10 = scmp.ne.s32.totalorder %s11936_s30, %s11292_s6  ;;  %p11296_p11 = scmp.lt.u32.totalorder %s11292_s6, %s11936_s30 }
  0x8e   :  { %p11298_p12 = pnand %p11296_p11, %p11293_p10 }
  0x90   :  { %11301 = shalt.err (!%p11298_p12)
}
  0x91   :  { %s11302_s0 = scalar_lea.vmem %s216_s2, 16  ;;  %s11306_s15 = scalar_lea.vmem %s216_s2, 32 }
  0x92   :  { %p11303_p13 = scmp.ne.s32.totalorder %s216_s2, %s11302_s0  ;;  %p11307_p0 = scmp.lt.s32.totalorder %s216_s2, %s216_s2 }
  0x93   :  { %p11308_p1 = scmp.lt.s32.totalorder %s11306_s15, %s11302_s0 }
  0x95   :  { %p11309_p2 = por %p11308_p1, %p11307_p0 }
  0x97   :  { %p11310_p3 = pnand %p11309_p2, %p11303_p13 }
  0x99   :  { %11313 = shalt.err (!%p11310_p3)
}
  0x9a   :  { %218 = dma.hbm_to_vmem [thread:$0]  %s11936_s30, 16, %s216_s2, [#allocation16]  }
  0x9b   :  { %s11807_s16 = smov [#allocation18]   ;;  %s11808_s23 = smov [#allocation21]  }
  0x9c   :  { %s236_s20 = sshll.u32 %s11807_s16, 4  ;;  %s261_s26 = sshll.u32 %s11808_s23, 4  ;;  %s237_s20 = int_to_ptr.vmem [resolvable:$true] %s236_s20  ;;  %s12087_s26 = int_to_ptr.vmem [resolvable:$true] %s261_s26 }
  0x9d   :  { %s11314_s28 = scalar_lea.hbm %s11951_s9, 512 }
  0x9e   :  { %p11315_p4 = scmp.ne.s32.totalorder %s11951_s9, %s11314_s28  ;;  %p11318_p5 = scmp.lt.u32.totalorder %s11314_s28, %s11951_s9 }
  0xa0   :  { %p11320_p6 = pnand %p11318_p5, %p11315_p4 }
  0xa2   :  { %11323 = shalt.err (!%p11320_p6)
}
  0xa3   :  { %s11324_s1 = scalar_lea.vmem %s237_s20, 512  ;;  %p11329_p8 = scmp.lt.s32.totalorder %s237_s20, %s237_s20 }
  0xa4   :  { %p11325_p7 = scmp.ne.s32.totalorder %s237_s20, %s11324_s1  ;;  %p11330_p9 = scmp.lt.s32.totalorder %s11324_s1, %s11324_s1 }
  0xa6   :  { %p11331_p10 = por %p11330_p9, %p11329_p8 }
  0xa8   :  { %p11332_p11 = pnand %p11331_p10, %p11325_p7 }
  0xaa   :  { %11335 = shalt.err (!%p11332_p11)
}
  0xab   :  { %s11809_s30 = smov 128   ;;  %s11810_s17 = smov 8  }
  0xac   :  { %242 = dma.hbm_to_vmem [thread:$0]  %s11951_s9, 512, %s237_s20, [#allocation19], %s11809_s30, %s11809_s30, %s11810_s17  }
  0xad   :  { %s11336_s2 = scalar_lea.hbm %s11966_s8, 16 }
  0xae   :  { %p11337_p12 = scmp.ne.s32.totalorder %s11966_s8, %s11336_s2  ;;  %p11340_p13 = scmp.lt.u32.totalorder %s11336_s2, %s11966_s8 }
  0xb0   :  { %p11342_p0 = pnand %p11340_p13, %p11337_p12 }
  0xb2   :  { %11345 = shalt.err (!%p11342_p0)
}
  0xb3   :  { %s11346_s7 = scalar_lea.vmem %s12087_s26, 16  ;;  %s11350_s10 = scalar_lea.vmem %s12087_s26, 32 }
  0xb4   :  { %p11347_p1 = scmp.ne.s32.totalorder %s12087_s26, %s11346_s7  ;;  %p11351_p2 = scmp.lt.s32.totalorder %s12087_s26, %s12087_s26 }
  0xb5   :  { %p11352_p3 = scmp.lt.s32.totalorder %s11350_s10, %s11346_s7 }
  0xb7   :  { %p11353_p4 = por %p11352_p3, %p11351_p2 }
  0xb9   :  { %p11354_p5 = pnand %p11353_p4, %p11347_p1 }
  0xbb   :  { %11357 = shalt.err (!%p11354_p5)
}
  0xbc   :  { %264 = dma.hbm_to_vmem [thread:$0]  %s11966_s8, 16, %s12087_s26, [#allocation22]  }
  0xbd   :  { %s11811_s9 = smov [#allocation24]   ;;  %s11812_s6 = smov [#allocation27]  }
  0xbe   :  { %s282_s11 = sshll.u32 %s11811_s9, 4  ;;  %s306_s0 = sshll.u32 %s11812_s6, 4  ;;  %s283_s11 = int_to_ptr.vmem [resolvable:$true] %s282_s11  ;;  %s12106_s0 = int_to_ptr.vmem [resolvable:$true] %s306_s0 }
  0xbf   :  { %s11358_s15 = scalar_lea.hbm %s11981_s27, 512 }
  0xc0   :  { %p11359_p6 = scmp.ne.s32.totalorder %s11981_s27, %s11358_s15  ;;  %p11362_p7 = scmp.lt.u32.totalorder %s11358_s15, %s11981_s27 }
  0xc2   :  { %p11364_p8 = pnand %p11362_p7, %p11359_p6 }
  0xc4   :  { %11367 = shalt.err (!%p11364_p8)
}
  0xc5   :  { %s11368_s16 = scalar_lea.vmem %s283_s11, 512  ;;  %p11373_p10 = scmp.lt.s32.totalorder %s283_s11, %s283_s11 }
  0xc6   :  { %p11369_p9 = scmp.ne.s32.totalorder %s283_s11, %s11368_s16  ;;  %p11374_p11 = scmp.lt.s32.totalorder %s11368_s16, %s11368_s16 }
  0xc8   :  { %p11375_p12 = por %p11374_p11, %p11373_p10 }
  0xca   :  { %p11376_p13 = pnand %p11375_p12, %p11369_p9 }
  0xcc   :  { %11379 = shalt.err (!%p11376_p13)
}
  0xcd   :  { %288 = dma.hbm_to_vmem [thread:$0]  %s11981_s27, 512, %s283_s11, [#allocation25], %s11809_s30, %s11809_s30, %s11810_s17  }
  0xce   :  { %s11380_s8 = scalar_lea.hbm %s11991_s3, 512 }
  0xcf   :  { %p11381_p0 = scmp.ne.s32.totalorder %s11991_s3, %s11380_s8  ;;  %p11384_p1 = scmp.lt.u32.totalorder %s11380_s8, %s11991_s3 }
  0xd1   :  { %p11386_p2 = pnand %p11384_p1, %p11381_p0 }
  0xd3   :  { %11389 = shalt.err (!%p11386_p2)
}
  0xd4   :  { %s11390_s20 = scalar_lea.vmem %s12106_s0, 512  ;;  %p11395_p4 = scmp.lt.s32.totalorder %s12106_s0, %s12106_s0 }
  0xd5   :  { %p11391_p3 = scmp.ne.s32.totalorder %s12106_s0, %s11390_s20  ;;  %p11396_p5 = scmp.lt.s32.totalorder %s11390_s20, %s11390_s20 }
  0xd7   :  { %p11397_p6 = por %p11396_p5, %p11395_p4 }
  0xd9   :  { %p11398_p7 = pnand %p11397_p6, %p11391_p3 }
  0xdb   :  { %11401 = shalt.err (!%p11398_p7)
}
  0xdc   :  { %312 = dma.hbm_to_vmem [thread:$0]  %s11991_s3, 512, %s12106_s0, [#allocation28], %s11809_s30, %s11809_s30, %s11810_s17  }
  0xdd   :  { %s11813_s27 = smov [#allocation30]   ;;  %s11814_s26 = smov [#allocation33]  }
  0xde   :  { %s328_s23 = sshll.u32 %s11813_s27, 4  ;;  %s355_s28 = sshll.u32 %s11814_s26, 4  ;;  %s329_s23 = int_to_ptr.vmem [resolvable:$true] %s328_s23  ;;  %s356_s28 = int_to_ptr.vmem [resolvable:$true] %s355_s28 }
  0xdf   :  { %s11402_s1 = scalar_lea.hbm %s12001_s5, 512 }
  0xe0   :  { %p11403_p8 = scmp.ne.s32.totalorder %s12001_s5, %s11402_s1  ;;  %p11406_p9 = scmp.lt.u32.totalorder %s11402_s1, %s12001_s5 }
  0xe2   :  { %p11408_p10 = pnand %p11406_p9, %p11403_p8 }
  0xe4   :  { %11411 = shalt.err (!%p11408_p10)
}
  0xe5   :  { %s11412_s2 = scalar_lea.vmem %s329_s23, 512  ;;  %p11417_p12 = scmp.lt.s32.totalorder %s329_s23, %s329_s23 }
  0xe6   :  { %p11413_p11 = scmp.ne.s32.totalorder %s329_s23, %s11412_s2  ;;  %p11418_p13 = scmp.lt.s32.totalorder %s11412_s2, %s11412_s2 }
  0xe8   :  { %p11419_p0 = por %p11418_p13, %p11417_p12 }
  0xea   :  { %p11420_p1 = pnand %p11419_p0, %p11413_p11 }
  0xec   :  { %11423 = shalt.err (!%p11420_p1)
}
  0xed   :  { %334 = dma.hbm_to_vmem [thread:$0]  %s12001_s5, 512, %s329_s23, [#allocation31], %s11809_s30, %s11809_s30, %s11810_s17  }
  0xee   :  { %s11424_s3 = scalar_lea.hbm %s12016_s21, 16 }
  0xef   :  { %p11425_p2 = scmp.ne.s32.totalorder %s12016_s21, %s11424_s3  ;;  %p11428_p3 = scmp.lt.u32.totalorder %s11424_s3, %s12016_s21 }
  0xf1   :  { %p11430_p4 = pnand %p11428_p3, %p11425_p2 }
  0xf3   :  { %11433 = shalt.err (!%p11430_p4)
}
  0xf4   :  { %s11434_s7 = scalar_lea.vmem %s356_s28, 16  ;;  %s11438_s10 = scalar_lea.vmem %s356_s28, 32 }
  0xf5   :  { %p11435_p5 = scmp.ne.s32.totalorder %s356_s28, %s11434_s7  ;;  %p11439_p6 = scmp.lt.s32.totalorder %s356_s28, %s356_s28 }
  0xf6   :  { %p11440_p7 = scmp.lt.s32.totalorder %s11438_s10, %s11434_s7 }
  0xf8   :  { %p11441_p8 = por %p11440_p7, %p11439_p6 }
  0xfa   :  { %p11442_p9 = pnand %p11441_p8, %p11435_p5 }
  0xfc   :  { %11445 = shalt.err (!%p11442_p9)
}
  0xfd   :  { %358 = dma.hbm_to_vmem [thread:$0]  %s12016_s21, 16, %s356_s28, [#allocation34]  }
  0xfe   :  { %s11815_s9 = smov [#allocation36]   ;;  %s11816_s11 = smov [#allocation4]  }
  0xff   :  { %s376_s5 = sshll.u32 %s11815_s9, 4  ;;  %s118_s6 = sshll.u32 %s11816_s11, 4  ;;  %s377_s5 = int_to_ptr.vmem [resolvable:$true] %s376_s5  ;;  %s12138_s6 = int_to_ptr.vmem [resolvable:$true] %s118_s6 }
 0x100   :  { %s11446_s0 = scalar_lea.hbm %s12026_s25, 512 }
 0x101   :  { %p11447_p10 = scmp.ne.s32.totalorder %s12026_s25, %s11446_s0  ;;  %p11450_p11 = scmp.lt.u32.totalorder %s11446_s0, %s12026_s25 }
 0x103   :  { %p11452_p12 = pnand %p11450_p11, %p11447_p10 }
 0x105   :  { %11455 = shalt.err (!%p11452_p12)
}
 0x106   :  { %s11456_s15 = scalar_lea.vmem %s377_s5, 512  ;;  %p11461_p0 = scmp.lt.s32.totalorder %s377_s5, %s377_s5 }
 0x107   :  { %p11457_p13 = scmp.ne.s32.totalorder %s377_s5, %s11456_s15  ;;  %p11462_p1 = scmp.lt.s32.totalorder %s11456_s15, %s11456_s15 }
 0x109   :  { %p11463_p2 = por %p11462_p1, %p11461_p0 }
 0x10b   :  { %p11464_p3 = pnand %p11463_p2, %p11457_p13 }
 0x10d   :  { %11467 = shalt.err (!%p11464_p3)
}
 0x10e   :  { %382 = dma.hbm_to_vmem [thread:$0]  %s12026_s25, 512, %s377_s5, [#allocation37], %s11809_s30, %s11809_s30, %s11810_s17  }
 0x10f   :  { %s11468_s21 = scalar_lea.hbm %s11851_s13, 512 }
 0x110   :  { %p11469_p4 = scmp.ne.s32.totalorder %s11851_s13, %s11468_s21  ;;  %p11472_p5 = scmp.lt.u32.totalorder %s11468_s21, %s11851_s13 }
 0x112   :  { %p11474_p6 = pnand %p11472_p5, %p11469_p4 }
 0x114   :  { %11477 = shalt.err (!%p11474_p6)
}
 0x115   :  { %s11478_s16 = scalar_lea.vmem %s12138_s6, 512  ;;  %p11483_p8 = scmp.lt.s32.totalorder %s12138_s6, %s12138_s6 }
 0x116   :  { %p11479_p7 = scmp.ne.s32.totalorder %s12138_s6, %s11478_s16  ;;  %p11484_p9 = scmp.lt.s32.totalorder %s11478_s16, %s11478_s16 }
 0x118   :  { %p11485_p10 = por %p11484_p9, %p11483_p8 }
 0x11a   :  { %p11486_p11 = pnand %p11485_p10, %p11479_p7 }
 0x11c   :  { %11489 = shalt.err (!%p11486_p11)
}
 0x11d   :  { %124 = dma.hbm_to_vmem [thread:$0]  %s11851_s13, 512, %s12138_s6, [#allocation5], %s11803_s18, %s11803_s18, %s11804_s22  }
 0x11e   :  { %s11817_s25 = smov [#allocation8]   ;;  %s11818_s20 = smov [#allocation11]  }
 0x11f   :  { %s153_s8 = sshll.u32 %s11817_s25, 4  ;;  %s178_s27 = sshll.u32 %s11818_s20, 4  ;;  %s154_s8 = int_to_ptr.vmem [resolvable:$true] %s153_s8  ;;  %s12159_s27 = int_to_ptr.vmem [resolvable:$true] %s178_s27 }
 0x120   :  { %s11490_s23 = scalar_lea.hbm %s11886_s14, 32 }
 0x121   :  { %p11491_p12 = scmp.ne.s32.totalorder %s11886_s14, %s11490_s23  ;;  %p11494_p13 = scmp.lt.u32.totalorder %s11490_s23, %s11886_s14 }
 0x123   :  { %p11496_p0 = pnand %p11494_p13, %p11491_p12 }
 0x125   :  { %11499 = shalt.err (!%p11496_p0)
}
 0x126   :  { %s11500_s26 = scalar_lea.vmem %s154_s8, 32  ;;  %p11505_p2 = scmp.lt.s32.totalorder %s154_s8, %s154_s8 }
 0x127   :  { %p11501_p1 = scmp.ne.s32.totalorder %s154_s8, %s11500_s26  ;;  %p11506_p3 = scmp.lt.s32.totalorder %s11500_s26, %s11500_s26 }
 0x129   :  { %p11507_p4 = por %p11506_p3, %p11505_p2 }
 0x12b   :  { %p11508_p5 = pnand %p11507_p4, %p11501_p1 }
 0x12d   :  { %11511 = shalt.err (!%p11508_p5)
}
 0x12e   :  { %156 = dma.hbm_to_vmem [thread:$0]  %s11886_s14, 32, %s154_s8, [#allocation7]  }
 0x12f   :  { %s11512_s13 = scalar_lea.hbm %s11911_s12, 1024 }
 0x130   :  { %p11513_p6 = scmp.ne.s32.totalorder %s11911_s12, %s11512_s13  ;;  %p11516_p7 = scmp.lt.u32.totalorder %s11512_s13, %s11911_s12 }
 0x132   :  { %p11518_p8 = pnand %p11516_p7, %p11513_p6 }
 0x134   :  { %11521 = shalt.err (!%p11518_p8)
}
 0x135   :  { %s11522_s18 = scalar_lea.vmem %s12159_s27, 1024  ;;  %p11527_p10 = scmp.lt.s32.totalorder %s12159_s27, %s12159_s27 }
 0x136   :  { %p11523_p9 = scmp.ne.s32.totalorder %s12159_s27, %s11522_s18  ;;  %p11528_p11 = scmp.lt.s32.totalorder %s11522_s18, %s11522_s18 }
 0x138   :  { %p11529_p12 = por %p11528_p11, %p11527_p10 }
 0x13a   :  { %p11530_p13 = pnand %p11529_p12, %p11523_p9 }
 0x13c   :  { %11533 = shalt.err (!%p11530_p13)
}
 0x13d   :  { %s13674_s14 = sld [smem:[#allocation62_spill]]  ;;  %s11819_s22 = smov [#allocation14]  }
 0x13e   :  { %184 = dma.hbm_to_vmem [thread:$0]  %s11911_s12, 1024, %s12159_s27, [#allocation10], %s11809_s30, %s11809_s30, %s11810_s17  }
 0x13f   :  { %s203_s28 = sshll.u32 %s11819_s22, 4  ;;  %s11820_s1 = smov [#allocation17]   ;;  %s204_s28 = int_to_ptr.vmem [resolvable:$true] %s203_s28 }
 0x140   :  { %s227_s2 = sshll.u32 %s11820_s1, 4  ;;  %s228_s2 = int_to_ptr.vmem [resolvable:$true] %s227_s2 }
 0x143   :  { %s11534_s3 = scalar_lea.hbm %s13674_s14, 16 }
 0x144   :  { %p11535_p0 = scmp.ne.s32.totalorder %s13674_s14, %s11534_s3  ;;  %p11538_p1 = scmp.lt.u32.totalorder %s11534_s3, %s13674_s14 }
 0x146   :  { %p11540_p2 = pnand %p11538_p1, %p11535_p0 }
 0x148   :  { %11543 = shalt.err (!%p11540_p2)
}
 0x149   :  { %s11544_s7 = scalar_lea.vmem %s204_s28, 16  ;;  %s11548_s10 = scalar_lea.vmem %s204_s28, 32 }
 0x14a   :  { %p11545_p3 = scmp.ne.s32.totalorder %s204_s28, %s11544_s7  ;;  %p11549_p4 = scmp.lt.s32.totalorder %s204_s28, %s204_s28 }
 0x14b   :  { %p11550_p5 = scmp.lt.s32.totalorder %s11548_s10, %s11544_s7 }
 0x14d   :  { %p11551_p6 = por %p11550_p5, %p11549_p4 }
 0x14f   :  { %p11552_p7 = pnand %p11551_p6, %p11545_p3 }
 0x151   :  { %11555 = shalt.err (!%p11552_p7)
}
 0x152   :  { %s13675_s12 = sld [smem:[#allocation65_spill]] }
 0x153   :  { %206 = dma.hbm_to_vmem [thread:$0]  %s13674_s14, 16, %s204_s28, [#allocation13]  }
 0x158   :  { %s11556_s9 = scalar_lea.hbm %s13675_s12, 16 }
 0x159   :  { %p11557_p8 = scmp.ne.s32.totalorder %s13675_s12, %s11556_s9  ;;  %p11560_p9 = scmp.lt.u32.totalorder %s11556_s9, %s13675_s12 }
 0x15b   :  { %p11562_p10 = pnand %p11560_p9, %p11557_p8 }
 0x15d   :  { %11565 = shalt.err (!%p11562_p10)
}
 0x15e   :  { %s11566_s5 = scalar_lea.vmem %s228_s2, 16  ;;  %s11570_s11 = scalar_lea.vmem %s228_s2, 32 }
 0x15f   :  { %p11567_p11 = scmp.ne.s32.totalorder %s228_s2, %s11566_s5  ;;  %p11571_p12 = scmp.lt.s32.totalorder %s228_s2, %s228_s2 }
 0x160   :  { %p11572_p13 = scmp.lt.s32.totalorder %s11570_s11, %s11566_s5 }
 0x162   :  { %p11573_p0 = por %p11572_p13, %p11571_p12 }
 0x164   :  { %p11574_p1 = pnand %p11573_p0, %p11567_p11 }
 0x166   :  { %11577 = shalt.err (!%p11574_p1)
}
 0x167   :  { %s13676_s6 = sld [smem:[#allocation66_spill]]  ;;  %s11821_s0 = smov [#allocation20]  }
 0x168   :  { %230 = dma.hbm_to_vmem [thread:$0]  %s13675_s12, 16, %s228_s2, [#allocation16]  }
 0x169   :  { %s249_s15 = sshll.u32 %s11821_s0, 4  ;;  %s11822_s21 = smov [#allocation23]   ;;  %s250_s15 = int_to_ptr.vmem [resolvable:$true] %s249_s15 }
 0x16a   :  { %s273_s16 = sshll.u32 %s11822_s21, 4  ;;  %s274_s16 = int_to_ptr.vmem [resolvable:$true] %s273_s16 }
 0x16d   :  { %s11578_s25 = scalar_lea.hbm %s13676_s6, 16 }
 0x16e   :  { %p11579_p2 = scmp.ne.s32.totalorder %s13676_s6, %s11578_s25  ;;  %p11582_p3 = scmp.lt.u32.totalorder %s11578_s25, %s13676_s6 }
 0x170   :  { %p11584_p4 = pnand %p11582_p3, %p11579_p2 }
 0x172   :  { %11587 = shalt.err (!%p11584_p4)
}
 0x173   :  { %s11588_s8 = scalar_lea.vmem %s250_s15, 16  ;;  %s11592_s20 = scalar_lea.vmem %s250_s15, 32 }
 0x174   :  { %p11589_p5 = scmp.ne.s32.totalorder %s250_s15, %s11588_s8  ;;  %p11593_p6 = scmp.lt.s32.totalorder %s250_s15, %s250_s15 }
 0x175   :  { %p11594_p7 = scmp.lt.s32.totalorder %s11592_s20, %s11588_s8 }
 0x177   :  { %p11595_p8 = por %p11594_p7, %p11593_p6 }
 0x179   :  { %p11596_p9 = pnand %p11595_p8, %p11589_p5 }
 0x17b   :  { %11599 = shalt.err (!%p11596_p9)
}
 0x17c   :  { %s13677_s27 = sld [smem:[#allocation69_spill]] }
 0x17d   :  { %252 = dma.hbm_to_vmem [thread:$0]  %s13676_s6, 16, %s250_s15, [#allocation19]  }
 0x182   :  { %s11600_s23 = scalar_lea.hbm %s13677_s27, 16 }
 0x183   :  { %p11601_p10 = scmp.ne.s32.totalorder %s13677_s27, %s11600_s23  ;;  %p11604_p11 = scmp.lt.u32.totalorder %s11600_s23, %s13677_s27 }
 0x185   :  { %p11606_p12 = pnand %p11604_p11, %p11601_p10 }
 0x187   :  { %11609 = shalt.err (!%p11606_p12)
}
 0x188   :  { %s11610_s26 = scalar_lea.vmem %s274_s16, 16  ;;  %s11614_s13 = scalar_lea.vmem %s274_s16, 32 }
 0x189   :  { %p11611_p13 = scmp.ne.s32.totalorder %s274_s16, %s11610_s26  ;;  %p11615_p0 = scmp.lt.s32.totalorder %s274_s16, %s274_s16 }
 0x18a   :  { %p11616_p1 = scmp.lt.s32.totalorder %s11614_s13, %s11610_s26 }
 0x18c   :  { %p11617_p2 = por %p11616_p1, %p11615_p0 }
 0x18e   :  { %p11618_p3 = pnand %p11617_p2, %p11611_p13 }
 0x190   :  { %11621 = shalt.err (!%p11618_p3)
}
 0x191   :  { %s13678_s18 = sld [smem:[#allocation70_spill]]  ;;  %s11823_s14 = smov [#allocation26]  }
 0x192   :  { %276 = dma.hbm_to_vmem [thread:$0]  %s13677_s27, 16, %s274_s16, [#allocation22]  }
 0x193   :  { %s294_s22 = sshll.u32 %s11823_s14, 4  ;;  %s11824_s28 = smov [#allocation29]   ;;  %s295_s22 = int_to_ptr.vmem [resolvable:$true] %s294_s22 }
 0x194   :  { %s319_s1 = sshll.u32 %s11824_s28, 4  ;;  %s320_s1 = int_to_ptr.vmem [resolvable:$true] %s319_s1 }
 0x197   :  { %s11622_s2 = scalar_lea.hbm %s13678_s18, 512 }
 0x198   :  { %p11623_p4 = scmp.ne.s32.totalorder %s13678_s18, %s11622_s2  ;;  %p11626_p5 = scmp.lt.u32.totalorder %s11622_s2, %s13678_s18 }
 0x19a   :  { %p11628_p6 = pnand %p11626_p5, %p11623_p4 }
 0x19c   :  { %11631 = shalt.err (!%p11628_p6)
}
 0x19d   :  { %s11632_s3 = scalar_lea.vmem %s295_s22, 512  ;;  %p11637_p8 = scmp.lt.s32.totalorder %s295_s22, %s295_s22 }
 0x19e   :  { %p11633_p7 = scmp.ne.s32.totalorder %s295_s22, %s11632_s3  ;;  %p11638_p9 = scmp.lt.s32.totalorder %s11632_s3, %s11632_s3 }
 0x1a0   :  { %p11639_p10 = por %p11638_p9, %p11637_p8 }
 0x1a2   :  { %p11640_p11 = pnand %p11639_p10, %p11633_p7 }
 0x1a4   :  { %11643 = shalt.err (!%p11640_p11)
}
 0x1a5   :  { %s13679_s7 = sld [smem:[#allocation71_spill]] }
 0x1a6   :  { %300 = dma.hbm_to_vmem [thread:$0]  %s13678_s18, 512, %s295_s22, [#allocation25], %s11809_s30, %s11809_s30, %s11810_s17  }
 0x1ab   :  { %s11644_s10 = scalar_lea.hbm %s13679_s7, 16 }
 0x1ac   :  { %p11645_p12 = scmp.ne.s32.totalorder %s13679_s7, %s11644_s10  ;;  %p11648_p13 = scmp.lt.u32.totalorder %s11644_s10, %s13679_s7 }
 0x1ae   :  { %p11650_p0 = pnand %p11648_p13, %p11645_p12 }
 0x1b0   :  { %11653 = shalt.err (!%p11650_p0)
}
 0x1b1   :  { %s11654_s12 = scalar_lea.vmem %s320_s1, 16  ;;  %s11658_s9 = scalar_lea.vmem %s320_s1, 32 }
 0x1b2   :  { %p11655_p1 = scmp.ne.s32.totalorder %s320_s1, %s11654_s12  ;;  %p11659_p2 = scmp.lt.s32.totalorder %s320_s1, %s320_s1 }
 0x1b3   :  { %p11660_p3 = scmp.lt.s32.totalorder %s11658_s9, %s11654_s12 }
 0x1b5   :  { %p11661_p4 = por %p11660_p3, %p11659_p2 }
 0x1b7   :  { %p11662_p5 = pnand %p11661_p4, %p11655_p1 }
 0x1b9   :  { %11665 = shalt.err (!%p11662_p5)
}
 0x1ba   :  { %s13680_s5 = sld [smem:[#allocation73_spill]]  ;;  %s11825_s11 = smov [#allocation32]  }
 0x1bb   :  { %322 = dma.hbm_to_vmem [thread:$0]  %s13679_s7, 16, %s320_s1, [#allocation28]  }
 0x1bc   :  { %s342_s6 = sshll.u32 %s11825_s11, 4  ;;  %s11826_s0 = smov [#allocation35]   ;;  %s343_s6 = int_to_ptr.vmem [resolvable:$true] %s342_s6 }
 0x1bd   :  { %s364_s15 = sshll.u32 %s11826_s0, 4  ;;  %s12204_s15 = int_to_ptr.vmem [resolvable:$true] %s364_s15 }
 0x1c0   :  { %s11666_s21 = scalar_lea.hbm %s13680_s5, 512 }
 0x1c1   :  { %p11667_p6 = scmp.ne.s32.totalorder %s13680_s5, %s11666_s21  ;;  %p11670_p7 = scmp.lt.u32.totalorder %s11666_s21, %s13680_s5 }
 0x1c3   :  { %p11672_p8 = pnand %p11670_p7, %p11667_p6 }
 0x1c5   :  { %11675 = shalt.err (!%p11672_p8)
}
 0x1c6   :  { %s11676_s16 = scalar_lea.vmem %s343_s6, 512  ;;  %p11681_p10 = scmp.lt.s32.totalorder %s343_s6, %s343_s6 }
 0x1c7   :  { %p11677_p9 = scmp.ne.s32.totalorder %s343_s6, %s11676_s16  ;;  %p11682_p11 = scmp.lt.s32.totalorder %s11676_s16, %s11676_s16 }
 0x1c9   :  { %p11683_p12 = por %p11682_p11, %p11681_p10 }
 0x1cb   :  { %p11684_p13 = pnand %p11683_p12, %p11677_p9 }
 0x1cd   :  { %11687 = shalt.err (!%p11684_p13)
}
 0x1ce   :  { %s13681_s25 = sld [smem:[#allocation74_spill]] }
 0x1cf   :  { %348 = dma.hbm_to_vmem [thread:$0]  %s13680_s5, 512, %s343_s6, [#allocation31], %s11809_s30, %s11809_s30, %s11810_s17  }
 0x1d4   :  { %s11688_s8 = scalar_lea.hbm %s13681_s25, 512 }
 0x1d5   :  { %p11689_p0 = scmp.ne.s32.totalorder %s13681_s25, %s11688_s8  ;;  %p11692_p1 = scmp.lt.u32.totalorder %s11688_s8, %s13681_s25 }
 0x1d7   :  { %p11694_p2 = pnand %p11692_p1, %p11689_p0 }
 0x1d9   :  { %11697 = shalt.err (!%p11694_p2)
}
 0x1da   :  { %s11698_s20 = scalar_lea.vmem %s12204_s15, 512  ;;  %p11703_p4 = scmp.lt.s32.totalorder %s12204_s15, %s12204_s15 }
 0x1db   :  { %p11699_p3 = scmp.ne.s32.totalorder %s12204_s15, %s11698_s20  ;;  %p11704_p5 = scmp.lt.s32.totalorder %s11698_s20, %s11698_s20 }
 0x1dd   :  { %p11705_p6 = por %p11704_p5, %p11703_p4 }
 0x1df   :  { %p11706_p7 = pnand %p11705_p6, %p11699_p3 }
 0x1e1   :  { %11709 = shalt.err (!%p11706_p7)
}
 0x1e2   :  { %s13682_s27 = sld [smem:[#allocation75_spill]]  ;;  %s11827_s23 = smov [#allocation38]  }
 0x1e3   :  { %370 = dma.hbm_to_vmem [thread:$0]  %s13681_s25, 512, %s12204_s15, [#allocation34], %s11809_s30, %s11809_s30, %s11810_s17  }
 0x1e4   :  { %s388_s26 = sshll.u32 %s11827_s23, 4  ;;  %s389_s26 = int_to_ptr.vmem [resolvable:$true] %s388_s26 }
 0x1e8   :  { %s11710_s13 = scalar_lea.hbm %s13682_s27, 512 }
 0x1e9   :  { %p11711_p8 = scmp.ne.s32.totalorder %s13682_s27, %s11710_s13  ;;  %p11714_p9 = scmp.lt.u32.totalorder %s11710_s13, %s13682_s27 }
 0x1eb   :  { %p11716_p10 = pnand %p11714_p9, %p11711_p8 }
 0x1ed   :  { %11719 = shalt.err (!%p11716_p10)
}
 0x1ee   :  { %s11720_s18 = scalar_lea.vmem %s389_s26, 512  ;;  %p11725_p12 = scmp.lt.s32.totalorder %s389_s26, %s389_s26 }
 0x1ef   :  { %p11721_p11 = scmp.ne.s32.totalorder %s389_s26, %s11720_s18  ;;  %p11726_p13 = scmp.lt.s32.totalorder %s11720_s18, %s11720_s18 }
 0x1f1   :  { %p11727_p0 = por %p11726_p13, %p11725_p12 }
 0x1f3   :  { %p11728_p1 = pnand %p11727_p0, %p11721_p11 }
 0x1f5   :  { %11731 = shalt.err (!%p11728_p1)
}
 0x1f6   :  { %394 = dma.hbm_to_vmem [thread:$0]  %s13682_s27, 512, %s389_s26, [#allocation37], %s11809_s30, %s11809_s30, %s11810_s17  }
 0x1f7   :  { %11732 = dma.done.wait [#allocation5], 512  }
 0x1f8   :  { %11733 = vsyncadd [#allocation5], 4294966784 }
 0x1f9   :  { %11734 = dma.done.wait [#allocation7], 544  }
 0x1fa   :  { %11735 = vsyncadd [#allocation7], 4294966752 }
 0x1fb   :  { %11736 = dma.done.wait [#allocation10], 1056  }
 0x1fc   :  { %11737 = vsyncadd [#allocation10], 4294966240 }
 0x1fd   :  { %11738 = dma.done.wait [#allocation13], 32  }
 0x1fe   :  { %11739 = vsyncadd [#allocation13], 4294967264 }
 0x1ff   :  { %11740 = dma.done.wait [#allocation16], 32  }
 0x200   :  { %11741 = vsyncadd [#allocation16], 4294967264 }
 0x201   :  { %11742 = dma.done.wait [#allocation19], 528  }
 0x202   :  { %11743 = vsyncadd [#allocation19], 4294966768 }
 0x203   :  { %11744 = dma.done.wait [#allocation22], 32  }
 0x204   :  { %11745 = vsyncadd [#allocation22], 4294967264 }
 0x205   :  { %11746 = dma.done.wait [#allocation25], 1024  }
 0x206   :  { %11747 = vsyncadd [#allocation25], 4294966272 }
 0x207   :  { %11748 = dma.done.wait [#allocation28], 528  }
 0x208   :  { %11749 = vsyncadd [#allocation28], 4294966768 }
 0x209   :  { %11750 = dma.done.wait [#allocation31], 1024  }
 0x20a   :  { %11751 = vsyncadd [#allocation31], 4294966272 }
 0x20b   :  { %11752 = dma.done.wait [#allocation34], 528  }
 0x20c   :  { %11753 = vsyncadd [#allocation34], 4294966768 }
 0x20d   :  { %11754 = dma.done.wait [#allocation37], 1024  }
 0x20e   :  { %11755 = vsyncadd [#allocation37], 4294966272  ;;  %v11828_v0 = vmov 0.0   ;;  %s13683_s30 = sld [smem:[#allocation51_spill]]  ;;  %v479_v1 = vld [vmem:[#allocation4 + $0x8] sm:$0xff]  ;;  %v481_v2 = vld [vmem:[#allocation4 + $0x18] sm:$0xff]  ;;  %v484_v45 = vlaneseq }
 0x20f   :  { %583 = vmatprep.mubr.f32.mxu0 %v11828_v0  ;;  %724 = vmatprep.mubr.f32.mxu1 %v11828_v0  ;;  %v633_v3 = vld [vmem:[#allocation6 + $0x8] sm:$0xff]  ;;  %v9715_v4 = vpack.c.bf16 %v481_v2, %v479_v1  ;;  %v635_v5 = vld [vmem:[#allocation6 + $0x18] sm:$0xff]  ;;  %s13684_s17 = sld [smem:[#allocation53_spill]]  ;;  %v478_v6 = vld [vmem:[#allocation4] sm:$0xff]  ;;  %vm494_vm0 = vcmask 130048   ;;  %s13685_s14 = sld [smem:[#allocation54_spill]] }
 0x210   :  { %v480_v7 = vld [vmem:[#allocation4 + $0x10] sm:$0xff]  ;;  %v9719_v8 = vpack.c.bf16 %v635_v5, %v633_v3  ;;  %v632_v10 = vld [vmem:[#allocation6] sm:$0xff]  ;;  %v485_v46 = vshrl.u32 %v484_v45, 7  ;;  %s11829_s22 = smov 64   ;;  %vm868_vm1 = vcmask 261120   ;;  %vm870_vm2 = vcmask 523520  }
 0x211   :  { %v9717_v9 = vpack.c.bf16 %v480_v7, %v478_v6  ;;  %v634_v11 = vld [vmem:[#allocation6 + $0x10] sm:$0xff]  ;;  %9716 = vmatprep.subr.bf16.mxu0 %v9715_v4  ;;  %vm765_vm3 = vcmask 523264   ;;  %s13686_s28 = sld [smem:[#allocation55_spill]]  ;;  %s13687_s1 = sld [smem:[#allocation56_spill]] }
 0x212   :  { %v9721_v12 = vpack.c.bf16 %v634_v11, %v632_v10  ;;  %10507 = vmatprep.subr.bf16.mxu1 %v9719_v8  ;;  %v12325_v50 = vsub.s32 0, %v485_v46  ;;  %v12328_v53 = vsub.s32 1, %v485_v46  ;;  %s13688_s2 = sld [smem:[#allocation57_spill]]  ;;  %s13689_s3 = sld [smem:[#allocation58_spill]] }
 0x213   :  { %9718 = vmatpush1.bf16.msra.mxu0 %v9717_v9  ;;  %s13690_s7 = sld [smem:[#allocation59_spill]]  ;;  %s13691_s10 = sld [smem:[#allocation60_spill]] }
 0x214   :  { %v470_v13 = vld [vmem:[%s13683_s30] sm:$0xff]  ;;  %10508 = vmatpush1.bf16.msra.mxu1 %v9721_v12  ;;  %9720 = vmatprep.subr.bf16.mxu0 %v9719_v8  ;;  %v471_v18 = vld [vmem:[%s13683_s30 + $0x8] sm:$0xff]  ;;  %v472_v20 = vld [vmem:[%s13683_s30 + $0x10] sm:$0xff]  ;;  %s13692_s12 = sld [smem:[#allocation61_spill]]  ;;  %s13693_s9 = sld [smem:[#allocation63_spill]] }
 0x215   :  { %v474_v14 = vld [vmem:[%s13683_s30 + $0x20] sm:$0xff]  ;;  %v750_v15 = vld [vmem:[%s13684_s17 + $0x8] sm:$0xff]  ;;  %v752_v16 = vld [vmem:[%s13684_s17 + $0x18] sm:$0xff]  ;;  %s13694_s5 = sld [smem:[#allocation64_spill]]  ;;  %s13695_s11 = sld [smem:[#allocation67_spill]] }
 0x216   :  { %v12238_v17 = vpack.c.bf16 %v752_v16, %v750_v15  ;;  %8494 = vmatmul.mubr.msk.f32.vlgmr.msra.gmra.mrb[0].mxu0 %vm494_vm0, %v470_v13  ;;  %v475_v19 = vld [vmem:[%s13683_s30 + $0x28] sm:$0xff]  ;;  %v476_v21 = vld [vmem:[%s13683_s30 + $0x30] sm:$0xff]  ;;  %v473_v22 = vld [vmem:[%s13683_s30 + $0x18] sm:$0xff]  ;;  %s13698_s6 = sld [smem:[#allocation72_spill]]  ;;  %s13699_s0 = sld [smem:[#allocation76_spill]] }
 0x217   :  { %8506 = vmatmul.mubr.msk.f32.vlgmr.msra.gmra.mrb[0].mxu1 %vm494_vm0, %v474_v14  ;;  %9722 = vmatpush1.bf16.msra.mxu0 %v9721_v12  ;;  %v477_v23 = vld [vmem:[%s13683_s30 + $0x38] sm:$0xff]  ;;  %v749_v24 = vld [vmem:[%s13684_s17] sm:$0xff]  ;;  %v751_v25 = vld [vmem:[%s13684_s17 + $0x10] sm:$0xff]  ;;  %s13700_s15 = sld [smem:[#allocation77_spill]]  ;;  %s13701_s21 = sld [smem:[#allocation78_spill]] }
 0x218   :  { %589 = vmatprep.mubr.f32.mxu0 %v11828_v0  ;;  %730 = vmatprep.mubr.f32.mxu1 %v11828_v0  ;;  %v754_v26 = vld [vmem:[%s13684_s17 + $0x28] sm:$0xff]  ;;  %v756_v27 = vld [vmem:[%s13684_s17 + $0x38] sm:$0xff]  ;;  %v12275_v28 = vpack.c.bf16 %v751_v25, %v749_v24  ;;  %v753_v30 = vld [vmem:[%s13684_s17 + $0x20] sm:$0xff] }
 0x219   :  { %9724 = vmatprep.subr.bf16.mxu0 %v12238_v17  ;;  %v12277_v29 = vpack.c.bf16 %v756_v27, %v754_v26  ;;  %v755_v31 = vld [vmem:[%s13684_s17 + $0x30] sm:$0xff]  ;;  %v758_v32 = vld [vmem:[%s13684_s17 + $0x48] sm:$0xff]  ;;  %v760_v33 = vld [vmem:[%s13684_s17 + $0x58] sm:$0xff] }
 0x21a   :  { %8495 = vmatmul.mubr.msk.f32.gmra.mrb[2].mxu0 %vm494_vm0, %v471_v18  ;;  %v12286_v34 = vpack.c.bf16 %v755_v31, %v753_v30  ;;  %v12289_v35 = vpack.c.bf16 %v760_v33, %v758_v32  ;;  %v757_v36 = vld [vmem:[%s13684_s17 + $0x40] sm:$0xff]  ;;  %v759_v37 = vld [vmem:[%s13684_s17 + $0x50] sm:$0xff]  ;;  %v762_v38 = vld [vmem:[%s13684_s17 + $0x68] sm:$0xff] }
 0x21b   :  { %8507 = vmatmul.mubr.msk.f32.gmra.mrb[2].mxu1 %vm494_vm0, %v475_v19  ;;  %595 = vmatprep.mubr.f32.mxu0 %v11828_v0  ;;  %v764_v39 = vld [vmem:[%s13684_s17 + $0x78] sm:$0xff]  ;;  %v12298_v40 = vpack.c.bf16 %v759_v37, %v757_v36  ;;  %v761_v42 = vld [vmem:[%s13684_s17 + $0x60] sm:$0xff]  ;;  %v763_v43 = vld [vmem:[%s13684_s17 + $0x70] sm:$0xff] }
 0x21c   :  { %736 = vmatprep.mubr.f32.mxu1 %v11828_v0  ;;  %v12301_v41 = vpack.c.bf16 %v764_v39, %v762_v38  ;;  %v12308_v44 = vpack.c.bf16 %v763_v43, %v761_v42  ;;  %v482_v52 = vld [vmem:[%s13685_s14] sm:$0x3] }
 0x21d   :  { %v12331_v57 = vrot.slane %v482_v52, %v12325_v50  ;;  %v12334_v59 = vrot.slane %v482_v52, %v12328_v53 }
 0x21e   :  { %8496 = vmatmul.mubr.msk.f32.gmra.mrb[4].mxu0 %vm494_vm0, %v472_v20 }
 0x21f   :  { %8508 = vmatmul.mubr.msk.f32.gmra.mrb[4].mxu1 %vm494_vm0, %v476_v21  ;;  %601 = vmatprep.mubr.f32.mxu0 %v11828_v0 }
 0x220   :  { %742 = vmatprep.mubr.f32.mxu1 %v11828_v0 }
 0x222   :  { %8497 = vmatmul.mubr.msk.f32.gmra.mrb[6].mxu0 %vm494_vm0, %v473_v22 }
 0x223   :  { %8509 = vmatmul.mubr.msk.f32.gmra.mrb[6].mxu1 %vm494_vm0, %v477_v23  ;;  %607 = vmatprep.mubr.f32.mxu0 %v11828_v0 }
 0x224   :  { %1717 = vmatprep.mubr.f32.mxu1 %v11828_v0 }
 0x226   :  { %8498 = vmatmul.mubr.msk.f32.gmra.mrb[8].mxu0 %vm494_vm0, %v474_v14 }
 0x227   :  { %613 = vmatprep.mubr.f32.mxu0 %v11828_v0 }
 0x22a   :  { %8499 = vmatmul.mubr.msk.f32.gmra.mrb[10].mxu0 %vm494_vm0, %v475_v19 }
 0x22b   :  { %619 = vmatprep.mubr.f32.mxu0 %v11828_v0 }
 0x22e   :  { %8500 = vmatmul.mubr.msk.f32.gmra.mrb[12].mxu0 %vm494_vm0, %v476_v21 }
 0x22f   :  { %625 = vmatprep.mubr.f32.mxu0 %v11828_v0 }
 0x232   :  { %8501 = vmatmul.mubr.msk.f32.gmra.mrb[14].mxu0 %vm494_vm0, %v477_v23 }
 0x233   :  { %700 = vmatprep.mubr.f32.mxu0 %v11828_v0 }
 0x23a   :  { %8502 = vmatmul.mubr.msk.f32.vlgmr.msra.gmra.mrb[14].mxu0 %vm494_vm0, %v470_v13 }
 0x23b   :  { %9726 = vmatpush1.bf16.msra.mxu0 %v12275_v28  ;;  %706 = vmatprep.mubr.f32.mxu0 %v11828_v0 }
 0x23c   :  { %9728 = vmatprep.subr.bf16.mxu0 %v12277_v29 }
 0x23e   :  { %8503 = vmatmul.mubr.msk.f32.gmra.mrb[12].mxu0 %vm494_vm0, %v471_v18 }
 0x23f   :  { %9730 = vmatpush1.bf16.msra.mxu0 %v12286_v34  ;;  %712 = vmatprep.mubr.f32.mxu0 %v11828_v0 }
 0x240   :  { %9732 = vmatprep.subr.bf16.mxu0 %v12289_v35 }
 0x242   :  { %8504 = vmatmul.mubr.msk.f32.gmra.mrb[10].mxu0 %vm494_vm0, %v472_v20 }
 0x243   :  { %9734 = vmatpush1.bf16.msra.mxu0 %v12298_v40  ;;  %718 = vmatprep.mubr.f32.mxu0 %v11828_v0 }
 0x244   :  { %9736 = vmatprep.subr.bf16.mxu0 %v12301_v41 }
 0x246   :  { %8505 = vmatmul.mubr.msk.f32.gmra.mrb[8].mxu0 %vm494_vm0, %v473_v22 }
 0x247   :  { %9738 = vmatpush1.bf16.msra.mxu0 %v12308_v44  ;;  %833 = vmatprep.mubr.f32.mxu0 %v11828_v0 }
 0x248   :  { %9740 = vmatprep.subr.bf16.mxu0 %v12238_v17 }
 0x24a   :  { %834 = vmatmul.mubr.f32.vlgmr.msra.gmra.mrb[16].mxu0 %v11828_v0 }
 0x24b   :  { %9742 = vmatpush1.bf16.msra.mxu0 %v12275_v28  ;;  %938 = vmatprep.mubr.f32.mxu0 %v11828_v0 }
 0x24c   :  { %9744 = vmatprep.subr.bf16.mxu0 %v12277_v29 }
 0x24f   :  { %9746 = vmatpush1.bf16.msra.mxu0 %v12286_v34 }
 0x250   :  { %9748 = vmatprep.subr.bf16.mxu0 %v12289_v35 }
 0x253   :  { %9750 = vmatpush1.bf16.msra.mxu0 %v12298_v40 }
 0x254   :  { %9752 = vmatprep.subr.bf16.mxu0 %v12301_v41 }
 0x257   :  { %9754 = vmatpush1.bf16.msra.mxu0 %v12308_v44 }
 0x258   :  { %9756 = vmatprep.subr.bf16.mxu0 %v12238_v17 }
 0x2e9   :  { %v585_v47 = vpop.f32.mrb[0].mxu0 }
 0x2ea   :  { %v587_v48 = vpop.f32.mrb[1].mxu0  ;;  %v726_v49 = vpop.f32.mrb[0].mxu1  ;;  %v586_v8 = vadd.f32 %v585_v47, %v12331_v57 }
 0x2eb   :  { %v728_v51 = vpop.f32.mrb[1].mxu1  ;;  %v588_v11 = vadd.f32 %v587_v48, %v12334_v59 }
 0x2ed   :  { %v591_v54 = vpop.f32.mrb[2].mxu0 }
 0x2ee   :  { %v593_v55 = vpop.f32.mrb[3].mxu0  ;;  %v732_v56 = vpop.f32.mrb[2].mxu1  ;;  %v592_v60 = vadd.f32 %v591_v54, %v12331_v57 }
 0x2ef   :  { %v734_v58 = vpop.f32.mrb[3].mxu1  ;;  %v594_v62 = vadd.f32 %v593_v55, %v12334_v59 }
 0x2f1   :  { %v597_v61 = vpop.f32.mrb[4].mxu0 }
 0x2f2   :  { %v598_v63 = vadd.f32 %v597_v61, %v12331_v57  ;;  %v738_v1 = vpop.f32.mrb[4].mxu1  ;;  %v599_v2 = vpop.f32.mrb[5].mxu0 }
 0x2f3   :  { %v12339_v3 = vadd.f32 %v738_v1, %v592_v60  ;;  %v600_v4 = vadd.f32 %v599_v2, %v12334_v59  ;;  %v740_v5 = vpop.f32.mrb[5].mxu1 }
 0x2f4   :  { %v10519_v6 = vadd.f32 %v740_v5, %v594_v62  ;;  %v12342_v7 = vadd.f32 %v732_v56, %v598_v63 }
 0x2f5   :  { %v603_v9 = vpop.f32.mrb[6].mxu0  ;;  %v12345_v10 = vadd.f32 %v734_v58, %v600_v4 }
 0x2f6   :  { %v604_v12 = vadd.f32 %v603_v9, %v12331_v57  ;;  %v744_v13 = vpop.f32.mrb[6].mxu1  ;;  %v605_v14 = vpop.f32.mrb[7].mxu0 }
 0x2f7   :  { %v10510_v15 = vadd.f32 %v744_v13, %v586_v8  ;;  %v606_v16 = vadd.f32 %v605_v14, %v12334_v59  ;;  %v746_v18 = vpop.f32.mrb[7].mxu1 }
 0x2f8   :  { %v10513_v19 = vadd.f32 %v746_v18, %v588_v11  ;;  %v12350_v20 = vadd.f32 %v726_v49, %v604_v12 }
 0x2f9   :  { %v12352_v21 = vadd.f32 %v728_v51, %v606_v16 }
 0x31d   :  { %v835_v22 = vpop.f32.mrb[16].mxu0 }
 0x31e   :  { %v10511_v23 = vadd.f32 %v10510_v15, %v835_v22  ;;  %v837_v24 = vpop.f32.mrb[17].mxu0 }
 0x31f   :  { %v10514_v25 = vadd.f32 %v10513_v19, %v837_v24 }
 0x320   :  { %v8510_v26 = vmul.f32 -1.442695, %v10511_v23 }
 0x321   :  { %v8511_v36 = vmul.f32 -1.442695, %v10514_v25 }
 0x322   :  { %10730 = vpow2.f32 %v8510_v26 }
 0x323   :  { %10732 = vtanh.f32 %v10514_v25 }
 0x32c   :  { %v10731_v27 = vpop.eup %10730 }
 0x32d   :  { %v848_v30 = vadd.f32 1.0, %v10731_v27  ;;  %v10733_v31 = vpop.eup %10732 }
 0x32f   :  { %10734 = vrcp.f32 %v848_v30 }
 0x330   :  { %10736 = vpow2.f32 %v8511_v36 }
 0x339   :  { %v10735_v32 = vpop.eup %10734 }
 0x33a   :  { %v856_v33 = vmul.f32 %v10735_v32, %v10733_v31  ;;  %v10737_v37 = vpop.eup %10736  ;;  %v855_v39 = vmul.f32 0.0, %v10735_v32 }
 0x33b   :  { %v849_v38 = vadd.f32 1.0, %v10737_v37 }
 0x33c   :  { %858 = vrot.lane.b32.xlu0 %v856_v33, %s11829_s22 }
 0x33d   :  { %10738 = vrcp.f32 %v849_v38 }
 0x347   :  { %v10739_v45 = vpop.eup %10738 }
 0x3ae   :  { %v859_v42 = vpop.permute.xlu0 %858 }
 0x3af   :  { %v861_v43 = vadd.f32 %v859_v42, %v855_v39 }
 0x3b1   :  { %10740 = vtanh.f32 %v861_v43 }
 0x3bb   :  { %v10741_v46 = vpop.eup %10740 }
 0x3bc   :  { %v863_v47 = vmul.f32 %v10741_v46, %v10739_v45 }
 0x3be   :  { %865 = vrot.lane.b32.xlu0 %v863_v47, %s11829_s22 }
 0x430   :  { %v866_v48 = vpop.permute.xlu0 %865 }
 0x431   :  { %869 = vst.msk [vmem:[#allocation2] sm:$0xff] %vm868_vm1, %v866_v48  ;;  %8512 = vmatmul.mubr.msk.f32.vlgmr.msra.gmra.mrb[18].mxu0 %vm765_vm3, %v866_v48 }
 0x432   :  { %871 = vst.msk [vmem:[#allocation2 + $0x38] sm:$0xff] %vm870_vm2, %v866_v48  ;;  %9758 = vmatpush1.bf16.msra.mxu0 %v12275_v28  ;;  %1041 = vmatprep.mubr.f32.mxu0 %v11828_v0 }
 0x433   :  { %9760 = vmatprep.subr.bf16.mxu0 %v12277_v29 }
 0x436   :  { %9762 = vmatpush1.bf16.msra.mxu0 %v12286_v34 }
 0x437   :  { %9764 = vmatprep.subr.bf16.mxu0 %v12289_v35 }
 0x43a   :  { %9766 = vmatpush1.bf16.msra.mxu0 %v12298_v40 }
 0x43b   :  { %9768 = vmatprep.subr.bf16.mxu0 %v12301_v41 }
 0x43e   :  { %9770 = vmatpush1.bf16.msra.mxu0 %v12308_v44 }
 0x43f   :  { %9772 = vmatprep.subr.bf16.mxu0 %v12238_v17 }
 0x504   :  { %v940_v49 = vpop.f32.mrb[18].mxu0 }
 0x505   :  { %v10517_v51 = vadd.f32 %v12339_v3, %v940_v49  ;;  %v942_v52 = vpop.f32.mrb[19].mxu0 }
 0x506   :  { %v10520_v54 = vadd.f32 %v10519_v6, %v942_v52 }
 0x507   :  { %v8513_v55 = vmul.f32 -1.442695, %v10517_v51 }
 0x508   :  { %v8514_v63 = vmul.f32 -1.442695, %v10520_v54 }
 0x509   :  { %10742 = vpow2.f32 %v8513_v55 }
 0x50a   :  { %10744 = vtanh.f32 %v10520_v54 }
 0x513   :  { %v10743_v56 = vpop.eup %10742 }
 0x514   :  { %v953_v58 = vadd.f32 1.0, %v10743_v56  ;;  %v10745_v60 = vpop.eup %10744 }
 0x516   :  { %10746 = vrcp.f32 %v953_v58 }
 0x517   :  { %10748 = vpow2.f32 %v8514_v63 }
 0x520   :  { %v10747_v61 = vpop.eup %10746 }
 0x521   :  { %v961_v62 = vmul.f32 %v10747_v61, %v10745_v60  ;;  %v10749_v1 = vpop.eup %10748  ;;  %v960_v4 = vmul.f32 %v10747_v61, %v861_v43 }
 0x522   :  { %v954_v2 = vadd.f32 1.0, %v10749_v1 }
 0x523   :  { %963 = vrot.lane.b32.xlu1 %v961_v62, %s11829_s22 }
 0x524   :  { %10750 = vrcp.f32 %v954_v2 }
 0x52e   :  { %v10751_v6 = vpop.eup %10750 }
 0x595   :  { %v964_v5 = vpop.permute.xlu1 %963 }
 0x596   :  { %v966_v3 = vadd.f32 %v964_v5, %v960_v4 }
 0x598   :  { %10752 = vtanh.f32 %v966_v3 }
 0x5a2   :  { %v10753_v8 = vpop.eup %10752 }
 0x5a3   :  { %v968_v9 = vmul.f32 %v10753_v8, %v10751_v6 }
 0x5a5   :  { %970 = vrot.lane.b32.xlu1 %v968_v9, %s11829_s22 }
 0x617   :  { %v971_v11 = vpop.permute.xlu1 %970 }
 0x618   :  { %973 = vst.msk [vmem:[#allocation2 + $0x8] sm:$0xff] %vm868_vm1, %v971_v11  ;;  %8515 = vmatmul.mubr.msk.f32.vlgmr.msra.gmra.mrb[20].mxu0 %vm765_vm3, %v971_v11 }
 0x619   :  { %974 = vst.msk [vmem:[#allocation2 + $0x30] sm:$0xff] %vm870_vm2, %v971_v11  ;;  %9774 = vmatpush1.bf16.msra.mxu0 %v12275_v28  ;;  %1144 = vmatprep.mubr.f32.mxu0 %v11828_v0 }
 0x61a   :  { %9776 = vmatprep.subr.bf16.mxu0 %v12277_v29 }
 0x61d   :  { %9778 = vmatpush1.bf16.msra.mxu0 %v12286_v34 }
 0x61e   :  { %9780 = vmatprep.subr.bf16.mxu0 %v12289_v35 }
 0x621   :  { %9782 = vmatpush1.bf16.msra.mxu0 %v12298_v40 }
 0x622   :  { %9784 = vmatprep.subr.bf16.mxu0 %v12301_v41 }
 0x625   :  { %9786 = vmatpush1.bf16.msra.mxu0 %v12308_v44 }
 0x626   :  { %9788 = vmatprep.subr.bf16.mxu0 %v12238_v17 }
 0x6eb   :  { %v1043_v12 = vpop.f32.mrb[20].mxu0 }
 0x6ec   :  { %v10523_v13 = vadd.f32 %v12342_v7, %v1043_v12  ;;  %v1045_v14 = vpop.f32.mrb[21].mxu0 }
 0x6ed   :  { %v10526_v15 = vadd.f32 %v12345_v10, %v1045_v14 }
 0x6ee   :  { %v8516_v16 = vmul.f32 -1.442695, %v10523_v13 }
 0x6ef   :  { %v8517_v25 = vmul.f32 -1.442695, %v10526_v15 }
 0x6f0   :  { %10754 = vpow2.f32 %v8516_v16 }
 0x6f1   :  { %10756 = vtanh.f32 %v10526_v15 }
 0x6fa   :  { %v10755_v18 = vpop.eup %10754 }
 0x6fb   :  { %v1056_v19 = vadd.f32 1.0, %v10755_v18  ;;  %v10757_v22 = vpop.eup %10756 }
 0x6fd   :  { %10758 = vrcp.f32 %v1056_v19 }
 0x6fe   :  { %10760 = vpow2.f32 %v8517_v25 }
 0x707   :  { %v10759_v23 = vpop.eup %10758 }
 0x708   :  { %v1064_v24 = vmul.f32 %v10759_v23, %v10757_v22  ;;  %v10761_v26 = vpop.eup %10760  ;;  %v1063_v30 = vmul.f32 %v10759_v23, %v966_v3 }
 0x709   :  { %v1057_v27 = vadd.f32 1.0, %v10761_v26 }
 0x70a   :  { %1066 = vrot.lane.b32.xlu0 %v1064_v24, %s11829_s22 }
 0x70b   :  { %10762 = vrcp.f32 %v1057_v27 }
 0x715   :  { %v10763_v10 = vpop.eup %10762 }
 0x77c   :  { %v1067_v7 = vpop.permute.xlu0 %1066 }
 0x77d   :  { %v1069_v31 = vadd.f32 %v1067_v7, %v1063_v30 }
 0x77f   :  { %10764 = vtanh.f32 %v1069_v31 }
 0x789   :  { %v10765_v32 = vpop.eup %10764 }
 0x78a   :  { %v1071_v33 = vmul.f32 %v10765_v32, %v10763_v10 }
 0x78c   :  { %1073 = vrot.lane.b32.xlu1 %v1071_v33, %s11829_s22 }
 0x7fe   :  { %v1074_v36 = vpop.permute.xlu1 %1073 }
 0x7ff   :  { %1076 = vst.msk [vmem:[#allocation2 + $0x10] sm:$0xff] %vm868_vm1, %v1074_v36  ;;  %8518 = vmatmul.mubr.msk.f32.vlgmr.msra.gmra.mrb[22].mxu0 %vm765_vm3, %v1074_v36 }
 0x800   :  { %1077 = vst.msk [vmem:[#allocation2 + $0x28] sm:$0xff] %vm870_vm2, %v1074_v36  ;;  %9790 = vmatpush1.bf16.msra.mxu0 %v12275_v28  ;;  %1247 = vmatprep.mubr.f32.mxu0 %v11828_v0 }
 0x801   :  { %9792 = vmatprep.subr.bf16.mxu0 %v12277_v29 }
 0x804   :  { %9794 = vmatpush1.bf16.msra.mxu0 %v12286_v34 }
 0x805   :  { %9796 = vmatprep.subr.bf16.mxu0 %v12289_v35 }
 0x808   :  { %9798 = vmatpush1.bf16.msra.mxu0 %v12298_v40 }
 0x809   :  { %9800 = vmatprep.subr.bf16.mxu0 %v12301_v41 }
 0x80c   :  { %9802 = vmatpush1.bf16.msra.mxu0 %v12308_v44 }
 0x80d   :  { %9804 = vmatprep.subr.bf16.mxu0 %v12238_v17 }
 0x8d2   :  { %v1146_v37 = vpop.f32.mrb[22].mxu0 }
 0x8d3   :  { %v10529_v38 = vadd.f32 %v12350_v20, %v1146_v37  ;;  %v1148_v39 = vpop.f32.mrb[23].mxu0 }
 0x8d4   :  { %v10532_v42 = vadd.f32 %v12352_v21, %v1148_v39 }
 0x8d5   :  { %v8519_v43 = vmul.f32 -1.442695, %v10529_v38 }
 0x8d6   :  { %v8520_v51 = vmul.f32 -1.442695, %v10532_v42 }
 0x8d7   :  { %10766 = vpow2.f32 %v8519_v43 }
 0x8d8   :  { %10768 = vtanh.f32 %v10532_v42 }
 0x8e1   :  { %v10767_v45 = vpop.eup %10766 }
 0x8e2   :  { %v1159_v46 = vadd.f32 1.0, %v10767_v45  ;;  %v10769_v47 = vpop.eup %10768 }
 0x8e4   :  { %10770 = vrcp.f32 %v1159_v46 }
 0x8e5   :  { %10772 = vpow2.f32 %v8520_v51 }
 0x8ee   :  { %v10771_v48 = vpop.eup %10770 }
 0x8ef   :  { %v1167_v49 = vmul.f32 %v10771_v48, %v10769_v47  ;;  %v10773_v52 = vpop.eup %10772  ;;  %v1166_v55 = vmul.f32 %v10771_v48, %v1069_v31 }
 0x8f0   :  { %v1160_v54 = vadd.f32 1.0, %v10773_v52 }
 0x8f1   :  { %1169 = vrot.lane.b32.xlu0 %v1167_v49, %s11829_s22 }
 0x8f2   :  { %10774 = vrcp.f32 %v1160_v54 }
 0x8fc   :  { %v10775_v21 = vpop.eup %10774 }
 0x963   :  { %v1170_v20 = vpop.permute.xlu0 %1169 }
 0x964   :  { %v1172_v56 = vadd.f32 %v1170_v20, %v1166_v55 }
 0x966   :  { %10776 = vtanh.f32 %v1172_v56 }
 0x970   :  { %v10777_v58 = vpop.eup %10776 }
 0x971   :  { %v1174_v60 = vmul.f32 %v10777_v58, %v10775_v21 }
 0x973   :  { %1176 = vrot.lane.b32.xlu1 %v1174_v60, %s11829_s22 }
 0x9e5   :  { %v1177_v61 = vpop.permute.xlu1 %1176 }
 0x9e6   :  { %1179 = vst.msk [vmem:[#allocation2 + $0x18] sm:$0xff] %vm868_vm1, %v1177_v61  ;;  %8521 = vmatmul.mubr.msk.f32.vlgmr.msra.gmra.mrb[8].mxu0 %vm765_vm3, %v1177_v61 }
 0x9e7   :  { %1180 = vst.msk [vmem:[#allocation2 + $0x20] sm:$0xff] %vm870_vm2, %v1177_v61  ;;  %9806 = vmatpush1.bf16.msra.mxu0 %v12275_v28  ;;  %1350 = vmatprep.mubr.f32.mxu0 %v11828_v0 }
 0x9e8   :  { %9808 = vmatprep.subr.bf16.mxu0 %v12277_v29 }
 0x9eb   :  { %9810 = vmatpush1.bf16.msra.mxu0 %v12286_v34 }
 0x9ec   :  { %9812 = vmatprep.subr.bf16.mxu0 %v12289_v35 }
 0x9ef   :  { %9814 = vmatpush1.bf16.msra.mxu0 %v12298_v40 }
 0x9f0   :  { %9816 = vmatprep.subr.bf16.mxu0 %v12301_v41 }
 0x9f3   :  { %9818 = vmatpush1.bf16.msra.mxu0 %v12308_v44 }
 0x9f4   :  { %9820 = vmatprep.subr.bf16.mxu0 %v12238_v17 }
 0xab9   :  { %v1249_v62 = vpop.f32.mrb[8].mxu0 }
 0xaba   :  { %v10533_v63 = vadd.f32 %v1249_v62, %v12331_v57  ;;  %v1251_v1 = vpop.f32.mrb[9].mxu0 }
 0xabb   :  { %v10534_v4 = vadd.f32 %v1251_v1, %v12334_v59 }
 0xabc   :  { %v8522_v2 = vmul.f32 -1.442695, %v10533_v63 }
 0xabd   :  { %v8523_v11 = vmul.f32 -1.442695, %v10534_v4 }
 0xabe   :  { %10778 = vpow2.f32 %v8522_v2 }
 0xabf   :  { %10780 = vtanh.f32 %v10534_v4 }
 0xac8   :  { %v10779_v5 = vpop.eup %10778 }
 0xac9   :  { %v1262_v3 = vadd.f32 1.0, %v10779_v5  ;;  %v10781_v6 = vpop.eup %10780 }
 0xacb   :  { %10782 = vrcp.f32 %v1262_v3 }
 0xacc   :  { %10784 = vpow2.f32 %v8523_v11 }
 0xad5   :  { %v10783_v8 = vpop.eup %10782 }
 0xad6   :  { %v1270_v9 = vmul.f32 %v10783_v8, %v10781_v6  ;;  %v10785_v12 = vpop.eup %10784  ;;  %v1269_v14 = vmul.f32 %v10783_v8, %v1172_v56 }
 0xad7   :  { %v1263_v13 = vadd.f32 1.0, %v10785_v12  ;;  %v1604_v12 = vld [vmem:[%s13686_s28 + $0x18] sm:$0xff] }
 0xad8   :  { %1272 = vrot.lane.b32.xlu0 %v1270_v9, %s11829_s22 }
 0xad9   :  { %10786 = vrcp.f32 %v1263_v13  ;;  %v1601_v13 = vld [vmem:[%s13686_s28] sm:$0xff] }
 0xae3   :  { %v10787_v18 = vpop.eup %10786 }
 0xb4a   :  { %v1273_v15 = vpop.permute.xlu0 %1272 }
 0xb4b   :  { %v1275_v16 = vadd.f32 %v1273_v15, %v1269_v14  ;;  %v1603_v15 = vld [vmem:[%s13686_s28 + $0x10] sm:$0xff] }
 0xb4d   :  { %10788 = vtanh.f32 %v1275_v16 }
 0xb57   :  { %v10789_v19 = vpop.eup %10788 }
 0xb58   :  { %v1277_v22 = vmul.f32 %v10789_v19, %v10787_v18  ;;  %v1608_v18 = vld [vmem:[%s13686_s28 + $0x38] sm:$0xff]  ;;  %v9853_v19 = vpack.c.bf16 %v1603_v15, %v1601_v13 }
 0xb5a   :  { %1279 = vrot.lane.b32.xlu1 %v1277_v22, %s11829_s22  ;;  %v1605_v22 = vld [vmem:[%s13686_s28 + $0x20] sm:$0xff] }
 0xbcc   :  { %v1280_v23 = vpop.permute.xlu1 %1279 }
 0xbcd   :  { %1282 = vst.msk [vmem:[#allocation2 + $0x20] sm:$0xff] %vm868_vm1, %v1280_v23  ;;  %8524 = vmatmul.mubr.msk.f32.vlgmr.msra.gmra.mrb[10].mxu0 %vm765_vm3, %v1280_v23 }
 0xbce   :  { %1283 = vst.msk [vmem:[#allocation2 + $0x18] sm:$0xff] %vm870_vm2, %v1280_v23  ;;  %9822 = vmatpush1.bf16.msra.mxu0 %v12275_v28  ;;  %1453 = vmatprep.mubr.f32.mxu0 %v11828_v0  ;;  %v1607_v23 = vld [vmem:[%s13686_s28 + $0x30] sm:$0xff] }
 0xbcf   :  { %9824 = vmatprep.subr.bf16.mxu0 %v12277_v29 }
 0xbd2   :  { %9826 = vmatpush1.bf16.msra.mxu0 %v12286_v34 }
 0xbd3   :  { %9828 = vmatprep.subr.bf16.mxu0 %v12289_v35 }
 0xbd4   :  { %v1597_v15 = vld [vmem:[#allocation2 + $0x20] sm:$0xff] }
 0xbd6   :  { %9830 = vmatpush1.bf16.msra.mxu0 %v12298_v40 }
 0xbd7   :  { %9832 = vmatprep.subr.bf16.mxu0 %v12301_v41 }
 0xbda   :  { %9834 = vmatpush1.bf16.msra.mxu0 %v12308_v44 }
 0xbdb   :  { %9836 = vmatprep.subr.bf16.mxu0 %v12238_v17 }
 0xca0   :  { %v1352_v24 = vpop.f32.mrb[10].mxu0 }
 0xca1   :  { %v10535_v25 = vadd.f32 %v1352_v24, %v12331_v57  ;;  %v1354_v26 = vpop.f32.mrb[11].mxu0  ;;  %v9857_v24 = vpack.c.bf16 %v1607_v23, %v1605_v22  ;;  %v1897_v22 = vld [vmem:[%s13688_s2 + $0x10] sm:$0xff]  ;;  %v1900_v23 = vld [vmem:[%s13688_s2 + $0x28] sm:$0xff] }
 0xca2   :  { %v10536_v30 = vadd.f32 %v1354_v26, %v12334_v59 }
 0xca3   :  { %v8525_v27 = vmul.f32 -1.442695, %v10535_v25 }
 0xca4   :  { %v8526_v36 = vmul.f32 -1.442695, %v10536_v30 }
 0xca5   :  { %10790 = vpow2.f32 %v8525_v27 }
 0xca6   :  { %10792 = vtanh.f32 %v10536_v30 }
 0xcaf   :  { %v10791_v7 = vpop.eup %10790 }
 0xcb0   :  { %v1365_v31 = vadd.f32 1.0, %v10791_v7  ;;  %v10793_v10 = vpop.eup %10792 }
 0xcb2   :  { %10794 = vrcp.f32 %v1365_v31 }
 0xcb3   :  { %10796 = vpow2.f32 %v8526_v36  ;;  %v1609_v36 = vld [vmem:[%s13686_s28 + $0x40] sm:$0xff] }
 0xcbc   :  { %v10795_v32 = vpop.eup %10794 }
 0xcbd   :  { %v1373_v33 = vmul.f32 %v10795_v32, %v10793_v10  ;;  %v10797_v17 = vpop.eup %10796  ;;  %v1372_v38 = vmul.f32 %v10795_v32, %v1275_v16  ;;  %v1606_v16 = vld [vmem:[%s13686_s28 + $0x28] sm:$0xff]  ;;  %v1612_v32 = vld [vmem:[%s13686_s28 + $0x58] sm:$0xff] }
 0xcbe   :  { %v1366_v37 = vadd.f32 1.0, %v10797_v17  ;;  %v1610_v10 = vld [vmem:[%s13686_s28 + $0x48] sm:$0xff]  ;;  %v1611_v17 = vld [vmem:[%s13686_s28 + $0x50] sm:$0xff] }
 0xcbf   :  { %1375 = vrot.lane.b32.xlu0 %v1373_v33, %s11829_s22  ;;  %v9859_v33 = vpack.c.bf16 %v1612_v32, %v1610_v10 }
 0xcc0   :  { %10798 = vrcp.f32 %v1366_v37  ;;  %v9861_v37 = vpack.c.bf16 %v1611_v17, %v1609_v36  ;;  %v1905_v36 = vld [vmem:[%s13688_s2 + $0x50] sm:$0xff]  ;;  %v1908_v17 = vld [vmem:[%s13688_s2 + $0x68] sm:$0xff] }
 0xcca   :  { %v10799_v43 = vpop.eup %10798 }
 0xd31   :  { %v1376_v39 = vpop.permute.xlu0 %1375 }
 0xd32   :  { %v1378_v42 = vadd.f32 %v1376_v39, %v1372_v38  ;;  %v1614_v38 = vld [vmem:[%s13686_s28 + $0x68] sm:$0xff]  ;;  %v1616_v39 = vld [vmem:[%s13686_s28 + $0x78] sm:$0xff] }
 0xd34   :  { %10800 = vtanh.f32 %v1378_v42 }
 0xd3e   :  { %v10801_v45 = vpop.eup %10800 }
 0xd3f   :  { %v1380_v46 = vmul.f32 %v10801_v45, %v10799_v43  ;;  %v9863_v43 = vpack.c.bf16 %v1616_v39, %v1614_v38  ;;  %v1615_v45 = vld [vmem:[%s13686_s28 + $0x70] sm:$0xff] }
 0xd41   :  { %1382 = vrot.lane.b32.xlu1 %v1380_v46, %s11829_s22 }
 0xdb3   :  { %v1383_v47 = vpop.permute.xlu1 %1382 }
 0xdb4   :  { %1385 = vst.msk [vmem:[#allocation2 + $0x28] sm:$0xff] %vm868_vm1, %v1383_v47  ;;  %8527 = vmatmul.mubr.msk.f32.vlgmr.msra.gmra.mrb[12].mxu0 %vm765_vm3, %v1383_v47 }
 0xdb5   :  { %1386 = vst.msk [vmem:[#allocation2 + $0x10] sm:$0xff] %vm870_vm2, %v1383_v47  ;;  %9838 = vmatpush1.bf16.msra.mxu0 %v12275_v28  ;;  %1556 = vmatprep.mubr.f32.mxu0 %v11828_v0  ;;  %v1767_v47 = vld [vmem:[%s13687_s1 + $0x8] sm:$0xff] }
 0xdb6   :  { %9840 = vmatprep.subr.bf16.mxu0 %v12277_v29 }
 0xdb9   :  { %9842 = vmatpush1.bf16.msra.mxu0 %v12286_v34 }
 0xdba   :  { %9844 = vmatprep.subr.bf16.mxu0 %v12289_v35 }
 0xdbd   :  { %9846 = vmatpush1.bf16.msra.mxu0 %v12298_v40 }
 0xdbe   :  { %9848 = vmatprep.subr.bf16.mxu0 %v12301_v41 }
 0xdc1   :  { %9850 = vmatpush1.bf16.msra.mxu0 %v12308_v44 }
 0xe87   :  { %v1455_v48 = vpop.f32.mrb[12].mxu0 }
 0xe88   :  { %v10537_v49 = vadd.f32 %v1455_v48, %v12331_v57  ;;  %v1457_v51 = vpop.f32.mrb[13].mxu0  ;;  %v1769_v48 = vld [vmem:[%s13687_s1 + $0x18] sm:$0xff] }
 0xe89   :  { %v10538_v28 = vadd.f32 %v1457_v51, %v12334_v59  ;;  %v9867_v51 = vpack.c.bf16 %v1769_v48, %v1767_v47 }
 0xe8a   :  { %v8528_v52 = vmul.f32 -1.442695, %v10537_v49 }
 0xe8b   :  { %v8529_v40 = vmul.f32 -1.442695, %v10538_v28 }
 0xe8c   :  { %10802 = vpow2.f32 %v8528_v52 }
 0xe8d   :  { %10804 = vtanh.f32 %v10538_v28 }
 0xe96   :  { %v10803_v54 = vpop.eup %10802 }
 0xe97   :  { %v1468_v29 = vadd.f32 1.0, %v10803_v54  ;;  %v10805_v34 = vpop.eup %10804 }
 0xe99   :  { %10806 = vrcp.f32 %v1468_v29  ;;  %v1766_v29 = vld [vmem:[%s13687_s1] sm:$0xff] }
 0xe9a   :  { %10808 = vpow2.f32 %v8529_v40 }
 0xea3   :  { %v10807_v35 = vpop.eup %10806 }
 0xea4   :  { %v1476_v55 = vmul.f32 %v10807_v35, %v10805_v34  ;;  %v10809_v41 = vpop.eup %10808  ;;  %v1475_v20 = vmul.f32 %v10807_v35, %v1378_v42  ;;  %v1613_v42 = vld [vmem:[%s13686_s28 + $0x60] sm:$0xff]  ;;  %v1768_v34 = vld [vmem:[%s13687_s1 + $0x10] sm:$0xff]  ;;  %v1771_v35 = vld [vmem:[%s13687_s1 + $0x28] sm:$0xff] }
 0xea5   :  { %v1469_v44 = vadd.f32 1.0, %v10809_v41  ;;  %v9865_v46 = vpack.c.bf16 %v1615_v45, %v1613_v42  ;;  %v9869_v40 = vpack.c.bf16 %v1768_v34, %v1766_v29  ;;  %v1907_v42 = vld [vmem:[%s13688_s2 + $0x60] sm:$0xff] }
 0xea6   :  { %1478 = vrot.lane.b32.xlu0 %v1476_v55, %s11829_s22  ;;  %v1773_v55 = vld [vmem:[%s13687_s1 + $0x38] sm:$0xff] }
 0xea7   :  { %10810 = vrcp.f32 %v1469_v44  ;;  %v9871_v41 = vpack.c.bf16 %v1773_v55, %v1771_v35  ;;  %v1770_v44 = vld [vmem:[%s13687_s1 + $0x20] sm:$0xff] }
 0xeb1   :  { %v10811_v58 = vpop.eup %10810 }
 0xf18   :  { %v1479_v56 = vpop.permute.xlu0 %1478 }
 0xf19   :  { %v1481_v21 = vadd.f32 %v1479_v56, %v1475_v20  ;;  %v1772_v20 = vld [vmem:[%s13687_s1 + $0x30] sm:$0xff] }
 0xf1b   :  { %10812 = vtanh.f32 %v1481_v21 }
 0xf25   :  { %v10813_v60 = vpop.eup %10812 }
 0xf26   :  { %v1483_v61 = vmul.f32 %v10813_v60, %v10811_v58  ;;  %v1777_v58 = vld [vmem:[%s13687_s1 + $0x58] sm:$0xff]  ;;  %v9873_v60 = vpack.c.bf16 %v1772_v20, %v1770_v44 }
 0xf28   :  { %1485 = vrot.lane.b32.xlu1 %v1483_v61, %s11829_s22 }
 0xf9a   :  { %v1486_v62 = vpop.permute.xlu1 %1485 }
 0xf9b   :  { %1488 = vst.msk [vmem:[#allocation2 + $0x30] sm:$0xff] %vm868_vm1, %v1486_v62  ;;  %8530 = vmatmul.mubr.msk.f32.vlgmr.msra.gmra.mrb[14].mxu0 %vm765_vm3, %v1486_v62 }
 0xf9c   :  { %1489 = vst.msk [vmem:[#allocation2 + $0x8] sm:$0xff] %vm870_vm2, %v1486_v62  ;;  %2857 = vmatprep.mubr.f32.mxu0 %v11828_v0  ;;  %v1774_v62 = vld [vmem:[%s13687_s1 + $0x40] sm:$0xff] }
0x106e   :  { %v1558_v63 = vpop.f32.mrb[14].mxu0 }
0x106f   :  { %v10539_v1 = vadd.f32 %v1558_v63, %v12331_v57  ;;  %v1560_v2 = vpop.f32.mrb[15].mxu0  ;;  %v1602_v57 = vld [vmem:[%s13686_s28 + $0x8] sm:$0xff]  ;;  %v1776_v63 = vld [vmem:[%s13687_s1 + $0x50] sm:$0xff] }
0x1070   :  { %v10540_v5 = vadd.f32 %v1560_v2, %v12334_v59  ;;  %v9851_v14 = vpack.c.bf16 %v1604_v12, %v1602_v57  ;;  %v9855_v59 = vpack.c.bf16 %v1608_v18, %v1606_v16  ;;  %v1779_v2 = vld [vmem:[%s13687_s1 + $0x68] sm:$0xff]  ;;  %v1898_v57 = vld [vmem:[%s13688_s2 + $0x18] sm:$0xff]  ;;  %v1599_v18 = vld [vmem:[#allocation2 + $0x30] sm:$0xff] }
0x1071   :  { %v8531_v4 = vmul.f32 -1.442695, %v10539_v1  ;;  %v1594_v1 = vld [vmem:[#allocation2 + $0x8] sm:$0xff] }
0x1072   :  { %9852 = vmatprep.subr.bf16.mxu1 %v9851_v14  ;;  %v8532_v25 = vmul.f32 -1.442695, %v10540_v5  ;;  %v1596_v14 = vld [vmem:[#allocation2 + $0x18] sm:$0xff]  ;;  %v1598_v16 = vld [vmem:[#allocation2 + $0x28] sm:$0xff] }
0x1073   :  { %10814 = vpow2.f32 %v8531_v4  ;;  %9854 = vmatpush1.bf16.msra.mxu1 %v9853_v19  ;;  %v1781_v4 = vld [vmem:[%s13687_s1 + $0x78] sm:$0xff] }
0x1074   :  { %10816 = vtanh.f32 %v10540_v5  ;;  %9856 = vmatprep.subr.bf16.mxu1 %v9855_v59  ;;  %v9877_v5 = vpack.c.bf16 %v1776_v63, %v1774_v62  ;;  %v1895_v59 = vld [vmem:[%s13688_s2] sm:$0xff] }
0x1077   :  { %9858 = vmatpush1.bf16.msra.mxu1 %v9857_v24  ;;  %v1902_v24 = vld [vmem:[%s13688_s2 + $0x38] sm:$0xff] }
0x1078   :  { %9860 = vmatprep.subr.bf16.mxu1 %v9859_v33  ;;  %v1903_v33 = vld [vmem:[%s13688_s2 + $0x40] sm:$0xff] }
0x1079   :  { %v12540_v38 = vpack.c.bf16 %v1905_v36, %v1903_v33 }
0x107b   :  { %9862 = vmatpush1.bf16.msra.mxu1 %v9861_v37  ;;  %v1910_v37 = vld [vmem:[%s13688_s2 + $0x78] sm:$0xff] }
0x107c   :  { %9864 = vmatprep.subr.bf16.mxu1 %v9863_v43  ;;  %v12543_v39 = vpack.c.bf16 %v1910_v37, %v1908_v17  ;;  %v1909_v43 = vld [vmem:[%s13688_s2 + $0x70] sm:$0xff] }
0x107d   :  { %v10815_v3 = vpop.eup %10814  ;;  %v12550_v45 = vpack.c.bf16 %v1909_v43, %v1907_v42 }
0x107e   :  { %v1571_v6 = vadd.f32 1.0, %v10815_v3  ;;  %v10817_v8 = vpop.eup %10816  ;;  %v9879_v3 = vpack.c.bf16 %v1781_v4, %v1779_v2 }
0x107f   :  { %9866 = vmatpush1.bf16.msra.mxu1 %v9865_v46  ;;  %v1617_v46 = vld [vmem:[#allocation8] sm:$0x3] }
0x1080   :  { %10818 = vrcp.f32 %v1571_v6  ;;  %9868 = vmatprep.subr.bf16.mxu1 %v9867_v51  ;;  %v1778_v6 = vld [vmem:[%s13687_s1 + $0x60] sm:$0xff]  ;;  %v12576_v47 = vrot.slane %v1617_v46, %v12325_v50 }
0x1081   :  { %10820 = vpow2.f32 %v8532_v25  ;;  %v12517_v25 = vpack.c.bf16 %v1897_v22, %v1895_v59 }
0x108a   :  { %v10819_v9 = vpop.eup %10818 }
0x108b   :  { %v1579_v11 = vmul.f32 %v10819_v9, %v10817_v8  ;;  %v10821_v26 = vpop.eup %10820  ;;  %v1578_v30 = vmul.f32 %v10819_v9, %v1481_v21  ;;  %v1775_v21 = vld [vmem:[%s13687_s1 + $0x48] sm:$0xff]  ;;  %v1780_v8 = vld [vmem:[%s13687_s1 + $0x70] sm:$0xff] }
0x108c   :  { %v1572_v27 = vadd.f32 1.0, %v10821_v26  ;;  %v9875_v61 = vpack.c.bf16 %v1777_v58, %v1775_v21  ;;  %v1595_v9 = vld [vmem:[#allocation2 + $0x10] sm:$0xff]  ;;  %v9881_v12 = vpack.c.bf16 %v1780_v8, %v1778_v6  ;;  %v12519_v26 = vpack.c.bf16 %v1902_v24, %v1900_v23 }
0x108d   :  { %1581 = vrot.lane.b32.xlu0 %v1579_v11, %s11829_s22  ;;  %v1896_v11 = vld [vmem:[%s13688_s2 + $0x8] sm:$0xff] }
0x108e   :  { %10822 = vrcp.f32 %v1572_v27  ;;  %v12500_v13 = vpack.c.bf16 %v1898_v57, %v1896_v11  ;;  %v1899_v27 = vld [vmem:[%s13688_s2 + $0x20] sm:$0xff] }
0x1098   :  { %v10823_v49 = vpop.eup %10822 }
0x10ff   :  { %v1582_v7 = vpop.permute.xlu0 %1581 }
0x1100   :  { %v1584_v31 = vadd.f32 %v1582_v7, %v1578_v30  ;;  %v1901_v30 = vld [vmem:[%s13688_s2 + $0x30] sm:$0xff]  ;;  %v1904_v7 = vld [vmem:[%s13688_s2 + $0x48] sm:$0xff] }
0x1101   :  { %v12528_v10 = vpack.c.bf16 %v1901_v30, %v1899_v27 }
0x1102   :  { %10824 = vtanh.f32 %v1584_v31  ;;  %v1906_v31 = vld [vmem:[%s13688_s2 + $0x58] sm:$0xff] }
0x1103   :  { %v12531_v32 = vpack.c.bf16 %v1906_v31, %v1904_v7 }
0x110c   :  { %v10825_v52 = vpop.eup %10824 }
0x110d   :  { %v1586_v28 = vmul.f32 %v10825_v52, %v10823_v49 }
0x110f   :  { %1588 = vrot.lane.b32.xlu1 %v1586_v28, %s11829_s22  ;;  %v12580_v28 = vrot.slane %v1617_v46, %v12328_v53 }
0x1181   :  { %v1589_v54 = vpop.permute.xlu1 %1588 }
0x1182   :  { %1591 = vst.msk [vmem:[#allocation2 + $0x38] sm:$0xff] %vm868_vm1, %v1589_v54 }
0x1183   :  { %1592 = vst.msk [vmem:[#allocation2] sm:$0xff] %vm870_vm2, %v1589_v54 }
0x1189   :  { %v1600_v19 = vld [vmem:[#allocation2 + $0x38] sm:$0xff] }
0x118a   :  { %v1593_v56 = vld [vmem:[#allocation2] sm:$0xff] }
0x118b   :  { %8533 = vmatmul.mubr.msk.f32.vlgmr.msra.gmra.mrb[8].mxu1 %vm765_vm3, %v1593_v56 }
0x118c   :  { %9870 = vmatpush1.bf16.msra.mxu1 %v9869_v40  ;;  %1723 = vmatprep.mubr.f32.mxu1 %v11828_v0 }
0x118d   :  { %9872 = vmatprep.subr.bf16.mxu1 %v9871_v41 }
0x118f   :  { %8534 = vmatmul.mubr.msk.f32.gmra.mrb[10].mxu1 %vm765_vm3, %v1594_v1 }
0x1190   :  { %1729 = vmatprep.mubr.f32.mxu1 %v11828_v0  ;;  %9874 = vmatpush1.bf16.msra.mxu1 %v9873_v60 }
0x1191   :  { %9876 = vmatprep.subr.bf16.mxu1 %v9875_v61 }
0x1193   :  { %8535 = vmatmul.mubr.msk.f32.gmra.mrb[12].mxu1 %vm765_vm3, %v1595_v9 }
0x1194   :  { %1735 = vmatprep.mubr.f32.mxu1 %v11828_v0  ;;  %9878 = vmatpush1.bf16.msra.mxu1 %v9877_v5 }
0x1195   :  { %9880 = vmatprep.subr.bf16.mxu1 %v9879_v3 }
0x1197   :  { %8536 = vmatmul.mubr.msk.f32.gmra.mrb[14].mxu1 %vm765_vm3, %v1596_v14 }
0x1198   :  { %1741 = vmatprep.mubr.f32.mxu1 %v11828_v0  ;;  %9882 = vmatpush1.bf16.msra.mxu1 %v9881_v12 }
0x1199   :  { %9884 = vmatprep.subr.bf16.mxu1 %v12500_v13 }
0x119b   :  { %8537 = vmatmul.mubr.msk.f32.gmra.mrb[16].mxu1 %vm765_vm3, %v1597_v15 }
0x119c   :  { %1747 = vmatprep.mubr.f32.mxu1 %v11828_v0 }
0x119f   :  { %8538 = vmatmul.mubr.msk.f32.gmra.mrb[18].mxu1 %vm765_vm3, %v1598_v16 }
0x11a0   :  { %1753 = vmatprep.mubr.f32.mxu1 %v11828_v0 }
0x11a3   :  { %8539 = vmatmul.mubr.msk.f32.gmra.mrb[20].mxu1 %vm765_vm3, %v1599_v18 }
0x11a4   :  { %1759 = vmatprep.mubr.f32.mxu1 %v11828_v0 }
0x11a7   :  { %8540 = vmatmul.mubr.msk.f32.gmra.mrb[22].mxu1 %vm765_vm3, %v1600_v19 }
0x11a8   :  { %1846 = vmatprep.mubr.f32.mxu1 %v11828_v0 }
0x11af   :  { %8541 = vmatmul.mubr.msk.f32.vlgmr.msra.gmra.mrb[22].mxu1 %vm765_vm3, %v1593_v56 }
0x11b0   :  { %9886 = vmatpush1.bf16.msra.mxu1 %v12517_v25  ;;  %1852 = vmatprep.mubr.f32.mxu1 %v11828_v0 }
0x11b1   :  { %9888 = vmatprep.subr.bf16.mxu1 %v12519_v26 }
0x11b3   :  { %8542 = vmatmul.mubr.msk.f32.gmra.mrb[20].mxu1 %vm765_vm3, %v1594_v1 }
0x11b4   :  { %1858 = vmatprep.mubr.f32.mxu1 %v11828_v0  ;;  %9890 = vmatpush1.bf16.msra.mxu1 %v12528_v10 }
0x11b5   :  { %9892 = vmatprep.subr.bf16.mxu1 %v12531_v32 }
0x11b7   :  { %8543 = vmatmul.mubr.msk.f32.gmra.mrb[18].mxu1 %vm765_vm3, %v1595_v9 }
0x11b8   :  { %1864 = vmatprep.mubr.f32.mxu1 %v11828_v0  ;;  %9894 = vmatpush1.bf16.msra.mxu1 %v12540_v38 }
0x11b9   :  { %9896 = vmatprep.subr.bf16.mxu1 %v12543_v39 }
0x11bb   :  { %8544 = vmatmul.mubr.msk.f32.gmra.mrb[16].mxu1 %vm765_vm3, %v1596_v14 }
0x11bc   :  { %1870 = vmatprep.mubr.f32.mxu1 %v11828_v0  ;;  %9898 = vmatpush1.bf16.msra.mxu1 %v12550_v45 }
0x11bd   :  { %9900 = vmatprep.subr.bf16.mxu1 %v12500_v13 }
0x11bf   :  { %8545 = vmatmul.mubr.msk.f32.gmra.mrb[14].mxu1 %vm765_vm3, %v1597_v15 }
0x11c0   :  { %1876 = vmatprep.mubr.f32.mxu1 %v11828_v0 }
0x11c3   :  { %8546 = vmatmul.mubr.msk.f32.gmra.mrb[12].mxu1 %vm765_vm3, %v1598_v16 }
0x11c4   :  { %1882 = vmatprep.mubr.f32.mxu1 %v11828_v0 }
0x11c7   :  { %8547 = vmatmul.mubr.msk.f32.gmra.mrb[10].mxu1 %vm765_vm3, %v1599_v18 }
0x11c8   :  { %1888 = vmatprep.mubr.f32.mxu1 %v11828_v0 }
0x11cb   :  { %8548 = vmatmul.mubr.msk.f32.gmra.mrb[8].mxu1 %vm765_vm3, %v1600_v19 }
0x11cc   :  { %1975 = vmatprep.mubr.f32.mxu1 %v11828_v0 }
0x11d3   :  { %1976 = vmatmul.mubr.f32.vlgmr.msra.gmra.mrb[8].mxu1 %v11828_v0 }
0x11d4   :  { %9902 = vmatpush1.bf16.msra.mxu1 %v12517_v25  ;;  %2078 = vmatprep.mubr.f32.mxu1 %v11828_v0 }
0x11d5   :  { %9904 = vmatprep.subr.bf16.mxu1 %v12519_v26 }
0x11d8   :  { %9906 = vmatpush1.bf16.msra.mxu1 %v12528_v10 }
0x11d9   :  { %9908 = vmatprep.subr.bf16.mxu1 %v12531_v32 }
0x11dc   :  { %9910 = vmatpush1.bf16.msra.mxu1 %v12540_v38 }
0x11dd   :  { %9912 = vmatprep.subr.bf16.mxu1 %v12543_v39 }
0x11e0   :  { %9914 = vmatpush1.bf16.msra.mxu1 %v12550_v45 }
0x11e1   :  { %9916 = vmatprep.subr.bf16.mxu1 %v12500_v13 }
0x12a6   :  { %v1977_v48 = vpop.f32.mrb[8].mxu1 }
0x12a7   :  { %v10541_v49 = vadd.f32 %v1977_v48, %v12576_v47  ;;  %v1979_v51 = vpop.f32.mrb[9].mxu1 }
0x12a8   :  { %v10542_v54 = vadd.f32 %v1979_v51, %v12580_v28 }
0x12a9   :  { %v8549_v52 = vmul.f32 -1.442695, %v10541_v49 }
0x12aa   :  { %v8550_v41 = vmul.f32 -1.442695, %v10542_v54 }
0x12ab   :  { %10826 = vpow2.f32 %v8549_v52 }
0x12ac   :  { %10828 = vtanh.f32 %v10542_v54 }
0x12b5   :  { %v10827_v29 = vpop.eup %10826 }
0x12b6   :  { %v1990_v34 = vadd.f32 1.0, %v10827_v29  ;;  %v10829_v35 = vpop.eup %10828 }
0x12b8   :  { %10830 = vrcp.f32 %v1990_v34 }
0x12b9   :  { %10832 = vpow2.f32 %v8550_v41 }
0x12c2   :  { %v10831_v55 = vpop.eup %10830 }
0x12c3   :  { %v1998_v40 = vmul.f32 %v10831_v55, %v10829_v35  ;;  %v10833_v44 = vpop.eup %10832  ;;  %v1997_v56 = vmul.f32 0.0, %v10831_v55 }
0x12c4   :  { %v1991_v20 = vadd.f32 1.0, %v10833_v44 }
0x12c5   :  { %2000 = vrot.lane.b32.xlu0 %v1998_v40, %s11829_s22 }
0x12c6   :  { %10834 = vrcp.f32 %v1991_v20 }
0x12d0   :  { %v10835_v60 = vpop.eup %10834 }
0x1337   :  { %v2001_v21 = vpop.permute.xlu0 %2000 }
0x1338   :  { %v2003_v58 = vadd.f32 %v2001_v21, %v1997_v56 }
0x133a   :  { %10836 = vtanh.f32 %v2003_v58 }
0x1344   :  { %v10837_v61 = vpop.eup %10836 }
0x1345   :  { %v2005_v62 = vmul.f32 %v10837_v61, %v10835_v60 }
0x1347   :  { %2007 = vrot.lane.b32.xlu1 %v2005_v62, %s11829_s22 }
0x13b9   :  { %v2008_v63 = vpop.permute.xlu1 %2007 }
0x13ba   :  { %2010 = vst.msk [vmem:[#allocation3] sm:$0xff] %vm868_vm1, %v2008_v63  ;;  %8551 = vmatmul.mubr.msk.f32.vlgmr.msra.gmra.mrb[10].mxu1 %vm765_vm3, %v2008_v63 }
0x13bb   :  { %2011 = vst.msk [vmem:[#allocation3 + $0x38] sm:$0xff] %vm870_vm2, %v2008_v63  ;;  %9918 = vmatpush1.bf16.msra.mxu1 %v12517_v25  ;;  %2181 = vmatprep.mubr.f32.mxu1 %v11828_v0 }
0x13bc   :  { %9920 = vmatprep.subr.bf16.mxu1 %v12519_v26 }
0x13bf   :  { %9922 = vmatpush1.bf16.msra.mxu1 %v12528_v10 }
0x13c0   :  { %9924 = vmatprep.subr.bf16.mxu1 %v12531_v32 }
0x13c3   :  { %9926 = vmatpush1.bf16.msra.mxu1 %v12540_v38 }
0x13c4   :  { %9928 = vmatprep.subr.bf16.mxu1 %v12543_v39 }
0x13c7   :  { %9930 = vmatpush1.bf16.msra.mxu1 %v12550_v45 }
0x13c8   :  { %9932 = vmatprep.subr.bf16.mxu1 %v12500_v13 }
0x148d   :  { %v2080_v1 = vpop.f32.mrb[10].mxu1 }
0x148e   :  { %v10543_v2 = vadd.f32 %v2080_v1, %v12576_v47  ;;  %v2082_v4 = vpop.f32.mrb[11].mxu1 }
0x148f   :  { %v10544_v3 = vadd.f32 %v2082_v4, %v12580_v28 }
0x1490   :  { %v8552_v5 = vmul.f32 -1.442695, %v10543_v2 }
0x1491   :  { %v8553_v12 = vmul.f32 -1.442695, %v10544_v3 }
0x1492   :  { %10838 = vpow2.f32 %v8552_v5 }
0x1493   :  { %10840 = vtanh.f32 %v10544_v3 }
0x149c   :  { %v10839_v6 = vpop.eup %10838 }
0x149d   :  { %v2093_v8 = vadd.f32 1.0, %v10839_v6  ;;  %v10841_v9 = vpop.eup %10840 }
0x149f   :  { %10842 = vrcp.f32 %v2093_v8 }
0x14a0   :  { %10844 = vpow2.f32 %v8553_v12 }
0x14a9   :  { %v10843_v11 = vpop.eup %10842 }
0x14aa   :  { %v2101_v57 = vmul.f32 %v10843_v11, %v10841_v9  ;;  %v10845_v14 = vpop.eup %10844  ;;  %v2100_v16 = vmul.f32 %v10843_v11, %v2003_v58 }
0x14ab   :  { %v2094_v15 = vadd.f32 1.0, %v10845_v14 }
0x14ac   :  { %2103 = vrot.lane.b32.xlu0 %v2101_v57, %s11829_s22 }
0x14ad   :  { %10846 = vrcp.f32 %v2094_v15 }
0x14b7   :  { %v10847_v59 = vpop.eup %10846 }
0x151e   :  { %v2104_v18 = vpop.permute.xlu0 %2103 }
0x151f   :  { %v2106_v19 = vadd.f32 %v2104_v18, %v2100_v16 }
0x1521   :  { %10848 = vtanh.f32 %v2106_v19 }
0x152b   :  { %v10849_v22 = vpop.eup %10848 }
0x152c   :  { %v2108_v23 = vmul.f32 %v10849_v22, %v10847_v59 }
0x152e   :  { %2110 = vrot.lane.b32.xlu1 %v2108_v23, %s11829_s22 }
0x15a0   :  { %v2111_v24 = vpop.permute.xlu1 %2110 }
0x15a1   :  { %2113 = vst.msk [vmem:[#allocation3 + $0x8] sm:$0xff] %vm868_vm1, %v2111_v24  ;;  %8554 = vmatmul.mubr.msk.f32.vlgmr.msra.gmra.mrb[12].mxu1 %vm765_vm3, %v2111_v24 }
0x15a2   :  { %2114 = vst.msk [vmem:[#allocation3 + $0x30] sm:$0xff] %vm870_vm2, %v2111_v24  ;;  %9934 = vmatpush1.bf16.msra.mxu1 %v12517_v25  ;;  %2284 = vmatprep.mubr.f32.mxu1 %v11828_v0 }
0x15a3   :  { %9936 = vmatprep.subr.bf16.mxu1 %v12519_v26 }
0x15a6   :  { %9938 = vmatpush1.bf16.msra.mxu1 %v12528_v10 }
0x15a7   :  { %9940 = vmatprep.subr.bf16.mxu1 %v12531_v32 }
0x15aa   :  { %9942 = vmatpush1.bf16.msra.mxu1 %v12540_v38 }
0x15ab   :  { %9944 = vmatprep.subr.bf16.mxu1 %v12543_v39 }
0x15ae   :  { %9946 = vmatpush1.bf16.msra.mxu1 %v12550_v45 }
0x15af   :  { %9948 = vmatprep.subr.bf16.mxu1 %v12500_v13 }
0x1674   :  { %v2183_v27 = vpop.f32.mrb[12].mxu1 }
0x1675   :  { %v10545_v30 = vadd.f32 %v2183_v27, %v12576_v47  ;;  %v2185_v7 = vpop.f32.mrb[13].mxu1 }
0x1676   :  { %v10546_v33 = vadd.f32 %v2185_v7, %v12580_v28 }
0x1677   :  { %v8555_v31 = vmul.f32 -1.442695, %v10545_v30 }
0x1678   :  { %v8556_v46 = vmul.f32 -1.442695, %v10546_v33 }
0x1679   :  { %10850 = vpow2.f32 %v8555_v31 }
0x167a   :  { %10852 = vtanh.f32 %v10546_v33 }
0x1683   :  { %v10851_v36 = vpop.eup %10850 }
0x1684   :  { %v2196_v17 = vadd.f32 1.0, %v10851_v36  ;;  %v10853_v37 = vpop.eup %10852 }
0x1686   :  { %10854 = vrcp.f32 %v2196_v17 }
0x1687   :  { %10856 = vpow2.f32 %v8556_v46 }
0x1690   :  { %v10855_v42 = vpop.eup %10854 }
0x1691   :  { %v2204_v43 = vmul.f32 %v10855_v42, %v10853_v37  ;;  %v10857_v48 = vpop.eup %10856  ;;  %v2203_v51 = vmul.f32 %v10855_v42, %v2106_v19 }
0x1692   :  { %v2197_v49 = vadd.f32 1.0, %v10857_v48 }
0x1693   :  { %2206 = vrot.lane.b32.xlu0 %v2204_v43, %s11829_s22 }
0x1694   :  { %10858 = vrcp.f32 %v2197_v49 }
0x169e   :  { %v10859_v29 = vpop.eup %10858 }
0x1705   :  { %v2207_v52 = vpop.permute.xlu0 %2206 }
0x1706   :  { %v2209_v54 = vadd.f32 %v2207_v52, %v2203_v51 }
0x1708   :  { %10860 = vtanh.f32 %v2209_v54 }
0x1712   :  { %v10861_v34 = vpop.eup %10860 }
0x1713   :  { %v2211_v35 = vmul.f32 %v10861_v34, %v10859_v29 }
0x1715   :  { %2213 = vrot.lane.b32.xlu1 %v2211_v35, %s11829_s22 }
0x1787   :  { %v2214_v55 = vpop.permute.xlu1 %2213 }
0x1788   :  { %2216 = vst.msk [vmem:[#allocation3 + $0x10] sm:$0xff] %vm868_vm1, %v2214_v55  ;;  %8557 = vmatmul.mubr.msk.f32.vlgmr.msra.gmra.mrb[14].mxu1 %vm765_vm3, %v2214_v55 }
0x1789   :  { %2217 = vst.msk [vmem:[#allocation3 + $0x28] sm:$0xff] %vm870_vm2, %v2214_v55  ;;  %9950 = vmatpush1.bf16.msra.mxu1 %v12517_v25  ;;  %2387 = vmatprep.mubr.f32.mxu1 %v11828_v0 }
0x178a   :  { %9952 = vmatprep.subr.bf16.mxu1 %v12519_v26 }
0x178d   :  { %9954 = vmatpush1.bf16.msra.mxu1 %v12528_v10 }
0x178e   :  { %9956 = vmatprep.subr.bf16.mxu1 %v12531_v32 }
0x1791   :  { %9958 = vmatpush1.bf16.msra.mxu1 %v12540_v38 }
0x1792   :  { %9960 = vmatprep.subr.bf16.mxu1 %v12543_v39 }
0x1795   :  { %9962 = vmatpush1.bf16.msra.mxu1 %v12550_v45 }
0x1796   :  { %9964 = vmatprep.subr.bf16.mxu1 %v12500_v13 }
0x185b   :  { %v2286_v40 = vpop.f32.mrb[14].mxu1 }
0x185c   :  { %v10547_v41 = vadd.f32 %v2286_v40, %v12576_v47  ;;  %v2288_v44 = vpop.f32.mrb[15].mxu1 }
0x185d   :  { %v10548_v56 = vadd.f32 %v2288_v44, %v12580_v28 }
0x185e   :  { %v8558_v20 = vmul.f32 -1.442695, %v10547_v41 }
0x185f   :  { %v8559_v63 = vmul.f32 -1.442695, %v10548_v56 }
0x1860   :  { %10862 = vpow2.f32 %v8558_v20 }
0x1861   :  { %10864 = vtanh.f32 %v10548_v56 }
0x186a   :  { %v10863_v21 = vpop.eup %10862 }
0x186b   :  { %v2299_v58 = vadd.f32 1.0, %v10863_v21  ;;  %v10865_v60 = vpop.eup %10864 }
0x186d   :  { %10866 = vrcp.f32 %v2299_v58 }
0x186e   :  { %10868 = vpow2.f32 %v8559_v63 }
0x1877   :  { %v10867_v61 = vpop.eup %10866 }
0x1878   :  { %v2307_v62 = vmul.f32 %v10867_v61, %v10865_v60  ;;  %v10869_v1 = vpop.eup %10868  ;;  %v2306_v4 = vmul.f32 %v10867_v61, %v2209_v54 }
0x1879   :  { %v2300_v2 = vadd.f32 1.0, %v10869_v1 }
0x187a   :  { %2309 = vrot.lane.b32.xlu0 %v2307_v62, %s11829_s22 }
0x187b   :  { %10870 = vrcp.f32 %v2300_v2 }
0x1885   :  { %v10871_v6 = vpop.eup %10870 }
0x18ec   :  { %v2310_v5 = vpop.permute.xlu0 %2309 }
0x18ed   :  { %v2312_v3 = vadd.f32 %v2310_v5, %v2306_v4 }
0x18ef   :  { %10872 = vtanh.f32 %v2312_v3 }
0x18f9   :  { %v10873_v8 = vpop.eup %10872 }
0x18fa   :  { %v2314_v9 = vmul.f32 %v10873_v8, %v10871_v6 }
0x18fc   :  { %2316 = vrot.lane.b32.xlu1 %v2314_v9, %s11829_s22 }
0x196e   :  { %v2317_v11 = vpop.permute.xlu1 %2316 }
0x196f   :  { %2319 = vst.msk [vmem:[#allocation3 + $0x18] sm:$0xff] %vm868_vm1, %v2317_v11  ;;  %8560 = vmatmul.mubr.msk.f32.vlgmr.msra.gmra.mrb[16].mxu1 %vm765_vm3, %v2317_v11 }
0x1970   :  { %2320 = vst.msk [vmem:[#allocation3 + $0x20] sm:$0xff] %vm870_vm2, %v2317_v11  ;;  %9966 = vmatpush1.bf16.msra.mxu1 %v12517_v25  ;;  %2490 = vmatprep.mubr.f32.mxu1 %v11828_v0 }
0x1971   :  { %9968 = vmatprep.subr.bf16.mxu1 %v12519_v26 }
0x1974   :  { %9970 = vmatpush1.bf16.msra.mxu1 %v12528_v10 }
0x1975   :  { %9972 = vmatprep.subr.bf16.mxu1 %v12531_v32 }
0x1978   :  { %9974 = vmatpush1.bf16.msra.mxu1 %v12540_v38 }
0x1979   :  { %9976 = vmatprep.subr.bf16.mxu1 %v12543_v39 }
0x197c   :  { %9978 = vmatpush1.bf16.msra.mxu1 %v12550_v45 }
0x197d   :  { %9980 = vmatprep.subr.bf16.mxu1 %v12500_v13 }
0x1a42   :  { %v2389_v57 = vpop.f32.mrb[16].mxu1 }
0x1a43   :  { %v10549_v12 = vadd.f32 %v2389_v57, %v12576_v47  ;;  %v2391_v14 = vpop.f32.mrb[17].mxu1 }
0x1a44   :  { %v10550_v16 = vadd.f32 %v2391_v14, %v12580_v28 }
0x1a45   :  { %v8561_v15 = vmul.f32 -1.442695, %v10549_v12 }
0x1a46   :  { %v8562_v24 = vmul.f32 -1.442695, %v10550_v16 }
0x1a47   :  { %10874 = vpow2.f32 %v8561_v15 }
0x1a48   :  { %10876 = vtanh.f32 %v10550_v16 }
0x1a51   :  { %v10875_v18 = vpop.eup %10874 }
0x1a52   :  { %v2402_v19 = vadd.f32 1.0, %v10875_v18  ;;  %v10877_v59 = vpop.eup %10876 }
0x1a54   :  { %10878 = vrcp.f32 %v2402_v19 }
0x1a55   :  { %10880 = vpow2.f32 %v8562_v24 }
0x1a5e   :  { %v10879_v22 = vpop.eup %10878 }
0x1a5f   :  { %v2410_v23 = vmul.f32 %v10879_v22, %v10877_v59  ;;  %v10881_v27 = vpop.eup %10880  ;;  %v2409_v7 = vmul.f32 %v10879_v22, %v2312_v3 }
0x1a60   :  { %v2403_v30 = vadd.f32 1.0, %v10881_v27  ;;  %v2744_v27 = vld [vmem:[%s13689_s3 + $0x18] sm:$0xff] }
0x1a61   :  { %2412 = vrot.lane.b32.xlu0 %v2410_v23, %s11829_s22 }
0x1a62   :  { %10882 = vrcp.f32 %v2403_v30  ;;  %v2741_v30 = vld [vmem:[%s13689_s3] sm:$0xff] }
0x1a6c   :  { %v10883_v36 = vpop.eup %10882 }
0x1ad3   :  { %v2413_v31 = vpop.permute.xlu0 %2412 }
0x1ad4   :  { %v2415_v33 = vadd.f32 %v2413_v31, %v2409_v7  ;;  %v2743_v31 = vld [vmem:[%s13689_s3 + $0x10] sm:$0xff] }
0x1ad6   :  { %10884 = vtanh.f32 %v2415_v33 }
0x1ae0   :  { %v10885_v17 = vpop.eup %10884 }
0x1ae1   :  { %v2417_v37 = vmul.f32 %v10885_v17, %v10883_v36  ;;  %v2748_v36 = vld [vmem:[%s13689_s3 + $0x38] sm:$0xff]  ;;  %v10013_v17 = vpack.c.bf16 %v2743_v31, %v2741_v30 }
0x1ae3   :  { %2419 = vrot.lane.b32.xlu1 %v2417_v37, %s11829_s22  ;;  %v2745_v37 = vld [vmem:[%s13689_s3 + $0x20] sm:$0xff] }
0x1b55   :  { %v2420_v42 = vpop.permute.xlu1 %2419 }
0x1b56   :  { %2422 = vst.msk [vmem:[#allocation3 + $0x20] sm:$0xff] %vm868_vm1, %v2420_v42  ;;  %8563 = vmatmul.mubr.msk.f32.vlgmr.msra.gmra.mrb[18].mxu1 %vm765_vm3, %v2420_v42 }
0x1b57   :  { %2423 = vst.msk [vmem:[#allocation3 + $0x18] sm:$0xff] %vm870_vm2, %v2420_v42  ;;  %9982 = vmatpush1.bf16.msra.mxu1 %v12517_v25  ;;  %2593 = vmatprep.mubr.f32.mxu1 %v11828_v0  ;;  %v2747_v42 = vld [vmem:[%s13689_s3 + $0x30] sm:$0xff] }
0x1b58   :  { %9984 = vmatprep.subr.bf16.mxu1 %v12519_v26 }
0x1b5b   :  { %9986 = vmatpush1.bf16.msra.mxu1 %v12528_v10 }
0x1b5c   :  { %9988 = vmatprep.subr.bf16.mxu1 %v12531_v32 }
0x1b5d   :  { %v2737_v31 = vld [vmem:[#allocation3 + $0x20] sm:$0xff] }
0x1b5f   :  { %9990 = vmatpush1.bf16.msra.mxu1 %v12540_v38 }
0x1b60   :  { %9992 = vmatprep.subr.bf16.mxu1 %v12543_v39 }
0x1b63   :  { %9994 = vmatpush1.bf16.msra.mxu1 %v12550_v45 }
0x1b64   :  { %9996 = vmatprep.subr.bf16.mxu1 %v12500_v13 }
0x1c29   :  { %v2492_v43 = vpop.f32.mrb[18].mxu1 }
0x1c2a   :  { %v10551_v46 = vadd.f32 %v2492_v43, %v12576_v47  ;;  %v2494_v48 = vpop.f32.mrb[19].mxu1  ;;  %v10017_v43 = vpack.c.bf16 %v2747_v42, %v2745_v37  ;;  %v3037_v37 = vld [vmem:[%s13691_s10 + $0x10] sm:$0xff]  ;;  %v3040_v42 = vld [vmem:[%s13691_s10 + $0x28] sm:$0xff] }
0x1c2b   :  { %v10552_v51 = vadd.f32 %v2494_v48, %v12580_v28 }
0x1c2c   :  { %v8564_v49 = vmul.f32 -1.442695, %v10551_v46 }
0x1c2d   :  { %v8565_v55 = vmul.f32 -1.442695, %v10552_v51 }
0x1c2e   :  { %10886 = vpow2.f32 %v8564_v49 }
0x1c2f   :  { %10888 = vtanh.f32 %v10552_v51 }
0x1c38   :  { %v10887_v52 = vpop.eup %10886 }
0x1c39   :  { %v2505_v54 = vadd.f32 1.0, %v10887_v52  ;;  %v10889_v29 = vpop.eup %10888 }
0x1c3b   :  { %10890 = vrcp.f32 %v2505_v54 }
0x1c3c   :  { %10892 = vpow2.f32 %v8565_v55  ;;  %v2749_v55 = vld [vmem:[%s13689_s3 + $0x40] sm:$0xff] }
0x1c45   :  { %v10891_v34 = vpop.eup %10890 }
0x1c46   :  { %v2513_v35 = vmul.f32 %v10891_v34, %v10889_v29  ;;  %v10893_v13 = vpop.eup %10892  ;;  %v2512_v41 = vmul.f32 %v10891_v34, %v2415_v33  ;;  %v2746_v33 = vld [vmem:[%s13689_s3 + $0x28] sm:$0xff]  ;;  %v2752_v34 = vld [vmem:[%s13689_s3 + $0x58] sm:$0xff] }
0x1c47   :  { %v2506_v40 = vadd.f32 1.0, %v10893_v13  ;;  %v2750_v29 = vld [vmem:[%s13689_s3 + $0x48] sm:$0xff]  ;;  %v2751_v13 = vld [vmem:[%s13689_s3 + $0x50] sm:$0xff] }
0x1c48   :  { %2515 = vrot.lane.b32.xlu0 %v2513_v35, %s11829_s22  ;;  %v10019_v35 = vpack.c.bf16 %v2752_v34, %v2750_v29 }
0x1c49   :  { %10894 = vrcp.f32 %v2506_v40  ;;  %v10021_v40 = vpack.c.bf16 %v2751_v13, %v2749_v55  ;;  %v3045_v55 = vld [vmem:[%s13691_s10 + $0x50] sm:$0xff]  ;;  %v3048_v13 = vld [vmem:[%s13691_s10 + $0x68] sm:$0xff] }
0x1c53   :  { %v10895_v56 = vpop.eup %10894 }
0x1cba   :  { %v2516_v44 = vpop.permute.xlu0 %2515 }
0x1cbb   :  { %v2518_v20 = vadd.f32 %v2516_v44, %v2512_v41  ;;  %v2754_v41 = vld [vmem:[%s13689_s3 + $0x68] sm:$0xff]  ;;  %v2756_v44 = vld [vmem:[%s13689_s3 + $0x78] sm:$0xff] }
0x1cbd   :  { %10896 = vtanh.f32 %v2518_v20 }
0x1cc7   :  { %v10897_v21 = vpop.eup %10896 }
0x1cc8   :  { %v2520_v58 = vmul.f32 %v10897_v21, %v10895_v56  ;;  %v10023_v56 = vpack.c.bf16 %v2756_v44, %v2754_v41  ;;  %v2755_v21 = vld [vmem:[%s13689_s3 + $0x70] sm:$0xff] }
0x1cca   :  { %2522 = vrot.lane.b32.xlu1 %v2520_v58, %s11829_s22 }
0x1d3c   :  { %v2523_v60 = vpop.permute.xlu1 %2522 }
0x1d3d   :  { %2525 = vst.msk [vmem:[#allocation3 + $0x28] sm:$0xff] %vm868_vm1, %v2523_v60  ;;  %8566 = vmatmul.mubr.msk.f32.vlgmr.msra.gmra.mrb[20].mxu1 %vm765_vm3, %v2523_v60 }
0x1d3e   :  { %2526 = vst.msk [vmem:[#allocation3 + $0x10] sm:$0xff] %vm870_vm2, %v2523_v60  ;;  %9998 = vmatpush1.bf16.msra.mxu1 %v12517_v25  ;;  %2696 = vmatprep.mubr.f32.mxu1 %v11828_v0  ;;  %v2907_v60 = vld [vmem:[%s13690_s7 + $0x8] sm:$0xff] }
0x1d3f   :  { %10000 = vmatprep.subr.bf16.mxu1 %v12519_v26 }
0x1d42   :  { %10002 = vmatpush1.bf16.msra.mxu1 %v12528_v10 }
0x1d43   :  { %10004 = vmatprep.subr.bf16.mxu1 %v12531_v32 }
0x1d46   :  { %10006 = vmatpush1.bf16.msra.mxu1 %v12540_v38 }
0x1d47   :  { %10008 = vmatprep.subr.bf16.mxu1 %v12543_v39 }
0x1d4a   :  { %10010 = vmatpush1.bf16.msra.mxu1 %v12550_v45 }
0x1e10   :  { %v2595_v61 = vpop.f32.mrb[20].mxu1 }
0x1e11   :  { %v10553_v62 = vadd.f32 %v2595_v61, %v12576_v47  ;;  %v2597_v63 = vpop.f32.mrb[21].mxu1  ;;  %v2909_v61 = vld [vmem:[%s13690_s7 + $0x18] sm:$0xff] }
0x1e12   :  { %v10554_v25 = vadd.f32 %v2597_v63, %v12580_v28  ;;  %v10027_v63 = vpack.c.bf16 %v2909_v61, %v2907_v60 }
0x1e13   :  { %v8567_v1 = vmul.f32 -1.442695, %v10553_v62 }
0x1e14   :  { %v8568_v38 = vmul.f32 -1.442695, %v10554_v25 }
0x1e15   :  { %10898 = vpow2.f32 %v8567_v1 }
0x1e16   :  { %10900 = vtanh.f32 %v10554_v25 }
0x1e1f   :  { %v10899_v2 = vpop.eup %10898 }
0x1e20   :  { %v2608_v26 = vadd.f32 1.0, %v10899_v2  ;;  %v10901_v10 = vpop.eup %10900 }
0x1e22   :  { %10902 = vrcp.f32 %v2608_v26  ;;  %v2906_v26 = vld [vmem:[%s13690_s7] sm:$0xff] }
0x1e23   :  { %10904 = vpow2.f32 %v8568_v38 }
0x1e2c   :  { %v10903_v32 = vpop.eup %10902 }
0x1e2d   :  { %v2616_v4 = vmul.f32 %v10903_v32, %v10901_v10  ;;  %v10905_v39 = vpop.eup %10904  ;;  %v2615_v5 = vmul.f32 %v10903_v32, %v2518_v20  ;;  %v2753_v20 = vld [vmem:[%s13689_s3 + $0x60] sm:$0xff]  ;;  %v2908_v10 = vld [vmem:[%s13690_s7 + $0x10] sm:$0xff]  ;;  %v2911_v32 = vld [vmem:[%s13690_s7 + $0x28] sm:$0xff] }
0x1e2e   :  { %v2609_v45 = vadd.f32 1.0, %v10905_v39  ;;  %v10025_v58 = vpack.c.bf16 %v2755_v21, %v2753_v20  ;;  %v10029_v38 = vpack.c.bf16 %v2908_v10, %v2906_v26  ;;  %v3047_v20 = vld [vmem:[%s13691_s10 + $0x60] sm:$0xff] }
0x1e2f   :  { %2618 = vrot.lane.b32.xlu0 %v2616_v4, %s11829_s22  ;;  %v2913_v4 = vld [vmem:[%s13690_s7 + $0x38] sm:$0xff] }
0x1e30   :  { %10906 = vrcp.f32 %v2609_v45  ;;  %v10031_v39 = vpack.c.bf16 %v2913_v4, %v2911_v32  ;;  %v2910_v45 = vld [vmem:[%s13690_s7 + $0x20] sm:$0xff] }
0x1e3a   :  { %v10907_v8 = vpop.eup %10906 }
0x1ea1   :  { %v2619_v3 = vpop.permute.xlu0 %2618 }
0x1ea2   :  { %v2621_v6 = vadd.f32 %v2619_v3, %v2615_v5  ;;  %v2912_v5 = vld [vmem:[%s13690_s7 + $0x30] sm:$0xff] }
0x1ea4   :  { %10908 = vtanh.f32 %v2621_v6 }
0x1eae   :  { %v10909_v9 = vpop.eup %10908 }
0x1eaf   :  { %v2623_v11 = vmul.f32 %v10909_v9, %v10907_v8  ;;  %v2917_v8 = vld [vmem:[%s13690_s7 + $0x58] sm:$0xff]  ;;  %v10033_v9 = vpack.c.bf16 %v2912_v5, %v2910_v45 }
0x1eb1   :  { %2625 = vrot.lane.b32.xlu1 %v2623_v11, %s11829_s22 }
0x1f23   :  { %v2626_v57 = vpop.permute.xlu1 %2625 }
0x1f24   :  { %2628 = vst.msk [vmem:[#allocation3 + $0x30] sm:$0xff] %vm868_vm1, %v2626_v57  ;;  %8569 = vmatmul.mubr.msk.f32.vlgmr.msra.gmra.mrb[22].mxu1 %vm765_vm3, %v2626_v57 }
0x1f25   :  { %2629 = vst.msk [vmem:[#allocation3 + $0x8] sm:$0xff] %vm870_vm2, %v2626_v57  ;;  %v2914_v57 = vld [vmem:[%s13690_s7 + $0x40] sm:$0xff] }
0x1ff7   :  { %v2698_v12 = vpop.f32.mrb[22].mxu1 }
0x1ff8   :  { %v10555_v14 = vadd.f32 %v2698_v12, %v12576_v47  ;;  %v2700_v15 = vpop.f32.mrb[23].mxu1  ;;  %v2742_v47 = vld [vmem:[%s13689_s3 + $0x8] sm:$0xff]  ;;  %v2916_v12 = vld [vmem:[%s13690_s7 + $0x50] sm:$0xff] }
0x1ff9   :  { %v10556_v18 = vadd.f32 %v2700_v15, %v12580_v28  ;;  %v10011_v7 = vpack.c.bf16 %v2744_v27, %v2742_v47  ;;  %v10015_v28 = vpack.c.bf16 %v2748_v36, %v2746_v33  ;;  %v2919_v15 = vld [vmem:[%s13690_s7 + $0x68] sm:$0xff]  ;;  %v3038_v47 = vld [vmem:[%s13691_s10 + $0x18] sm:$0xff]  ;;  %v2739_v36 = vld [vmem:[#allocation3 + $0x30] sm:$0xff] }
0x1ffa   :  { %v8570_v16 = vmul.f32 -1.442695, %v10555_v14  ;;  %v2734_v14 = vld [vmem:[#allocation3 + $0x8] sm:$0xff] }
0x1ffb   :  { %10012 = vmatprep.subr.bf16.mxu0 %v10011_v7  ;;  %v8571_v46 = vmul.f32 -1.442695, %v10556_v18  ;;  %v2736_v7 = vld [vmem:[#allocation3 + $0x18] sm:$0xff]  ;;  %v2738_v33 = vld [vmem:[#allocation3 + $0x28] sm:$0xff] }
0x1ffc   :  { %10910 = vpow2.f32 %v8570_v16  ;;  %10014 = vmatpush1.bf16.msra.mxu0 %v10013_v17  ;;  %v2921_v16 = vld [vmem:[%s13690_s7 + $0x78] sm:$0xff] }
0x1ffd   :  { %10912 = vtanh.f32 %v10556_v18  ;;  %10016 = vmatprep.subr.bf16.mxu0 %v10015_v28  ;;  %v10037_v18 = vpack.c.bf16 %v2916_v12, %v2914_v57  ;;  %v3035_v28 = vld [vmem:[%s13691_s10] sm:$0xff] }
0x2000   :  { %10018 = vmatpush1.bf16.msra.mxu0 %v10017_v43  ;;  %v3042_v43 = vld [vmem:[%s13691_s10 + $0x38] sm:$0xff] }
0x2001   :  { %10020 = vmatprep.subr.bf16.mxu0 %v10019_v35  ;;  %v3043_v35 = vld [vmem:[%s13691_s10 + $0x40] sm:$0xff] }
0x2002   :  { %v12769_v41 = vpack.c.bf16 %v3045_v55, %v3043_v35 }
0x2004   :  { %10022 = vmatpush1.bf16.msra.mxu0 %v10021_v40  ;;  %v3050_v40 = vld [vmem:[%s13691_s10 + $0x78] sm:$0xff] }
0x2005   :  { %10024 = vmatprep.subr.bf16.mxu0 %v10023_v56  ;;  %v12772_v44 = vpack.c.bf16 %v3050_v40, %v3048_v13  ;;  %v3049_v56 = vld [vmem:[%s13691_s10 + $0x70] sm:$0xff] }
0x2006   :  { %v10911_v19 = vpop.eup %10910  ;;  %v12779_v21 = vpack.c.bf16 %v3049_v56, %v3047_v20 }
0x2007   :  { %v2711_v59 = vadd.f32 1.0, %v10911_v19  ;;  %v10913_v22 = vpop.eup %10912  ;;  %v10039_v19 = vpack.c.bf16 %v2921_v16, %v2919_v15 }
0x2008   :  { %10026 = vmatpush1.bf16.msra.mxu0 %v10025_v58  ;;  %v2757_v58 = vld [vmem:[#allocation9] sm:$0x3] }
0x2009   :  { %10914 = vrcp.f32 %v2711_v59  ;;  %10028 = vmatprep.subr.bf16.mxu0 %v10027_v63  ;;  %v2918_v59 = vld [vmem:[%s13690_s7 + $0x60] sm:$0xff]  ;;  %v12805_v60 = vrot.slane %v2757_v58, %v12325_v50 }
0x200a   :  { %10916 = vpow2.f32 %v8571_v46  ;;  %v12746_v46 = vpack.c.bf16 %v3037_v37, %v3035_v28 }
0x2013   :  { %v10915_v23 = vpop.eup %10914 }
0x2014   :  { %v2719_v24 = vmul.f32 %v10915_v23, %v10913_v22  ;;  %v10917_v48 = vpop.eup %10916  ;;  %v2718_v51 = vmul.f32 %v10915_v23, %v2621_v6  ;;  %v2915_v6 = vld [vmem:[%s13690_s7 + $0x48] sm:$0xff]  ;;  %v2920_v22 = vld [vmem:[%s13690_s7 + $0x70] sm:$0xff] }
0x2015   :  { %v2712_v49 = vadd.f32 1.0, %v10917_v48  ;;  %v10035_v11 = vpack.c.bf16 %v2917_v8, %v2915_v6  ;;  %v2735_v23 = vld [vmem:[#allocation3 + $0x10] sm:$0xff]  ;;  %v10041_v27 = vpack.c.bf16 %v2920_v22, %v2918_v59  ;;  %v12748_v48 = vpack.c.bf16 %v3042_v43, %v3040_v42 }
0x2016   :  { %2721 = vrot.lane.b32.xlu0 %v2719_v24, %s11829_s22  ;;  %v3036_v24 = vld [vmem:[%s13691_s10 + $0x8] sm:$0xff] }
0x2017   :  { %10918 = vrcp.f32 %v2712_v49  ;;  %v12729_v30 = vpack.c.bf16 %v3038_v47, %v3036_v24  ;;  %v3039_v49 = vld [vmem:[%s13691_s10 + $0x20] sm:$0xff] }
0x2021   :  { %v10919_v62 = vpop.eup %10918 }
0x2088   :  { %v2722_v52 = vpop.permute.xlu0 %2721 }
0x2089   :  { %v2724_v54 = vadd.f32 %v2722_v52, %v2718_v51  ;;  %v3041_v51 = vld [vmem:[%s13691_s10 + $0x30] sm:$0xff]  ;;  %v3044_v52 = vld [vmem:[%s13691_s10 + $0x48] sm:$0xff] }
0x208a   :  { %v12757_v29 = vpack.c.bf16 %v3041_v51, %v3039_v49 }
0x208b   :  { %10920 = vtanh.f32 %v2724_v54  ;;  %v3046_v54 = vld [vmem:[%s13691_s10 + $0x58] sm:$0xff] }
0x208c   :  { %v12760_v34 = vpack.c.bf16 %v3046_v54, %v3044_v52 }
0x2095   :  { %v10921_v1 = vpop.eup %10920 }
0x2096   :  { %v2726_v25 = vmul.f32 %v10921_v1, %v10919_v62 }
0x2098   :  { %2728 = vrot.lane.b32.xlu1 %v2726_v25, %s11829_s22  ;;  %v12809_v25 = vrot.slane %v2757_v58, %v12328_v53 }
0x210a   :  { %v2729_v2 = vpop.permute.xlu1 %2728 }
0x210b   :  { %2731 = vst.msk [vmem:[#allocation3 + $0x38] sm:$0xff] %vm868_vm1, %v2729_v2 }
0x210c   :  { %2732 = vst.msk [vmem:[#allocation3] sm:$0xff] %vm870_vm2, %v2729_v2 }
0x2112   :  { %v2740_v17 = vld [vmem:[#allocation3 + $0x38] sm:$0xff] }
0x2113   :  { %v2733_v3 = vld [vmem:[#allocation3] sm:$0xff] }
0x2114   :  { %8572 = vmatmul.mubr.msk.f32.vlgmr.msra.gmra.mrb[24].mxu0 %vm765_vm3, %v2733_v3 }
0x2115   :  { %10030 = vmatpush1.bf16.msra.mxu0 %v10029_v38  ;;  %2863 = vmatprep.mubr.f32.mxu0 %v11828_v0 }
0x2116   :  { %10032 = vmatprep.subr.bf16.mxu0 %v10031_v39 }
0x2118   :  { %8573 = vmatmul.mubr.msk.f32.gmra.mrb[26].mxu0 %vm765_vm3, %v2734_v14 }
0x2119   :  { %2869 = vmatprep.mubr.f32.mxu0 %v11828_v0  ;;  %10034 = vmatpush1.bf16.msra.mxu0 %v10033_v9 }
0x211a   :  { %10036 = vmatprep.subr.bf16.mxu0 %v10035_v11 }
0x211c   :  { %8574 = vmatmul.mubr.msk.f32.gmra.mrb[28].mxu0 %vm765_vm3, %v2735_v23 }
0x211d   :  { %2875 = vmatprep.mubr.f32.mxu0 %v11828_v0  ;;  %10038 = vmatpush1.bf16.msra.mxu0 %v10037_v18 }
0x211e   :  { %10040 = vmatprep.subr.bf16.mxu0 %v10039_v19 }
0x2120   :  { %8575 = vmatmul.mubr.msk.f32.gmra.mrb[30].mxu0 %vm765_vm3, %v2736_v7 }
0x2121   :  { %2881 = vmatprep.mubr.f32.mxu0 %v11828_v0  ;;  %10042 = vmatpush1.bf16.msra.mxu0 %v10041_v27 }
0x2122   :  { %10044 = vmatprep.subr.bf16.mxu0 %v12729_v30 }
0x2124   :  { %8576 = vmatmul.mubr.msk.f32.gmra.mrb[32].mxu0 %vm765_vm3, %v2737_v31 }
0x2125   :  { %2887 = vmatprep.mubr.f32.mxu0 %v11828_v0 }
0x2128   :  { %8577 = vmatmul.mubr.msk.f32.gmra.mrb[34].mxu0 %vm765_vm3, %v2738_v33 }
0x2129   :  { %2893 = vmatprep.mubr.f32.mxu0 %v11828_v0 }
0x212c   :  { %8578 = vmatmul.mubr.msk.f32.gmra.mrb[36].mxu0 %vm765_vm3, %v2739_v36 }
0x212d   :  { %2899 = vmatprep.mubr.f32.mxu0 %v11828_v0 }
0x2130   :  { %8579 = vmatmul.mubr.msk.f32.gmra.mrb[38].mxu0 %vm765_vm3, %v2740_v17 }
0x2131   :  { %2986 = vmatprep.mubr.f32.mxu0 %v11828_v0 }
0x2138   :  { %8580 = vmatmul.mubr.msk.f32.vlgmr.msra.gmra.mrb[38].mxu0 %vm765_vm3, %v2733_v3 }
0x2139   :  { %10046 = vmatpush1.bf16.msra.mxu0 %v12746_v46  ;;  %2992 = vmatprep.mubr.f32.mxu0 %v11828_v0 }
0x213a   :  { %10048 = vmatprep.subr.bf16.mxu0 %v12748_v48 }
0x213c   :  { %8581 = vmatmul.mubr.msk.f32.gmra.mrb[36].mxu0 %vm765_vm3, %v2734_v14 }
0x213d   :  { %2998 = vmatprep.mubr.f32.mxu0 %v11828_v0  ;;  %10050 = vmatpush1.bf16.msra.mxu0 %v12757_v29 }
0x213e   :  { %10052 = vmatprep.subr.bf16.mxu0 %v12760_v34 }
0x2140   :  { %8582 = vmatmul.mubr.msk.f32.gmra.mrb[34].mxu0 %vm765_vm3, %v2735_v23 }
0x2141   :  { %3004 = vmatprep.mubr.f32.mxu0 %v11828_v0  ;;  %10054 = vmatpush1.bf16.msra.mxu0 %v12769_v41 }
0x2142   :  { %10056 = vmatprep.subr.bf16.mxu0 %v12772_v44 }
0x2144   :  { %8583 = vmatmul.mubr.msk.f32.gmra.mrb[32].mxu0 %vm765_vm3, %v2736_v7 }
0x2145   :  { %3010 = vmatprep.mubr.f32.mxu0 %v11828_v0  ;;  %10058 = vmatpush1.bf16.msra.mxu0 %v12779_v21 }
0x2146   :  { %10060 = vmatprep.subr.bf16.mxu0 %v12729_v30 }
0x2148   :  { %8584 = vmatmul.mubr.msk.f32.gmra.mrb[30].mxu0 %vm765_vm3, %v2737_v31 }
0x2149   :  { %3016 = vmatprep.mubr.f32.mxu0 %v11828_v0 }
0x214c   :  { %8585 = vmatmul.mubr.msk.f32.gmra.mrb[28].mxu0 %vm765_vm3, %v2738_v33 }
0x214d   :  { %3022 = vmatprep.mubr.f32.mxu0 %v11828_v0 }
0x2150   :  { %8586 = vmatmul.mubr.msk.f32.gmra.mrb[26].mxu0 %vm765_vm3, %v2739_v36 }
0x2151   :  { %3028 = vmatprep.mubr.f32.mxu0 %v11828_v0 }
0x2154   :  { %8587 = vmatmul.mubr.msk.f32.gmra.mrb[24].mxu0 %vm765_vm3, %v2740_v17 }
0x2155   :  { %3115 = vmatprep.mubr.f32.mxu0 %v11828_v0 }
0x215c   :  { %3116 = vmatmul.mubr.f32.vlgmr.msra.gmra.mrb[24].mxu0 %v11828_v0 }
0x215d   :  { %10062 = vmatpush1.bf16.msra.mxu0 %v12746_v46  ;;  %3218 = vmatprep.mubr.f32.mxu0 %v11828_v0 }
0x215e   :  { %10064 = vmatprep.subr.bf16.mxu0 %v12748_v48 }
0x2161   :  { %10066 = vmatpush1.bf16.msra.mxu0 %v12757_v29 }
0x2162   :  { %10068 = vmatprep.subr.bf16.mxu0 %v12760_v34 }
0x2165   :  { %10070 = vmatpush1.bf16.msra.mxu0 %v12769_v41 }
0x2166   :  { %10072 = vmatprep.subr.bf16.mxu0 %v12772_v44 }
0x2169   :  { %10074 = vmatpush1.bf16.msra.mxu0 %v12779_v21 }
0x216a   :  { %10076 = vmatprep.subr.bf16.mxu0 %v12729_v30 }
0x222f   :  { %v3117_v61 = vpop.f32.mrb[24].mxu0 }
0x2230   :  { %v10557_v62 = vadd.f32 %v3117_v61, %v12805_v60  ;;  %v3119_v63 = vpop.f32.mrb[25].mxu0 }
0x2231   :  { %v10558_v2 = vadd.f32 %v3119_v63, %v12809_v25 }
0x2232   :  { %v8588_v1 = vmul.f32 -1.442695, %v10557_v62 }
0x2233   :  { %v8589_v50 = vmul.f32 -1.442695, %v10558_v2 }
0x2234   :  { %10922 = vpow2.f32 %v8588_v1 }
0x2235   :  { %10924 = vtanh.f32 %v10558_v2 }
0x223e   :  { %v10923_v26 = vpop.eup %10922 }
0x223f   :  { %v3130_v10 = vadd.f32 1.0, %v10923_v26  ;;  %v10925_v32 = vpop.eup %10924 }
0x2241   :  { %10926 = vrcp.f32 %v3130_v10 }
0x2242   :  { %10928 = vpow2.f32 %v8589_v50 }
0x224b   :  { %v10927_v4 = vpop.eup %10926 }
0x224c   :  { %v3138_v38 = vmul.f32 %v10927_v4, %v10925_v32  ;;  %v10929_v39 = vpop.eup %10928  ;;  %v3137_v5 = vmul.f32 0.0, %v10927_v4 }
0x224d   :  { %v3131_v45 = vadd.f32 1.0, %v10929_v39 }
0x224e   :  { %3140 = vrot.lane.b32.xlu0 %v3138_v38, %s11829_s22 }
0x224f   :  { %10930 = vrcp.f32 %v3131_v45 }
0x2259   :  { %v10931_v53 = vpop.eup %10930 }
0x22c0   :  { %v3141_v3 = vpop.permute.xlu0 %3140 }
0x22c1   :  { %v3143_v6 = vadd.f32 %v3141_v3, %v3137_v5 }
0x22c3   :  { %10932 = vtanh.f32 %v3143_v6 }
0x22cd   :  { %v10933_v8 = vpop.eup %10932 }
0x22ce   :  { %v3145_v9 = vmul.f32 %v10933_v8, %v10931_v53 }
0x22d0   :  { %3147 = vrot.lane.b32.xlu1 %v3145_v9, %s11829_s22 }
0x2342   :  { %v3148_v11 = vpop.permute.xlu1 %3147 }
0x2343   :  { %3150 = vst.msk [vmem:[#allocation2] sm:$0xff] %vm868_vm1, %v3148_v11  ;;  %8590 = vmatmul.mubr.msk.f32.vlgmr.msra.gmra.mrb[26].mxu0 %vm765_vm3, %v3148_v11 }
0x2344   :  { %3151 = vst.msk [vmem:[#allocation2 + $0x38] sm:$0xff] %vm870_vm2, %v3148_v11  ;;  %10078 = vmatpush1.bf16.msra.mxu0 %v12746_v46  ;;  %3321 = vmatprep.mubr.f32.mxu0 %v11828_v0 }
0x2345   :  { %10080 = vmatprep.subr.bf16.mxu0 %v12748_v48 }
0x2348   :  { %10082 = vmatpush1.bf16.msra.mxu0 %v12757_v29 }
0x2349   :  { %10084 = vmatprep.subr.bf16.mxu0 %v12760_v34 }
0x234c   :  { %10086 = vmatpush1.bf16.msra.mxu0 %v12769_v41 }
0x234d   :  { %10088 = vmatprep.subr.bf16.mxu0 %v12772_v44 }
0x2350   :  { %10090 = vmatpush1.bf16.msra.mxu0 %v12779_v21 }
0x2351   :  { %10092 = vmatprep.subr.bf16.mxu0 %v12729_v30 }
0x2416   :  { %v3220_v57 = vpop.f32.mrb[26].mxu0 }
0x2417   :  { %v10559_v12 = vadd.f32 %v3220_v57, %v12805_v60  ;;  %v3222_v14 = vpop.f32.mrb[27].mxu0 }
0x2418   :  { %v10560_v16 = vadd.f32 %v3222_v14, %v12809_v25 }
0x2419   :  { %v8591_v15 = vmul.f32 -1.442695, %v10559_v12 }
0x241a   :  { %v8592_v24 = vmul.f32 -1.442695, %v10560_v16 }
0x241b   :  { %10934 = vpow2.f32 %v8591_v15 }
0x241c   :  { %10936 = vtanh.f32 %v10560_v16 }
0x2425   :  { %v10935_v18 = vpop.eup %10934 }
0x2426   :  { %v3233_v19 = vadd.f32 1.0, %v10935_v18  ;;  %v10937_v59 = vpop.eup %10936 }
0x2428   :  { %10938 = vrcp.f32 %v3233_v19 }
0x2429   :  { %10940 = vpow2.f32 %v8592_v24 }
0x2432   :  { %v10939_v22 = vpop.eup %10938 }
0x2433   :  { %v3241_v23 = vmul.f32 %v10939_v22, %v10937_v59  ;;  %v10941_v47 = vpop.eup %10940  ;;  %v3240_v7 = vmul.f32 %v10939_v22, %v3143_v6 }
0x2434   :  { %v3234_v27 = vadd.f32 1.0, %v10941_v47 }
0x2435   :  { %3243 = vrot.lane.b32.xlu0 %v3241_v23, %s11829_s22 }
0x2436   :  { %10942 = vrcp.f32 %v3234_v27 }
0x2440   :  { %v10943_v36 = vpop.eup %10942 }
0x24a7   :  { %v3244_v31 = vpop.permute.xlu0 %3243 }
0x24a8   :  { %v3246_v33 = vadd.f32 %v3244_v31, %v3240_v7 }
0x24aa   :  { %10944 = vtanh.f32 %v3246_v33 }
0x24b4   :  { %v10945_v17 = vpop.eup %10944 }
0x24b5   :  { %v3248_v28 = vmul.f32 %v10945_v17, %v10943_v36 }
0x24b7   :  { %3250 = vrot.lane.b32.xlu1 %v3248_v28, %s11829_s22 }
0x2529   :  { %v3251_v37 = vpop.permute.xlu1 %3250 }
0x252a   :  { %3253 = vst.msk [vmem:[#allocation2 + $0x8] sm:$0xff] %vm868_vm1, %v3251_v37  ;;  %8593 = vmatmul.mubr.msk.f32.vlgmr.msra.gmra.mrb[28].mxu0 %vm765_vm3, %v3251_v37 }
0x252b   :  { %3254 = vst.msk [vmem:[#allocation2 + $0x30] sm:$0xff] %vm870_vm2, %v3251_v37  ;;  %10094 = vmatpush1.bf16.msra.mxu0 %v12746_v46  ;;  %3424 = vmatprep.mubr.f32.mxu0 %v11828_v0 }
0x252c   :  { %10096 = vmatprep.subr.bf16.mxu0 %v12748_v48 }
0x252f   :  { %10098 = vmatpush1.bf16.msra.mxu0 %v12757_v29 }
0x2530   :  { %10100 = vmatprep.subr.bf16.mxu0 %v12760_v34 }
0x2533   :  { %10102 = vmatpush1.bf16.msra.mxu0 %v12769_v41 }
0x2534   :  { %10104 = vmatprep.subr.bf16.mxu0 %v12772_v44 }
0x2537   :  { %10106 = vmatpush1.bf16.msra.mxu0 %v12779_v21 }
0x2538   :  { %10108 = vmatprep.subr.bf16.mxu0 %v12729_v30 }
0x25fd   :  { %v3323_v42 = vpop.f32.mrb[28].mxu0 }
0x25fe   :  { %v10561_v43 = vadd.f32 %v3323_v42, %v12805_v60  ;;  %v3325_v49 = vpop.f32.mrb[29].mxu0 }
0x25ff   :  { %v10562_v52 = vadd.f32 %v3325_v49, %v12809_v25 }
0x2600   :  { %v8594_v51 = vmul.f32 -1.442695, %v10561_v43 }
0x2601   :  { %v8595_v20 = vmul.f32 -1.442695, %v10562_v52 }
0x2602   :  { %10946 = vpow2.f32 %v8594_v51 }
0x2603   :  { %10948 = vtanh.f32 %v10562_v52 }
0x260c   :  { %v10947_v54 = vpop.eup %10946 }
0x260d   :  { %v3336_v35 = vadd.f32 1.0, %v10947_v54  ;;  %v10949_v55 = vpop.eup %10948 }
0x260f   :  { %10950 = vrcp.f32 %v3336_v35 }
0x2610   :  { %10952 = vpow2.f32 %v8595_v20 }
0x2619   :  { %v10951_v13 = vpop.eup %10950 }
0x261a   :  { %v3344_v40 = vmul.f32 %v10951_v13, %v10949_v55  ;;  %v10953_v56 = vpop.eup %10952  ;;  %v3343_v61 = vmul.f32 %v10951_v13, %v3246_v33 }
0x261b   :  { %v3337_v58 = vadd.f32 1.0, %v10953_v56 }
0x261c   :  { %3346 = vrot.lane.b32.xlu0 %v3344_v40, %s11829_s22 }
0x261d   :  { %10954 = vrcp.f32 %v3337_v58 }
0x2627   :  { %v10955_v1 = vpop.eup %10954 }
0x268e   :  { %v3347_v62 = vpop.permute.xlu0 %3346 }
0x268f   :  { %v3349_v63 = vadd.f32 %v3347_v62, %v3343_v61 }
0x2691   :  { %10956 = vtanh.f32 %v3349_v63 }
0x269b   :  { %v10957_v2 = vpop.eup %10956 }
0x269c   :  { %v3351_v26 = vmul.f32 %v10957_v2, %v10955_v1 }
0x269e   :  { %3353 = vrot.lane.b32.xlu1 %v3351_v26, %s11829_s22 }
0x2710   :  { %v3354_v10 = vpop.permute.xlu1 %3353 }
0x2711   :  { %3356 = vst.msk [vmem:[#allocation2 + $0x10] sm:$0xff] %vm868_vm1, %v3354_v10  ;;  %8596 = vmatmul.mubr.msk.f32.vlgmr.msra.gmra.mrb[30].mxu0 %vm765_vm3, %v3354_v10 }
0x2712   :  { %3357 = vst.msk [vmem:[#allocation2 + $0x28] sm:$0xff] %vm870_vm2, %v3354_v10  ;;  %10110 = vmatpush1.bf16.msra.mxu0 %v12746_v46  ;;  %3527 = vmatprep.mubr.f32.mxu0 %v11828_v0 }
0x2713   :  { %10112 = vmatprep.subr.bf16.mxu0 %v12748_v48 }
0x2716   :  { %10114 = vmatpush1.bf16.msra.mxu0 %v12757_v29 }
0x2717   :  { %10116 = vmatprep.subr.bf16.mxu0 %v12760_v34 }
0x271a   :  { %10118 = vmatpush1.bf16.msra.mxu0 %v12769_v41 }
0x271b   :  { %10120 = vmatprep.subr.bf16.mxu0 %v12772_v44 }
0x271e   :  { %10122 = vmatpush1.bf16.msra.mxu0 %v12779_v21 }
0x271f   :  { %10124 = vmatprep.subr.bf16.mxu0 %v12729_v30 }
0x27e4   :  { %v3426_v32 = vpop.f32.mrb[30].mxu0 }
0x27e5   :  { %v10563_v4 = vadd.f32 %v3426_v32, %v12805_v60  ;;  %v3428_v38 = vpop.f32.mrb[31].mxu0 }
0x27e6   :  { %v10564_v39 = vadd.f32 %v3428_v38, %v12809_v25 }
0x27e7   :  { %v8597_v50 = vmul.f32 -1.442695, %v10563_v4 }
0x27e8   :  { %v8598_v8 = vmul.f32 -1.442695, %v10564_v39 }
0x27e9   :  { %10958 = vpow2.f32 %v8597_v50 }
0x27ea   :  { %10960 = vtanh.f32 %v10564_v39 }
0x27f3   :  { %v10959_v45 = vpop.eup %10958 }
0x27f4   :  { %v3439_v5 = vadd.f32 1.0, %v10959_v45  ;;  %v10961_v3 = vpop.eup %10960 }
0x27f6   :  { %10962 = vrcp.f32 %v3439_v5 }
0x27f7   :  { %10964 = vpow2.f32 %v8598_v8 }
0x2800   :  { %v10963_v6 = vpop.eup %10962 }
0x2801   :  { %v3447_v53 = vmul.f32 %v10963_v6, %v10961_v3  ;;  %v10965_v9 = vpop.eup %10964  ;;  %v3446_v57 = vmul.f32 %v10963_v6, %v3349_v63 }
0x2802   :  { %v3440_v11 = vadd.f32 1.0, %v10965_v9 }
0x2803   :  { %3449 = vrot.lane.b32.xlu0 %v3447_v53, %s11829_s22 }
0x2804   :  { %10966 = vrcp.f32 %v3440_v11 }
0x280e   :  { %v10967_v15 = vpop.eup %10966 }
0x2875   :  { %v3450_v12 = vpop.permute.xlu0 %3449 }
0x2876   :  { %v3452_v14 = vadd.f32 %v3450_v12, %v3446_v57 }
0x2878   :  { %10968 = vtanh.f32 %v3452_v14 }
0x2882   :  { %v10969_v16 = vpop.eup %10968 }
0x2883   :  { %v3454_v18 = vmul.f32 %v10969_v16, %v10967_v15 }
0x2885   :  { %3456 = vrot.lane.b32.xlu1 %v3454_v18, %s11829_s22 }
0x28f7   :  { %v3457_v19 = vpop.permute.xlu1 %3456 }
0x28f8   :  { %3459 = vst.msk [vmem:[#allocation2 + $0x18] sm:$0xff] %vm868_vm1, %v3457_v19  ;;  %8599 = vmatmul.mubr.msk.f32.vlgmr.msra.gmra.mrb[32].mxu0 %vm765_vm3, %v3457_v19 }
0x28f9   :  { %3460 = vst.msk [vmem:[#allocation2 + $0x20] sm:$0xff] %vm870_vm2, %v3457_v19  ;;  %10126 = vmatpush1.bf16.msra.mxu0 %v12746_v46  ;;  %3630 = vmatprep.mubr.f32.mxu0 %v11828_v0 }
0x28fa   :  { %10128 = vmatprep.subr.bf16.mxu0 %v12748_v48 }
0x28fd   :  { %10130 = vmatpush1.bf16.msra.mxu0 %v12757_v29 }
0x28fe   :  { %10132 = vmatprep.subr.bf16.mxu0 %v12760_v34 }
0x2901   :  { %10134 = vmatpush1.bf16.msra.mxu0 %v12769_v41 }
0x2902   :  { %10136 = vmatprep.subr.bf16.mxu0 %v12772_v44 }
0x2905   :  { %10138 = vmatpush1.bf16.msra.mxu0 %v12779_v21 }
0x2906   :  { %10140 = vmatprep.subr.bf16.mxu0 %v12729_v30 }
0x29cb   :  { %v3529_v59 = vpop.f32.mrb[32].mxu0 }
0x29cc   :  { %v10565_v22 = vadd.f32 %v3529_v59, %v12805_v60  ;;  %v3531_v23 = vpop.f32.mrb[33].mxu0 }
0x29cd   :  { %v10566_v47 = vadd.f32 %v3531_v23, %v12809_v25 }
0x29ce   :  { %v8600_v24 = vmul.f32 -1.442695, %v10565_v22 }
0x29cf   :  { %v8601_v17 = vmul.f32 -1.442695, %v10566_v47 }
0x29d0   :  { %10970 = vpow2.f32 %v8600_v24 }
0x29d1   :  { %10972 = vtanh.f32 %v10566_v47 }
0x29da   :  { %v10971_v27 = vpop.eup %10970 }
0x29db   :  { %v3542_v7 = vadd.f32 1.0, %v10971_v27  ;;  %v10973_v31 = vpop.eup %10972 }
0x29dd   :  { %10974 = vrcp.f32 %v3542_v7 }
0x29de   :  { %10976 = vpow2.f32 %v8601_v17  ;;  %v3882_v17 = vld [vmem:[#allocation11 + $0x8] sm:$0xff] }
0x29e7   :  { %v10975_v33 = vpop.eup %10974 }
0x29e8   :  { %v3550_v36 = vmul.f32 %v10975_v33, %v10973_v31  ;;  %v10977_v28 = vpop.eup %10976  ;;  %v3549_v42 = vmul.f32 %v10975_v33, %v3452_v14 }
0x29e9   :  { %v3543_v37 = vadd.f32 1.0, %v10977_v28  ;;  %v3883_v28 = vld [vmem:[#allocation11 + $0x10] sm:$0xff] }
0x29ea   :  { %3552 = vrot.lane.b32.xlu0 %v3550_v36, %s11829_s22  ;;  %v3881_v36 = vld [vmem:[#allocation11] sm:$0xff] }
0x29eb   :  { %10978 = vrcp.f32 %v3543_v37  ;;  %v10171_v37 = vpack.c.bf16 %v3882_v17, %v3881_v36  ;;  %v4203_v36 = vld [vmem:[%s13693_s9 + $0x10] sm:$0xff]  ;;  %v4204_v17 = vld [vmem:[%s13693_s9 + $0x18] sm:$0xff] }
0x29ed   :  { %10172 = vmatprep.subr.bf16.mxu1 %v10171_v37 }
0x29ee   :  { %10174 = vmatpush3.bf16.msra.mxu1 %v10171_v37 }
0x29f5   :  { %v10979_v51 = vpop.eup %10978 }
0x2a5c   :  { %v3553_v43 = vpop.permute.xlu0 %3552 }
0x2a5d   :  { %v3555_v49 = vadd.f32 %v3553_v43, %v3549_v42  ;;  %v3884_v42 = vld [vmem:[#allocation11 + $0x18] sm:$0xff] }
0x2a5f   :  { %10980 = vtanh.f32 %v3555_v49 }
0x2a69   :  { %v10981_v52 = vpop.eup %10980 }
0x2a6a   :  { %v3557_v54 = vmul.f32 %v10981_v52, %v10979_v51 }
0x2a6c   :  { %3559 = vrot.lane.b32.xlu1 %v3557_v54, %s11829_s22 }
0x2ade   :  { %v3560_v35 = vpop.permute.xlu1 %3559 }
0x2adf   :  { %3562 = vst.msk [vmem:[#allocation2 + $0x20] sm:$0xff] %vm868_vm1, %v3560_v35  ;;  %8602 = vmatmul.mubr.msk.f32.vlgmr.msra.gmra.mrb[34].mxu0 %vm765_vm3, %v3560_v35 }
0x2ae0   :  { %3563 = vst.msk [vmem:[#allocation2 + $0x18] sm:$0xff] %vm870_vm2, %v3560_v35  ;;  %10142 = vmatpush1.bf16.msra.mxu0 %v12746_v46  ;;  %3733 = vmatprep.mubr.f32.mxu0 %v11828_v0  ;;  %v3885_v35 = vld [vmem:[#allocation11 + $0x20] sm:$0xff] }
0x2ae1   :  { %10144 = vmatprep.subr.bf16.mxu0 %v12748_v48 }
0x2ae4   :  { %10146 = vmatpush1.bf16.msra.mxu0 %v12757_v29 }
0x2ae5   :  { %10148 = vmatprep.subr.bf16.mxu0 %v12760_v34 }
0x2ae8   :  { %10150 = vmatpush1.bf16.msra.mxu0 %v12769_v41 }
0x2ae9   :  { %10152 = vmatprep.subr.bf16.mxu0 %v12772_v44 }
0x2aec   :  { %10154 = vmatpush1.bf16.msra.mxu0 %v12779_v21 }
0x2aed   :  { %10156 = vmatprep.subr.bf16.mxu0 %v12729_v30 }
0x2bb2   :  { %v3632_v55 = vpop.f32.mrb[34].mxu0 }
0x2bb3   :  { %v10567_v13 = vadd.f32 %v3632_v55, %v12805_v60  ;;  %v3634_v40 = vpop.f32.mrb[35].mxu0  ;;  %v3886_v55 = vld [vmem:[#allocation11 + $0x28] sm:$0xff] }
0x2bb4   :  { %v10568_v56 = vadd.f32 %v3634_v40, %v12809_v25  ;;  %v3887_v40 = vld [vmem:[#allocation11 + $0x30] sm:$0xff] }
0x2bb5   :  { %v8603_v20 = vmul.f32 -1.442695, %v10567_v13  ;;  %v10179_v13 = vpack.c.bf16 %v3886_v55, %v3885_v35 }
0x2bb6   :  { %v8604_v2 = vmul.f32 -1.442695, %v10568_v56 }
0x2bb7   :  { %10982 = vpow2.f32 %v8603_v20  ;;  %v3888_v20 = vld [vmem:[#allocation11 + $0x38] sm:$0xff] }
0x2bb8   :  { %10984 = vtanh.f32 %v10568_v56  ;;  %v10183_v56 = vpack.c.bf16 %v3888_v20, %v3887_v40 }
0x2bc1   :  { %v10983_v58 = vpop.eup %10982 }
0x2bc2   :  { %v3645_v61 = vadd.f32 1.0, %v10983_v58  ;;  %v10985_v62 = vpop.eup %10984 }
0x2bc4   :  { %10986 = vrcp.f32 %v3645_v61 }
0x2bc5   :  { %10988 = vpow2.f32 %v8604_v2 }
0x2bce   :  { %v10987_v63 = vpop.eup %10986 }
0x2bcf   :  { %v3653_v1 = vmul.f32 %v10987_v63, %v10985_v62  ;;  %v10989_v30 = vpop.eup %10988  ;;  %v3652_v10 = vmul.f32 %v10987_v63, %v3555_v49  ;;  %v4049_v63 = vld [vmem:[%s13692_s12] sm:$0xff] }
0x2bd0   :  { %v3646_v26 = vadd.f32 1.0, %v10989_v30 }
0x2bd1   :  { %3655 = vrot.lane.b32.xlu0 %v3653_v1, %s11829_s22  ;;  %v4050_v1 = vld [vmem:[%s13692_s12 + $0x8] sm:$0xff] }
0x2bd2   :  { %10990 = vrcp.f32 %v3646_v26  ;;  %v10187_v2 = vpack.c.bf16 %v4050_v1, %v4049_v63  ;;  %v4051_v26 = vld [vmem:[%s13692_s12 + $0x10] sm:$0xff] }
0x2bdc   :  { %v10991_v38 = vpop.eup %10990 }
0x2c43   :  { %v3656_v32 = vpop.permute.xlu0 %3655 }
0x2c44   :  { %v3658_v4 = vadd.f32 %v3656_v32, %v3652_v10  ;;  %v4052_v10 = vld [vmem:[%s13692_s12 + $0x18] sm:$0xff] }
0x2c46   :  { %10992 = vtanh.f32 %v3658_v4 }
0x2c50   :  { %v10993_v50 = vpop.eup %10992 }
0x2c51   :  { %v3660_v39 = vmul.f32 %v10993_v50, %v10991_v38  ;;  %v4053_v50 = vld [vmem:[%s13692_s12 + $0x20] sm:$0xff] }
0x2c53   :  { %3662 = vrot.lane.b32.xlu1 %v3660_v39, %s11829_s22  ;;  %v4054_v39 = vld [vmem:[%s13692_s12 + $0x28] sm:$0xff] }
0x2cc5   :  { %v3663_v45 = vpop.permute.xlu1 %3662 }
0x2cc6   :  { %3665 = vst.msk [vmem:[#allocation2 + $0x28] sm:$0xff] %vm868_vm1, %v3663_v45  ;;  %8605 = vmatmul.mubr.msk.f32.vlgmr.msra.gmra.mrb[36].mxu0 %vm765_vm3, %v3663_v45 }
0x2cc7   :  { %3666 = vst.msk [vmem:[#allocation2 + $0x10] sm:$0xff] %vm870_vm2, %v3663_v45  ;;  %10158 = vmatpush1.bf16.msra.mxu0 %v12746_v46  ;;  %3836 = vmatprep.mubr.f32.mxu0 %v11828_v0 }
0x2cc8   :  { %10160 = vmatprep.subr.bf16.mxu0 %v12748_v48 }
0x2ccb   :  { %10162 = vmatpush1.bf16.msra.mxu0 %v12757_v29 }
0x2ccc   :  { %10164 = vmatprep.subr.bf16.mxu0 %v12760_v34 }
0x2cce   :  { %v3875_v45 = vld [vmem:[#allocation2 + $0x10] sm:$0xff] }
0x2ccf   :  { %10166 = vmatpush1.bf16.msra.mxu0 %v12769_v41 }
0x2cd0   :  { %10168 = vmatprep.subr.bf16.mxu0 %v12772_v44 }
0x2cd3   :  { %10170 = vmatpush1.bf16.msra.mxu0 %v12779_v21 }
0x2d99   :  { %v3735_v5 = vpop.f32.mrb[36].mxu0 }
0x2d9a   :  { %v10569_v3 = vadd.f32 %v3735_v5, %v12805_v60  ;;  %v3737_v6 = vpop.f32.mrb[37].mxu0  ;;  %v10195_v5 = vpack.c.bf16 %v4054_v39, %v4053_v50  ;;  %v4205_v50 = vld [vmem:[%s13693_s9 + $0x20] sm:$0xff]  ;;  %v4206_v39 = vld [vmem:[%s13693_s9 + $0x28] sm:$0xff] }
0x2d9b   :  { %v10570_v46 = vadd.f32 %v3737_v6, %v12809_v25  ;;  %v4055_v6 = vld [vmem:[%s13692_s12 + $0x30] sm:$0xff] }
0x2d9c   :  { %v8606_v53 = vmul.f32 -1.442695, %v10569_v3  ;;  %v3876_v3 = vld [vmem:[#allocation2 + $0x18] sm:$0xff] }
0x2d9d   :  { %v8607_v41 = vmul.f32 -1.442695, %v10570_v46 }
0x2d9e   :  { %10994 = vpow2.f32 %v8606_v53  ;;  %v4056_v53 = vld [vmem:[%s13692_s12 + $0x38] sm:$0xff] }
0x2d9f   :  { %10996 = vtanh.f32 %v10570_v46  ;;  %v3877_v46 = vld [vmem:[#allocation2 + $0x20] sm:$0xff] }
0x2da8   :  { %v10995_v8 = vpop.eup %10994 }
0x2da9   :  { %v3748_v48 = vadd.f32 1.0, %v10995_v8  ;;  %v10997_v29 = vpop.eup %10996  ;;  %v10199_v8 = vpack.c.bf16 %v4056_v53, %v4055_v6  ;;  %v4345_v53 = vld [vmem:[%s13694_s5] sm:$0xff] }
0x2dab   :  { %10998 = vrcp.f32 %v3748_v48  ;;  %v3878_v48 = vld [vmem:[#allocation2 + $0x28] sm:$0xff] }
0x2dac   :  { %11000 = vpow2.f32 %v8607_v41 }
0x2db5   :  { %v10999_v34 = vpop.eup %10998 }
0x2db6   :  { %v3756_v9 = vmul.f32 %v10999_v34, %v10997_v29  ;;  %v11001_v44 = vpop.eup %11000  ;;  %v3755_v11 = vmul.f32 %v10999_v34, %v3658_v4  ;;  %v10191_v4 = vpack.c.bf16 %v4052_v10, %v4051_v26  ;;  %v4057_v29 = vld [vmem:[%s13692_s12 + $0x40] sm:$0xff]  ;;  %v4058_v34 = vld [vmem:[%s13692_s12 + $0x48] sm:$0xff] }
0x2db7   :  { %v3749_v21 = vadd.f32 1.0, %v11001_v44  ;;  %v10203_v41 = vpack.c.bf16 %v4058_v34, %v4057_v29 }
0x2db8   :  { %3758 = vrot.lane.b32.xlu0 %v3756_v9, %s11829_s22 }
0x2db9   :  { %11002 = vrcp.f32 %v3749_v21  ;;  %v4059_v21 = vld [vmem:[%s13692_s12 + $0x50] sm:$0xff] }
0x2dc3   :  { %v11003_v14 = vpop.eup %11002 }
0x2e2a   :  { %v3759_v57 = vpop.permute.xlu0 %3758 }
0x2e2b   :  { %v3761_v12 = vadd.f32 %v3759_v57, %v3755_v11  ;;  %v4060_v11 = vld [vmem:[%s13692_s12 + $0x58] sm:$0xff] }
0x2e2c   :  { %v10207_v57 = vpack.c.bf16 %v4060_v11, %v4059_v21  ;;  %v4347_v21 = vld [vmem:[%s13694_s5 + $0x10] sm:$0xff]  ;;  %v4348_v11 = vld [vmem:[%s13694_s5 + $0x18] sm:$0xff] }
0x2e2d   :  { %11004 = vtanh.f32 %v3761_v12 }
0x2e37   :  { %v11005_v15 = vpop.eup %11004 }
0x2e38   :  { %v3763_v16 = vmul.f32 %v11005_v15, %v11003_v14  ;;  %v4062_v14 = vld [vmem:[%s13692_s12 + $0x68] sm:$0xff] }
0x2e3a   :  { %3765 = vrot.lane.b32.xlu1 %v3763_v16, %s11829_s22  ;;  %v4063_v16 = vld [vmem:[%s13692_s12 + $0x70] sm:$0xff] }
0x2eac   :  { %v3766_v18 = vpop.permute.xlu1 %3765 }
0x2ead   :  { %3768 = vst.msk [vmem:[#allocation2 + $0x30] sm:$0xff] %vm868_vm1, %v3766_v18  ;;  %8608 = vmatmul.mubr.msk.f32.vlgmr.msra.gmra.mrb[38].mxu0 %vm765_vm3, %v3766_v18 }
0x2eae   :  { %3769 = vst.msk [vmem:[#allocation2 + $0x8] sm:$0xff] %vm870_vm2, %v3766_v18  ;;  %v4064_v18 = vld [vmem:[%s13692_s12 + $0x78] sm:$0xff] }
0x2eb4   :  { %v3879_v9 = vld [vmem:[#allocation2 + $0x30] sm:$0xff] }
0x2eb5   :  { %v3874_v38 = vld [vmem:[#allocation2 + $0x8] sm:$0xff] }
0x2f80   :  { %v3838_v19 = vpop.f32.mrb[38].mxu0 }
0x2f81   :  { %v10571_v59 = vadd.f32 %v3838_v19, %v12805_v60  ;;  %v3840_v22 = vpop.f32.mrb[39].mxu0  ;;  %v10175_v60 = vpack.c.bf16 %v3884_v42, %v3883_v28  ;;  %v10215_v19 = vpack.c.bf16 %v4064_v18, %v4063_v16 }
0x2f82   :  { %v10572_v24 = vadd.f32 %v3840_v22, %v12809_v25  ;;  %v4202_v22 = vld [vmem:[%s13693_s9 + $0x8] sm:$0xff] }
0x2f83   :  { %v8609_v23 = vmul.f32 -1.442695, %v10571_v59  ;;  %10176 = vmatprep.subr.bf16.mxu1 %v10175_v60  ;;  %v4201_v59 = vld [vmem:[%s13693_s9] sm:$0xff] }
0x2f84   :  { %10178 = vmatpush3.bf16.msra.mxu1 %v10175_v60  ;;  %v8610_v25 = vmul.f32 -1.442695, %v10572_v24 }
0x2f85   :  { %11006 = vpow2.f32 %v8609_v23  ;;  %10180 = vmatprep.subr.bf16.mxu1 %v10179_v13  ;;  %v10219_v23 = vpack.c.bf16 %v4202_v22, %v4201_v59 }
0x2f86   :  { %11008 = vtanh.f32 %v10572_v24  ;;  %v8611_v24 = vld [vmem:[#allocation12] ss:$0 sm:$0xff] }
0x2f88   :  { %10182 = vmatpush3.bf16.msra.mxu1 %v10179_v13 }
0x2f89   :  { %10184 = vmatprep.subr.bf16.mxu1 %v10183_v56 }
0x2f8c   :  { %10186 = vmatpush3.bf16.msra.mxu1 %v10183_v56 }
0x2f8d   :  { %10188 = vmatprep.subr.bf16.mxu1 %v10187_v2 }
0x2f8f   :  { %v11007_v47 = vpop.eup %11006 }
0x2f90   :  { %v3851_v27 = vadd.f32 1.0, %v11007_v47  ;;  %v11009_v7 = vpop.eup %11008 }
0x2f92   :  { %11010 = vrcp.f32 %v3851_v27 }
0x2f93   :  { %11012 = vpow2.f32 %v8610_v25 }
0x2f9c   :  { %v11011_v31 = vpop.eup %11010 }
0x2f9d   :  { %v3859_v33 = vmul.f32 %v11011_v31, %v11009_v7  ;;  %v11013_v43 = vpop.eup %11012  ;;  %v3858_v51 = vmul.f32 %v11011_v31, %v3761_v12  ;;  %v4061_v12 = vld [vmem:[%s13692_s12 + $0x60] sm:$0xff] }
0x2f9e   :  { %v3852_v49 = vadd.f32 1.0, %v11013_v43  ;;  %v10211_v15 = vpack.c.bf16 %v4062_v14, %v4061_v12 }
0x2f9f   :  { %3861 = vrot.lane.b32.xlu0 %v3859_v33, %s11829_s22 }
0x2fa0   :  { %11014 = vrcp.f32 %v3852_v49  ;;  %v10223_v49 = vpack.c.bf16 %v4204_v17, %v4203_v36 }
0x2faa   :  { %v11015_v58 = vpop.eup %11014 }
0x3011   :  { %v3862_v52 = vpop.permute.xlu0 %3861 }
0x3012   :  { %v3864_v54 = vadd.f32 %v3862_v52, %v3858_v51 }
0x3014   :  { %11016 = vtanh.f32 %v3864_v54 }
0x301e   :  { %v11017_v61 = vpop.eup %11016 }
0x301f   :  { %v3866_v62 = vmul.f32 %v11017_v61, %v11015_v58 }
0x3021   :  { %3868 = vrot.lane.b32.xlu1 %v3866_v62, %s11829_s22 }
0x3093   :  { %v3869_v30 = vpop.permute.xlu1 %3868 }
0x3094   :  { %3871 = vst.msk [vmem:[#allocation2 + $0x38] sm:$0xff] %vm868_vm1, %v3869_v30 }
0x3095   :  { %3872 = vst.msk [vmem:[#allocation2] sm:$0xff] %vm870_vm2, %v3869_v30 }
0x309b   :  { %v3880_v44 = vld [vmem:[#allocation2 + $0x38] sm:$0xff] }
0x309c   :  { %v3873_v32 = vld [vmem:[#allocation2] sm:$0xff] }
0x309d   :  { %9107 = vmatprep.mubr.msk.f32.mxu1 %vm765_vm3, %v3873_v32 }
0x309e   :  { %9108 = vmatmul.mubr.msk.f32.vlgmr.msra.gmra.mrb[24].mxu1 %vm765_vm3, %v3874_v38 }
0x309f   :  { %9110 = vmatprep.mubr.msk.f32.mxu1 %vm765_vm3, %v3875_v45  ;;  %10190 = vmatpush3.bf16.msra.mxu1 %v10187_v2  ;;  %v10227_v45 = vpack.c.bf16 %v4206_v39, %v4205_v50 }
0x30a0   :  { %10192 = vmatprep.subr.bf16.mxu1 %v10191_v4 }
0x30a2   :  { %9111 = vmatmul.mubr.msk.f32.gmra.mrb[26].mxu1 %vm765_vm3, %v3876_v3  ;;  %v4208_v3 = vld [vmem:[%s13693_s9 + $0x38] sm:$0xff] }
0x30a3   :  { %9113 = vmatprep.mubr.msk.f32.mxu1 %vm765_vm3, %v3877_v46  ;;  %10194 = vmatpush3.bf16.msra.mxu1 %v10191_v4  ;;  %v4346_v46 = vld [vmem:[%s13694_s5 + $0x8] sm:$0xff] }
0x30a4   :  { %10196 = vmatprep.subr.bf16.mxu1 %v10195_v5 }
0x30a6   :  { %9114 = vmatmul.mubr.msk.f32.gmra.mrb[28].mxu1 %vm765_vm3, %v3878_v48  ;;  %v8620_v48 = vld [vmem:[#allocation14] ss:$0 sm:$0xff] }
0x30a7   :  { %9116 = vmatprep.mubr.msk.f32.mxu1 %vm765_vm3, %v3879_v9  ;;  %10198 = vmatpush3.bf16.msra.mxu1 %v10195_v5  ;;  %v4207_v5 = vld [vmem:[%s13693_s9 + $0x30] sm:$0xff] }
0x30a8   :  { %10200 = vmatprep.subr.bf16.mxu1 %v10199_v8  ;;  %v10231_v6 = vpack.c.bf16 %v4208_v3, %v4207_v5 }
0x30aa   :  { %9117 = vmatmul.mubr.msk.f32.gmra.mrb[30].mxu1 %vm765_vm3, %v3880_v44 }
0x30ab   :  { %10202 = vmatpush3.bf16.msra.mxu1 %v10199_v8  ;;  %v10235_v8 = vpack.c.bf16 %v4346_v46, %v4345_v53 }
0x30ac   :  { %10204 = vmatprep.subr.bf16.mxu1 %v10203_v41 }
0x30af   :  { %10206 = vmatpush3.bf16.msra.mxu1 %v10203_v41 }
0x30b0   :  { %10208 = vmatprep.subr.bf16.mxu1 %v10207_v57 }
0x30b3   :  { %10210 = vmatpush3.bf16.msra.mxu1 %v10207_v57 }
0x30b4   :  { %10212 = vmatprep.subr.bf16.mxu1 %v10211_v15 }
0x30b7   :  { %10214 = vmatpush3.bf16.msra.mxu1 %v10211_v15 }
0x30b8   :  { %10216 = vmatprep.subr.bf16.mxu1 %v10215_v19 }
0x30bb   :  { %10218 = vmatpush3.bf16.msra.mxu1 %v10215_v19  ;;  %v10239_v19 = vpack.c.bf16 %v4348_v11, %v4347_v21 }
0x30bc   :  { %10220 = vmatprep.subr.bf16.mxu1 %v10219_v23 }
0x3171   :  { %v9109_v47 = vpop.f32.mrb[24].mxu1 }
0x3172   :  { %v3992_v27 = vadd.f32 %v9109_v47, %v8611_v24  ;;  %v3986_v7 = vpop.f32.mrb[25].mxu1 }
0x3173   :  { %v3987_v31 = vadd.f32 %v8611_v24, %v3986_v7 }
0x3174   :  { %v4034_v33 = vmul.f32 0.01, %v3992_v27  ;;  %vm4026_vm4 = vcmp.ge.f32.partialorder %v3992_v27, 0.0 }
0x3175   :  { %v4033_v28 = vmul.f32 0.01, %v3987_v31  ;;  %v9112_v37 = vpop.f32.mrb[26].mxu1  ;;  %vm4025_vm5 = vcmp.ge.f32.partialorder %v3987_v31, 0.0 }
0x3176   :  { %v4002_v42 = vadd.f32 %v9112_v37, %v8611_v24  ;;  %v3996_v60 = vpop.f32.mrb[27].mxu1  ;;  %v4042_v51 = vsel %vm4026_vm4, %v3992_v27, %v4034_v33 }
0x3177   :  { %v3997_v25 = vadd.f32 %v8611_v24, %v3996_v60  ;;  %v4041_v43 = vsel %vm4025_vm5, %v3987_v31, %v4033_v28  ;;  %v4352_v60 = vld [vmem:[%s13694_s5 + $0x38] sm:$0xff] }
0x3178   :  { %v4036_v52 = vmul.f32 0.01, %v4002_v42  ;;  %9151 = vmatprep.mubr.f32.mxu1 %v4041_v43  ;;  %vm4028_vm7 = vcmp.ge.f32.partialorder %v4002_v42, 0.0 }
0x3179   :  { %v4035_v54 = vmul.f32 0.01, %v3997_v25  ;;  %v9115_v35 = vpop.f32.mrb[28].mxu1  ;;  %9152 = vmatmul.mubr.f32.vlgmr.msra.gmra.mrb[32].mxu1 %v4042_v51  ;;  %vm4027_vm6 = vcmp.ge.f32.partialorder %v3997_v25, 0.0 }
0x317a   :  { %v4012_v55 = vadd.f32 %v9115_v35, %v8611_v24  ;;  %v4006_v13 = vpop.f32.mrb[29].mxu1  ;;  %10222 = vmatpush3.bf16.msra.mxu1 %v10219_v23  ;;  %v4044_v58 = vsel %vm4028_vm7, %v4002_v42, %v4036_v52  ;;  %v4349_v23 = vld [vmem:[%s13694_s5 + $0x20] sm:$0xff]  ;;  %v4351_v42 = vld [vmem:[%s13694_s5 + $0x30] sm:$0xff] }
0x317b   :  { %v4007_v40 = vadd.f32 %v8611_v24, %v4006_v13  ;;  %v4043_v20 = vsel %vm4027_vm6, %v3997_v25, %v4035_v54  ;;  %10224 = vmatprep.subr.bf16.mxu1 %v10223_v49  ;;  %v10247_v35 = vpack.c.bf16 %v4352_v60, %v4351_v42 }
0x317c   :  { %v4038_v56 = vmul.f32 0.01, %v4012_v55  ;;  %9154 = vmatprep.mubr.f32.mxu1 %v4043_v20  ;;  %vm4030_vm9 = vcmp.ge.f32.partialorder %v4012_v55, 0.0 }
0x317d   :  { %v4037_v61 = vmul.f32 0.01, %v4007_v40  ;;  %v9118_v62 = vpop.f32.mrb[30].mxu1  ;;  %9155 = vmatmul.mubr.f32.gmra.mrb[34].mxu1 %v4044_v58  ;;  %vm4029_vm8 = vcmp.ge.f32.partialorder %v4007_v40, 0.0  ;;  %v4513_v58 = vld [vmem:[#allocation18] sm:$0xff] }
0x317e   :  { %v4022_v63 = vadd.f32 %v9118_v62, %v8611_v24  ;;  %v4016_v1 = vpop.f32.mrb[31].mxu1  ;;  %10226 = vmatpush3.bf16.msra.mxu1 %v10223_v49  ;;  %v4046_v10 = vsel %vm4030_vm9, %v4012_v55, %v4038_v56 }
0x317f   :  { %v4017_v2 = vadd.f32 %v8611_v24, %v4016_v1  ;;  %v4045_v30 = vsel %vm4029_vm8, %v4007_v40, %v4037_v61  ;;  %10228 = vmatprep.subr.bf16.mxu1 %v10227_v45  ;;  %v4350_v24 = vld [vmem:[%s13694_s5 + $0x28] sm:$0xff]  ;;  %v4514_v61 = vld [vmem:[#allocation18 + $0x8] sm:$0xff] }
0x3180   :  { %v4040_v26 = vmul.f32 0.01, %v4022_v63  ;;  %9157 = vmatprep.mubr.f32.mxu1 %v4045_v30  ;;  %vm4032_vm11 = vcmp.ge.f32.partialorder %v4022_v63, 0.0  ;;  %v10243_v17 = vpack.c.bf16 %v4350_v24, %v4349_v23  ;;  %v10251_v62 = vpack.c.bf16 %v4514_v61, %v4513_v58  ;;  %v4516_v1 = vld [vmem:[#allocation18 + $0x18] sm:$0xff] }
0x3181   :  { %v4039_v32 = vmul.f32 0.01, %v4017_v2  ;;  %9158 = vmatmul.mubr.f32.gmra.mrb[36].mxu1 %v4046_v10  ;;  %vm4031_vm10 = vcmp.ge.f32.partialorder %v4017_v2, 0.0  ;;  %v4677_v30 = vld [vmem:[%s13695_s11] sm:$0xff] }
0x3182   :  { %v4048_v38 = vsel %vm4032_vm11, %v4022_v63, %v4040_v26  ;;  %10230 = vmatpush3.bf16.msra.mxu1 %v10227_v45  ;;  %v4515_v63 = vld [vmem:[#allocation18 + $0x10] sm:$0xff]  ;;  %v4678_v26 = vld [vmem:[%s13695_s11 + $0x8] sm:$0xff] }
0x3183   :  { %v4047_v4 = vsel %vm4031_vm10, %v4017_v2, %v4039_v32  ;;  %10232 = vmatprep.subr.bf16.mxu1 %v10231_v6  ;;  %v10255_v2 = vpack.c.bf16 %v4516_v1, %v4515_v63  ;;  %v12976_v10 = vpack.c.bf16 %v4678_v26, %v4677_v30  ;;  %v8621_v32 = vld [vmem:[#allocation15] ss:$0 sm:$0xff]  ;;  %v4679_v63 = vld [vmem:[%s13695_s11 + $0x10] sm:$0xff]  ;;  %v4680_v1 = vld [vmem:[%s13695_s11 + $0x18] sm:$0xff] }
0x3184   :  { %9160 = vmatprep.mubr.f32.mxu1 %v4047_v4 }
0x3185   :  { %9161 = vmatmul.mubr.f32.gmra.mrb[38].mxu1 %v4048_v38 }
0x3186   :  { %10234 = vmatpush3.bf16.msra.mxu1 %v10231_v6 }
0x3187   :  { %10236 = vmatprep.subr.bf16.mxu1 %v10235_v8 }
0x324c   :  { %v9153_v29 = vpop.f32.mrb[32].mxu1 }
0x324d   :  { %v4144_v34 = vadd.f32 %v9153_v29, %v8620_v48  ;;  %v4138_v9 = vpop.f32.mrb[33].mxu1 }
0x324e   :  { %v4139_v41 = vadd.f32 %v8620_v48, %v4138_v9 }
0x324f   :  { %v4186_v44 = vmul.f32 0.01, %v4144_v34  ;;  %vm4178_vm12 = vcmp.ge.f32.partialorder %v4144_v34, 0.0 }
0x3250   :  { %vm4177_vm13 = vcmp.ge.f32.partialorder %v4139_v41, 0.0  ;;  %v4185_v57 = vmul.f32 0.01, %v4139_v41  ;;  %v9156_v12 = vpop.f32.mrb[34].mxu1 }
0x3251   :  { %v4154_v14 = vadd.f32 %v9156_v12, %v8620_v48  ;;  %v4148_v15 = vpop.f32.mrb[35].mxu1  ;;  %v4194_v59 = vsel %vm4178_vm12, %v4144_v34, %v4186_v44  ;;  %v8630_v44 = vld [vmem:[#allocation17] ss:$0 sm:$0xff] }
0x3252   :  { %v4149_v16 = vadd.f32 %v8620_v48, %v4148_v15  ;;  %v4193_v18 = vsel %vm4177_vm13, %v4139_v41, %v4185_v57 }
0x3253   :  { %v4188_v22 = vmul.f32 0.01, %v4154_v14  ;;  %9179 = vmatprep.mubr.msk.f32.mxu1 %vm765_vm3, %v4193_v18  ;;  %vm4180_vm14 = vcmp.ge.f32.partialorder %v4154_v14, 0.0 }
0x3254   :  { %vm4179_vm15 = vcmp.ge.f32.partialorder %v4149_v16, 0.0  ;;  %v4187_v47 = vmul.f32 0.01, %v4149_v16  ;;  %v9159_v27 = vpop.f32.mrb[36].mxu1  ;;  %9180 = vmatmul.mubr.msk.f32.vlgmr.msra.gmra.mrb[40].mxu1 %vm765_vm3, %v4194_v59 }
0x3255   :  { %v4164_v7 = vadd.f32 %v9159_v27, %v8620_v48  ;;  %v4158_v31 = vpop.f32.mrb[37].mxu1  ;;  %10238 = vmatpush3.bf16.msra.mxu1 %v10235_v8  ;;  %v4196_v37 = vsel %vm4180_vm14, %v4154_v14, %v4188_v22 }
0x3256   :  { %v4159_v33 = vadd.f32 %v8620_v48, %v4158_v31  ;;  %v4195_v36 = vsel %vm4179_vm15, %v4149_v16, %v4187_v47  ;;  %10240 = vmatprep.subr.bf16.mxu1 %v10239_v19 }
0x3257   :  { %v4190_v28 = vmul.f32 0.01, %v4164_v7  ;;  %9182 = vmatprep.mubr.msk.f32.mxu1 %vm765_vm3, %v4195_v36  ;;  %vm4182_vm2 = vcmp.ge.f32.partialorder %v4164_v7, 0.0 }
0x3258   :  { %vm4181_vm4 = vcmp.ge.f32.partialorder %v4159_v33, 0.0  ;;  %v4189_v25 = vmul.f32 0.01, %v4159_v33  ;;  %v9162_v43 = vpop.f32.mrb[38].mxu1  ;;  %9183 = vmatmul.mubr.msk.f32.gmra.mrb[42].mxu1 %vm765_vm3, %v4196_v37 }
0x3259   :  { %v4174_v49 = vadd.f32 %v9162_v43, %v8620_v48  ;;  %v4168_v51 = vpop.f32.mrb[39].mxu1  ;;  %10242 = vmatpush3.bf16.msra.mxu1 %v10239_v19  ;;  %v4198_v13 = vsel %vm4182_vm2, %v4164_v7, %v4190_v28 }
0x325a   :  { %v4169_v52 = vadd.f32 %v8620_v48, %v4168_v51  ;;  %v4197_v54 = vsel %vm4181_vm4, %v4159_v33, %v4189_v25  ;;  %10244 = vmatprep.subr.bf16.mxu1 %v10243_v17 }
0x325b   :  { %v4192_v55 = vmul.f32 0.01, %v4174_v49  ;;  %9185 = vmatprep.mubr.msk.f32.mxu1 %vm765_vm3, %v4197_v54  ;;  %vm4184_vm5 = vcmp.ge.f32.partialorder %v4174_v49, 0.0 }
0x325c   :  { %vm4183_vm6 = vcmp.ge.f32.partialorder %v4169_v52, 0.0  ;;  %v4191_v40 = vmul.f32 0.01, %v4169_v52  ;;  %9186 = vmatmul.mubr.msk.f32.gmra.mrb[44].mxu1 %vm765_vm3, %v4198_v13 }
0x325d   :  { %10246 = vmatpush3.bf16.msra.mxu1 %v10243_v17  ;;  %v4200_v56 = vsel %vm4184_vm5, %v4174_v49, %v4192_v55 }
0x325e   :  { %v4199_v20 = vsel %vm4183_vm6, %v4169_v52, %v4191_v40  ;;  %10248 = vmatprep.subr.bf16.mxu1 %v10247_v35 }
0x325f   :  { %9188 = vmatprep.mubr.msk.f32.mxu1 %vm765_vm3, %v4199_v20 }
0x3260   :  { %9189 = vmatmul.mubr.msk.f32.gmra.mrb[46].mxu1 %vm765_vm3, %v4200_v56 }
0x3261   :  { %10250 = vmatpush3.bf16.msra.mxu1 %v10247_v35  ;;  %9207 = vmatprep.mubr.msk.f32.mxu1 %vm765_vm3, %v4193_v18 }
0x3262   :  { %10252 = vmatprep.subr.bf16.mxu1 %v10251_v62 }
0x3264   :  { %9208 = vmatmul.mubr.msk.f32.vlgmr.msra.gmra.mrb[48].mxu1 %vm765_vm3, %v4194_v59 }
0x3265   :  { %9210 = vmatprep.mubr.msk.f32.mxu1 %vm765_vm3, %v4195_v36  ;;  %10254 = vmatpush3.bf16.msra.mxu1 %v10251_v62 }
0x3266   :  { %10256 = vmatprep.subr.bf16.mxu1 %v10255_v2 }
0x3268   :  { %9211 = vmatmul.mubr.msk.f32.gmra.mrb[50].mxu1 %vm765_vm3, %v4196_v37 }
0x3269   :  { %9213 = vmatprep.mubr.msk.f32.mxu1 %vm765_vm3, %v4197_v54  ;;  %10258 = vmatpush3.bf16.msra.mxu1 %v10255_v2 }
0x326a   :  { %10260 = vmatprep.subr.bf16.mxu1 %v12976_v10 }
0x326c   :  { %9214 = vmatmul.mubr.msk.f32.gmra.mrb[52].mxu1 %vm765_vm3, %v4198_v13 }
0x326d   :  { %9216 = vmatprep.mubr.msk.f32.mxu1 %vm765_vm3, %v4199_v20 }
0x3270   :  { %9217 = vmatmul.mubr.msk.f32.gmra.mrb[54].mxu1 %vm765_vm3, %v4200_v56 }
0x3327   :  { %v9181_v4 = vpop.f32.mrb[40].mxu1 }
0x3328   :  { %v12979_v38 = vadd.f32 %v9181_v4, %v8621_v32  ;;  %v4306_v50 = vpop.f32.mrb[41].mxu1 }
0x3329   :  { %v12981_v39 = vadd.f32 %v8621_v32, %v4306_v50 }
0x332a   :  { %4998 = vst.msk [vmem:[%s12061_s19 + $0x8] sm:$0xff] %vm868_vm1, %v12979_v38 }
0x332b   :  { %4997 = vst.msk [vmem:[%s12061_s19] sm:$0xff] %vm868_vm1, %v12981_v39  ;;  %v9184_v45 = vpop.f32.mrb[42].mxu1 }
0x332c   :  { %v12989_v5 = vadd.f32 %v9184_v45, %v8621_v32  ;;  %v4316_v3 = vpop.f32.mrb[43].mxu1  ;;  %v10263_v45 = vpack.c.bf16 %v4680_v1, %v4679_v63 }
0x332d   :  { %v12991_v6 = vadd.f32 %v8621_v32, %v4316_v3 }
0x332e   :  { %5000 = vst.msk [vmem:[%s12061_s19 + $0x18] sm:$0xff] %vm868_vm1, %v12989_v5 }
0x332f   :  { %4999 = vst.msk [vmem:[%s12061_s19 + $0x10] sm:$0xff] %vm868_vm1, %v12991_v6  ;;  %v9187_v53 = vpop.f32.mrb[44].mxu1 }
0x3330   :  { %v12999_v46 = vadd.f32 %v9187_v53, %v8621_v32  ;;  %v4326_v8 = vpop.f32.mrb[45].mxu1 }
0x3331   :  { %v13001_v48 = vadd.f32 %v8621_v32, %v4326_v8 }
0x3332   :  { %5002 = vst.msk [vmem:[%s12061_s19 + $0x28] sm:$0xff] %vm868_vm1, %v12999_v46 }
0x3333   :  { %5001 = vst.msk [vmem:[%s12061_s19 + $0x20] sm:$0xff] %vm868_vm1, %v13001_v48  ;;  %v9190_v29 = vpop.f32.mrb[46].mxu1 }
0x3334   :  { %v13009_v34 = vadd.f32 %v9190_v29, %v8621_v32  ;;  %v4336_v9 = vpop.f32.mrb[47].mxu1 }
0x3335   :  { %v13011_v41 = vadd.f32 %v8621_v32, %v4336_v9 }
0x3336   :  { %5004 = vst.msk [vmem:[%s12061_s19 + $0x38] sm:$0xff] %vm868_vm1, %v13009_v34 }
0x3337   :  { %5003 = vst.msk [vmem:[%s12061_s19 + $0x30] sm:$0xff] %vm868_vm1, %v13011_v41  ;;  %v9209_v21 = vpop.f32.mrb[48].mxu1  ;;  %s13696_s19 = sld [smem:[#allocation52_spill]] }
0x3338   :  { %v4432_v11 = vadd.f32 %v9209_v21, %v8630_v44  ;;  %v4426_v57 = vpop.f32.mrb[49].mxu1 }
0x3339   :  { %v4427_v12 = vadd.f32 %v8630_v44, %v4426_v57 }
0x333a   :  { %v4466_v14 = vmul.f32 0.5, %v4432_v11  ;;  %5006 = vst.msk [vmem:[%s12066_s4 + $0x8] sm:$0xff] %vm868_vm1, %v4432_v11 }
0x333b   :  { %v4465_v15 = vmul.f32 0.5, %v4427_v12  ;;  %5005 = vst.msk [vmem:[%s12066_s4] sm:$0xff] %vm868_vm1, %v4427_v12  ;;  %v9212_v16 = vpop.f32.mrb[50].mxu1 }
0x333c   :  { %v4475_v18 = vmul.f32 1.442695, %v4466_v14  ;;  %v4442_v19 = vadd.f32 %v9212_v16, %v8630_v44  ;;  %v4436_v59 = vpop.f32.mrb[51].mxu1  ;;  %v4681_v16 = vld [vmem:[%s13695_s11 + $0x20] sm:$0xff] }
0x333d   :  { %v4473_v22 = vmul.f32 1.442695, %v4465_v15  ;;  %v4437_v23 = vadd.f32 %v8630_v44, %v4436_v59  ;;  %v4490_v52 = vld [vmem:[%s13696_s19 + $0x8] sm:$0xff]  ;;  %v4489_v55 = vld [vmem:[%s13696_s19] sm:$0xff]  ;;  %v4492_v62 = vld [vmem:[%s13696_s19 + $0x18] sm:$0xff] }
0x333e   :  { %11018 = vpow2.f32 %v4475_v18  ;;  %v4468_v24 = vmul.f32 0.5, %v4442_v19  ;;  %5008 = vst.msk [vmem:[%s12066_s4 + $0x18] sm:$0xff] %vm868_vm1, %v4442_v19  ;;  %v4491_v30 = vld [vmem:[%s13696_s19 + $0x10] sm:$0xff]  ;;  %v4494_v53 = vld [vmem:[%s13696_s19 + $0x28] sm:$0xff]  ;;  %v4496_v11 = vld [vmem:[%s13696_s19 + $0x38] sm:$0xff] }
0x333f   :  { %11020 = vpow2.f32 %v4473_v22  ;;  %v4467_v47 = vmul.f32 0.5, %v4437_v23  ;;  %5007 = vst.msk [vmem:[%s12066_s4 + $0x10] sm:$0xff] %vm868_vm1, %v4437_v23  ;;  %v9215_v27 = vpop.f32.mrb[52].mxu1  ;;  %v4682_v18 = vld [vmem:[%s13695_s11 + $0x28] sm:$0xff]  ;;  %v4683_v59 = vld [vmem:[%s13695_s11 + $0x30] sm:$0xff] }
0x3340   :  { %v4479_v7 = vmul.f32 1.442695, %v4468_v24  ;;  %v4452_v31 = vadd.f32 %v9215_v27, %v8630_v44  ;;  %v4446_v33 = vpop.f32.mrb[53].mxu1  ;;  %v10267_v19 = vpack.c.bf16 %v4682_v18, %v4681_v16  ;;  %v5021_v16 = vld [vmem:[#allocation24] sm:$0xff]  ;;  %v5022_v18 = vld [vmem:[#allocation24 + $0x8] sm:$0xff] }
0x3341   :  { %v4477_v36 = vmul.f32 1.442695, %v4467_v47  ;;  %v4447_v17 = vadd.f32 %v8630_v44, %v4446_v33  ;;  %v8639_v47 = vld [vmem:[#allocation20] ss:$0 sm:$0xff] }
0x3342   :  { %11022 = vpow2.f32 %v4479_v7  ;;  %v4470_v28 = vmul.f32 0.5, %v4452_v31  ;;  %5010 = vst.msk [vmem:[%s12066_s4 + $0x28] sm:$0xff] %vm868_vm1, %v4452_v31 }
0x3343   :  { %11024 = vpow2.f32 %v4477_v36  ;;  %v4469_v37 = vmul.f32 0.5, %v4447_v17  ;;  %5009 = vst.msk [vmem:[%s12066_s4 + $0x20] sm:$0xff] %vm868_vm1, %v4447_v17  ;;  %v9218_v42 = vpop.f32.mrb[54].mxu1 }
0x3344   :  { %v4483_v60 = vmul.f32 1.442695, %v4470_v28  ;;  %v4462_v25 = vadd.f32 %v9218_v42, %v8630_v44  ;;  %v4456_v43 = vpop.f32.mrb[55].mxu1 }
0x3345   :  { %v4481_v49 = vmul.f32 1.442695, %v4469_v37  ;;  %v4457_v51 = vadd.f32 %v8630_v44, %v4456_v43 }
0x3346   :  { %11026 = vpow2.f32 %v4483_v60  ;;  %v4472_v54 = vmul.f32 0.5, %v4462_v25  ;;  %5012 = vst.msk [vmem:[%s12066_s4 + $0x38] sm:$0xff] %vm868_vm1, %v4462_v25 }
0x3347   :  { %11028 = vpow2.f32 %v4481_v49  ;;  %v4471_v35 = vmul.f32 0.5, %v4457_v51  ;;  %5011 = vst.msk [vmem:[%s12066_s4 + $0x30] sm:$0xff] %vm868_vm1, %v4457_v51  ;;  %s13697_s4 = sld [smem:[#allocation68_spill]] }
0x3348   :  { %v11019_v13 = vpop.eup %11018  ;;  %v4487_v40 = vmul.f32 1.442695, %v4472_v54 }
0x3349   :  { %v11021_v20 = vpop.eup %11020  ;;  %v4498_v56 = vmul.f32 %v11019_v13, %v4490_v52  ;;  %v4485_v58 = vmul.f32 1.442695, %v4471_v35 }
0x334a   :  { %11030 = vpow2.f32 %v4487_v40  ;;  %v4497_v61 = vmul.f32 %v11021_v20, %v4489_v55 }
0x334b   :  { %v4506_v2 = vadd.f32 %v4498_v56, %v12979_v38  ;;  %11032 = vpow2.f32 %v4485_v58 }
0x334c   :  { %v11023_v26 = vpop.eup %11022  ;;  %v4505_v32 = vadd.f32 %v4497_v61, %v12981_v39  ;;  %v4493_v39 = vld [vmem:[%s13696_s19 + $0x20] sm:$0xff] }
0x334d   :  { %v11025_v4 = vpop.eup %11024  ;;  %5014 = vst.msk [vmem:[%s12056_s24 + $0x8] sm:$0xff] %vm868_vm1, %v4506_v2  ;;  %v4500_v50 = vmul.f32 %v11023_v26, %v4492_v62  ;;  %v4846_v23 = vld [vmem:[%s13697_s4 + $0x8] sm:$0xff]  ;;  %v4847_v17 = vld [vmem:[%s13697_s4 + $0x10] sm:$0xff]  ;;  %v4848_v28 = vld [vmem:[%s13697_s4 + $0x18] sm:$0xff] }
0x334e   :  { %9227 = vmatprep.mubr.msk.f32.mxu1 %vm868_vm1, %v4505_v32  ;;  %5013 = vst.msk [vmem:[%s12056_s24] sm:$0xff] %vm868_vm1, %v4505_v32  ;;  %v4499_v3 = vmul.f32 %v11025_v4, %v4491_v30  ;;  %v10279_v51 = vpack.c.bf16 %v4848_v28, %v4847_v17  ;;  %v4849_v35 = vld [vmem:[%s13697_s4 + $0x20] sm:$0xff]  ;;  %v4850_v55 = vld [vmem:[%s13697_s4 + $0x28] sm:$0xff]  ;;  %v4852_v30 = vld [vmem:[%s13697_s4 + $0x38] sm:$0xff] }
0x334f   :  { %9228 = vmatmul.mubr.msk.f32.vlgmr.msra.gmra.mrb[56].mxu1 %vm868_vm1, %v4506_v2  ;;  %v4508_v38 = vadd.f32 %v4500_v50, %v12989_v5  ;;  %v10283_v62 = vpack.c.bf16 %v4850_v55, %v4849_v35  ;;  %v4851_v2 = vld [vmem:[%s13697_s4 + $0x30] sm:$0xff] }
0x3350   :  { %v11027_v8 = vpop.eup %11026  ;;  %v4507_v29 = vadd.f32 %v4499_v3, %v12991_v6  ;;  %10262 = vmatpush3.bf16.msra.mxu1 %v12976_v10  ;;  %v4495_v10 = vld [vmem:[%s13696_s19 + $0x30] sm:$0xff] }
0x3351   :  { %v11029_v9 = vpop.eup %11028  ;;  %5016 = vst.msk [vmem:[%s12056_s24 + $0x18] sm:$0xff] %vm868_vm1, %v4508_v38  ;;  %v4502_v44 = vmul.f32 %v11027_v8, %v4494_v53  ;;  %10264 = vmatprep.subr.bf16.mxu1 %v10263_v45  ;;  %v10287_v53 = vpack.c.bf16 %v4852_v30, %v4851_v2  ;;  %v4853_v8 = vld [vmem:[%s13697_s4 + $0x40] sm:$0xff]  ;;  %v5024_v2 = vld [vmem:[#allocation24 + $0x18] sm:$0xff]  ;;  %v5270_v30 = vld [vmem:[#allocation27] sm:$0xff] }
0x3352   :  { %9230 = vmatprep.mubr.msk.f32.mxu1 %vm868_vm1, %v4507_v29  ;;  %5015 = vst.msk [vmem:[%s12056_s24 + $0x10] sm:$0xff] %vm868_vm1, %v4507_v29  ;;  %v4501_v21 = vmul.f32 %v11029_v9, %v4493_v39  ;;  %v4854_v29 = vld [vmem:[%s13697_s4 + $0x48] sm:$0xff] }
0x3353   :  { %9231 = vmatmul.mubr.msk.f32.gmra.mrb[58].mxu1 %vm868_vm1, %v4508_v38  ;;  %v4510_v5 = vadd.f32 %v4502_v44, %v12999_v46 }
0x3354   :  { %v11031_v6 = vpop.eup %11030  ;;  %v4509_v57 = vadd.f32 %v4501_v21, %v13001_v48  ;;  %10266 = vmatpush3.bf16.msra.mxu1 %v10263_v45  ;;  %v10291_v21 = vpack.c.bf16 %v4854_v29, %v4853_v8  ;;  %v8657_v29 = vld [vmem:[#allocation23] ss:$0 sm:$0xff] }
0x3355   :  { %v11033_v12 = vpop.eup %11032  ;;  %5018 = vst.msk [vmem:[%s12056_s24 + $0x28] sm:$0xff] %vm868_vm1, %v4510_v5  ;;  %v4504_v14 = vmul.f32 %v11031_v6, %v4496_v11  ;;  %10268 = vmatprep.subr.bf16.mxu1 %v10267_v19 }
0x3356   :  { %9233 = vmatprep.mubr.msk.f32.mxu1 %vm868_vm1, %v4509_v57  ;;  %5017 = vst.msk [vmem:[%s12056_s24 + $0x20] sm:$0xff] %vm868_vm1, %v4509_v57  ;;  %v4503_v15 = vmul.f32 %v11033_v12, %v4495_v10  ;;  %v4856_v10 = vld [vmem:[%s13697_s4 + $0x58] sm:$0xff]  ;;  %v4857_v57 = vld [vmem:[%s13697_s4 + $0x60] sm:$0xff]  ;;  %v4858_v12 = vld [vmem:[%s13697_s4 + $0x68] sm:$0xff] }
0x3357   :  { %9234 = vmatmul.mubr.msk.f32.gmra.mrb[60].mxu1 %vm868_vm1, %v4510_v5  ;;  %v4512_v46 = vadd.f32 %v4504_v14, %v13009_v34  ;;  %v4684_v34 = vld [vmem:[%s13695_s11 + $0x38] sm:$0xff]  ;;  %v4855_v5 = vld [vmem:[%s13697_s4 + $0x50] sm:$0xff]  ;;  %v10299_v14 = vpack.c.bf16 %v4858_v12, %v4857_v57 }
0x3358   :  { %v4511_v48 = vadd.f32 %v4503_v15, %v13011_v41  ;;  %10270 = vmatpush3.bf16.msra.mxu1 %v10267_v19  ;;  %v10271_v22 = vpack.c.bf16 %v4684_v34, %v4683_v59  ;;  %v4845_v41 = vld [vmem:[%s13697_s4] sm:$0xff]  ;;  %v10295_v6 = vpack.c.bf16 %v4856_v10, %v4855_v5  ;;  %v4859_v15 = vld [vmem:[%s13697_s4 + $0x70] sm:$0xff]  ;;  %v10307_v19 = vpack.c.bf16 %v5022_v18, %v5021_v16  ;;  %v8648_v59 = vld [vmem:[#allocation21] ss:$0 sm:$0xff] }
0x3359   :  { %5020 = vst.msk [vmem:[%s12056_s24 + $0x38] sm:$0xff] %vm868_vm1, %v4512_v46  ;;  %v10275_v24 = vpack.c.bf16 %v4846_v23, %v4845_v41  ;;  %v5163_v10 = vld [vmem:[#allocation26 + $0x10] sm:$0xff] }
0x335a   :  { %9236 = vmatprep.mubr.msk.f32.mxu1 %vm868_vm1, %v4511_v48  ;;  %5019 = vst.msk [vmem:[%s12056_s24 + $0x30] sm:$0xff] %vm868_vm1, %v4511_v48  ;;  %10272 = vmatprep.subr.bf16.mxu1 %v10271_v22  ;;  %s11832_s24 = smov 32  }
0x335b   :  { %9237 = vmatmul.mubr.msk.f32.gmra.mrb[62].mxu1 %vm868_vm1, %v4512_v46  ;;  %v4860_v46 = vld [vmem:[%s13697_s4 + $0x78] sm:$0xff] }
0x335c   :  { %10274 = vmatpush3.bf16.msra.mxu1 %v10271_v22  ;;  %v10303_v48 = vpack.c.bf16 %v4860_v46, %v4859_v15 }
0x335d   :  { %10276 = vmatprep.subr.bf16.mxu1 %v10275_v24 }
0x3422   :  { %v9229_v27 = vpop.f32.mrb[56].mxu1 }
0x3423   :  { %v4620_v7 = vadd.f32 %v9229_v27, %v8639_v47  ;;  %v4614_v31 = vpop.f32.mrb[57].mxu1 }
0x3424   :  { %v4615_v33 = vadd.f32 %v8639_v47, %v4614_v31 }
0x3425   :  { %v4662_v36 = vmul.f32 0.01, %v4620_v7  ;;  %vm4654_vm7 = vcmp.ge.f32.partialorder %v4620_v7, 0.0 }
0x3426   :  { %vm4653_vm8 = vcmp.ge.f32.partialorder %v4615_v33, 0.0  ;;  %v4661_v37 = vmul.f32 0.01, %v4615_v33  ;;  %v9232_v42 = vpop.f32.mrb[58].mxu1 }
0x3427   :  { %v4630_v60 = vadd.f32 %v9232_v42, %v8639_v47  ;;  %v4624_v25 = vpop.f32.mrb[59].mxu1  ;;  %v4670_v52 = vsel %vm4654_vm7, %v4620_v7, %v4662_v36 }
0x3428   :  { %v4625_v43 = vadd.f32 %v8639_v47, %v4624_v25  ;;  %v4669_v49 = vsel %vm4653_vm8, %v4615_v33, %v4661_v37 }
0x3429   :  { %v4664_v54 = vmul.f32 0.01, %v4630_v60  ;;  %9255 = vmatprep.mubr.msk.f32.mxu1 %vm765_vm3, %v4669_v49  ;;  %vm4656_vm9 = vcmp.ge.f32.partialorder %v4630_v60, 0.0 }
0x342a   :  { %vm4655_vm10 = vcmp.ge.f32.partialorder %v4625_v43, 0.0  ;;  %v4663_v13 = vmul.f32 0.01, %v4625_v43  ;;  %v9235_v40 = vpop.f32.mrb[60].mxu1  ;;  %9256 = vmatmul.mubr.msk.f32.vlgmr.msra.gmra.mrb[64].mxu1 %vm765_vm3, %v4670_v52 }
0x342b   :  { %v4640_v20 = vadd.f32 %v9235_v40, %v8639_v47  ;;  %v4634_v56 = vpop.f32.mrb[61].mxu1  ;;  %10278 = vmatpush3.bf16.msra.mxu1 %v10275_v24  ;;  %v4672_v1 = vsel %vm4656_vm9, %v4630_v60, %v4664_v54  ;;  %vm11831_vm9 = vmmov 0  }
0x342c   :  { %v4635_v58 = vadd.f32 %v8639_v47, %v4634_v56  ;;  %v4671_v61 = vsel %vm4655_vm10, %v4625_v43, %v4663_v13  ;;  %10280 = vmatprep.subr.bf16.mxu1 %v10279_v51  ;;  %9359 = vmatprep.mubr.msk.f32.mxu0 %vm11831_vm9, %v11828_v0 }
0x342d   :  { %v4666_v63 = vmul.f32 0.01, %v4640_v20  ;;  %9258 = vmatprep.mubr.msk.f32.mxu1 %vm765_vm3, %v4671_v61  ;;  %vm4658_vm11 = vcmp.ge.f32.partialorder %v4640_v20, 0.0 }
0x342e   :  { %vm4657_vm12 = vcmp.ge.f32.partialorder %v4635_v58, 0.0  ;;  %v4665_v26 = vmul.f32 0.01, %v4635_v58  ;;  %v9238_v32 = vpop.f32.mrb[62].mxu1  ;;  %9259 = vmatmul.mubr.msk.f32.gmra.mrb[66].mxu1 %vm765_vm3, %v4672_v1  ;;  %v5023_v1 = vld [vmem:[#allocation24 + $0x10] sm:$0xff] }
0x342f   :  { %v4650_v4 = vadd.f32 %v9238_v32, %v8639_v47  ;;  %v4644_v50 = vpop.f32.mrb[63].mxu1  ;;  %10282 = vmatpush3.bf16.msra.mxu1 %v10279_v51  ;;  %v4674_v39 = vsel %vm4658_vm11, %v4640_v20, %v4666_v63  ;;  %v5271_v32 = vld [vmem:[#allocation27 + $0x8] sm:$0xff] }
0x3430   :  { %v4645_v45 = vadd.f32 %v8639_v47, %v4644_v50  ;;  %v4673_v3 = vsel %vm4657_vm12, %v4635_v58, %v4665_v26  ;;  %10284 = vmatprep.subr.bf16.mxu1 %v10283_v62  ;;  %v10311_v26 = vpack.c.bf16 %v5024_v2, %v5023_v1  ;;  %v13107_v50 = vpack.c.bf16 %v5271_v32, %v5270_v30 }
0x3431   :  { %v4668_v38 = vmul.f32 0.01, %v4650_v4  ;;  %9261 = vmatprep.mubr.msk.f32.mxu1 %vm765_vm3, %v4673_v3  ;;  %vm4660_vm13 = vcmp.ge.f32.partialorder %v4650_v4, 0.0  ;;  %v5273_v3 = vld [vmem:[#allocation27 + $0x18] sm:$0xff] }
0x3432   :  { %vm4659_vm14 = vcmp.ge.f32.partialorder %v4645_v45, 0.0  ;;  %v4667_v9 = vmul.f32 0.01, %v4645_v45  ;;  %9262 = vmatmul.mubr.msk.f32.gmra.mrb[68].mxu1 %vm765_vm3, %v4674_v39  ;;  %v5162_v39 = vld [vmem:[#allocation26 + $0x8] sm:$0xff] }
0x3433   :  { %10286 = vmatpush3.bf16.msra.mxu1 %v10283_v62  ;;  %v4676_v11 = vsel %vm4660_vm13, %v4650_v4, %v4668_v38  ;;  %v11830_v4 = vmov 0.0|0.0   ;;  %v5161_v38 = vld [vmem:[#allocation26] sm:$0xff] }
0x3434   :  { %v4675_v44 = vsel %vm4659_vm14, %v4645_v45, %v4667_v9  ;;  %10288 = vmatprep.subr.bf16.mxu1 %v10287_v53  ;;  %10323 = vmatprep.subr.bf16.mxu0 %v11830_v4  ;;  %v5272_v45 = vld [vmem:[#allocation27 + $0x10] sm:$0xff]  ;;  %v10315_v8 = vpack.c.bf16 %v5162_v39, %v5161_v38 }
0x3435   :  { %9264 = vmatprep.mubr.msk.f32.mxu1 %vm765_vm3, %v4675_v44  ;;  %10325 = vmatpush3.bf16.msra.mxu0 %v13107_v50 }
0x3436   :  { %9265 = vmatmul.mubr.msk.f32.gmra.mrb[70].mxu1 %vm765_vm3, %v4676_v11  ;;  %10326 = vmatprep.subr.bf16.mxu0 %v11830_v4 }
0x3437   :  { %10290 = vmatpush3.bf16.msra.mxu1 %v10287_v53  ;;  %v13111_v53 = vpack.c.bf16 %v5273_v3, %v5272_v45 }
0x3438   :  { %10292 = vmatprep.subr.bf16.mxu1 %v10291_v21 }
0x3439   :  { %10328 = vmatpush3.bf16.msra.mxu0 %v13111_v53 }
0x343a   :  { %10335 = vmatprep.subr.bf16.mxu0 %v11830_v4 }
0x343b   :  { %10294 = vmatpush3.bf16.msra.mxu1 %v10291_v21 }
0x343c   :  { %10296 = vmatprep.subr.bf16.mxu1 %v10295_v6  ;;  %9360 = vmatmul.mubr.f32.vlgmr.msra.gmra.mrb[40].mxu0 %v11828_v0 }
0x343d   :  { %10337 = vmatpush3.bf16.msra.mxu0 %v13107_v50  ;;  %9381 = vmatprep.mubr.msk.f32.mxu0 %vm11831_vm9, %v11828_v0 }
0x343e   :  { %10338 = vmatprep.subr.bf16.mxu0 %v11830_v4 }
0x343f   :  { %10298 = vmatpush3.bf16.msra.mxu1 %v10295_v6  ;;  %v5164_v6 = vld [vmem:[#allocation26 + $0x18] sm:$0xff] }
0x3440   :  { %10300 = vmatprep.subr.bf16.mxu1 %v10299_v14  ;;  %v10319_v16 = vpack.c.bf16 %v5164_v6, %v5163_v10 }
0x3441   :  { %10340 = vmatpush3.bf16.msra.mxu0 %v13111_v53 }
0x3442   :  { %10347 = vmatprep.subr.bf16.mxu0 %v11830_v4 }
0x3443   :  { %10302 = vmatpush3.bf16.msra.mxu1 %v10299_v14 }
0x3444   :  { %10304 = vmatprep.subr.bf16.mxu1 %v10303_v48 }
0x3447   :  { %10306 = vmatpush3.bf16.msra.mxu1 %v10303_v48 }
0x3448   :  { %10308 = vmatprep.subr.bf16.mxu1 %v10307_v19 }
0x34fd   :  { %v9257_v34 = vpop.f32.mrb[64].mxu1 }
0x34fe   :  { %v4788_v22 = vadd.f32 %v9257_v34, %v8648_v59  ;;  %v4782_v41 = vpop.f32.mrb[65].mxu1 }
0x34ff   :  { %v4783_v23 = vadd.f32 %v8648_v59, %v4782_v41 }
0x3500   :  { %v4830_v24 = vmul.f32 0.01, %v4788_v22  ;;  %vm4822_vm3 = vcmp.ge.f32.partialorder %v4788_v22, 0.0 }
0x3501   :  { %v4829_v47 = vmul.f32 0.01, %v4783_v23  ;;  %v9260_v27 = vpop.f32.mrb[66].mxu1  ;;  %vm4821_vm15 = vcmp.ge.f32.partialorder %v4783_v23, 0.0 }
0x3502   :  { %v4798_v7 = vadd.f32 %v9260_v27, %v8648_v59  ;;  %v4792_v31 = vpop.f32.mrb[67].mxu1  ;;  %v4838_v17 = vsel %vm4822_vm3, %v4788_v22, %v4830_v24 }
0x3503   :  { %v4793_v33 = vadd.f32 %v8648_v59, %v4792_v31  ;;  %v4837_v36 = vsel %vm4821_vm15, %v4783_v23, %v4829_v47 }
0x3504   :  { %v4832_v28 = vmul.f32 0.01, %v4798_v7  ;;  %9299 = vmatprep.mubr.f32.mxu1 %v4837_v36  ;;  %vm4824_vm4 = vcmp.ge.f32.partialorder %v4798_v7, 0.0 }
0x3505   :  { %v4831_v37 = vmul.f32 0.01, %v4793_v33  ;;  %v9263_v42 = vpop.f32.mrb[68].mxu1  ;;  %9300 = vmatmul.mubr.f32.vlgmr.msra.gmra.mrb[72].mxu1 %v4838_v17  ;;  %vm4823_vm2 = vcmp.ge.f32.partialorder %v4793_v33, 0.0 }
0x3506   :  { %v4808_v60 = vadd.f32 %v9263_v42, %v8648_v59  ;;  %v4802_v25 = vpop.f32.mrb[69].mxu1  ;;  %10310 = vmatpush3.bf16.msra.mxu1 %v10307_v19  ;;  %v4840_v52 = vsel %vm4824_vm4, %v4798_v7, %v4832_v28  ;;  %vm5376_vm4 = vcmask 261248  }
0x3507   :  { %v4803_v43 = vadd.f32 %v8648_v59, %v4802_v25  ;;  %v4839_v49 = vsel %vm4823_vm2, %v4793_v33, %v4831_v37  ;;  %10312 = vmatprep.subr.bf16.mxu1 %v10311_v26 }
0x3508   :  { %v4834_v51 = vmul.f32 0.01, %v4808_v60  ;;  %9302 = vmatprep.mubr.f32.mxu1 %v4839_v49  ;;  %vm4826_vm6 = vcmp.ge.f32.partialorder %v4808_v60, 0.0 }
0x3509   :  { %v4833_v54 = vmul.f32 0.01, %v4803_v43  ;;  %v9266_v35 = vpop.f32.mrb[70].mxu1  ;;  %9303 = vmatmul.mubr.f32.gmra.mrb[74].mxu1 %v4840_v52  ;;  %vm4825_vm5 = vcmp.ge.f32.partialorder %v4803_v43, 0.0  ;;  %v8658_v52 = vld [vmem:[#allocation29] ss:$0 sm:$0xff] }
0x350a   :  { %v4818_v55 = vadd.f32 %v9266_v35, %v8648_v59  ;;  %v4812_v13 = vpop.f32.mrb[71].mxu1  ;;  %v4842_v58 = vsel %vm4826_vm6, %v4808_v60, %v4834_v51  ;;  %10314 = vmatpush3.bf16.msra.mxu1 %v10311_v26 }
0x350b   :  { %v4813_v40 = vadd.f32 %v8648_v59, %v4812_v13  ;;  %v4841_v20 = vsel %vm4825_vm5, %v4803_v43, %v4833_v54  ;;  %10316 = vmatprep.subr.bf16.mxu1 %v10315_v8 }
0x350c   :  { %v4836_v56 = vmul.f32 0.01, %v4818_v55  ;;  %9305 = vmatprep.mubr.f32.mxu1 %v4841_v20  ;;  %vm4828_vm8 = vcmp.ge.f32.partialorder %v4818_v55, 0.0 }
0x350d   :  { %v4835_v61 = vmul.f32 0.01, %v4813_v40  ;;  %9306 = vmatmul.mubr.f32.gmra.mrb[76].mxu1 %v4842_v58  ;;  %vm4827_vm7 = vcmp.ge.f32.partialorder %v4813_v40, 0.0 }
0x350e   :  { %v4844_v63 = vsel %vm4828_vm8, %v4818_v55, %v4836_v56 }
0x350f   :  { %v4843_v62 = vsel %vm4827_vm7, %v4813_v40, %v4835_v61  ;;  %v5342_v49 = vpop.f32.mrb[40].mxu0 }
0x3510   :  { %9308 = vmatprep.mubr.f32.mxu1 %v4843_v62  ;;  %v9361_v51 = vpop.f32.mrb[41].mxu0 }
0x3511   :  { %9309 = vmatmul.mubr.f32.gmra.mrb[78].mxu1 %v4844_v63 }
0x35d8   :  { %v9301_v9 = vpop.f32.mrb[72].mxu1 }
0x35d9   :  { %v4940_v44 = vadd.f32 %v9301_v9, %v8657_v29  ;;  %v4934_v21 = vpop.f32.mrb[73].mxu1 }
0x35da   :  { %v4935_v11 = vadd.f32 %v8657_v29, %v4934_v21 }
0x35db   :  { %v4982_v5 = vmul.f32 0.01, %v4940_v44  ;;  %vm4974_vm10 = vcmp.ge.f32.partialorder %v4940_v44, 0.0 }
0x35dc   :  { %vm4973_vm11 = vcmp.ge.f32.partialorder %v4935_v11, 0.0  ;;  %v4981_v57 = vmul.f32 0.01, %v4935_v11  ;;  %v9304_v12 = vpop.f32.mrb[74].mxu1 }
0x35dd   :  { %v4950_v14 = vadd.f32 %v9304_v12, %v8657_v29  ;;  %v4944_v15 = vpop.f32.mrb[75].mxu1  ;;  %v4990_v18 = vsel %vm4974_vm10, %v4940_v44, %v4982_v5 }
0x35de   :  { %v4945_v46 = vadd.f32 %v8657_v29, %v4944_v15  ;;  %v4989_v48 = vsel %vm4973_vm11, %v4935_v11, %v4981_v57 }
0x35df   :  { %v4984_v19 = vmul.f32 0.01, %v4950_v14  ;;  %9319 = vmatprep.mubr.msk.f32.mxu1 %vm868_vm1, %v4989_v48  ;;  %vm4976_vm12 = vcmp.ge.f32.partialorder %v4950_v14, 0.0 }
0x35e0   :  { %vm4975_vm13 = vcmp.ge.f32.partialorder %v4945_v46, 0.0  ;;  %v4983_v59 = vmul.f32 0.01, %v4945_v46  ;;  %v9307_v34 = vpop.f32.mrb[76].mxu1  ;;  %9320 = vmatmul.mubr.msk.f32.vlgmr.msra.gmra.mrb[80].mxu1 %vm868_vm1, %v4990_v18 }
0x35e1   :  { %v4960_v22 = vadd.f32 %v9307_v34, %v8657_v29  ;;  %v4954_v41 = vpop.f32.mrb[77].mxu1  ;;  %10318 = vmatpush3.bf16.msra.mxu1 %v10315_v8  ;;  %v4992_v27 = vsel %vm4976_vm12, %v4950_v14, %v4984_v19 }
0x35e2   :  { %v4955_v23 = vadd.f32 %v8657_v29, %v4954_v41  ;;  %v4991_v24 = vsel %vm4975_vm13, %v4945_v46, %v4983_v59  ;;  %10320 = vmatprep.subr.bf16.mxu1 %v10319_v16 }
0x35e3   :  { %v4986_v47 = vmul.f32 0.01, %v4960_v22  ;;  %9322 = vmatprep.mubr.msk.f32.mxu1 %vm868_vm1, %v4991_v24  ;;  %vm4978_vm14 = vcmp.ge.f32.partialorder %v4960_v22, 0.0 }
0x35e4   :  { %vm4977_vm3 = vcmp.ge.f32.partialorder %v4955_v23, 0.0  ;;  %v4985_v7 = vmul.f32 0.01, %v4955_v23  ;;  %v9310_v31 = vpop.f32.mrb[78].mxu1  ;;  %9323 = vmatmul.mubr.msk.f32.gmra.mrb[82].mxu1 %vm868_vm1, %v4992_v27 }
0x35e5   :  { %v4970_v33 = vadd.f32 %v9310_v31, %v8657_v29  ;;  %v4964_v36 = vpop.f32.mrb[79].mxu1  ;;  %10322 = vmatpush3.bf16.msra.mxu1 %v10319_v16  ;;  %v4994_v42 = vsel %vm4978_vm14, %v4960_v22, %v4986_v47 }
0x35e6   :  { %v4965_v17 = vadd.f32 %v8657_v29, %v4964_v36  ;;  %v4993_v28 = vsel %vm4977_vm3, %v4955_v23, %v4985_v7  ;;  %10329 = vmatprep.subr.bf16.mxu1 %v11830_v4 }
0x35e7   :  { %v4988_v37 = vmul.f32 0.01, %v4970_v33  ;;  %9325 = vmatprep.mubr.msk.f32.mxu1 %vm868_vm1, %v4993_v28  ;;  %vm4980_vm15 = vcmp.ge.f32.partialorder %v4970_v33, 0.0 }
0x35e8   :  { %vm4979_vm2 = vcmp.ge.f32.partialorder %v4965_v17, 0.0  ;;  %v4987_v60 = vmul.f32 0.01, %v4965_v17  ;;  %9326 = vmatmul.mubr.msk.f32.gmra.mrb[84].mxu1 %vm868_vm1, %v4994_v42 }
0x35e9   :  { %v4996_v43 = vsel %vm4980_vm15, %v4970_v33, %v4988_v37 }
0x35ea   :  { %v4995_v25 = vsel %vm4979_vm2, %v4965_v17, %v4987_v60 }
0x35eb   :  { %9328 = vmatprep.mubr.msk.f32.mxu1 %vm868_vm1, %v4995_v25 }
0x35ec   :  { %9329 = vmatmul.mubr.msk.f32.gmra.mrb[86].mxu1 %vm868_vm1, %v4996_v43 }
0x35ed   :  { %9339 = vmatprep.mubr.msk.f32.mxu1 %vm868_vm1, %v4989_v48 }
0x35f0   :  { %9340 = vmatmul.mubr.msk.f32.vlgmr.msra.gmra.mrb[88].mxu1 %vm868_vm1, %v4990_v18 }
0x35f1   :  { %9342 = vmatprep.mubr.msk.f32.mxu1 %vm868_vm1, %v4991_v24  ;;  %10331 = vmatpush3.bf16.msra.mxu1 %v13107_v50 }
0x35f2   :  { %10332 = vmatprep.subr.bf16.mxu1 %v11830_v4 }
0x35f4   :  { %9343 = vmatmul.mubr.msk.f32.gmra.mrb[90].mxu1 %vm868_vm1, %v4992_v27 }
0x35f5   :  { %9345 = vmatprep.mubr.msk.f32.mxu1 %vm868_vm1, %v4993_v28  ;;  %10334 = vmatpush3.bf16.msra.mxu1 %v13111_v53 }
0x35f6   :  { %10341 = vmatprep.subr.bf16.mxu1 %v11830_v4 }
0x35f8   :  { %9346 = vmatmul.mubr.msk.f32.gmra.mrb[92].mxu1 %vm868_vm1, %v4994_v42 }
0x35f9   :  { %9348 = vmatprep.mubr.msk.f32.mxu1 %vm868_vm1, %v4995_v25 }
0x35fc   :  { %9349 = vmatmul.mubr.msk.f32.gmra.mrb[94].mxu1 %vm868_vm1, %v4996_v43 }
0x35fd   :  { %9370 = vmatprep.mubr.msk.f32.mxu1 %vm11831_vm9, %v11828_v0 }
0x36b3   :  { %v9321_v54 = vpop.f32.mrb[80].mxu1 }
0x36b4   :  { %v5128_v35 = vadd.f32 %v9321_v54, %v8658_v52  ;;  %v5122_v55 = vpop.f32.mrb[81].mxu1 }
0x36b5   :  { %v5123_v13 = vadd.f32 %v8658_v52, %v5122_v55 }
0x36b7   :  { %v5343_v40 = vadd.f32 %v5342_v49, %v5123_v13  ;;  %v9324_v20 = vpop.f32.mrb[82].mxu1 }
0x36b8   :  { %v13147_v56 = vadd.f32 %v9324_v20, %v8658_v52  ;;  %v5132_v58 = vpop.f32.mrb[83].mxu1 }
0x36b9   :  { %v13149_v61 = vadd.f32 %v8658_v52, %v5132_v58 }
0x36bb   :  { %v9327_v62 = vpop.f32.mrb[84].mxu1 }
0x36bc   :  { %v13151_v63 = vadd.f32 %v9327_v62, %v8658_v52  ;;  %v5142_v1 = vpop.f32.mrb[85].mxu1 }
0x36bd   :  { %v13153_v2 = vadd.f32 %v8658_v52, %v5142_v1 }
0x36bf   :  { %v9330_v30 = vpop.f32.mrb[86].mxu1 }
0x36c0   :  { %v13155_v26 = vadd.f32 %v9330_v30, %v8658_v52  ;;  %v5152_v32 = vpop.f32.mrb[87].mxu1 }
0x36c1   :  { %v13157_v45 = vadd.f32 %v8658_v52, %v5152_v32 }
0x36c3   :  { %v13159_v3 = vpop.f32.mrb[88].mxu1 }
0x36c4   :  { %v13161_v38 = vpop.f32.mrb[89].mxu1 }
0x36c7   :  { %v13163_v39 = vpop.f32.mrb[90].mxu1 }
0x36c8   :  { %v13165_v8 = vpop.f32.mrb[91].mxu1 }
0x36cb   :  { %v13167_v29 = vpop.f32.mrb[92].mxu1 }
0x36cc   :  { %v13169_v9 = vpop.f32.mrb[93].mxu1 }
0x36cf   :  { %v9350_v44 = vpop.f32.mrb[94].mxu1 }
0x36d0   :  { %v5346_v21 = vadd.f32 %v9350_v44, %v5343_v40  ;;  %v5261_v11 = vpop.f32.mrb[95].mxu1 }
0x36d2   :  { %11034 = vtanh.f32 %v5346_v21  ;;  %v8675_v10 = vmul.f32 -1.442695, %v5346_v21 }
0x36d4   :  { %11036 = vpow2.f32 %v8675_v10 }
0x36dc   :  { %v11035_v5 = vpop.eup %11034 }
0x36dd   :  { %5356 = vrot.lane.b32.xlu0 %v11035_v5, %s11829_s22 }
0x36de   :  { %v11037_v6 = vpop.eup %11036 }
0x36df   :  { %v5350_v57 = vadd.f32 1.0, %v11037_v6 }
0x36e1   :  { %11038 = vrcp.f32 %v5350_v57 }
0x36eb   :  { %v11039_v12 = vpop.eup %11038 }
0x36ec   :  { %v5354_v46 = vmul.f32 0.0, %v11039_v12 }
0x374f   :  { %v5357_v14 = vpop.permute.xlu0 %5356 }
0x3750   :  { %v5359_v15 = vmul.f32 %v11039_v12, %v5357_v14 }
0x3752   :  { %5361 = vrot.lane.b32.xlu1 %v5359_v15, %s11832_s24 }
0x37c4   :  { %v5362_v48 = vpop.permute.xlu1 %5361 }
0x37c5   :  { %v5364_v16 = vadd.f32 %v5362_v48, %v5354_v46 }
0x37c7   :  { %11040 = vtanh.f32 %v5364_v16 }
0x37d1   :  { %v11041_v18 = vpop.eup %11040 }
0x37d2   :  { %5367 = vrot.lane.b32.xlu0 %v11041_v18, %s11829_s22 }
0x3844   :  { %v5368_v19 = vpop.permute.xlu0 %5367 }
0x3845   :  { %v5370_v59 = vmul.f32 %v11039_v12, %v5368_v19 }
0x3847   :  { %5372 = vrot.lane.b32.xlu1 %v5370_v59, %s11832_s24 }
0x38b9   :  { %v5373_v34 = vpop.permute.xlu1 %5372 }
0x38ba   :  { %5375 = vst.msk [vmem:[#allocation3] sm:$0xff] %vm494_vm0, %v5373_v34  ;;  %9371 = vmatmul.mubr.msk.f32.vlgmr.msra.gmra.mrb[96].mxu1 %vm868_vm1, %v5373_v34 }
0x38bb   :  { %5377 = vst.msk [vmem:[#allocation3 + $0x38] sm:$0xff] %vm5376_vm4, %v5373_v34  ;;  %10343 = vmatpush3.bf16.msra.mxu1 %v13107_v50  ;;  %9392 = vmatprep.mubr.msk.f32.mxu1 %vm11831_vm9, %v11828_v0 }
0x38bc   :  { %10344 = vmatprep.subr.bf16.mxu1 %v11830_v4 }
0x38bf   :  { %10346 = vmatpush3.bf16.msra.mxu1 %v13111_v53 }
0x38c0   :  { %10353 = vmatprep.subr.bf16.mxu1 %v11830_v4 }
0x398d   :  { %v5446_v22 = vpop.f32.mrb[96].mxu1 }
0x398e   :  { %v5447_v41 = vadd.f32 %v5446_v22, %v5128_v35  ;;  %v9372_v23 = vpop.f32.mrb[97].mxu1 }
0x3990   :  { %v5450_v24 = vadd.f32 %v5447_v41, %v5261_v11 }
0x3992   :  { %11042 = vtanh.f32 %v5450_v24  ;;  %v8677_v27 = vmul.f32 -1.442695, %v5450_v24 }
0x3994   :  { %11044 = vpow2.f32 %v8677_v27 }
0x399c   :  { %v11043_v47 = vpop.eup %11042 }
0x399d   :  { %5460 = vrot.lane.b32.xlu0 %v11043_v47, %s11829_s22 }
0x399e   :  { %v11045_v7 = vpop.eup %11044 }
0x399f   :  { %v5454_v31 = vadd.f32 1.0, %v11045_v7 }
0x39a1   :  { %11046 = vrcp.f32 %v5454_v31 }
0x39ab   :  { %v11047_v33 = vpop.eup %11046 }
0x39ac   :  { %v5458_v28 = vmul.f32 %v11047_v33, %v5364_v16 }
0x3a0f   :  { %v5461_v36 = vpop.permute.xlu0 %5460 }
0x3a10   :  { %v5463_v17 = vmul.f32 %v11047_v33, %v5461_v36 }
0x3a12   :  { %5465 = vrot.lane.b32.xlu1 %v5463_v17, %s11832_s24 }
0x3a84   :  { %v5466_v37 = vpop.permute.xlu1 %5465 }
0x3a85   :  { %v5468_v42 = vadd.f32 %v5466_v37, %v5458_v28 }
0x3a87   :  { %11048 = vtanh.f32 %v5468_v42 }
0x3a91   :  { %v11049_v60 = vpop.eup %11048 }
0x3a92   :  { %5471 = vrot.lane.b32.xlu0 %v11049_v60, %s11829_s22 }
0x3b04   :  { %v5472_v25 = vpop.permute.xlu0 %5471 }
0x3b05   :  { %v5474_v43 = vmul.f32 %v11047_v33, %v5472_v25 }
0x3b07   :  { %5476 = vrot.lane.b32.xlu1 %v5474_v43, %s11832_s24 }
0x3b79   :  { %v5477_v49 = vpop.permute.xlu1 %5476 }
0x3b7a   :  { %5479 = vst.msk [vmem:[#allocation3 + $0x8] sm:$0xff] %vm494_vm0, %v5477_v49  ;;  %9382 = vmatmul.mubr.msk.f32.vlgmr.msra.gmra.mrb[42].mxu0 %vm868_vm1, %v5477_v49 }
0x3b7b   :  { %5480 = vst.msk [vmem:[#allocation3 + $0x30] sm:$0xff] %vm5376_vm4, %v5477_v49  ;;  %10349 = vmatpush3.bf16.msra.mxu0 %v13107_v50  ;;  %9403 = vmatprep.mubr.msk.f32.mxu0 %vm11831_vm9, %v11828_v0 }
0x3b7c   :  { %10350 = vmatprep.subr.bf16.mxu0 %v11830_v4 }
0x3b7f   :  { %10352 = vmatpush3.bf16.msra.mxu0 %v13111_v53 }
0x3b80   :  { %10359 = vmatprep.subr.bf16.mxu0 %v11830_v4 }
0x3c4d   :  { %v5549_v51 = vpop.f32.mrb[42].mxu0 }
0x3c4e   :  { %v5550_v52 = vadd.f32 %v5549_v51, %v13149_v61  ;;  %v9383_v54 = vpop.f32.mrb[43].mxu0 }
0x3c50   :  { %v5553_v35 = vadd.f32 %v13167_v29, %v5550_v52 }
0x3c52   :  { %11050 = vtanh.f32 %v5553_v35  ;;  %v8679_v13 = vmul.f32 -1.442695, %v5553_v35 }
0x3c54   :  { %11052 = vpow2.f32 %v8679_v13 }
0x3c5c   :  { %v11051_v55 = vpop.eup %11050 }
0x3c5d   :  { %5563 = vrot.lane.b32.xlu0 %v11051_v55, %s11829_s22 }
0x3c5e   :  { %v11053_v40 = vpop.eup %11052 }
0x3c5f   :  { %v5557_v20 = vadd.f32 1.0, %v11053_v40 }
0x3c61   :  { %11054 = vrcp.f32 %v5557_v20 }
0x3c6b   :  { %v11055_v58 = vpop.eup %11054 }
0x3c6c   :  { %v5561_v30 = vmul.f32 %v11055_v58, %v5468_v42 }
0x3ccf   :  { %v5564_v62 = vpop.permute.xlu0 %5563 }
0x3cd0   :  { %v5566_v1 = vmul.f32 %v11055_v58, %v5564_v62 }
0x3cd2   :  { %5568 = vrot.lane.b32.xlu1 %v5566_v1, %s11832_s24 }
0x3d44   :  { %v5569_v32 = vpop.permute.xlu1 %5568 }
0x3d45   :  { %v5571_v61 = vadd.f32 %v5569_v32, %v5561_v30 }
0x3d47   :  { %11056 = vtanh.f32 %v5571_v61 }
0x3d51   :  { %v11057_v44 = vpop.eup %11056 }
0x3d52   :  { %5574 = vrot.lane.b32.xlu0 %v11057_v44, %s11829_s22 }
0x3dc4   :  { %v5575_v29 = vpop.permute.xlu0 %5574 }
0x3dc5   :  { %v5577_v21 = vmul.f32 %v11055_v58, %v5575_v29 }
0x3dc7   :  { %5579 = vrot.lane.b32.xlu1 %v5577_v21, %s11832_s24 }
0x3e39   :  { %v5580_v11 = vpop.permute.xlu1 %5579 }
0x3e3a   :  { %5582 = vst.msk [vmem:[#allocation3 + $0x10] sm:$0xff] %vm494_vm0, %v5580_v11  ;;  %9393 = vmatmul.mubr.msk.f32.vlgmr.msra.gmra.mrb[98].mxu1 %vm868_vm1, %v5580_v11 }
0x3e3b   :  { %5583 = vst.msk [vmem:[#allocation3 + $0x28] sm:$0xff] %vm5376_vm4, %v5580_v11  ;;  %10355 = vmatpush3.bf16.msra.mxu1 %v13107_v50  ;;  %9414 = vmatprep.mubr.msk.f32.mxu1 %vm11831_vm9, %v11828_v0 }
0x3e3c   :  { %10356 = vmatprep.subr.bf16.mxu1 %v11830_v4 }
0x3e3f   :  { %10358 = vmatpush3.bf16.msra.mxu1 %v13111_v53 }
0x3e40   :  { %10365 = vmatprep.subr.bf16.mxu1 %v11830_v4 }
0x3f0d   :  { %v5652_v5 = vpop.f32.mrb[98].mxu1 }
0x3f0e   :  { %v5653_v10 = vadd.f32 %v5652_v5, %v13147_v56  ;;  %v9394_v6 = vpop.f32.mrb[99].mxu1 }
0x3f10   :  { %v5656_v57 = vadd.f32 %v5653_v10, %v13169_v9 }
0x3f12   :  { %11058 = vtanh.f32 %v5656_v57  ;;  %v8681_v14 = vmul.f32 -1.442695, %v5656_v57 }
0x3f14   :  { %11060 = vpow2.f32 %v8681_v14 }
0x3f1c   :  { %v11059_v12 = vpop.eup %11058 }
0x3f1d   :  { %5666 = vrot.lane.b32.xlu0 %v11059_v12, %s11829_s22 }
0x3f1e   :  { %v11061_v15 = vpop.eup %11060 }
0x3f1f   :  { %v5660_v46 = vadd.f32 1.0, %v11061_v15 }
0x3f21   :  { %11062 = vrcp.f32 %v5660_v46 }
0x3f2b   :  { %v11063_v48 = vpop.eup %11062 }
0x3f2c   :  { %v5664_v19 = vmul.f32 %v11063_v48, %v5571_v61 }
0x3f8f   :  { %v5667_v16 = vpop.permute.xlu0 %5666 }
0x3f90   :  { %v5669_v18 = vmul.f32 %v11063_v48, %v5667_v16 }
0x3f92   :  { %5671 = vrot.lane.b32.xlu1 %v5669_v18, %s11832_s24 }
0x4004   :  { %v5672_v59 = vpop.permute.xlu1 %5671 }
0x4005   :  { %v5674_v56 = vadd.f32 %v5672_v59, %v5664_v19 }
0x4007   :  { %11064 = vtanh.f32 %v5674_v56 }
0x4011   :  { %v11065_v34 = vpop.eup %11064 }
0x4012   :  { %5677 = vrot.lane.b32.xlu0 %v11065_v34, %s11829_s22 }
0x4084   :  { %v5678_v9 = vpop.permute.xlu0 %5677 }
0x4085   :  { %v5680_v22 = vmul.f32 %v11063_v48, %v5678_v9 }
0x4087   :  { %5682 = vrot.lane.b32.xlu1 %v5680_v22, %s11832_s24 }
0x40f9   :  { %v5683_v41 = vpop.permute.xlu1 %5682 }
0x40fa   :  { %5685 = vst.msk [vmem:[#allocation3 + $0x18] sm:$0xff] %vm494_vm0, %v5683_v41  ;;  %9404 = vmatmul.mubr.msk.f32.vlgmr.msra.gmra.mrb[44].mxu0 %vm868_vm1, %v5683_v41 }
0x40fb   :  { %5686 = vst.msk [vmem:[#allocation3 + $0x20] sm:$0xff] %vm5376_vm4, %v5683_v41  ;;  %10361 = vmatpush3.bf16.msra.mxu0 %v13107_v50  ;;  %9425 = vmatprep.mubr.msk.f32.mxu0 %vm11831_vm9, %v11828_v0 }
0x40fc   :  { %10362 = vmatprep.subr.bf16.mxu0 %v11830_v4 }
0x40ff   :  { %10364 = vmatpush3.bf16.msra.mxu0 %v13111_v53 }
0x41cd   :  { %v5755_v23 = vpop.f32.mrb[44].mxu0 }
0x41ce   :  { %v5756_v24 = vadd.f32 %v5755_v23, %v13153_v2  ;;  %v9405_v47 = vpop.f32.mrb[45].mxu0 }
0x41d0   :  { %v5759_v27 = vadd.f32 %v13163_v39, %v5756_v24 }
0x41d2   :  { %11066 = vtanh.f32 %v5759_v27  ;;  %v8683_v31 = vmul.f32 -1.442695, %v5759_v27 }
0x41d4   :  { %11068 = vpow2.f32 %v8683_v31 }
0x41dc   :  { %v11067_v7 = vpop.eup %11066 }
0x41dd   :  { %5769 = vrot.lane.b32.xlu0 %v11067_v7, %s11829_s22 }
0x41de   :  { %v11069_v33 = vpop.eup %11068 }
0x41df   :  { %v5763_v36 = vadd.f32 1.0, %v11069_v33 }
0x41e1   :  { %11070 = vrcp.f32 %v5763_v36  ;;  %v6107_v36 = vld [vmem:[#allocation30] sm:$0xff] }
0x41eb   :  { %v11071_v17 = vpop.eup %11070 }
0x41ec   :  { %v5767_v42 = vmul.f32 %v11071_v17, %v5674_v56 }
0x424f   :  { %v5770_v28 = vpop.permute.xlu0 %5769 }
0x4250   :  { %v5772_v37 = vmul.f32 %v11071_v17, %v5770_v28  ;;  %v6247_v28 = vld [vmem:[%s13698_s6] sm:$0xff] }
0x4252   :  { %5774 = vrot.lane.b32.xlu1 %v5772_v37, %s11832_s24 }
0x42c4   :  { %v5775_v60 = vpop.permute.xlu1 %5774 }
0x42c5   :  { %v5777_v2 = vadd.f32 %v5775_v60, %v5767_v42  ;;  %v6248_v42 = vld [vmem:[%s13698_s6 + $0x8] sm:$0xff] }
0x42c6   :  { %v6109_v60 = vld [vmem:[#allocation30 + $0x10] sm:$0xff] }
0x42c7   :  { %11072 = vtanh.f32 %v5777_v2 }
0x42d1   :  { %v11073_v25 = vpop.eup %11072 }
0x42d2   :  { %5780 = vrot.lane.b32.xlu0 %v11073_v25, %s11829_s22  ;;  %v10379_v25 = vpack.c.bf16 %v6248_v42, %v6247_v28 }
0x4344   :  { %v5781_v39 = vpop.permute.xlu0 %5780 }
0x4345   :  { %v5783_v43 = vmul.f32 %v11071_v17, %v5781_v39  ;;  %v6108_v17 = vld [vmem:[#allocation30 + $0x8] sm:$0xff] }
0x4346   :  { %v10371_v37 = vpack.c.bf16 %v6108_v17, %v6107_v36 }
0x4347   :  { %5785 = vrot.lane.b32.xlu1 %v5783_v43, %s11832_s24  ;;  %v6249_v43 = vld [vmem:[%s13698_s6 + $0x10] sm:$0xff] }
0x4348   :  { %10372 = vmatprep.subr.bf16.mxu0 %v10371_v37 }
0x43b9   :  { %v5786_v49 = vpop.permute.xlu1 %5785 }
0x43ba   :  { %5788 = vst.msk [vmem:[#allocation3 + $0x20] sm:$0xff] %vm494_vm0, %v5786_v49  ;;  %9415 = vmatmul.mubr.msk.f32.vlgmr.msra.gmra.mrb[100].mxu1 %vm868_vm1, %v5786_v49 }
0x43bb   :  { %5789 = vst.msk [vmem:[#allocation3 + $0x18] sm:$0xff] %vm5376_vm4, %v5786_v49  ;;  %10367 = vmatpush3.bf16.msra.mxu1 %v13107_v50  ;;  %9436 = vmatprep.mubr.msk.f32.mxu1 %vm11831_vm9, %v11828_v0  ;;  %v6250_v49 = vld [vmem:[%s13698_s6 + $0x18] sm:$0xff] }
0x43bc   :  { %10368 = vmatprep.subr.bf16.mxu1 %v11830_v4 }
0x43bf   :  { %10370 = vmatpush3.bf16.msra.mxu1 %v13111_v53 }
0x43c0   :  { %10380 = vmatprep.subr.bf16.mxu1 %v10379_v25 }
0x448d   :  { %v5858_v51 = vpop.f32.mrb[100].mxu1 }
0x448e   :  { %v5859_v52 = vadd.f32 %v5858_v51, %v13151_v63  ;;  %v9416_v54 = vpop.f32.mrb[101].mxu1  ;;  %v10383_v51 = vpack.c.bf16 %v6250_v49, %v6249_v43 }
0x4490   :  { %v5862_v35 = vadd.f32 %v5859_v52, %v13165_v8 }
0x4492   :  { %11074 = vtanh.f32 %v5862_v35  ;;  %v8685_v13 = vmul.f32 -1.442695, %v5862_v35 }
0x4494   :  { %11076 = vpow2.f32 %v8685_v13  ;;  %v6357_v13 = vld [vmem:[#allocation32 + $0x8] sm:$0xff] }
0x449c   :  { %v11075_v55 = vpop.eup %11074 }
0x449d   :  { %5872 = vrot.lane.b32.xlu0 %v11075_v55, %s11829_s22  ;;  %v6356_v55 = vld [vmem:[#allocation32] sm:$0xff] }
0x449e   :  { %v11077_v50 = vpop.eup %11076 }
0x449f   :  { %v5866_v40 = vadd.f32 1.0, %v11077_v50 }
0x44a1   :  { %11078 = vrcp.f32 %v5866_v40  ;;  %v13272_v40 = vpack.c.bf16 %v6357_v13, %v6356_v55 }
0x44ab   :  { %v11079_v20 = vpop.eup %11078 }
0x44ac   :  { %v5870_v53 = vmul.f32 %v11079_v20, %v5777_v2  ;;  %v6110_v2 = vld [vmem:[#allocation30 + $0x18] sm:$0xff] }
0x44ad   :  { %v10375_v39 = vpack.c.bf16 %v6110_v2, %v6109_v60 }
0x450f   :  { %v5873_v58 = vpop.permute.xlu0 %5872 }
0x4510   :  { %v5875_v62 = vmul.f32 %v11079_v20, %v5873_v58  ;;  %v6358_v58 = vld [vmem:[#allocation32 + $0x10] sm:$0xff] }
0x4512   :  { %5877 = vrot.lane.b32.xlu1 %v5875_v62, %s11832_s24  ;;  %v6359_v62 = vld [vmem:[#allocation32 + $0x18] sm:$0xff] }
0x4584   :  { %v5878_v1 = vpop.permute.xlu1 %5877 }
0x4585   :  { %v5880_v63 = vadd.f32 %v5878_v1, %v5870_v53  ;;  %v13281_v1 = vpack.c.bf16 %v6359_v62, %v6358_v58 }
0x4587   :  { %11080 = vtanh.f32 %v5880_v63 }
0x4591   :  { %v11081_v30 = vpop.eup %11080 }
0x4592   :  { %5883 = vrot.lane.b32.xlu0 %v11081_v30, %s11829_s22  ;;  %v6103_v30 = vld [vmem:[#allocation3 + $0x20] sm:$0xff] }
0x4604   :  { %v5884_v8 = vpop.permute.xlu0 %5883 }
0x4605   :  { %v5886_v32 = vmul.f32 %v11079_v20, %v5884_v8 }
0x4607   :  { %5888 = vrot.lane.b32.xlu1 %v5886_v32, %s11832_s24 }
0x4679   :  { %v5889_v61 = vpop.permute.xlu1 %5888 }
0x467a   :  { %5891 = vst.msk [vmem:[#allocation3 + $0x28] sm:$0xff] %vm494_vm0, %v5889_v61  ;;  %9426 = vmatmul.mubr.msk.f32.vlgmr.msra.gmra.mrb[46].mxu0 %vm868_vm1, %v5889_v61 }
0x467b   :  { %5892 = vst.msk [vmem:[#allocation3 + $0x10] sm:$0xff] %vm5376_vm4, %v5889_v61  ;;  %10374 = vmatpush3.bf16.msra.mxu0 %v10371_v37 }
0x467c   :  { %10376 = vmatprep.subr.bf16.mxu0 %v10375_v39 }
0x467f   :  { %10378 = vmatpush3.bf16.msra.mxu0 %v10375_v39 }
0x4680   :  { %10387 = vmatprep.subr.bf16.mxu0 %v11830_v4 }
0x4681   :  { %v6104_v8 = vld [vmem:[#allocation3 + $0x28] sm:$0xff] }
0x4682   :  { %v6101_v53 = vld [vmem:[#allocation3 + $0x10] sm:$0xff] }
0x474d   :  { %v5961_v44 = vpop.f32.mrb[46].mxu0 }
0x474e   :  { %v5962_v29 = vadd.f32 %v5961_v44, %v13157_v45  ;;  %v9427_v21 = vpop.f32.mrb[47].mxu0  ;;  %v8690_v44 = vld [vmem:[#allocation33] ss:$0 sm:$0xff] }
0x4750   :  { %v5965_v11 = vadd.f32 %v13159_v3, %v5962_v29 }
0x4752   :  { %11082 = vtanh.f32 %v5965_v11  ;;  %v8687_v10 = vmul.f32 -1.442695, %v5965_v11 }
0x4754   :  { %11084 = vpow2.f32 %v8687_v10 }
0x475c   :  { %v11083_v5 = vpop.eup %11082 }
0x475d   :  { %5975 = vrot.lane.b32.xlu0 %v11083_v5, %s11829_s22 }
0x475e   :  { %v11085_v6 = vpop.eup %11084 }
0x475f   :  { %v5969_v57 = vadd.f32 1.0, %v11085_v6 }
0x4761   :  { %11086 = vrcp.f32 %v5969_v57 }
0x476b   :  { %v11087_v12 = vpop.eup %11086 }
0x476c   :  { %v5973_v46 = vmul.f32 %v11087_v12, %v5880_v63  ;;  %v6102_v63 = vld [vmem:[#allocation3 + $0x18] sm:$0xff] }
0x47cf   :  { %v5976_v14 = vpop.permute.xlu0 %5975 }
0x47d0   :  { %v5978_v15 = vmul.f32 %v11087_v12, %v5976_v14 }
0x47d2   :  { %5980 = vrot.lane.b32.xlu1 %v5978_v15, %s11832_s24 }
0x4844   :  { %v5981_v48 = vpop.permute.xlu1 %5980 }
0x4845   :  { %v5983_v45 = vadd.f32 %v5981_v48, %v5973_v46 }
0x4847   :  { %11088 = vtanh.f32 %v5983_v45 }
0x4851   :  { %v11089_v16 = vpop.eup %11088 }
0x4852   :  { %5986 = vrot.lane.b32.xlu0 %v11089_v16, %s11829_s22 }
0x48c4   :  { %v5987_v3 = vpop.permute.xlu0 %5986 }
0x48c5   :  { %v5989_v18 = vmul.f32 %v11087_v12, %v5987_v3 }
0x48c7   :  { %5991 = vrot.lane.b32.xlu1 %v5989_v18, %s11832_s24 }
0x4939   :  { %v5992_v19 = vpop.permute.xlu1 %5991 }
0x493a   :  { %5994 = vst.msk [vmem:[#allocation3 + $0x30] sm:$0xff] %vm494_vm0, %v5992_v19  ;;  %9437 = vmatmul.mubr.msk.f32.vlgmr.msra.gmra.mrb[102].mxu1 %vm868_vm1, %v5992_v19 }
0x493b   :  { %5995 = vst.msk [vmem:[#allocation3 + $0x8] sm:$0xff] %vm5376_vm4, %v5992_v19  ;;  %10382 = vmatpush3.bf16.msra.mxu1 %v10379_v25 }
0x493c   :  { %10384 = vmatprep.subr.bf16.mxu1 %v10383_v51 }
0x493f   :  { %10386 = vmatpush3.bf16.msra.mxu1 %v10383_v51 }
0x4940   :  { %10393 = vmatprep.subr.bf16.mxu1 %v11830_v4 }
0x4941   :  { %v6105_v32 = vld [vmem:[#allocation3 + $0x30] sm:$0xff] }
0x4942   :  { %v6100_v20 = vld [vmem:[#allocation3 + $0x8] sm:$0xff] }
0x4a0d   :  { %v6064_v59 = vpop.f32.mrb[102].mxu1 }
0x4a0e   :  { %v6065_v56 = vadd.f32 %v6064_v59, %v13155_v26  ;;  %v9438_v34 = vpop.f32.mrb[103].mxu1 }
0x4a10   :  { %v6068_v9 = vadd.f32 %v6065_v56, %v13161_v38 }
0x4a12   :  { %11090 = vtanh.f32 %v6068_v9  ;;  %v8689_v41 = vmul.f32 -1.442695, %v6068_v9 }
0x4a14   :  { %11092 = vpow2.f32 %v8689_v41 }
0x4a1c   :  { %v11091_v22 = vpop.eup %11090 }
0x4a1d   :  { %6078 = vrot.lane.b32.xlu0 %v11091_v22, %s11829_s22 }
0x4a1e   :  { %v11093_v23 = vpop.eup %11092 }
0x4a1f   :  { %v6072_v24 = vadd.f32 1.0, %v11093_v23 }
0x4a21   :  { %11094 = vrcp.f32 %v6072_v24 }
0x4a2b   :  { %v11095_v47 = vpop.eup %11094 }
0x4a2c   :  { %v6076_v26 = vmul.f32 %v11095_v47, %v5983_v45 }
0x4a8f   :  { %v6079_v27 = vpop.permute.xlu0 %6078 }
0x4a90   :  { %v6081_v7 = vmul.f32 %v11095_v47, %v6079_v27 }
0x4a92   :  { %6083 = vrot.lane.b32.xlu1 %v6081_v7, %s11832_s24 }
0x4b04   :  { %v6084_v38 = vpop.permute.xlu1 %6083 }
0x4b05   :  { %v6086_v31 = vadd.f32 %v6084_v38, %v6076_v26 }
0x4b07   :  { %11096 = vtanh.f32 %v6086_v31 }
0x4b11   :  { %v11097_v33 = vpop.eup %11096 }
0x4b12   :  { %6089 = vrot.lane.b32.xlu0 %v11097_v33, %s11829_s22 }
0x4b84   :  { %v6090_v52 = vpop.permute.xlu0 %6089 }
0x4b85   :  { %v6092_v54 = vmul.f32 %v11095_v47, %v6090_v52 }
0x4b87   :  { %6094 = vrot.lane.b32.xlu1 %v6092_v54, %s11832_s24 }
0x4bf9   :  { %v6095_v35 = vpop.permute.xlu1 %6094 }
0x4bfa   :  { %6097 = vst.msk [vmem:[#allocation3 + $0x38] sm:$0xff] %vm494_vm0, %v6095_v35 }
0x4bfb   :  { %6098 = vst.msk [vmem:[#allocation3] sm:$0xff] %vm5376_vm4, %v6095_v35 }
0x4c01   :  { %v6106_v61 = vld [vmem:[#allocation3 + $0x38] sm:$0xff] }
0x4c02   :  { %v6099_v50 = vld [vmem:[#allocation3] sm:$0xff] }
0x4c03   :  { %9447 = vmatprep.mubr.msk.f32.mxu0 %vm868_vm1, %v6099_v50  ;;  %9467 = vmatprep.mubr.msk.f32.mxu1 %vm868_vm1, %v6099_v50 }
0x4c04   :  { %9448 = vmatmul.mubr.msk.f32.vlgmr.msra.gmra.mrb[48].mxu0 %vm868_vm1, %v6100_v20  ;;  %9468 = vmatmul.mubr.msk.f32.vlgmr.msra.gmra.mrb[104].mxu1 %vm868_vm1, %v6100_v20 }
0x4c05   :  { %9450 = vmatprep.mubr.msk.f32.mxu0 %vm868_vm1, %v6101_v53  ;;  %9470 = vmatprep.mubr.msk.f32.mxu1 %vm868_vm1, %v6101_v53 }
0x4c06   :  { %10389 = vmatpush3.bf16.msra.mxu0 %v13272_v40  ;;  %10395 = vmatpush3.bf16.msra.mxu1 %v13272_v40 }
0x4c07   :  { %10390 = vmatprep.subr.bf16.mxu0 %v11830_v4  ;;  %10396 = vmatprep.subr.bf16.mxu1 %v11830_v4 }
0x4c08   :  { %9451 = vmatmul.mubr.msk.f32.gmra.mrb[50].mxu0 %vm868_vm1, %v6102_v63  ;;  %9471 = vmatmul.mubr.msk.f32.gmra.mrb[106].mxu1 %vm868_vm1, %v6102_v63 }
0x4c09   :  { %9453 = vmatprep.mubr.msk.f32.mxu0 %vm868_vm1, %v6103_v30  ;;  %9473 = vmatprep.mubr.msk.f32.mxu1 %vm868_vm1, %v6103_v30 }
0x4c0a   :  { %10392 = vmatpush3.bf16.msra.mxu0 %v13281_v1  ;;  %10398 = vmatpush3.bf16.msra.mxu1 %v13281_v1 }
0x4c0b   :  { %10399 = vmatprep.subr.bf16.mxu0 %v11830_v4  ;;  %10405 = vmatprep.subr.bf16.mxu1 %v11830_v4 }
0x4c0c   :  { %9454 = vmatmul.mubr.msk.f32.gmra.mrb[52].mxu0 %vm868_vm1, %v6104_v8  ;;  %9474 = vmatmul.mubr.msk.f32.gmra.mrb[108].mxu1 %vm868_vm1, %v6104_v8 }
0x4c0d   :  { %9456 = vmatprep.mubr.msk.f32.mxu0 %vm868_vm1, %v6105_v32  ;;  %9476 = vmatprep.mubr.msk.f32.mxu1 %vm868_vm1, %v6105_v32 }
0x4c10   :  { %9457 = vmatmul.mubr.msk.f32.gmra.mrb[54].mxu0 %vm868_vm1, %v6106_v61  ;;  %9477 = vmatmul.mubr.msk.f32.gmra.mrb[110].mxu1 %vm868_vm1, %v6106_v61 }
0x4c11   :  { %9487 = vmatprep.mubr.msk.f32.mxu0 %vm11831_vm9, %v11828_v0  ;;  %9498 = vmatprep.mubr.msk.f32.mxu1 %vm11831_vm9, %v11828_v0 }
0x4c14   :  { %9488 = vmatmul.mubr.f32.vlgmr.msra.gmra.mrb[56].mxu0 %v11828_v0 }
0x4c15   :  { %10401 = vmatpush3.bf16.msra.mxu0 %v13272_v40  ;;  %9509 = vmatprep.mubr.msk.f32.mxu0 %vm11831_vm9, %v11828_v0 }
0x4c16   :  { %10402 = vmatprep.subr.bf16.mxu0 %v11830_v4 }
0x4c19   :  { %10404 = vmatpush3.bf16.msra.mxu0 %v13281_v1 }
0x4c1a   :  { %10411 = vmatprep.subr.bf16.mxu0 %v11830_v4 }
0x4cd7   :  { %v9449_v29 = vpop.f32.mrb[48].mxu0  ;;  %v13311_v21 = vpop.f32.mrb[104].mxu1 }
0x4cd8   :  { %v6214_v11 = vadd.f32 %v9449_v29, %v8690_v44  ;;  %v6208_v5 = vpop.f32.mrb[49].mxu0  ;;  %v13313_v10 = vpop.f32.mrb[105].mxu1 }
0x4cd9   :  { %v6209_v23 = vadd.f32 %v8690_v44, %v6208_v5 }
0x4cdb   :  { %v9452_v6 = vpop.f32.mrb[50].mxu0  ;;  %v13315_v57 = vpop.f32.mrb[106].mxu1 }
0x4cdc   :  { %v13317_v12 = vadd.f32 %v9452_v6, %v8690_v44  ;;  %v6218_v14 = vpop.f32.mrb[51].mxu0  ;;  %v13319_v15 = vpop.f32.mrb[107].mxu1 }
0x4cdd   :  { %v13321_v46 = vadd.f32 %v8690_v44, %v6218_v14 }
0x4cdf   :  { %v9455_v48 = vpop.f32.mrb[52].mxu0  ;;  %v13323_v45 = vpop.f32.mrb[108].mxu1 }
0x4ce0   :  { %v13325_v16 = vadd.f32 %v9455_v48, %v8690_v44  ;;  %v6228_v3 = vpop.f32.mrb[53].mxu0  ;;  %v13327_v18 = vpop.f32.mrb[109].mxu1 }
0x4ce1   :  { %v13329_v19 = vadd.f32 %v8690_v44, %v6228_v3 }
0x4ce3   :  { %v9458_v59 = vpop.f32.mrb[54].mxu0  ;;  %v9478_v56 = vpop.f32.mrb[110].mxu1 }
0x4ce4   :  { %v13331_v34 = vadd.f32 %v9458_v59, %v8690_v44  ;;  %v6238_v9 = vpop.f32.mrb[55].mxu0  ;;  %v6347_v22 = vpop.f32.mrb[111].mxu1 }
0x4ce5   :  { %v13333_v41 = vadd.f32 %v8690_v44, %v6238_v9 }
0x4ce7   :  { %v6426_v24 = vpop.f32.mrb[56].mxu0 }
0x4ce8   :  { %v6427_v47 = vadd.f32 %v6426_v24, %v6209_v23  ;;  %v9489_v27 = vpop.f32.mrb[57].mxu0 }
0x4cea   :  { %v6430_v7 = vadd.f32 %v9478_v56, %v6427_v47 }
0x4cec   :  { %11098 = vtanh.f32 %v6430_v7  ;;  %v8707_v38 = vmul.f32 -1.442695, %v6430_v7 }
0x4cee   :  { %11100 = vpow2.f32 %v8707_v38 }
0x4cf6   :  { %v11099_v26 = vpop.eup %11098 }
0x4cf7   :  { %6440 = vrot.lane.b32.xlu0 %v11099_v26, %s11829_s22 }
0x4cf8   :  { %v11101_v31 = vpop.eup %11100 }
0x4cf9   :  { %v6434_v33 = vadd.f32 1.0, %v11101_v31 }
0x4cfb   :  { %11102 = vrcp.f32 %v6434_v33 }
0x4d05   :  { %v11103_v36 = vpop.eup %11102 }
0x4d06   :  { %v6438_v37 = vmul.f32 0.0, %v11103_v36 }
0x4d69   :  { %v6441_v17 = vpop.permute.xlu0 %6440 }
0x4d6a   :  { %v6443_v28 = vmul.f32 %v11103_v36, %v6441_v17 }
0x4d6c   :  { %6445 = vrot.lane.b32.xlu1 %v6443_v28, %s11832_s24 }
0x4dde   :  { %v6446_v42 = vpop.permute.xlu1 %6445 }
0x4ddf   :  { %v6448_v60 = vadd.f32 %v6446_v42, %v6438_v37 }
0x4de1   :  { %11104 = vtanh.f32 %v6448_v60 }
0x4deb   :  { %v11105_v2 = vpop.eup %11104 }
0x4dec   :  { %6451 = vrot.lane.b32.xlu0 %v11105_v2, %s11829_s22 }
0x4e5e   :  { %v6452_v25 = vpop.permute.xlu0 %6451 }
0x4e5f   :  { %v6454_v39 = vmul.f32 %v11103_v36, %v6452_v25 }
0x4e61   :  { %6456 = vrot.lane.b32.xlu1 %v6454_v39, %s11832_s24 }
0x4ed3   :  { %v6457_v43 = vpop.permute.xlu1 %6456 }
0x4ed4   :  { %6459 = vst.msk [vmem:[#allocation2] sm:$0xff] %vm494_vm0, %v6457_v43  ;;  %9499 = vmatmul.mubr.msk.f32.vlgmr.msra.gmra.mrb[112].mxu1 %vm868_vm1, %v6457_v43 }
0x4ed5   :  { %6460 = vst.msk [vmem:[#allocation2 + $0x38] sm:$0xff] %vm5376_vm4, %v6457_v43  ;;  %10407 = vmatpush3.bf16.msra.mxu1 %v13272_v40  ;;  %9520 = vmatprep.mubr.msk.f32.mxu1 %vm11831_vm9, %v11828_v0 }
0x4ed6   :  { %10408 = vmatprep.subr.bf16.mxu1 %v11830_v4 }
0x4ed9   :  { %10410 = vmatpush3.bf16.msra.mxu1 %v13281_v1 }
0x4eda   :  { %10417 = vmatprep.subr.bf16.mxu1 %v11830_v4 }
0x4fa7   :  { %v6529_v49 = vpop.f32.mrb[112].mxu1 }
0x4fa8   :  { %v6530_v51 = vadd.f32 %v6529_v49, %v6214_v11  ;;  %v9500_v52 = vpop.f32.mrb[113].mxu1 }
0x4faa   :  { %v6533_v54 = vadd.f32 %v6530_v51, %v6347_v22 }
0x4fac   :  { %11106 = vtanh.f32 %v6533_v54  ;;  %v8709_v55 = vmul.f32 -1.442695, %v6533_v54 }
0x4fae   :  { %11108 = vpow2.f32 %v8709_v55 }
0x4fb6   :  { %v11107_v35 = vpop.eup %11106 }
0x4fb7   :  { %6543 = vrot.lane.b32.xlu0 %v11107_v35, %s11829_s22 }
0x4fb8   :  { %v11109_v13 = vpop.eup %11108 }
0x4fb9   :  { %v6537_v50 = vadd.f32 1.0, %v11109_v13 }
0x4fbb   :  { %11110 = vrcp.f32 %v6537_v50 }
0x4fc5   :  { %v11111_v20 = vpop.eup %11110 }
0x4fc6   :  { %v6541_v53 = vmul.f32 %v11111_v20, %v6448_v60 }
0x5029   :  { %v6544_v58 = vpop.permute.xlu0 %6543 }
0x502a   :  { %v6546_v62 = vmul.f32 %v11111_v20, %v6544_v58 }
0x502c   :  { %6548 = vrot.lane.b32.xlu1 %v6546_v62, %s11832_s24 }
0x509e   :  { %v6549_v63 = vpop.permute.xlu1 %6548 }
0x509f   :  { %v6551_v30 = vadd.f32 %v6549_v63, %v6541_v53 }
0x50a1   :  { %11112 = vtanh.f32 %v6551_v30 }
0x50ab   :  { %v11113_v8 = vpop.eup %11112 }
0x50ac   :  { %6554 = vrot.lane.b32.xlu0 %v11113_v8, %s11829_s22 }
0x511e   :  { %v6555_v32 = vpop.permute.xlu0 %6554 }
0x511f   :  { %v6557_v61 = vmul.f32 %v11111_v20, %v6555_v32 }
0x5121   :  { %6559 = vrot.lane.b32.xlu1 %v6557_v61, %s11832_s24 }
0x5193   :  { %v6560_v44 = vpop.permute.xlu1 %6559 }
0x5194   :  { %6562 = vst.msk [vmem:[#allocation2 + $0x8] sm:$0xff] %vm494_vm0, %v6560_v44  ;;  %9510 = vmatmul.mubr.msk.f32.vlgmr.msra.gmra.mrb[58].mxu0 %vm868_vm1, %v6560_v44 }
0x5195   :  { %6563 = vst.msk [vmem:[#allocation2 + $0x30] sm:$0xff] %vm5376_vm4, %v6560_v44  ;;  %10413 = vmatpush3.bf16.msra.mxu0 %v13272_v40  ;;  %9531 = vmatprep.mubr.msk.f32.mxu0 %vm11831_vm9, %v11828_v0 }
0x5196   :  { %10414 = vmatprep.subr.bf16.mxu0 %v11830_v4 }
0x5199   :  { %10416 = vmatpush3.bf16.msra.mxu0 %v13281_v1 }
0x519a   :  { %10423 = vmatprep.subr.bf16.mxu0 %v11830_v4 }
0x5267   :  { %v6632_v29 = vpop.f32.mrb[58].mxu0 }
0x5268   :  { %v6633_v11 = vadd.f32 %v6632_v29, %v13321_v46  ;;  %v9511_v5 = vpop.f32.mrb[59].mxu0 }
0x526a   :  { %v6636_v6 = vadd.f32 %v13323_v45, %v6633_v11 }
0x526c   :  { %11114 = vtanh.f32 %v6636_v6  ;;  %v8711_v48 = vmul.f32 -1.442695, %v6636_v6 }
0x526e   :  { %11116 = vpow2.f32 %v8711_v48 }
0x5276   :  { %v11115_v14 = vpop.eup %11114 }
0x5277   :  { %6646 = vrot.lane.b32.xlu0 %v11115_v14, %s11829_s22 }
0x5278   :  { %v11117_v3 = vpop.eup %11116 }
0x5279   :  { %v6640_v59 = vadd.f32 1.0, %v11117_v3 }
0x527b   :  { %11118 = vrcp.f32 %v6640_v59 }
0x5285   :  { %v11119_v56 = vpop.eup %11118 }
0x5286   :  { %v6644_v23 = vmul.f32 %v11119_v56, %v6551_v30 }
0x52e9   :  { %v6647_v9 = vpop.permute.xlu0 %6646 }
0x52ea   :  { %v6649_v22 = vmul.f32 %v11119_v56, %v6647_v9 }
0x52ec   :  { %6651 = vrot.lane.b32.xlu1 %v6649_v22, %s11832_s24 }
0x535e   :  { %v6652_v24 = vpop.permute.xlu1 %6651 }
0x535f   :  { %v6654_v46 = vadd.f32 %v6652_v24, %v6644_v23 }
0x5361   :  { %11120 = vtanh.f32 %v6654_v46 }
0x536b   :  { %v11121_v47 = vpop.eup %11120 }
0x536c   :  { %6657 = vrot.lane.b32.xlu0 %v11121_v47, %s11829_s22 }
0x53de   :  { %v6658_v45 = vpop.permute.xlu0 %6657 }
0x53df   :  { %v6660_v27 = vmul.f32 %v11119_v56, %v6658_v45 }
0x53e1   :  { %6662 = vrot.lane.b32.xlu1 %v6660_v27, %s11832_s24 }
0x5453   :  { %v6663_v7 = vpop.permute.xlu1 %6662 }
0x5454   :  { %6665 = vst.msk [vmem:[#allocation2 + $0x10] sm:$0xff] %vm494_vm0, %v6663_v7  ;;  %9521 = vmatmul.mubr.msk.f32.vlgmr.msra.gmra.mrb[114].mxu1 %vm868_vm1, %v6663_v7 }
0x5455   :  { %6666 = vst.msk [vmem:[#allocation2 + $0x28] sm:$0xff] %vm5376_vm4, %v6663_v7  ;;  %10419 = vmatpush3.bf16.msra.mxu1 %v13272_v40  ;;  %9542 = vmatprep.mubr.msk.f32.mxu1 %vm11831_vm9, %v11828_v0 }
0x5456   :  { %10420 = vmatprep.subr.bf16.mxu1 %v11830_v4 }
0x5459   :  { %10422 = vmatpush3.bf16.msra.mxu1 %v13281_v1 }
0x545a   :  { %10429 = vmatprep.subr.bf16.mxu1 %v11830_v4 }
0x5527   :  { %v6735_v26 = vpop.f32.mrb[114].mxu1 }
0x5528   :  { %v6736_v38 = vadd.f32 %v6735_v26, %v13317_v12  ;;  %v9522_v31 = vpop.f32.mrb[115].mxu1 }
0x552a   :  { %v6739_v33 = vadd.f32 %v6736_v38, %v13327_v18 }
0x552c   :  { %11122 = vtanh.f32 %v6739_v33  ;;  %v8713_v17 = vmul.f32 -1.442695, %v6739_v33 }
0x552e   :  { %11124 = vpow2.f32 %v8713_v17 }
0x5536   :  { %v11123_v36 = vpop.eup %11122 }
0x5537   :  { %6749 = vrot.lane.b32.xlu0 %v11123_v36, %s11829_s22 }
0x5538   :  { %v11125_v28 = vpop.eup %11124 }
0x5539   :  { %v6743_v37 = vadd.f32 1.0, %v11125_v28 }
0x553b   :  { %11126 = vrcp.f32 %v6743_v37 }
0x5545   :  { %v11127_v42 = vpop.eup %11126 }
0x5546   :  { %v6747_v25 = vmul.f32 %v11127_v42, %v6654_v46 }
0x55a9   :  { %v6750_v60 = vpop.permute.xlu0 %6749 }
0x55aa   :  { %v6752_v2 = vmul.f32 %v11127_v42, %v6750_v60 }
0x55ac   :  { %6754 = vrot.lane.b32.xlu1 %v6752_v2, %s11832_s24 }
0x561e   :  { %v6755_v39 = vpop.permute.xlu1 %6754 }
0x561f   :  { %v6757_v12 = vadd.f32 %v6755_v39, %v6747_v25 }
0x5621   :  { %11128 = vtanh.f32 %v6757_v12 }
0x562b   :  { %v11129_v43 = vpop.eup %11128 }
0x562c   :  { %6760 = vrot.lane.b32.xlu0 %v11129_v43, %s11829_s22 }
0x569e   :  { %v6761_v18 = vpop.permute.xlu0 %6760 }
0x569f   :  { %v6763_v49 = vmul.f32 %v11127_v42, %v6761_v18 }
0x56a1   :  { %6765 = vrot.lane.b32.xlu1 %v6763_v49, %s11832_s24 }
0x5713   :  { %v6766_v51 = vpop.permute.xlu1 %6765 }
0x5714   :  { %6768 = vst.msk [vmem:[#allocation2 + $0x18] sm:$0xff] %vm494_vm0, %v6766_v51  ;;  %9532 = vmatmul.mubr.msk.f32.vlgmr.msra.gmra.mrb[60].mxu0 %vm868_vm1, %v6766_v51 }
0x5715   :  { %6769 = vst.msk [vmem:[#allocation2 + $0x20] sm:$0xff] %vm5376_vm4, %v6766_v51  ;;  %10425 = vmatpush3.bf16.msra.mxu0 %v13272_v40  ;;  %9553 = vmatprep.mubr.msk.f32.mxu0 %vm11831_vm9, %v11828_v0 }
0x5716   :  { %10426 = vmatprep.subr.bf16.mxu0 %v11830_v4 }
0x5719   :  { %10428 = vmatpush3.bf16.msra.mxu0 %v13281_v1 }
0x57e7   :  { %v6838_v52 = vpop.f32.mrb[60].mxu0 }
0x57e8   :  { %v6839_v54 = vadd.f32 %v6838_v52, %v13329_v19  ;;  %v9533_v35 = vpop.f32.mrb[61].mxu0 }
0x57ea   :  { %v6842_v55 = vadd.f32 %v13315_v57, %v6839_v54 }
0x57ec   :  { %11130 = vtanh.f32 %v6842_v55  ;;  %v8715_v50 = vmul.f32 -1.442695, %v6842_v55 }
0x57ee   :  { %11132 = vpow2.f32 %v8715_v50 }
0x57f6   :  { %v11131_v13 = vpop.eup %11130 }
0x57f7   :  { %6852 = vrot.lane.b32.xlu0 %v11131_v13, %s11829_s22 }
0x57f8   :  { %v11133_v20 = vpop.eup %11132 }
0x57f9   :  { %v6846_v58 = vadd.f32 1.0, %v11133_v20 }
0x57fb   :  { %11134 = vrcp.f32 %v6846_v58 }
0x5805   :  { %v11135_v62 = vpop.eup %11134 }
0x5806   :  { %v6850_v30 = vmul.f32 %v11135_v62, %v6757_v12 }
0x5869   :  { %v6853_v53 = vpop.permute.xlu0 %6852 }
0x586a   :  { %v6855_v63 = vmul.f32 %v11135_v62, %v6853_v53  ;;  %v7330_v53 = vld [vmem:[#allocation36] sm:$0xff] }
0x586c   :  { %6857 = vrot.lane.b32.xlu1 %v6855_v63, %s11832_s24 }
0x58de   :  { %v6858_v8 = vpop.permute.xlu1 %6857 }
0x58df   :  { %v6860_v19 = vadd.f32 %v6858_v8, %v6850_v30  ;;  %v7331_v30 = vld [vmem:[#allocation36 + $0x8] sm:$0xff]  ;;  %v7192_v8 = vld [vmem:[#allocation35 + $0x10] sm:$0xff] }
0x58e1   :  { %11136 = vtanh.f32 %v6860_v19 }
0x58eb   :  { %v11137_v32 = vpop.eup %11136 }
0x58ec   :  { %6863 = vrot.lane.b32.xlu0 %v11137_v32, %s11829_s22  ;;  %v10443_v32 = vpack.c.bf16 %v7331_v30, %v7330_v53 }
0x595e   :  { %v6864_v57 = vpop.permute.xlu0 %6863 }
0x595f   :  { %v6866_v61 = vmul.f32 %v11135_v62, %v6864_v57  ;;  %v7191_v62 = vld [vmem:[#allocation35 + $0x8] sm:$0xff] }
0x5961   :  { %6868 = vrot.lane.b32.xlu1 %v6866_v61, %s11832_s24  ;;  %v7332_v61 = vld [vmem:[#allocation36 + $0x10] sm:$0xff] }
0x59d3   :  { %v6869_v44 = vpop.permute.xlu1 %6868 }
0x59d4   :  { %6871 = vst.msk [vmem:[#allocation2 + $0x20] sm:$0xff] %vm494_vm0, %v6869_v44  ;;  %9543 = vmatmul.mubr.msk.f32.vlgmr.msra.gmra.mrb[116].mxu1 %vm868_vm1, %v6869_v44 }
0x59d5   :  { %6872 = vst.msk [vmem:[#allocation2 + $0x18] sm:$0xff] %vm5376_vm4, %v6869_v44  ;;  %10431 = vmatpush3.bf16.msra.mxu1 %v13272_v40  ;;  %9564 = vmatprep.mubr.msk.f32.mxu1 %vm11831_vm9, %v11828_v0  ;;  %v7333_v44 = vld [vmem:[#allocation36 + $0x18] sm:$0xff] }
0x59d6   :  { %10432 = vmatprep.subr.bf16.mxu1 %v11830_v4 }
0x59d9   :  { %10434 = vmatpush3.bf16.msra.mxu1 %v13281_v1 }
0x59da   :  { %10444 = vmatprep.subr.bf16.mxu1 %v10443_v32 }
0x5aa7   :  { %v6941_v29 = vpop.f32.mrb[116].mxu1 }
0x5aa8   :  { %v6942_v11 = vadd.f32 %v6941_v29, %v13325_v16  ;;  %v9544_v5 = vpop.f32.mrb[117].mxu1  ;;  %v10447_v29 = vpack.c.bf16 %v7333_v44, %v7332_v61 }
0x5aaa   :  { %v6945_v6 = vadd.f32 %v6942_v11, %v13319_v15 }
0x5aac   :  { %11138 = vtanh.f32 %v6945_v6  ;;  %v8717_v48 = vmul.f32 -1.442695, %v6945_v6 }
0x5aae   :  { %11140 = vpow2.f32 %v8717_v48  ;;  %v7440_v48 = vld [vmem:[#allocation38 + $0x8] sm:$0xff] }
0x5ab6   :  { %v11139_v14 = vpop.eup %11138 }
0x5ab7   :  { %6955 = vrot.lane.b32.xlu0 %v11139_v14, %s11829_s22  ;;  %v7439_v14 = vld [vmem:[#allocation38] sm:$0xff] }
0x5ab8   :  { %v11141_v40 = vpop.eup %11140 }
0x5ab9   :  { %v6949_v3 = vadd.f32 1.0, %v11141_v40 }
0x5abb   :  { %11142 = vrcp.f32 %v6949_v3  ;;  %v13432_v3 = vpack.c.bf16 %v7440_v48, %v7439_v14 }
0x5ac5   :  { %v11143_v59 = vpop.eup %11142 }
0x5ac6   :  { %v6953_v1 = vmul.f32 %v11143_v59, %v6860_v19  ;;  %v7193_v19 = vld [vmem:[#allocation35 + $0x18] sm:$0xff] }
0x5ac7   :  { %v10439_v57 = vpack.c.bf16 %v7193_v19, %v7192_v8 }
0x5b29   :  { %v6956_v56 = vpop.permute.xlu0 %6955 }
0x5b2a   :  { %v6958_v9 = vmul.f32 %v11143_v59, %v6956_v56  ;;  %v7441_v56 = vld [vmem:[#allocation38 + $0x10] sm:$0xff] }
0x5b2c   :  { %6960 = vrot.lane.b32.xlu1 %v6958_v9, %s11832_s24  ;;  %v7442_v9 = vld [vmem:[#allocation38 + $0x18] sm:$0xff] }
0x5b9e   :  { %v6961_v22 = vpop.permute.xlu1 %6960 }
0x5b9f   :  { %v6963_v16 = vadd.f32 %v6961_v22, %v6953_v1  ;;  %v13441_v22 = vpack.c.bf16 %v7442_v9, %v7441_v56 }
0x5ba1   :  { %11144 = vtanh.f32 %v6963_v16 }
0x5bab   :  { %v11145_v23 = vpop.eup %11144 }
0x5bac   :  { %6966 = vrot.lane.b32.xlu0 %v11145_v23, %s11829_s22  ;;  %v7186_v23 = vld [vmem:[#allocation2 + $0x20] sm:$0xff] }
0x5c1e   :  { %v6967_v15 = vpop.permute.xlu0 %6966 }
0x5c1f   :  { %v6969_v24 = vmul.f32 %v11143_v59, %v6967_v15 }
0x5c21   :  { %6971 = vrot.lane.b32.xlu1 %v6969_v24, %s11832_s24 }
0x5c93   :  { %v6972_v46 = vpop.permute.xlu1 %6971 }
0x5c94   :  { %6974 = vst.msk [vmem:[#allocation2 + $0x28] sm:$0xff] %vm494_vm0, %v6972_v46  ;;  %9554 = vmatmul.mubr.msk.f32.vlgmr.msra.gmra.mrb[62].mxu0 %vm868_vm1, %v6972_v46 }
0x5c95   :  { %6975 = vst.msk [vmem:[#allocation2 + $0x10] sm:$0xff] %vm5376_vm4, %v6972_v46 }
0x5c9b   :  { %v7187_v15 = vld [vmem:[#allocation2 + $0x28] sm:$0xff] }
0x5c9c   :  { %v7184_v1 = vld [vmem:[#allocation2 + $0x10] sm:$0xff] }
0x5d67   :  { %v7044_v47 = vpop.f32.mrb[62].mxu0 }
0x5d68   :  { %v7045_v45 = vadd.f32 %v7044_v47, %v13333_v41  ;;  %v9555_v27 = vpop.f32.mrb[63].mxu0  ;;  %v8722_v47 = vld [vmem:[%s13699_s0] ss:$0 sm:$0xff] }
0x5d6a   :  { %v7048_v7 = vadd.f32 %v13311_v21, %v7045_v45 }
0x5d6c   :  { %11146 = vtanh.f32 %v7048_v7  ;;  %v8719_v38 = vmul.f32 -1.442695, %v7048_v7 }
0x5d6e   :  { %11148 = vpow2.f32 %v8719_v38 }
0x5d76   :  { %v11147_v26 = vpop.eup %11146 }
0x5d77   :  { %7058 = vrot.lane.b32.xlu0 %v11147_v26, %s11829_s22 }
0x5d78   :  { %v11149_v31 = vpop.eup %11148 }
0x5d79   :  { %v7052_v33 = vadd.f32 1.0, %v11149_v31 }
0x5d7b   :  { %11150 = vrcp.f32 %v7052_v33 }
0x5d85   :  { %v11151_v36 = vpop.eup %11150 }
0x5d86   :  { %v7056_v37 = vmul.f32 %v11151_v36, %v6963_v16  ;;  %v7185_v16 = vld [vmem:[#allocation2 + $0x18] sm:$0xff] }
0x5de9   :  { %v7059_v17 = vpop.permute.xlu0 %7058 }
0x5dea   :  { %v7061_v28 = vmul.f32 %v11151_v36, %v7059_v17 }
0x5dec   :  { %7063 = vrot.lane.b32.xlu1 %v7061_v28, %s11832_s24 }
0x5e5e   :  { %v7064_v42 = vpop.permute.xlu1 %7063 }
0x5e5f   :  { %v7066_v41 = vadd.f32 %v7064_v42, %v7056_v37 }
0x5e61   :  { %11152 = vtanh.f32 %v7066_v41 }
0x5e6b   :  { %v11153_v60 = vpop.eup %11152 }
0x5e6c   :  { %7069 = vrot.lane.b32.xlu0 %v11153_v60, %s11829_s22 }
0x5ede   :  { %v7070_v21 = vpop.permute.xlu0 %7069 }
0x5edf   :  { %v7072_v2 = vmul.f32 %v11151_v36, %v7070_v21 }
0x5ee1   :  { %7074 = vrot.lane.b32.xlu1 %v7072_v2, %s11832_s24 }
0x5f53   :  { %v7075_v25 = vpop.permute.xlu1 %7074 }
0x5f54   :  { %7077 = vst.msk [vmem:[#allocation2 + $0x30] sm:$0xff] %vm494_vm0, %v7075_v25  ;;  %9565 = vmatmul.mubr.msk.f32.vlgmr.msra.gmra.mrb[118].mxu1 %vm868_vm1, %v7075_v25 }
0x5f55   :  { %7078 = vst.msk [vmem:[#allocation2 + $0x8] sm:$0xff] %vm5376_vm4, %v7075_v25  ;;  %10446 = vmatpush3.bf16.msra.mxu1 %v10443_v32 }
0x5f56   :  { %10448 = vmatprep.subr.bf16.mxu1 %v10447_v29 }
0x5f59   :  { %10450 = vmatpush3.bf16.msra.mxu1 %v10447_v29 }
0x5f5a   :  { %10457 = vmatprep.subr.bf16.mxu1 %v11830_v4 }
0x5f5b   :  { %v7188_v24 = vld [vmem:[#allocation2 + $0x30] sm:$0xff] }
0x5f5c   :  { %v7183_v59 = vld [vmem:[#allocation2 + $0x8] sm:$0xff] }
0x6027   :  { %v7147_v39 = vpop.f32.mrb[118].mxu1 }
0x6028   :  { %v7148_v12 = vadd.f32 %v7147_v39, %v13331_v34  ;;  %v9566_v43 = vpop.f32.mrb[119].mxu1 }
0x602a   :  { %v7151_v18 = vadd.f32 %v7148_v12, %v13313_v10  ;;  %v7190_v10 = vld [vmem:[#allocation35] sm:$0xff] }
0x602b   :  { %v10435_v63 = vpack.c.bf16 %v7191_v62, %v7190_v10 }
0x602c   :  { %11154 = vtanh.f32 %v7151_v18  ;;  %v8721_v51 = vmul.f32 -1.442695, %v7151_v18 }
0x602d   :  { %10436 = vmatprep.subr.bf16.mxu0 %v10435_v63 }
0x602e   :  { %11156 = vpow2.f32 %v8721_v51  ;;  %10438 = vmatpush3.bf16.msra.mxu0 %v10435_v63 }
0x602f   :  { %10440 = vmatprep.subr.bf16.mxu0 %v10439_v57 }
0x6032   :  { %10442 = vmatpush3.bf16.msra.mxu0 %v10439_v57 }
0x6033   :  { %10451 = vmatprep.subr.bf16.mxu0 %v11830_v4 }
0x6036   :  { %v11155_v49 = vpop.eup %11154 }
0x6037   :  { %7161 = vrot.lane.b32.xlu0 %v11155_v49, %s11829_s22 }
0x6038   :  { %v11157_v52 = vpop.eup %11156 }
0x6039   :  { %v7155_v54 = vadd.f32 1.0, %v11157_v52 }
0x603b   :  { %11158 = vrcp.f32 %v7155_v54 }
0x6045   :  { %v11159_v35 = vpop.eup %11158 }
0x6046   :  { %v7159_v50 = vmul.f32 %v11159_v35, %v7066_v41 }
0x60a9   :  { %v7162_v55 = vpop.permute.xlu0 %7161 }
0x60aa   :  { %v7164_v13 = vmul.f32 %v11159_v35, %v7162_v55 }
0x60ac   :  { %7166 = vrot.lane.b32.xlu1 %v7164_v13, %s11832_s24 }
0x611e   :  { %v7167_v20 = vpop.permute.xlu1 %7166 }
0x611f   :  { %v7169_v34 = vadd.f32 %v7167_v20, %v7159_v50 }
0x6121   :  { %11160 = vtanh.f32 %v7169_v34 }
0x612b   :  { %v11161_v58 = vpop.eup %11160 }
0x612c   :  { %7172 = vrot.lane.b32.xlu0 %v11161_v58, %s11829_s22 }
0x619e   :  { %v7173_v11 = vpop.permute.xlu0 %7172 }
0x619f   :  { %v7175_v5 = vmul.f32 %v11159_v35, %v7173_v11 }
0x61a1   :  { %7177 = vrot.lane.b32.xlu1 %v7175_v5, %s11832_s24 }
0x6213   :  { %v7178_v6 = vpop.permute.xlu1 %7177 }
0x6214   :  { %7180 = vst.msk [vmem:[#allocation2 + $0x38] sm:$0xff] %vm494_vm0, %v7178_v6 }
0x6215   :  { %7181 = vst.msk [vmem:[#allocation2] sm:$0xff] %vm5376_vm4, %v7178_v6 }
0x621b   :  { %v7189_v46 = vld [vmem:[#allocation2 + $0x38] sm:$0xff] }
0x621c   :  { %v7182_v40 = vld [vmem:[#allocation2] sm:$0xff] }
0x621d   :  { %9575 = vmatprep.mubr.msk.f32.mxu0 %vm868_vm1, %v7182_v40  ;;  %9595 = vmatprep.mubr.msk.f32.mxu1 %vm868_vm1, %v7182_v40 }
0x621e   :  { %9576 = vmatmul.mubr.msk.f32.vlgmr.msra.gmra.mrb[64].mxu0 %vm868_vm1, %v7183_v59  ;;  %9596 = vmatmul.mubr.msk.f32.vlgmr.msra.gmra.mrb[120].mxu1 %vm868_vm1, %v7183_v59 }
0x621f   :  { %9578 = vmatprep.mubr.msk.f32.mxu0 %vm868_vm1, %v7184_v1  ;;  %9598 = vmatprep.mubr.msk.f32.mxu1 %vm868_vm1, %v7184_v1 }
0x6220   :  { %10453 = vmatpush3.bf16.msra.mxu0 %v13432_v3  ;;  %10459 = vmatpush3.bf16.msra.mxu1 %v13432_v3 }
0x6221   :  { %10454 = vmatprep.subr.bf16.mxu0 %v11830_v4  ;;  %10460 = vmatprep.subr.bf16.mxu1 %v11830_v4 }
0x6222   :  { %9579 = vmatmul.mubr.msk.f32.gmra.mrb[66].mxu0 %vm868_vm1, %v7185_v16  ;;  %9599 = vmatmul.mubr.msk.f32.gmra.mrb[122].mxu1 %vm868_vm1, %v7185_v16 }
0x6223   :  { %9581 = vmatprep.mubr.msk.f32.mxu0 %vm868_vm1, %v7186_v23  ;;  %9601 = vmatprep.mubr.msk.f32.mxu1 %vm868_vm1, %v7186_v23 }
0x6224   :  { %10456 = vmatpush3.bf16.msra.mxu0 %v13441_v22  ;;  %10462 = vmatpush3.bf16.msra.mxu1 %v13441_v22 }
0x6225   :  { %10463 = vmatprep.subr.bf16.mxu0 %v11830_v4  ;;  %10469 = vmatprep.subr.bf16.mxu1 %v11830_v4 }
0x6226   :  { %9582 = vmatmul.mubr.msk.f32.gmra.mrb[68].mxu0 %vm868_vm1, %v7187_v15  ;;  %9602 = vmatmul.mubr.msk.f32.gmra.mrb[124].mxu1 %vm868_vm1, %v7187_v15 }
0x6227   :  { %9584 = vmatprep.mubr.msk.f32.mxu0 %vm868_vm1, %v7188_v24  ;;  %9604 = vmatprep.mubr.msk.f32.mxu1 %vm868_vm1, %v7188_v24 }
0x622a   :  { %9585 = vmatmul.mubr.msk.f32.gmra.mrb[70].mxu0 %vm868_vm1, %v7189_v46  ;;  %9605 = vmatmul.mubr.msk.f32.gmra.mrb[126].mxu1 %vm868_vm1, %v7189_v46 }
0x622b   :  { %9615 = vmatprep.mubr.msk.f32.mxu0 %vm11831_vm9, %v11828_v0  ;;  %9626 = vmatprep.mubr.msk.f32.mxu1 %vm11831_vm9, %v11828_v0 }
0x622e   :  { %9616 = vmatmul.mubr.f32.vlgmr.msra.gmra.mrb[72].mxu0 %v11828_v0 }
0x622f   :  { %10465 = vmatpush3.bf16.msra.mxu0 %v13432_v3  ;;  %9637 = vmatprep.mubr.msk.f32.mxu0 %vm11831_vm9, %v11828_v0 }
0x6230   :  { %10466 = vmatprep.subr.bf16.mxu0 %v11830_v4 }
0x6233   :  { %10468 = vmatpush3.bf16.msra.mxu0 %v13441_v22 }
0x6234   :  { %10475 = vmatprep.subr.bf16.mxu0 %v11830_v4 }
0x62f1   :  { %v9577_v45 = vpop.f32.mrb[64].mxu0  ;;  %v13472_v27 = vpop.f32.mrb[120].mxu1 }
0x62f2   :  { %v7297_v7 = vadd.f32 %v9577_v45, %v8722_v47  ;;  %v7291_v26 = vpop.f32.mrb[65].mxu0  ;;  %v13474_v38 = vpop.f32.mrb[121].mxu1 }
0x62f3   :  { %v7292_v52 = vadd.f32 %v8722_v47, %v7291_v26 }
0x62f5   :  { %v9580_v31 = vpop.f32.mrb[66].mxu0  ;;  %v13476_v33 = vpop.f32.mrb[122].mxu1 }
0x62f6   :  { %v13478_v36 = vadd.f32 %v9580_v31, %v8722_v47  ;;  %v7301_v17 = vpop.f32.mrb[67].mxu0  ;;  %v13480_v28 = vpop.f32.mrb[123].mxu1 }
0x62f7   :  { %v13482_v37 = vadd.f32 %v8722_v47, %v7301_v17 }
0x62f9   :  { %v9583_v42 = vpop.f32.mrb[68].mxu0  ;;  %v13484_v41 = vpop.f32.mrb[124].mxu1 }
0x62fa   :  { %v13486_v60 = vadd.f32 %v9583_v42, %v8722_v47  ;;  %v7311_v21 = vpop.f32.mrb[69].mxu0  ;;  %v13488_v2 = vpop.f32.mrb[125].mxu1 }
0x62fb   :  { %v13490_v25 = vadd.f32 %v8722_v47, %v7311_v21 }
0x62fd   :  { %v9586_v39 = vpop.f32.mrb[70].mxu0  ;;  %v9606_v12 = vpop.f32.mrb[126].mxu1 }
0x62fe   :  { %v13492_v43 = vadd.f32 %v9586_v39, %v8722_v47  ;;  %v7321_v18 = vpop.f32.mrb[71].mxu0  ;;  %v7430_v49 = vpop.f32.mrb[127].mxu1 }
0x62ff   :  { %v13494_v51 = vadd.f32 %v8722_v47, %v7321_v18 }
0x6301   :  { %v7509_v54 = vpop.f32.mrb[72].mxu0 }
0x6302   :  { %v7510_v35 = vadd.f32 %v7509_v54, %v7292_v52  ;;  %v9617_v55 = vpop.f32.mrb[73].mxu0 }
0x6304   :  { %v7513_v13 = vadd.f32 %v9606_v12, %v7510_v35 }
0x6306   :  { %11162 = vtanh.f32 %v7513_v13  ;;  %v8739_v20 = vmul.f32 -1.442695, %v7513_v13 }
0x6308   :  { %11164 = vpow2.f32 %v8739_v20 }
0x6310   :  { %v11163_v50 = vpop.eup %11162 }
0x6311   :  { %7523 = vrot.lane.b32.xlu0 %v11163_v50, %s11829_s22 }
0x6312   :  { %v11165_v34 = vpop.eup %11164 }
0x6313   :  { %v7517_v58 = vadd.f32 1.0, %v11165_v34 }
0x6315   :  { %11166 = vrcp.f32 %v7517_v58 }
0x631f   :  { %v11167_v10 = vpop.eup %11166 }
0x6320   :  { %v7521_v63 = vmul.f32 0.0, %v11167_v10 }
0x6383   :  { %v7524_v62 = vpop.permute.xlu0 %7523 }
0x6384   :  { %v7526_v53 = vmul.f32 %v11167_v10, %v7524_v62 }
0x6386   :  { %7528 = vrot.lane.b32.xlu1 %v7526_v53, %s11832_s24 }
0x63f8   :  { %v7529_v30 = vpop.permute.xlu1 %7528 }
0x63f9   :  { %v7531_v8 = vadd.f32 %v7529_v30, %v7521_v63 }
0x63fb   :  { %11168 = vtanh.f32 %v7531_v8 }
0x6405   :  { %v11169_v19 = vpop.eup %11168 }
0x6406   :  { %7534 = vrot.lane.b32.xlu0 %v11169_v19, %s11829_s22 }
0x6478   :  { %v7535_v32 = vpop.permute.xlu0 %7534 }
0x6479   :  { %v7537_v57 = vmul.f32 %v11167_v10, %v7535_v32 }
0x647b   :  { %7539 = vrot.lane.b32.xlu1 %v7537_v57, %s11832_s24 }
0x64ed   :  { %v7540_v61 = vpop.permute.xlu1 %7539 }
0x64ee   :  { %7542 = vst.msk [vmem:[#allocation3] sm:$0xff] %vm494_vm0, %v7540_v61  ;;  %9627 = vmatmul.mubr.msk.f32.vlgmr.msra.gmra.mrb[128].mxu1 %vm868_vm1, %v7540_v61 }
0x64ef   :  { %7543 = vst.msk [vmem:[#allocation3 + $0x38] sm:$0xff] %vm5376_vm4, %v7540_v61  ;;  %10471 = vmatpush3.bf16.msra.mxu1 %v13432_v3  ;;  %9648 = vmatprep.mubr.msk.f32.mxu1 %vm11831_vm9, %v11828_v0 }
0x64f0   :  { %10472 = vmatprep.subr.bf16.mxu1 %v11830_v4 }
0x64f3   :  { %10474 = vmatpush3.bf16.msra.mxu1 %v13441_v22 }
0x64f4   :  { %10481 = vmatprep.subr.bf16.mxu1 %v11830_v4 }
0x65c1   :  { %v7612_v44 = vpop.f32.mrb[128].mxu1 }
0x65c2   :  { %v7613_v29 = vadd.f32 %v7612_v44, %v7297_v7  ;;  %v9628_v11 = vpop.f32.mrb[129].mxu1 }
0x65c4   :  { %v7616_v5 = vadd.f32 %v7613_v29, %v7430_v49 }
0x65c6   :  { %11170 = vtanh.f32 %v7616_v5  ;;  %v8741_v14 = vmul.f32 -1.442695, %v7616_v5 }
0x65c8   :  { %11172 = vpow2.f32 %v8741_v14 }
0x65d0   :  { %v11171_v6 = vpop.eup %11170 }
0x65d1   :  { %7626 = vrot.lane.b32.xlu0 %v11171_v6, %s11829_s22 }
0x65d2   :  { %v11173_v48 = vpop.eup %11172 }
0x65d3   :  { %v7620_v40 = vadd.f32 1.0, %v11173_v48 }
0x65d5   :  { %11174 = vrcp.f32 %v7620_v40 }
0x65df   :  { %v11175_v59 = vpop.eup %11174 }
0x65e0   :  { %v7624_v1 = vmul.f32 %v11175_v59, %v7531_v8 }
0x6643   :  { %v7627_v56 = vpop.permute.xlu0 %7626 }
0x6644   :  { %v7629_v9 = vmul.f32 %v11175_v59, %v7627_v56 }
0x6646   :  { %7631 = vrot.lane.b32.xlu1 %v7629_v9, %s11832_s24 }
0x66b8   :  { %v7632_v16 = vpop.permute.xlu1 %7631 }
0x66b9   :  { %v7634_v23 = vadd.f32 %v7632_v16, %v7624_v1 }
0x66bb   :  { %11176 = vtanh.f32 %v7634_v23 }
0x66c5   :  { %v11177_v15 = vpop.eup %11176 }
0x66c6   :  { %7637 = vrot.lane.b32.xlu0 %v11177_v15, %s11829_s22 }
0x6738   :  { %v7638_v24 = vpop.permute.xlu0 %7637 }
0x6739   :  { %v7640_v46 = vmul.f32 %v11175_v59, %v7638_v24 }
0x673b   :  { %7642 = vrot.lane.b32.xlu1 %v7640_v46, %s11832_s24 }
0x67ad   :  { %v7643_v47 = vpop.permute.xlu1 %7642 }
0x67ae   :  { %7645 = vst.msk [vmem:[#allocation3 + $0x8] sm:$0xff] %vm494_vm0, %v7643_v47  ;;  %9638 = vmatmul.mubr.msk.f32.vlgmr.msra.gmra.mrb[74].mxu0 %vm868_vm1, %v7643_v47 }
0x67af   :  { %7646 = vst.msk [vmem:[#allocation3 + $0x30] sm:$0xff] %vm5376_vm4, %v7643_v47  ;;  %10477 = vmatpush3.bf16.msra.mxu0 %v13432_v3  ;;  %9659 = vmatprep.mubr.msk.f32.mxu0 %vm11831_vm9, %v11828_v0 }
0x67b0   :  { %10478 = vmatprep.subr.bf16.mxu0 %v11830_v4 }
0x67b3   :  { %10480 = vmatpush3.bf16.msra.mxu0 %v13441_v22 }
0x67b4   :  { %10487 = vmatprep.subr.bf16.mxu0 %v11830_v4 }
0x6881   :  { %v7715_v45 = vpop.f32.mrb[74].mxu0 }
0x6882   :  { %v7716_v7 = vadd.f32 %v7715_v45, %v13482_v37  ;;  %v9639_v26 = vpop.f32.mrb[75].mxu0 }
0x6884   :  { %v7719_v31 = vadd.f32 %v13484_v41, %v7716_v7 }
0x6886   :  { %11178 = vtanh.f32 %v7719_v31  ;;  %v8743_v42 = vmul.f32 -1.442695, %v7719_v31 }
0x6888   :  { %11180 = vpow2.f32 %v8743_v42 }
0x6890   :  { %v11179_v17 = vpop.eup %11178 }
0x6891   :  { %7729 = vrot.lane.b32.xlu0 %v11179_v17, %s11829_s22 }
0x6892   :  { %v11181_v21 = vpop.eup %11180 }
0x6893   :  { %v7723_v39 = vadd.f32 1.0, %v11181_v21 }
0x6895   :  { %11182 = vrcp.f32 %v7723_v39 }
0x689f   :  { %v11183_v12 = vpop.eup %11182 }
0x68a0   :  { %v7727_v52 = vmul.f32 %v11183_v12, %v7634_v23 }
0x6903   :  { %v7730_v18 = vpop.permute.xlu0 %7729 }
0x6904   :  { %v7732_v49 = vmul.f32 %v11183_v12, %v7730_v18 }
0x6906   :  { %7734 = vrot.lane.b32.xlu1 %v7732_v49, %s11832_s24 }
0x6978   :  { %v7735_v54 = vpop.permute.xlu1 %7734 }
0x6979   :  { %v7737_v37 = vadd.f32 %v7735_v54, %v7727_v52 }
0x697b   :  { %11184 = vtanh.f32 %v7737_v37 }
0x6985   :  { %v11185_v35 = vpop.eup %11184 }
0x6986   :  { %7740 = vrot.lane.b32.xlu0 %v11185_v35, %s11829_s22 }
0x69f8   :  { %v7741_v41 = vpop.permute.xlu0 %7740 }
0x69f9   :  { %v7743_v55 = vmul.f32 %v11183_v12, %v7741_v41 }
0x69fb   :  { %7745 = vrot.lane.b32.xlu1 %v7743_v55, %s11832_s24 }
0x6a6d   :  { %v7746_v13 = vpop.permute.xlu1 %7745 }
0x6a6e   :  { %7748 = vst.msk [vmem:[#allocation3 + $0x10] sm:$0xff] %vm494_vm0, %v7746_v13  ;;  %9649 = vmatmul.mubr.msk.f32.vlgmr.msra.gmra.mrb[130].mxu1 %vm868_vm1, %v7746_v13 }
0x6a6f   :  { %7749 = vst.msk [vmem:[#allocation3 + $0x28] sm:$0xff] %vm5376_vm4, %v7746_v13  ;;  %10483 = vmatpush3.bf16.msra.mxu1 %v13432_v3  ;;  %9670 = vmatprep.mubr.msk.f32.mxu1 %vm11831_vm9, %v11828_v0 }
0x6a70   :  { %10484 = vmatprep.subr.bf16.mxu1 %v11830_v4 }
0x6a73   :  { %10486 = vmatpush3.bf16.msra.mxu1 %v13441_v22 }
0x6a74   :  { %10493 = vmatprep.subr.bf16.mxu1 %v11830_v4 }
0x6b41   :  { %v7818_v50 = vpop.f32.mrb[130].mxu1 }
0x6b42   :  { %v7819_v20 = vadd.f32 %v7818_v50, %v13478_v36  ;;  %v9650_v34 = vpop.f32.mrb[131].mxu1 }
0x6b44   :  { %v7822_v58 = vadd.f32 %v7819_v20, %v13488_v2 }
0x6b46   :  { %11186 = vtanh.f32 %v7822_v58  ;;  %v8745_v62 = vmul.f32 -1.442695, %v7822_v58 }
0x6b48   :  { %11188 = vpow2.f32 %v8745_v62 }
0x6b50   :  { %v11187_v10 = vpop.eup %11186 }
0x6b51   :  { %7832 = vrot.lane.b32.xlu0 %v11187_v10, %s11829_s22 }
0x6b52   :  { %v11189_v53 = vpop.eup %11188 }
0x6b53   :  { %v7826_v63 = vadd.f32 1.0, %v11189_v53 }
0x6b55   :  { %11190 = vrcp.f32 %v7826_v63 }
0x6b5f   :  { %v11191_v30 = vpop.eup %11190 }
0x6b60   :  { %v7830_v32 = vmul.f32 %v11191_v30, %v7737_v37 }
0x6bc3   :  { %v7833_v8 = vpop.permute.xlu0 %7832 }
0x6bc4   :  { %v7835_v19 = vmul.f32 %v11191_v30, %v7833_v8 }
0x6bc6   :  { %7837 = vrot.lane.b32.xlu1 %v7835_v19, %s11832_s24 }
0x6c38   :  { %v7838_v57 = vpop.permute.xlu1 %7837 }
0x6c39   :  { %v7840_v36 = vadd.f32 %v7838_v57, %v7830_v32 }
0x6c3b   :  { %11192 = vtanh.f32 %v7840_v36 }
0x6c45   :  { %v11193_v61 = vpop.eup %11192 }
0x6c46   :  { %7843 = vrot.lane.b32.xlu0 %v11193_v61, %s11829_s22 }
0x6cb8   :  { %v7844_v2 = vpop.permute.xlu0 %7843 }
0x6cb9   :  { %v7846_v44 = vmul.f32 %v11191_v30, %v7844_v2 }
0x6cbb   :  { %7848 = vrot.lane.b32.xlu1 %v7846_v44, %s11832_s24 }
0x6d2d   :  { %v7849_v29 = vpop.permute.xlu1 %7848 }
0x6d2e   :  { %7851 = vst.msk [vmem:[#allocation3 + $0x18] sm:$0xff] %vm494_vm0, %v7849_v29  ;;  %9660 = vmatmul.mubr.msk.f32.vlgmr.msra.gmra.mrb[76].mxu0 %vm868_vm1, %v7849_v29 }
0x6d2f   :  { %7852 = vst.msk [vmem:[#allocation3 + $0x20] sm:$0xff] %vm5376_vm4, %v7849_v29  ;;  %10489 = vmatpush3.bf16.msra.mxu0 %v13432_v3  ;;  %9681 = vmatprep.mubr.msk.f32.mxu0 %vm11831_vm9, %v11828_v0 }
0x6d30   :  { %10490 = vmatprep.subr.bf16.mxu0 %v11830_v4 }
0x6d33   :  { %10492 = vmatpush3.bf16.msra.mxu0 %v13441_v22 }
0x6e01   :  { %v7921_v11 = vpop.f32.mrb[76].mxu0 }
0x6e02   :  { %v7922_v5 = vadd.f32 %v7921_v11, %v13490_v25  ;;  %v9661_v6 = vpop.f32.mrb[77].mxu0 }
0x6e04   :  { %v7925_v14 = vadd.f32 %v13476_v33, %v7922_v5 }
0x6e06   :  { %11194 = vtanh.f32 %v7925_v14  ;;  %v8747_v40 = vmul.f32 -1.442695, %v7925_v14 }
0x6e08   :  { %11196 = vpow2.f32 %v8747_v40  ;;  %v8273_v40 = vld [vmem:[%s13700_s15] sm:$0xff] }
0x6e10   :  { %v11195_v48 = vpop.eup %11194 }
0x6e11   :  { %7935 = vrot.lane.b32.xlu0 %v11195_v48, %s11829_s22 }
0x6e12   :  { %v11197_v59 = vpop.eup %11196 }
0x6e13   :  { %v7929_v56 = vadd.f32 1.0, %v11197_v59  ;;  %v8274_v59 = vld [vmem:[%s13700_s15 + $0x8] sm:$0xff] }
0x6e15   :  { %11198 = vrcp.f32 %v7929_v56  ;;  %v10499_v56 = vpack.c.bf16 %v8274_v59, %v8273_v40 }
0x6e17   :  { %10500 = vmatprep.subr.bf16.mxu0 %v10499_v56 }
0x6e1f   :  { %v11199_v9 = vpop.eup %11198 }
0x6e20   :  { %v7933_v23 = vmul.f32 %v11199_v9, %v7840_v36 }
0x6e83   :  { %v7936_v1 = vpop.permute.xlu0 %7935 }
0x6e84   :  { %v7938_v16 = vmul.f32 %v11199_v9, %v7936_v1  ;;  %v8276_v1 = vld [vmem:[%s13700_s15 + $0x18] sm:$0xff] }
0x6e86   :  { %7940 = vrot.lane.b32.xlu1 %v7938_v16, %s11832_s24 }
0x6ef8   :  { %v7941_v15 = vpop.permute.xlu1 %7940 }
0x6ef9   :  { %v7943_v25 = vadd.f32 %v7941_v15, %v7933_v23 }
0x6efb   :  { %11200 = vtanh.f32 %v7943_v25 }
0x6f05   :  { %v11201_v24 = vpop.eup %11200 }
0x6f06   :  { %7946 = vrot.lane.b32.xlu0 %v11201_v24, %s11829_s22 }
0x6f78   :  { %v7947_v33 = vpop.permute.xlu0 %7946 }
0x6f79   :  { %v7949_v46 = vmul.f32 %v11199_v9, %v7947_v33  ;;  %v8275_v9 = vld [vmem:[%s13700_s15 + $0x10] sm:$0xff] }
0x6f7a   :  { %v10503_v16 = vpack.c.bf16 %v8276_v1, %v8275_v9 }
0x6f7b   :  { %7951 = vrot.lane.b32.xlu1 %v7949_v46, %s11832_s24 }
0x6fed   :  { %v7952_v47 = vpop.permute.xlu1 %7951 }
0x6fee   :  { %7954 = vst.msk [vmem:[#allocation3 + $0x20] sm:$0xff] %vm494_vm0, %v7952_v47  ;;  %9671 = vmatmul.mubr.msk.f32.vlgmr.msra.gmra.mrb[132].mxu1 %vm868_vm1, %v7952_v47 }
0x6fef   :  { %7955 = vst.msk [vmem:[#allocation3 + $0x18] sm:$0xff] %vm5376_vm4, %v7952_v47  ;;  %10495 = vmatpush3.bf16.msra.mxu1 %v13432_v3  ;;  %9692 = vmatprep.mubr.msk.f32.mxu1 %vm11831_vm9, %v11828_v0 }
0x6ff0   :  { %10496 = vmatprep.subr.bf16.mxu1 %v11830_v4 }
0x6ff3   :  { %10498 = vmatpush3.bf16.msra.mxu1 %v13441_v22 }
0x6ff6   :  { %v8268_v47 = vld [vmem:[#allocation3 + $0x18] sm:$0xff] }
0x70c1   :  { %v8024_v45 = vpop.f32.mrb[132].mxu1 }
0x70c2   :  { %v8025_v7 = vadd.f32 %v8024_v45, %v13486_v60  ;;  %v9672_v26 = vpop.f32.mrb[133].mxu1  ;;  %v8269_v45 = vld [vmem:[#allocation3 + $0x20] sm:$0xff] }
0x70c4   :  { %v8028_v31 = vadd.f32 %v8025_v7, %v13480_v28 }
0x70c6   :  { %11202 = vtanh.f32 %v8028_v31  ;;  %v8749_v42 = vmul.f32 -1.442695, %v8028_v31 }
0x70c8   :  { %11204 = vpow2.f32 %v8749_v42 }
0x70d0   :  { %v11203_v17 = vpop.eup %11202 }
0x70d1   :  { %8038 = vrot.lane.b32.xlu0 %v11203_v17, %s11829_s22  ;;  %v8754_v17 = vld [vmem:[%s13701_s21] ss:$0 sm:$0xff] }
0x70d2   :  { %v11205_v3 = vpop.eup %11204 }
0x70d3   :  { %v8032_v21 = vadd.f32 1.0, %v11205_v3 }
0x70d5   :  { %11206 = vrcp.f32 %v8032_v21 }
0x70df   :  { %v11207_v0 = vpop.eup %11206 }
0x70e0   :  { %v8036_v22 = vmul.f32 %v11207_v0, %v7943_v25 }
0x7143   :  { %v8039_v39 = vpop.permute.xlu0 %8038 }
0x7144   :  { %v8041_v4 = vmul.f32 %v11207_v0, %v8039_v39 }
0x7146   :  { %8043 = vrot.lane.b32.xlu1 %v8041_v4, %s11832_s24 }
0x71b8   :  { %v8044_v12 = vpop.permute.xlu1 %8043 }
0x71b9   :  { %v8046_v60 = vadd.f32 %v8044_v12, %v8036_v22 }
0x71bb   :  { %11208 = vtanh.f32 %v8046_v60 }
0x71c5   :  { %v11209_v18 = vpop.eup %11208 }
0x71c6   :  { %8049 = vrot.lane.b32.xlu0 %v11209_v18, %s11829_s22 }
0x7238   :  { %v8050_v28 = vpop.permute.xlu0 %8049 }
0x7239   :  { %v8052_v49 = vmul.f32 %v11207_v0, %v8050_v28 }
0x723b   :  { %8054 = vrot.lane.b32.xlu1 %v8052_v49, %s11832_s24 }
0x72ad   :  { %v8055_v52 = vpop.permute.xlu1 %8054 }
0x72ae   :  { %8057 = vst.msk [vmem:[#allocation3 + $0x28] sm:$0xff] %vm494_vm0, %v8055_v52  ;;  %9682 = vmatmul.mubr.msk.f32.vlgmr.msra.gmra.mrb[78].mxu0 %vm868_vm1, %v8055_v52 }
0x72af   :  { %8058 = vst.msk [vmem:[#allocation3 + $0x10] sm:$0xff] %vm5376_vm4, %v8055_v52  ;;  %10502 = vmatpush3.bf16.msra.mxu0 %v10499_v56 }
0x72b0   :  { %10504 = vmatprep.subr.bf16.mxu0 %v10503_v16 }
0x72b3   :  { %10506 = vmatpush3.bf16.msra.mxu0 %v10503_v16 }
0x72b5   :  { %v8270_v7 = vld [vmem:[#allocation3 + $0x28] sm:$0xff] }
0x72b6   :  { %v8267_v46 = vld [vmem:[#allocation3 + $0x10] sm:$0xff] }
0x7381   :  { %v8127_v54 = vpop.f32.mrb[78].mxu0 }
0x7382   :  { %v8128_v37 = vadd.f32 %v8127_v54, %v13494_v51  ;;  %v9683_v35 = vpop.f32.mrb[79].mxu0 }
0x7384   :  { %v8131_v41 = vadd.f32 %v13472_v27, %v8128_v37 }
0x7386   :  { %11210 = vtanh.f32 %v8131_v41  ;;  %v8751_v13 = vmul.f32 -1.442695, %v8131_v41 }
0x7388   :  { %11212 = vpow2.f32 %v8751_v13 }
0x7390   :  { %v11211_v55 = vpop.eup %11210 }
0x7391   :  { %8141 = vrot.lane.b32.xlu0 %v11211_v55, %s11829_s22 }
0x7392   :  { %v11213_v50 = vpop.eup %11212 }
0x7393   :  { %v8135_v20 = vadd.f32 1.0, %v11213_v50 }
0x7395   :  { %11214 = vrcp.f32 %v8135_v20 }
0x739f   :  { %v11215_v34 = vpop.eup %11214 }
0x73a0   :  { %v8139_v62 = vmul.f32 %v11215_v34, %v8046_v60 }
0x7403   :  { %v8142_v58 = vpop.permute.xlu0 %8141 }
0x7404   :  { %v8144_v10 = vmul.f32 %v11215_v34, %v8142_v58 }
0x7406   :  { %8146 = vrot.lane.b32.xlu1 %v8144_v10, %s11832_s24 }
0x7478   :  { %v8147_v53 = vpop.permute.xlu1 %8146 }
0x7479   :  { %v8149_v51 = vadd.f32 %v8147_v53, %v8139_v62 }
0x747b   :  { %11216 = vtanh.f32 %v8149_v51 }
0x7485   :  { %v11217_v63 = vpop.eup %11216 }
0x7486   :  { %8152 = vrot.lane.b32.xlu0 %v11217_v63, %s11829_s22 }
0x74f8   :  { %v8153_v27 = vpop.permute.xlu0 %8152 }
0x74f9   :  { %v8155_v30 = vmul.f32 %v11215_v34, %v8153_v27 }
0x74fb   :  { %8157 = vrot.lane.b32.xlu1 %v8155_v30, %s11832_s24 }
0x756d   :  { %v8158_v8 = vpop.permute.xlu1 %8157 }
0x756e   :  { %8160 = vst.msk [vmem:[#allocation3 + $0x30] sm:$0xff] %vm494_vm0, %v8158_v8  ;;  %9693 = vmatmul.mubr.msk.f32.vlgmr.msra.gmra.mrb[134].mxu1 %vm868_vm1, %v8158_v8 }
0x756f   :  { %8161 = vst.msk [vmem:[#allocation3 + $0x8] sm:$0xff] %vm5376_vm4, %v8158_v8 }
0x7575   :  { %v8271_v26 = vld [vmem:[#allocation3 + $0x30] sm:$0xff] }
0x7576   :  { %v8266_v33 = vld [vmem:[#allocation3 + $0x8] sm:$0xff] }
0x7641   :  { %v8230_v19 = vpop.f32.mrb[134].mxu1 }
0x7642   :  { %v8231_v32 = vadd.f32 %v8230_v19, %v13492_v43  ;;  %v9694_v57 = vpop.f32.mrb[135].mxu1 }
0x7644   :  { %v8234_v36 = vadd.f32 %v8231_v32, %v13474_v38 }
0x7646   :  { %11218 = vtanh.f32 %v8234_v36  ;;  %v8753_v2 = vmul.f32 -1.442695, %v8234_v36 }
0x7648   :  { %11220 = vpow2.f32 %v8753_v2 }
0x7650   :  { %v11219_v61 = vpop.eup %11218 }
0x7651   :  { %8244 = vrot.lane.b32.xlu0 %v11219_v61, %s11829_s22 }
0x7652   :  { %v11221_v44 = vpop.eup %11220 }
0x7653   :  { %v8238_v29 = vadd.f32 1.0, %v11221_v44 }
0x7655   :  { %11222 = vrcp.f32 %v8238_v29 }
0x765f   :  { %v11223_v11 = vpop.eup %11222 }
0x7660   :  { %v8242_v43 = vmul.f32 %v11223_v11, %v8149_v51 }
0x76c3   :  { %v8245_v5 = vpop.permute.xlu0 %8244 }
0x76c4   :  { %v8247_v6 = vmul.f32 %v11223_v11, %v8245_v5 }
0x76c6   :  { %8249 = vrot.lane.b32.xlu1 %v8247_v6, %s11832_s24 }
0x7738   :  { %v8250_v38 = vpop.permute.xlu1 %8249 }
0x7739   :  { %v8252_v14 = vadd.f32 %v8250_v38, %v8242_v43 }
0x773b   :  { %11224 = vtanh.f32 %v8252_v14 }
0x7745   :  { %v11225_v48 = vpop.eup %11224 }
0x7746   :  { %8255 = vrot.lane.b32.xlu0 %v11225_v48, %s11829_s22 }
0x77b8   :  { %v8256_v23 = vpop.permute.xlu0 %8255 }
0x77b9   :  { %v8258_v15 = vmul.f32 %v11223_v11, %v8256_v23 }
0x77bb   :  { %8260 = vrot.lane.b32.xlu1 %v8258_v15, %s11832_s24 }
0x782d   :  { %v8261_v25 = vpop.permute.xlu1 %8260 }
0x782e   :  { %8263 = vst.msk [vmem:[#allocation3 + $0x38] sm:$0xff] %vm494_vm0, %v8261_v25 }
0x782f   :  { %8264 = vst.msk [vmem:[#allocation3] sm:$0xff] %vm5376_vm4, %v8261_v25 }
0x7835   :  { %v8272_v31 = vld [vmem:[#allocation3 + $0x38] sm:$0xff] }
0x7836   :  { %v8265_v24 = vld [vmem:[#allocation3] sm:$0xff] }
0x7837   :  { %9703 = vmatprep.mubr.msk.f32.mxu0 %vm868_vm1, %v8265_v24 }
0x7838   :  { %9704 = vmatmul.mubr.msk.f32.vlgmr.msra.gmra.mrb[80].mxu0 %vm868_vm1, %v8266_v33 }
0x7839   :  { %9706 = vmatprep.mubr.msk.f32.mxu0 %vm868_vm1, %v8267_v46 }
0x783c   :  { %9707 = vmatmul.mubr.msk.f32.gmra.mrb[82].mxu0 %vm868_vm1, %v8268_v47 }
0x783d   :  { %9709 = vmatprep.mubr.msk.f32.mxu0 %vm868_vm1, %v8269_v45 }
0x7840   :  { %9710 = vmatmul.mubr.msk.f32.gmra.mrb[84].mxu0 %vm868_vm1, %v8270_v7 }
0x7841   :  { %9712 = vmatprep.mubr.msk.f32.mxu0 %vm868_vm1, %v8271_v26 }
0x7844   :  { %9713 = vmatmul.mubr.msk.f32.gmra.mrb[86].mxu0 %vm868_vm1, %v8272_v31 }
0x790b   :  { %v9705_v42 = vpop.f32.mrb[80].mxu0 }
0x790c   :  { %v8380_v3 = vadd.f32 %v9705_v42, %v8754_v17  ;;  %v8374_v21 = vpop.f32.mrb[81].mxu0 }
0x790d   :  { %v8375_v0 = vadd.f32 %v8754_v17, %v8374_v21 }
0x790e   :  { %8414 = vst.msk [vmem:[%s12051_s29 + $0x8] sm:$0xff] %vm494_vm0, %v8380_v3 }
0x790f   :  { %8413 = vst.msk [vmem:[%s12051_s29] sm:$0xff] %vm494_vm0, %v8375_v0  ;;  %v9708_v39 = vpop.f32.mrb[82].mxu0 }
0x7910   :  { %v8390_v4 = vadd.f32 %v9708_v39, %v8754_v17  ;;  %v8384_v22 = vpop.f32.mrb[83].mxu0 }
0x7911   :  { %v8385_v12 = vadd.f32 %v8754_v17, %v8384_v22 }
0x7912   :  { %8416 = vst.msk [vmem:[%s12051_s29 + $0x18] sm:$0xff] %vm494_vm0, %v8390_v4 }
0x7913   :  { %8415 = vst.msk [vmem:[%s12051_s29 + $0x10] sm:$0xff] %vm494_vm0, %v8385_v12  ;;  %v9711_v60 = vpop.f32.mrb[84].mxu0 }
0x7914   :  { %v8400_v18 = vadd.f32 %v9711_v60, %v8754_v17  ;;  %v8394_v28 = vpop.f32.mrb[85].mxu0 }
0x7915   :  { %v8395_v49 = vadd.f32 %v8754_v17, %v8394_v28 }
0x7916   :  { %8418 = vst.msk [vmem:[%s12051_s29 + $0x28] sm:$0xff] %vm494_vm0, %v8400_v18 }
0x7917   :  { %8417 = vst.msk [vmem:[%s12051_s29 + $0x20] sm:$0xff] %vm494_vm0, %v8395_v49  ;;  %v9714_v52 = vpop.f32.mrb[86].mxu0 }
0x7918   :  { %v8410_v54 = vadd.f32 %v9714_v52, %v8754_v17  ;;  %v8404_v37 = vpop.f32.mrb[87].mxu0 }
0x7919   :  { %v8405_v35 = vadd.f32 %v8754_v17, %v8404_v37 }
0x791a   :  { %8420 = vst.msk [vmem:[%s12051_s29 + $0x38] sm:$0xff] %vm494_vm0, %v8410_v54 }
0x791b   :  { %8419 = vst.msk [vmem:[%s12051_s29 + $0x30] sm:$0xff] %vm494_vm0, %v8405_v35 }
0x791c   :  { %8437 = vsyncpa [#allocation5], 1 }
0x791d   :  { %8438 = vsyncpa [#allocation7], 1 }
0x791e   :  { %8439 = vsyncpa [#allocation10], 1 }
0x791f   :  { %8440 = vsyncpa [#allocation13], 1 }
0x7920   :  { %8441 = vsyncpa [#allocation16], 1 }
0x7921   :  { %8442 = vsyncpa [#allocation19], 1 }
0x7922   :  { %8443 = vsyncpa [#allocation22], 1 }
0x7923   :  { %8444 = vsyncpa [#allocation25], 1 }
0x7924   :  { %8445 = vsyncpa [#allocation28], 1 }
0x7925   :  { %8446 = vsyncpa [#allocation31], 1 }
0x7926   :  { %8447 = vsyncpa [#allocation34], 1 }
0x7927   :  { %8448 = vsyncpa [#allocation37], 1 }

</bundles_post_ra>
